<compile_context>
chip_gen: v7x
topology: tpu7x:2x2x1
jax: 0.10.0
libtpu: 0.0.40
codegen_flags: <defaults>
</compile_context>

<pallas_src>
import jax
import jax.numpy as jnp
from jax import lax
from jax.experimental import pallas as pl
from jax.experimental.pallas import tpu as pltpu


_KH = _KW = 3                              # ConvBlock defaults: kernel=3, pad=1
_VMEM_LIMIT_BYTES = 48 * 1024 * 1024       # fits v5e/v6e (128 MiB) and v7x (64 MiB)
_VMEM_TILE_BUDGET = (3 * _VMEM_LIMIT_BYTES) // 4


def conv3x3_relu_kernel(x_ref, w_ref, b_ref, o_ref):
    """One grid step: TB padded NHWC images -> TB ReLU(conv3x3) maps.

    x_ref: (TB, H+2, W+2, Cin)  padded input tile (VMEM)
    w_ref: (9, Cin, Cout)       per-tap weights (pre-transposed in wrapper)
    b_ref: (1, Cout)            bias
    o_ref: (TB, H*W, Cout)      output tile
    """
    tb, hp, wp, cin = x_ref.shape
    h, w = hp - (_KH - 1), wp - (_KW - 1)
    cout = o_ref.shape[-1]

    acc = jnp.zeros((tb * h * w, cout), jnp.float32)
    for kh in range(_KH):
        for kw in range(_KW):
            # Windowed VMEM load of one 3x3 tap, flattened to a matmul LHS.
            patch = x_ref[:, pl.ds(kh, h), pl.ds(kw, w), :]      # (TB, H, W, Cin)
            patch = patch.reshape(tb * h * w, cin)
            w_tap = w_ref[kh * _KW + kw]                         # (Cin, Cout)
            acc = acc + jnp.dot(
                patch,
                w_tap,
                preferred_element_type=jnp.float32,
                precision=lax.Precision.HIGHEST,
            )
    acc = acc + b_ref[...].astype(jnp.float32)
    out = jnp.maximum(acc, 0.0)                                  # ReLU
    o_ref[...] = out.reshape(tb, h * w, cout).astype(o_ref.dtype)


def _pick_batch_tile(batch, bytes_per_row, vmem_budget):
    """Largest divisor of `batch` whose double-buffered tiles fit the budget,
    capped so that (for batch >= 2) at least two grid blocks remain — feeds
    both v7x TensorCores; near-neutral on single-TC v5e/v6e."""
    max_tb = max(1, vmem_budget // max(bytes_per_row, 1))
    if batch >= 2:
        max_tb = min(max_tb, max(1, batch // 2))
    tb = 1
    for d in range(1, batch + 1):
        if batch % d == 0 and d <= max_tb:
            tb = d
    return tb


def conv_block_forward(x_nchw, weight, bias):
    """ReLU(Conv2d(x, weight, bias, kernel=3, stride=1, padding=1)), NCHW in/out.

    weight: (Cout, Cin, 3, 3) in PyTorch OIHW layout; bias: (Cout,).
    """
    b, cin, h, w = x_nchw.shape
    cout = weight.shape[0]
    assert weight.shape == (cout, cin, _KH, _KW)
    hp, wp = h + _KH - 1, w + _KW - 1
    hw = h * w

    # NCHW -> NHWC, zero-pad spatially (padding=1) once in the wrapper.
    x_nhwc = jnp.transpose(x_nchw, (0, 2, 3, 1))
    x_pad = jnp.pad(x_nhwc, ((0, 0), (1, 1), (1, 1), (0, 0)))

    # Pre-arrange weights to (9, Cin, Cout): no in-kernel transpose.
    w9 = jnp.transpose(weight, (2, 3, 1, 0)).reshape(_KH * _KW, cin, cout)
    b2 = bias.reshape(1, cout)

    # Batch-block the grid so each step moves a large contiguous tile.
    itemsize = x_pad.dtype.itemsize
    bytes_per_row = 2 * (hp * wp * cin + hw * cout) * itemsize   # double-buffered
    tb = _pick_batch_tile(b, bytes_per_row, _VMEM_TILE_BUDGET)

    cost = pl.CostEstimate(
        flops=2 * b * hw * _KH * _KW * cin * cout,
        transcendentals=0,
        bytes_accessed=(x_pad.size + w9.size + b2.size + b * hw * cout) * itemsize,
    )

    out_flat = pl.pallas_call(
        conv3x3_relu_kernel,
        out_shape=jax.ShapeDtypeStruct((b, hw, cout), x_nchw.dtype),
        grid_spec=pltpu.PrefetchScalarGridSpec(
            num_scalar_prefetch=0,
            grid=(b // tb,),
            in_specs=[
                pl.BlockSpec((tb, hp, wp, cin), lambda i: (i, 0, 0, 0)),
                pl.BlockSpec((_KH * _KW, cin, cout), lambda i: (0, 0, 0)),
                pl.BlockSpec((1, cout), lambda i: (0, 0)),
            ],
            out_specs=pl.BlockSpec((tb, hw, cout), lambda i: (i, 0, 0)),
        ),
        compiler_params=pltpu.CompilerParams(
            dimension_semantics=("parallel",),
            vmem_limit_bytes=_VMEM_LIMIT_BYTES,
        ),
        cost_estimate=cost,
    )(x_pad, w9, b2)

    # (B, H*W, Cout) -> NCHW
    return jnp.transpose(out_flat.reshape(b, h, w, cout), (0, 3, 1, 2))


def conv_block_reference(x_nchw, weight, bias):
    """Pure-JAX reference matching the PyTorch ConvBlock forward."""
    out = lax.conv_general_dilated(
        x_nchw.astype(jnp.float32),
        weight.astype(jnp.float32),
        window_strides=(1, 1),
        padding=((1, 1), (1, 1)),
        dimension_numbers=("NCHW", "OIHW", "NCHW"),
        precision=lax.Precision.HIGHEST,
    )
    out = out + bias.astype(jnp.float32)[None, :, None, None]
    return jnp.maximum(out, 0.0).astype(x_nchw.dtype)


if __name__ == "__main__":
    # Small shapes consistent with the module: batch=2, 8 -> 16 channels, 16x16.
    B, CIN, COUT, H, W = 2, 8, 16, 16, 16

    key = jax.random.PRNGKey(0)
    kx, kw_, kb = jax.random.split(key, 3)
    x = jax.random.normal(kx, (B, CIN, H, W), dtype=jnp.float32)
    weight = jax.random.normal(kw_, (COUT, CIN, _KH, _KW), dtype=jnp.float32) * 0.1
    bias = jax.random.normal(kb, (COUT,), dtype=jnp.float32) * 0.1

    out = conv_block_forward(x, weight, bias)
    out = jax.block_until_ready(out)

    ref = conv_block_reference(x, weight, bias)
    assert out.shape == (B, COUT, H, W)
    assert jnp.allclose(out, ref, atol=1e-4, rtol=1e-4), "mismatch vs reference"

    print("KERNEL_OK")
</pallas_src>

<mosaic_0001>
module attributes {stable_mosaic.version = 11 : i64} {
  func.func @conv3x3_relu_kernel(%arg0: i32, %arg1: memref<1x18x18x8xf32, #tpu.memory_space<vmem>>, %arg2: memref<9x8x16xf32, #tpu.memory_space<vmem>>, %arg3: memref<1x16xf32, #tpu.memory_space<vmem>>, %arg4: memref<1x256x16xf32, #tpu.memory_space<vmem>>) attributes {dimension_semantics = [#tpu.dimension_semantics<parallel>], iteration_bounds = array<i64: 2>, scalar_prefetch = 0 : i64, scratch_operands = 0 : i64, tpu.core_type = #tpu.core_type<tc>, window_params = [{transform_indices = @transform_0, window_bounds = array<i64: 1, 18, 18, 8>}, {pipeline_mode = #tpu.pipeline_mode<synchronous>, transform_indices = @transform_1, window_bounds = array<i64: 9, 8, 16>}, {pipeline_mode = #tpu.pipeline_mode<synchronous>, transform_indices = @transform_2, window_bounds = array<i64: 1, 16>}, {transform_indices = @transform_3, window_bounds = array<i64: 1, 256, 16>}]} {
    %cst = arith.constant 0.000000e+00 : f32
    %0 = vector.broadcast %cst : f32 to vector<256x16xf32>
    %c0 = arith.constant 0 : index
    %c0_0 = arith.constant 0 : index
    %c0_1 = arith.constant 0 : index
    %c0_2 = arith.constant 0 : index
    %1 = vector.load %arg1[%c0, %c0_0, %c0_1, %c0_2] : memref<1x18x18x8xf32, #tpu.memory_space<vmem>>, vector<1x16x16x8xf32>
    %2 = vector.shape_cast %1 : vector<1x16x16x8xf32> to vector<256x8xf32>
    %c0_3 = arith.constant 0 : index
    %c0_4 = arith.constant 0 : index
    %c0_5 = arith.constant 0 : index
    %3 = vector.load %arg2[%c0_3, %c0_4, %c0_5] : memref<9x8x16xf32, #tpu.memory_space<vmem>>, vector<1x8x16xf32>
    %4 = vector.shape_cast %3 : vector<1x8x16xf32> to vector<8x16xf32>
    %cst_6 = arith.constant dense<0.000000e+00> : vector<256x16xf32>
    %5 = tpu.matmul %2, %4, %cst_6 {dimension_numbers = #tpu.dot_dimension_numbers<[1], [0], [0], [1], [0, 0, 1, 1], [], []>, precision = #tpu.contract_precision<fp32>} : vector<256x8xf32>, vector<8x16xf32>, vector<256x16xf32> -> vector<256x16xf32>
    %6 = arith.addf %0, %5 : vector<256x16xf32>
    %c0_7 = arith.constant 0 : index
    %c0_8 = arith.constant 0 : index
    %c1 = arith.constant 1 : index
    %c0_9 = arith.constant 0 : index
    %7 = vector.load %arg1[%c0_7, %c0_8, %c1, %c0_9] : memref<1x18x18x8xf32, #tpu.memory_space<vmem>>, vector<1x16x16x8xf32>
    %8 = vector.shape_cast %7 : vector<1x16x16x8xf32> to vector<256x8xf32>
    %c1_10 = arith.constant 1 : index
    %c0_11 = arith.constant 0 : index
    %c0_12 = arith.constant 0 : index
    %9 = vector.load %arg2[%c1_10, %c0_11, %c0_12] : memref<9x8x16xf32, #tpu.memory_space<vmem>>, vector<1x8x16xf32>
    %10 = vector.shape_cast %9 : vector<1x8x16xf32> to vector<8x16xf32>
    %cst_13 = arith.constant dense<0.000000e+00> : vector<256x16xf32>
    %11 = tpu.matmul %8, %10, %cst_13 {dimension_numbers = #tpu.dot_dimension_numbers<[1], [0], [0], [1], [0, 0, 1, 1], [], []>, precision = #tpu.contract_precision<fp32>} : vector<256x8xf32>, vector<8x16xf32>, vector<256x16xf32> -> vector<256x16xf32>
    %12 = arith.addf %6, %11 : vector<256x16xf32>
    %c0_14 = arith.constant 0 : index
    %c0_15 = arith.constant 0 : index
    %c2 = arith.constant 2 : index
    %c0_16 = arith.constant 0 : index
    %13 = vector.load %arg1[%c0_14, %c0_15, %c2, %c0_16] : memref<1x18x18x8xf32, #tpu.memory_space<vmem>>, vector<1x16x16x8xf32>
    %14 = vector.shape_cast %13 : vector<1x16x16x8xf32> to vector<256x8xf32>
    %c2_17 = arith.constant 2 : index
    %c0_18 = arith.constant 0 : index
    %c0_19 = arith.constant 0 : index
    %15 = vector.load %arg2[%c2_17, %c0_18, %c0_19] : memref<9x8x16xf32, #tpu.memory_space<vmem>>, vector<1x8x16xf32>
    %16 = vector.shape_cast %15 : vector<1x8x16xf32> to vector<8x16xf32>
    %cst_20 = arith.constant dense<0.000000e+00> : vector<256x16xf32>
    %17 = tpu.matmul %14, %16, %cst_20 {dimension_numbers = #tpu.dot_dimension_numbers<[1], [0], [0], [1], [0, 0, 1, 1], [], []>, precision = #tpu.contract_precision<fp32>} : vector<256x8xf32>, vector<8x16xf32>, vector<256x16xf32> -> vector<256x16xf32>
    %18 = arith.addf %12, %17 : vector<256x16xf32>
    %c0_21 = arith.constant 0 : index
    %c1_22 = arith.constant 1 : index
    %c0_23 = arith.constant 0 : index
    %c0_24 = arith.constant 0 : index
    %19 = vector.load %arg1[%c0_21, %c1_22, %c0_23, %c0_24] : memref<1x18x18x8xf32, #tpu.memory_space<vmem>>, vector<1x16x16x8xf32>
    %20 = vector.shape_cast %19 : vector<1x16x16x8xf32> to vector<256x8xf32>
    %c3 = arith.constant 3 : index
    %c0_25 = arith.constant 0 : index
    %c0_26 = arith.constant 0 : index
    %21 = vector.load %arg2[%c3, %c0_25, %c0_26] : memref<9x8x16xf32, #tpu.memory_space<vmem>>, vector<1x8x16xf32>
    %22 = vector.shape_cast %21 : vector<1x8x16xf32> to vector<8x16xf32>
    %cst_27 = arith.constant dense<0.000000e+00> : vector<256x16xf32>
    %23 = tpu.matmul %20, %22, %cst_27 {dimension_numbers = #tpu.dot_dimension_numbers<[1], [0], [0], [1], [0, 0, 1, 1], [], []>, precision = #tpu.contract_precision<fp32>} : vector<256x8xf32>, vector<8x16xf32>, vector<256x16xf32> -> vector<256x16xf32>
    %24 = arith.addf %18, %23 : vector<256x16xf32>
    %c0_28 = arith.constant 0 : index
    %c1_29 = arith.constant 1 : index
    %c1_30 = arith.constant 1 : index
    %c0_31 = arith.constant 0 : index
    %25 = vector.load %arg1[%c0_28, %c1_29, %c1_30, %c0_31] : memref<1x18x18x8xf32, #tpu.memory_space<vmem>>, vector<1x16x16x8xf32>
    %26 = vector.shape_cast %25 : vector<1x16x16x8xf32> to vector<256x8xf32>
    %c4 = arith.constant 4 : index
    %c0_32 = arith.constant 0 : index
    %c0_33 = arith.constant 0 : index
    %27 = vector.load %arg2[%c4, %c0_32, %c0_33] : memref<9x8x16xf32, #tpu.memory_space<vmem>>, vector<1x8x16xf32>
    %28 = vector.shape_cast %27 : vector<1x8x16xf32> to vector<8x16xf32>
    %cst_34 = arith.constant dense<0.000000e+00> : vector<256x16xf32>
    %29 = tpu.matmul %26, %28, %cst_34 {dimension_numbers = #tpu.dot_dimension_numbers<[1], [0], [0], [1], [0, 0, 1, 1], [], []>, precision = #tpu.contract_precision<fp32>} : vector<256x8xf32>, vector<8x16xf32>, vector<256x16xf32> -> vector<256x16xf32>
    %30 = arith.addf %24, %29 : vector<256x16xf32>
    %c0_35 = arith.constant 0 : index
    %c1_36 = arith.constant 1 : index
    %c2_37 = arith.constant 2 : index
    %c0_38 = arith.constant 0 : index
    %31 = vector.load %arg1[%c0_35, %c1_36, %c2_37, %c0_38] : memref<1x18x18x8xf32, #tpu.memory_space<vmem>>, vector<1x16x16x8xf32>
    %32 = vector.shape_cast %31 : vector<1x16x16x8xf32> to vector<256x8xf32>
    %c5 = arith.constant 5 : index
    %c0_39 = arith.constant 0 : index
    %c0_40 = arith.constant 0 : index
    %33 = vector.load %arg2[%c5, %c0_39, %c0_40] : memref<9x8x16xf32, #tpu.memory_space<vmem>>, vector<1x8x16xf32>
    %34 = vector.shape_cast %33 : vector<1x8x16xf32> to vector<8x16xf32>
    %cst_41 = arith.constant dense<0.000000e+00> : vector<256x16xf32>
    %35 = tpu.matmul %32, %34, %cst_41 {dimension_numbers = #tpu.dot_dimension_numbers<[1], [0], [0], [1], [0, 0, 1, 1], [], []>, precision = #tpu.contract_precision<fp32>} : vector<256x8xf32>, vector<8x16xf32>, vector<256x16xf32> -> vector<256x16xf32>
    %36 = arith.addf %30, %35 : vector<256x16xf32>
    %c0_42 = arith.constant 0 : index
    %c2_43 = arith.constant 2 : index
    %c0_44 = arith.constant 0 : index
    %c0_45 = arith.constant 0 : index
    %37 = vector.load %arg1[%c0_42, %c2_43, %c0_44, %c0_45] : memref<1x18x18x8xf32, #tpu.memory_space<vmem>>, vector<1x16x16x8xf32>
    %38 = vector.shape_cast %37 : vector<1x16x16x8xf32> to vector<256x8xf32>
    %c6 = arith.constant 6 : index
    %c0_46 = arith.constant 0 : index
    %c0_47 = arith.constant 0 : index
    %39 = vector.load %arg2[%c6, %c0_46, %c0_47] : memref<9x8x16xf32, #tpu.memory_space<vmem>>, vector<1x8x16xf32>
    %40 = vector.shape_cast %39 : vector<1x8x16xf32> to vector<8x16xf32>
    %cst_48 = arith.constant dense<0.000000e+00> : vector<256x16xf32>
    %41 = tpu.matmul %38, %40, %cst_48 {dimension_numbers = #tpu.dot_dimension_numbers<[1], [0], [0], [1], [0, 0, 1, 1], [], []>, precision = #tpu.contract_precision<fp32>} : vector<256x8xf32>, vector<8x16xf32>, vector<256x16xf32> -> vector<256x16xf32>
    %42 = arith.addf %36, %41 : vector<256x16xf32>
    %c0_49 = arith.constant 0 : index
    %c2_50 = arith.constant 2 : index
    %c1_51 = arith.constant 1 : index
    %c0_52 = arith.constant 0 : index
    %43 = vector.load %arg1[%c0_49, %c2_50, %c1_51, %c0_52] : memref<1x18x18x8xf32, #tpu.memory_space<vmem>>, vector<1x16x16x8xf32>
    %44 = vector.shape_cast %43 : vector<1x16x16x8xf32> to vector<256x8xf32>
    %c7 = arith.constant 7 : index
    %c0_53 = arith.constant 0 : index
    %c0_54 = arith.constant 0 : index
    %45 = vector.load %arg2[%c7, %c0_53, %c0_54] : memref<9x8x16xf32, #tpu.memory_space<vmem>>, vector<1x8x16xf32>
    %46 = vector.shape_cast %45 : vector<1x8x16xf32> to vector<8x16xf32>
    %cst_55 = arith.constant dense<0.000000e+00> : vector<256x16xf32>
    %47 = tpu.matmul %44, %46, %cst_55 {dimension_numbers = #tpu.dot_dimension_numbers<[1], [0], [0], [1], [0, 0, 1, 1], [], []>, precision = #tpu.contract_precision<fp32>} : vector<256x8xf32>, vector<8x16xf32>, vector<256x16xf32> -> vector<256x16xf32>
    %48 = arith.addf %42, %47 : vector<256x16xf32>
    %c0_56 = arith.constant 0 : index
    %c2_57 = arith.constant 2 : index
    %c2_58 = arith.constant 2 : index
    %c0_59 = arith.constant 0 : index
    %49 = vector.load %arg1[%c0_56, %c2_57, %c2_58, %c0_59] : memref<1x18x18x8xf32, #tpu.memory_space<vmem>>, vector<1x16x16x8xf32>
    %50 = vector.shape_cast %49 : vector<1x16x16x8xf32> to vector<256x8xf32>
    %c8 = arith.constant 8 : index
    %c0_60 = arith.constant 0 : index
    %c0_61 = arith.constant 0 : index
    %51 = vector.load %arg2[%c8, %c0_60, %c0_61] : memref<9x8x16xf32, #tpu.memory_space<vmem>>, vector<1x8x16xf32>
    %52 = vector.shape_cast %51 : vector<1x8x16xf32> to vector<8x16xf32>
    %cst_62 = arith.constant dense<0.000000e+00> : vector<256x16xf32>
    %53 = tpu.matmul %50, %52, %cst_62 {dimension_numbers = #tpu.dot_dimension_numbers<[1], [0], [0], [1], [0, 0, 1, 1], [], []>, precision = #tpu.contract_precision<fp32>} : vector<256x8xf32>, vector<8x16xf32>, vector<256x16xf32> -> vector<256x16xf32>
    %54 = arith.addf %48, %53 : vector<256x16xf32>
    %c0_63 = arith.constant 0 : index
    %c0_64 = arith.constant 0 : index
    %55 = vector.load %arg3[%c0_63, %c0_64] : memref<1x16xf32, #tpu.memory_space<vmem>>, vector<1x16xf32>
    %56 = vector.broadcast %55 : vector<1x16xf32> to vector<256x16xf32>
    %57 = arith.addf %54, %56 : vector<256x16xf32>
    %cst_65 = arith.constant 0.000000e+00 : f32
    %58 = vector.broadcast %cst_65 : f32 to vector<256x16xf32>
    %59 = arith.maximumf %57, %58 : vector<256x16xf32>
    %60 = vector.shape_cast %59 : vector<256x16xf32> to vector<1x256x16xf32>
    %c0_66 = arith.constant 0 : index
    %c0_67 = arith.constant 0 : index
    %c0_68 = arith.constant 0 : index
    %61 = vector.load %arg4[%c0_66, %c0_67, %c0_68] : memref<1x256x16xf32, #tpu.memory_space<vmem>>, vector<1x256x16xf32>
    tpu.vector_store %arg4[%c0_66, %c0_67, %c0_68], %60 {strides = array<i32>} : memref<1x256x16xf32, #tpu.memory_space<vmem>>, vector<1x256x16xf32>,
    return
  }
  func.func @transform_0(%arg0: i32) -> (i32, i32, i32, i32) {
    %c0_i32 = arith.constant 0 : i32
    %c0_i32_0 = arith.constant 0 : i32
    %c0_i32_1 = arith.constant 0 : i32
    %c0_i32_2 = arith.constant 0 : i32
    return %arg0, %c0_i32, %c0_i32_0, %c0_i32_1 : i32, i32, i32, i32
  }
  func.func @transform_1(%arg0: i32) -> (i32, i32, i32) {
    %c0_i32 = arith.constant 0 : i32
    %c0_i32_0 = arith.constant 0 : i32
    %c0_i32_1 = arith.constant 0 : i32
    %c0_i32_2 = arith.constant 0 : i32
    return %c0_i32, %c0_i32_0, %c0_i32_1 : i32, i32, i32
  }
  func.func @transform_2(%arg0: i32) -> (i32, i32) {
    %c0_i32 = arith.constant 0 : i32
    %c0_i32_0 = arith.constant 0 : i32
    %c0_i32_1 = arith.constant 0 : i32
    return %c0_i32, %c0_i32_0 : i32, i32
  }
  func.func @transform_3(%arg0: i32) -> (i32, i32, i32) {
    %c0_i32 = arith.constant 0 : i32
    %c0_i32_0 = arith.constant 0 : i32
    %c0_i32_1 = arith.constant 0 : i32
    return %arg0, %c0_i32, %c0_i32_0 : i32, i32, i32
  }
}

</mosaic_0001>

<bundles_post_ra>
// kernel: tpu_custom_call.1
= control target key start
LH: loop header
LB: loop body
LE: loop exit
PB: predicated region body
PF: predicated region fallthrough
CT: control target
= control target key end

     0   :  { %s24164_s12 = smov 0   ;;  %s28965_s0 = inlined_call_operand.vmem [shape: f32[2,18,18,8], index: 0, kind: input, shape index: {}]   ;;  %s28966_s1 = inlined_call_operand.vmem [shape: f32[9,8,16], index: 1, kind: input, shape index: {}]   ;;  %s28967_s2 = inlined_call_operand.vmem [shape: f32[1,16], index: 2, kind: input, shape index: {}]   ;;  %s28968_s3 = inlined_call_operand.vmem [shape: f32[2,256,16], index: 3, kind: output, shape index: {}]  }
   0x1 LB: > { %s17737_s13 = sadd.s32 4294967295, %s24142_s12   ;;  %p17741_p0 = scmp.ge.s32.totalorder %s24142_s12, 1  ;;  %s24142_s12 = sphi %s24164_s12, %s13_s12  }
   0x2   : > { %p137_p1 = scmp.lt.s32.totalorder %s24142_s12, 3 }
   0x4   : > { %p138_p2 = pnand %p17741_p0, %p137_p1 }
   0x6   : > { %141 = sbr.rel (%p138_p2) target bundleno = 1978 (0x7ba), region = 32 }
   0xd   : > { %v17812_v0 = vld [vmem:[%s28966_s1 + $0x20] sm:$0xff]  ;;  %p161_p3 = scmp.lt.s32.totalorder %s17737_s13, 1  ;;  %v17745_v1 = vld [vmem:[%s28966_s1 + $0x8] sm:$0xff]  ;;  %vm238_vm0 = vcmask 64512   ;;  %vm17649_vm1 = vcmask 130048  }
   0xe   : > { %v24178_v2 = vand.u32 4294901760, %v17812_v0  ;;  %v24180_v3 = vand.u32 4294901760, %v17745_v1 }
   0xf   : > { %s31410_s13 = smov (!%p161_p3, %s17737_s13), 1 }
  0x10   : > { %29964 = vst [vmem:[#allocation2_spill] sm:$0xff] %v24178_v2  ;;  %21081 = vmatprep.subr.mxu0 %v24178_v2  ;;  %19731 = vmatprep.subr.mxu1 %v24180_v3  ;;  %v24187_v4 = vsub.f32 %v17745_v1, %v24180_v3  ;;  %v24190_v5 = vsub.f32 %v17812_v0, %v24178_v2  ;;  %s24127_s18 = smul.u32 432, %s31410_s13  ;;  %s17948_s11 = sshll.u32 %s31410_s13, 8 }
  0x11   : > { %21082 = vmatpush3.msra.mxu0 %v24178_v2  ;;  %19732 = vmatpush3.msra.mxu1 %v24180_v3  ;;  %s28865_s16 = scalar_lea.vmem %s28968_s3, %s17948_s11 }
  0x12   : > { %29965 = vst [vmem:[#allocation3_spill] sm:$0xff] %v24190_v5  ;;  %v24196_v6 = vand.u32 4294901760, %v24187_v4  ;;  %v24199_v7 = vand.u32 4294901760, %v24190_v5  ;;  %s24204_s21 = scalar_lea.vmem %s28965_s0, %s24127_s18 }
  0x13   : > { %v17780_v8 = vld [vmem:[%s24204_s21 + $0x19] sm:$0xff]  ;;  %v17781_v9 = vld [vmem:[%s24204_s21 + $0x21] sm:$0xff]  ;;  %v17782_v15 = vld [vmem:[%s24204_s21 + $0x31] sm:$0xff] }
  0x14   : > { %29966 = vst [vmem:[#allocation4_spill] sm:$0xff] %v24199_v7  ;;  %v204_v10 = vld [vmem:[%s24204_s21 + $0x1] sm:$0xff]  ;;  %v725_v11 = vsub.f32 %v24187_v4, %v24196_v6  ;;  %21131 = vmatprep.subr.mxu0 %v24199_v7  ;;  %v7907_v12 = vsel %vm238_vm0, %v17780_v8, 0  ;;  %v7910_v13 = vsel %vm238_vm0, %v17781_v9, 0  ;;  %v205_v16 = vld [vmem:[%s24204_s21 + $0x9] sm:$0xff]  ;;  %v17783_v17 = vld [vmem:[%s24204_s21 + $0x39] sm:$0xff] }
  0x15   : > { %v240_v14 = vsel %vm238_vm0, %v204_v10, 0  ;;  %v24218_v18 = vand.u32 4294901760, %v7907_v12  ;;  %v24220_v19 = vand.u32 4294901760, %v7910_v13  ;;  %v17784_v22 = vld [vmem:[%s24204_s21 + $0x49] sm:$0xff]  ;;  %v17785_v23 = vld [vmem:[%s24204_s21 + $0x51] sm:$0xff]  ;;  %v7913_v24 = vsel %vm238_vm0, %v17782_v15, 0 }
  0x16   : > { %v24222_v20 = vand.u32 4294901760, %v240_v14  ;;  %v24224_v21 = vand.u32 4294901760, %v725_v11  ;;  %v243_v25 = vsel %vm238_vm0, %v205_v16, 0  ;;  %v7916_v26 = vsel %vm238_vm0, %v17783_v17, 0  ;;  %v17786_v48 = vld [vmem:[%s24204_s21 + $0x61] sm:$0xff]  ;;  %v17787_v52 = vld [vmem:[%s24204_s21 + $0x69] sm:$0xff] }
  0x17   : > { %29967 = vst [vmem:[#allocation5_spill] sm:$0xff] %v24218_v18  ;;  %29968 = vst [vmem:[#allocation6_spill] sm:$0xff] %v24220_v19  ;;  %v7919_v27 = vsel %vm238_vm0, %v17784_v22, 0  ;;  %v24233_v28 = vsub.f32 %v7907_v12, %v24218_v18  ;;  %v24236_v29 = vsub.f32 %v7910_v13, %v24220_v19  ;;  %v24242_v31 = vand.u32 4294901760, %v7913_v24  ;;  %v17788_v56 = vld [vmem:[%s24204_s21 + $0x79] sm:$0xff]  ;;  %v17789_v59 = vld [vmem:[%s24204_s21 + $0x81] sm:$0xff] }
  0x18   : > { %v24239_v30 = vsub.f32 %v240_v14, %v24222_v20  ;;  %19781 = vmatprep.subr.mxu1 %v24224_v21  ;;  %v24244_v32 = vand.u32 4294901760, %v243_v25  ;;  %v24246_v33 = vand.u32 4294901760, %v7916_v26  ;;  %v24248_v34 = vand.u32 4294901760, %v7919_v27  ;;  %v17790_v0 = vld [vmem:[%s24204_s21 + $0x91] sm:$0xff]  ;;  %v17791_v1 = vld [vmem:[%s24204_s21 + $0x99] sm:$0xff]  ;;  %v17792_v16 = vld [vmem:[%s24204_s21 + $0xa9] sm:$0xff] }
  0x19   : > { %29969 = vst [vmem:[#allocation7_spill] sm:$0xff] %v24233_v28  ;;  %29970 = vst [vmem:[#allocation8_spill] sm:$0xff] %v24236_v29  ;;  %v7922_v35 = vsel %vm238_vm0, %v17785_v23, 0  ;;  %v24252_v36 = vand.u32 4294901760, %v24233_v28  ;;  %v24255_v37 = vand.u32 4294901760, %v24236_v29  ;;  %v24259_v39 = vsub.f32 %v7913_v24, %v24242_v31 }
  0x1a   : > { %29971 = vst [vmem:[#allocation9_spill] sm:$0xff] %v24242_v31  ;;  %29972 = vst [vmem:[#allocation10_spill] sm:$0xff] %v24246_v33  ;;  %v28970_v38 = vand.u32 4294901760, %v24239_v30  ;;  %v24262_v40 = vsub.f32 %v243_v25, %v24244_v32  ;;  %v24265_v41 = vsub.f32 %v7916_v26, %v24246_v33  ;;  %v24268_v42 = vsub.f32 %v7919_v27, %v24248_v34 }
  0x1b   : > { %29973 = vst [vmem:[#allocation11_spill] sm:$0xff] %v24248_v34  ;;  %29974 = vst [vmem:[#allocation12_spill] sm:$0xff] %v24252_v36  ;;  %v24270_v43 = vand.u32 4294901760, %v7922_v35  ;;  %v8071_v44 = vsub.f32 %v24233_v28, %v24252_v36  ;;  %21083 = vmatprep.mubr.f32.mxu0 %v24252_v36  ;;  %v8081_v45 = vsub.f32 %v24236_v29, %v24255_v37  ;;  %v24281_v47 = vand.u32 4294901760, %v24259_v39  ;;  %v17802_v36 = vld [vmem:[%s24204_s21 + $0x121] sm:$0xff] }
  0x1c   : > { %29975 = vst [vmem:[#allocation13_spill] sm:$0xff] %v24255_v37  ;;  %29976 = vst [vmem:[#allocation14_spill] sm:$0xff] %v24259_v39  ;;  %v404_v46 = vsub.f32 %v24239_v30, %v28970_v38  ;;  %21084 = vmatmul.mubr.f32.vlgmr.msra.gmra.mrb[0].mxu0 %v24255_v37  ;;  %v28969_v49 = vand.u32 4294901760, %v24262_v40  ;;  %v24287_v50 = vand.u32 4294901760, %v24265_v41  ;;  %v24296_v54 = vand.u32 4294901760, %v24268_v42  ;;  %v17797_v38 = vld [vmem:[%s24204_s21 + $0xe1] sm:$0xff] }
  0x1d   : > { %29977 = vst [vmem:[#allocation15_spill] sm:$0xff] %v24265_v41  ;;  %29978 = vst [vmem:[#allocation16_spill] sm:$0xff] %v24268_v42  ;;  %v24290_v51 = vsub.f32 %v7922_v35, %v24270_v43  ;;  %21086 = vmatprep.mubr.f32.mxu0 %v24281_v47  ;;  %21132 = vmatpush3.msra.mxu0 %v24199_v7  ;;  %v444_v55 = vsub.f32 %v24259_v39, %v24281_v47  ;;  %v7925_v58 = vsel %vm238_vm0, %v17786_v48, 0 }
  0x1e   : > { %29979 = vst [vmem:[#allocation17_spill] sm:$0xff] %v24270_v43  ;;  %29980 = vst [vmem:[#allocation18_spill] sm:$0xff] %v24281_v47  ;;  %v405_v53 = vand.u32 4294901760, %v404_v46  ;;  %v414_v57 = vsub.f32 %v24262_v40, %v28969_v49  ;;  %21181 = vmatprep.subr.mxu0 %v24178_v2  ;;  %v24307_v60 = vand.u32 4294901760, %v8081_v45  ;;  %v24309_v61 = vand.u32 4294901760, %v8071_v44  ;;  %v17793_v44 = vld [vmem:[%s24204_s21 + $0xb1] sm:$0xff] }
  0x1f   : > { %29981 = vst [vmem:[#allocation19_spill] sm:$0xff] %v24287_v50  ;;  %29982 = vst [vmem:[#allocation20_spill] sm:$0xff] %v24290_v51  ;;  %v24311_v62 = vand.u32 4294901760, %v7925_v58  ;;  %v7928_v63 = vsel %vm238_vm0, %v17787_v52, 0  ;;  %v24318_v9 = vand.u32 4294901760, %v24290_v51  ;;  %v7931_v11 = vsel %vm238_vm0, %v17788_v56, 0 }
  0x20   : > { %29983 = vst [vmem:[#allocation21_spill] sm:$0xff] %v24296_v54  ;;  %29984 = vst [vmem:[#allocation22_spill] sm:$0xff] %v24307_v60  ;;  %19733 = vmatprep.mubr.f32.mxu1 %v405_v53  ;;  %v415_v8 = vand.u32 4294901760, %v414_v57  ;;  %21087 = vmatmul.mubr.f32.gmra.mrb[2].mxu0 %v24287_v50  ;;  %v24320_v10 = vand.u32 4294901760, %v7928_v63  ;;  %v24324_v12 = vand.u32 4294901760, %v444_v55  ;;  %v454_v14 = vsub.f32 %v24265_v41, %v24287_v50  ;;  %v17801_v47 = vld [vmem:[%s24204_s21 + $0x111] sm:$0xff] }
  0x21   : > { %29985 = vst [vmem:[#allocation23_spill] sm:$0xff] %v24309_v61  ;;  %29986 = vst [vmem:[#allocation24_spill] sm:$0xff] %v24311_v62  ;;  %21089 = vmatprep.mubr.f32.mxu0 %v24296_v54  ;;  %v24327_v13 = vsub.f32 %v7925_v58, %v24311_v62  ;;  %v24331_v15 = vand.u32 4294901760, %v7931_v11  ;;  %v7934_v22 = vsel %vm238_vm0, %v17789_v59, 0  ;;  %v7937_v23 = vsel %vm238_vm0, %v17790_v0, 0  ;;  %v17810_v41 = vld [vmem:[%s24204_s21 + $0x181] sm:$0xff] }
  0x22   : > { %29987 = vst [vmem:[#allocation25_spill] sm:$0xff] %v24318_v9  ;;  %29988 = vst [vmem:[#allocation26_spill] sm:$0xff] %v24320_v10  ;;  %19734 = vmatmul.mubr.f32.vlgmr.msra.gmra.mrb[0].mxu1 %v415_v8  ;;  %v24335_v17 = vsub.f32 %v7928_v63, %v24320_v10  ;;  %v7940_v24 = vsel %vm238_vm0, %v17791_v1, 0  ;;  %v464_v26 = vsub.f32 %v24268_v42, %v24296_v54  ;;  %v24350_v35 = vand.u32 4294901760, %v7934_v22  ;;  %v17794_v63 = vld [vmem:[%s24204_s21 + $0xc1] sm:$0xff]  ;;  %v17800_v54 = vld [vmem:[%s24204_s21 + $0x109] sm:$0xff] }
  0x23   : > { %29989 = vst [vmem:[#allocation27_spill] sm:$0xff] %v24324_v12  ;;  %29990 = vst [vmem:[#allocation28_spill] sm:$0xff] %v24327_v13  ;;  %19782 = vmatpush3.msra.mxu1 %v24224_v21  ;;  %19736 = vmatprep.mubr.f32.mxu1 %v24309_v61  ;;  %v24343_v25 = vand.u32 4294901760, %v24327_v13  ;;  %v24348_v27 = vsub.f32 %v7931_v11, %v24331_v15  ;;  %v24357_v21 = vand.u32 4294901760, %v7937_v23  ;;  %v24359_v46 = vand.u32 4294901760, %v7940_v24 }
  0x24   : > { %29991 = vst [vmem:[#allocation29_spill] sm:$0xff] %v24331_v15  ;;  %29992 = vst [vmem:[#allocation30_spill] sm:$0xff] %v24335_v17  ;;  %21090 = vmatmul.mubr.f32.gmra.mrb[4].mxu0 %v24318_v9  ;;  %v24355_v45 = vand.u32 4294901760, %v24335_v17  ;;  %v7943_v48 = vsel %vm238_vm0, %v17792_v16, 0  ;;  %19831 = vmatprep.subr.mxu1 %v24187_v4  ;;  %v24368_v53 = vsub.f32 %v7934_v22, %v24350_v35  ;;  %v24373_v56 = vand.u32 4294901760, %v454_v14  ;;  %v17795_v22 = vld [vmem:[%s24204_s21 + $0xc9] sm:$0xff] }
  0x25   : > { %29993 = vst [vmem:[#allocation31_spill] sm:$0xff] %v24343_v25  ;;  %29994 = vst [vmem:[#allocation32_spill] sm:$0xff] %v24348_v27  ;;  %21092 = vmatprep.mubr.f32.mxu0 %v24343_v25  ;;  %v24365_v52 = vand.u32 4294901760, %v24348_v27  ;;  %v24370_v55 = vand.u32 4294901760, %v7943_v48  ;;  %v474_v57 = vsub.f32 %v24290_v51, %v24318_v9  ;;  %v24378_v58 = vsub.f32 %v7937_v23, %v24357_v21  ;;  %v17796_v23 = vld [vmem:[%s24204_s21 + $0xd9] sm:$0xff]  ;;  %v17808_v51 = vld [vmem:[%s24204_s21 + $0x169] sm:$0xff] }
  0x26   : > { %29995 = vst [vmem:[#allocation33_spill] sm:$0xff] %v24350_v35  ;;  %29996 = vst [vmem:[#allocation34_spill] sm:$0xff] %v24355_v45  ;;  %19737 = vmatmul.mubr.f32.gmra.mrb[2].mxu1 %v24307_v60  ;;  %v7946_v59 = vsel %vm238_vm0, %v17793_v44, 0  ;;  %v24383_v0 = vand.u32 4294901760, %v464_v26  ;;  %v484_v1 = vsub.f32 %v24327_v13, %v24343_v25  ;;  %v24389_v8 = vand.u32 4294901760, %v24368_v53  ;;  %v17799_v25 = vld [vmem:[%s24204_s21 + $0xf9] sm:$0xff] }
  0x27   : > { %29997 = vst [vmem:[#allocation35_spill] sm:$0xff] %v24357_v21  ;;  %29998 = vst [vmem:[#allocation36_spill] sm:$0xff] %v24359_v46  ;;  %19739 = vmatprep.mubr.f32.mxu1 %v24324_v12  ;;  %v24392_v11 = vsub.f32 %v7940_v24, %v24359_v46  ;;  %v24395_v14 = vsub.f32 %v7943_v48, %v24370_v55  ;;  %v24397_v16 = vand.u32 4294901760, %v7946_v59  ;;  %v24403_v26 = vand.u32 4294901760, %v24378_v58 }
  0x28   : > { %29999 = vst [vmem:[#allocation37_spill] sm:$0xff] %v24365_v52  ;;  %30000 = vst [vmem:[#allocation38_spill] sm:$0xff] %v24368_v53  ;;  %21093 = vmatmul.mubr.f32.gmra.mrb[6].mxu0 %v24355_v45  ;;  %v7949_v44 = vsel %vm238_vm0, %v17794_v63, 0  ;;  %v24407_v49 = vand.u32 4294901760, %v474_v57  ;;  %v494_v24 = vsub.f32 %v24335_v17, %v24355_v45  ;;  %v24415_v12 = vand.u32 4294901760, %v484_v1  ;;  %v17798_v57 = vld [vmem:[%s24204_s21 + $0xf1] sm:$0xff] }
  0x29   : > { %30001 = vst [vmem:[#allocation39_spill] sm:$0xff] %v24370_v55  ;;  %30002 = vst [vmem:[#allocation40_spill] sm:$0xff] %v24373_v56  ;;  %21095 = vmatprep.mubr.f32.mxu0 %v24365_v52  ;;  %v24411_v48 = vand.u32 4294901760, %v7949_v44  ;;  %v504_v60 = vsub.f32 %v24348_v27, %v24365_v52  ;;  %v7952_v61 = vsel %vm238_vm0, %v17795_v22, 0  ;;  %v7955_v63 = vsel %vm238_vm0, %v17796_v23, 0  ;;  %v17806_v17 = vld [vmem:[%s24204_s21 + $0x151] sm:$0xff] }
  0x2a   : > { %30003 = vst [vmem:[#allocation41_spill] sm:$0xff] %v24378_v58  ;;  %30004 = vst [vmem:[#allocation42_spill] sm:$0xff] %v24383_v0  ;;  %19740 = vmatmul.mubr.f32.gmra.mrb[4].mxu1 %v24373_v56  ;;  %v24424_v56 = vand.u32 4294901760, %v24392_v11  ;;  %v24427_v5 = vand.u32 4294901760, %v24395_v14  ;;  %v24430_v1 = vsub.f32 %v7946_v59, %v24397_v16  ;;  %v24438_v23 = vand.u32 4294901760, %v7955_v63 }
  0x2b   : > { %30005 = vst [vmem:[#allocation43_spill] sm:$0xff] %v24389_v8  ;;  %30006 = vst [vmem:[#allocation44_spill] sm:$0xff] %v24392_v11  ;;  %19742 = vmatprep.mubr.f32.mxu1 %v24383_v0  ;;  %v24434_v22 = vsub.f32 %v7949_v44, %v24411_v48  ;;  %v24436_v0 = vand.u32 4294901760, %v7952_v61  ;;  %v7958_v7 = vsel %vm238_vm0, %v17797_v38, 0  ;;  %v24442_v52 = vand.u32 4294901760, %v494_v24 }
  0x2c   : > { %30007 = vst [vmem:[#allocation45_spill] sm:$0xff] %v24395_v14  ;;  %30008 = vst [vmem:[#allocation46_spill] sm:$0xff] %v24397_v16  ;;  %21096 = vmatmul.mubr.f32.gmra.mrb[8].mxu0 %v24389_v8  ;;  %v514_v45 = vsub.f32 %v24368_v53, %v24389_v8  ;;  %v7961_v59 = vsel %vm238_vm0, %v17798_v57, 0  ;;  %v24449_v44 = vand.u32 4294901760, %v504_v60  ;;  %v524_v9 = vsub.f32 %v24378_v58, %v24403_v26  ;;  %v17804_v53 = vld [vmem:[%s24204_s21 + $0x139] sm:$0xff] }
  0x2d   : > { %30009 = vst [vmem:[#allocation47_spill] sm:$0xff] %v24403_v26  ;;  %30010 = vst [vmem:[#allocation48_spill] sm:$0xff] %v24407_v49  ;;  %21098 = vmatprep.mubr.f32.mxu0 %v24403_v26  ;;  %v24456_v38 = vand.u32 4294901760, %v24430_v1  ;;  %v24459_v24 = vsub.f32 %v7952_v61, %v24436_v0  ;;  %v24461_v57 = vand.u32 4294901760, %v7958_v7  ;;  %v24465_v60 = vand.u32 4294901760, %v24434_v22 }
  0x2e   : > { %30011 = vst [vmem:[#allocation49_spill] sm:$0xff] %v24411_v48  ;;  %30012 = vst [vmem:[#allocation50_spill] sm:$0xff] %v24415_v12  ;;  %19743 = vmatmul.mubr.f32.gmra.mrb[6].mxu1 %v24407_v49  ;;  %v24470_v49 = vand.u32 4294901760, %v7961_v59  ;;  %v7964_v26 = vsel %vm238_vm0, %v17799_v25, 0  ;;  %v24474_v8 = vand.u32 4294901760, %v514_v45  ;;  %v534_v61 = vsub.f32 %v24392_v11, %v24424_v56  ;;  %v17803_v11 = vld [vmem:[%s24204_s21 + $0x129] sm:$0xff] }
  0x2f   : > { %30013 = vst [vmem:[#allocation51_spill] sm:$0xff] %v24424_v56  ;;  %30014 = vst [vmem:[#allocation52_spill] sm:$0xff] %v24427_v5  ;;  %19745 = vmatprep.mubr.f32.mxu1 %v24415_v12  ;;  %v24468_v12 = vsub.f32 %v7955_v63, %v24438_v23  ;;  %v7967_v50 = vsel %vm238_vm0, %v17800_v54, 0  ;;  %v24481_v37 = vand.u32 4294901760, %v524_v9  ;;  %v544_v63 = vsub.f32 %v24395_v14, %v24427_v5 }
  0x30   : > { %30015 = vst [vmem:[#allocation53_spill] sm:$0xff] %v24430_v1  ;;  %30016 = vst [vmem:[#allocation54_spill] sm:$0xff] %v24434_v22  ;;  %21099 = vmatmul.mubr.f32.gmra.mrb[10].mxu0 %v24424_v56  ;;  %v24488_v25 = vand.u32 4294901760, %v24459_v24  ;;  %v24491_v45 = vsub.f32 %v7958_v7, %v24461_v57  ;;  %v24493_v54 = vand.u32 4294901760, %v7964_v26  ;;  %v24506_v56 = vand.u32 4294901760, %v534_v61 }
  0x31   : > { %30017 = vst [vmem:[#allocation55_spill] sm:$0xff] %v24436_v0  ;;  %30018 = vst [vmem:[#allocation56_spill] sm:$0xff] %v24438_v23  ;;  %21101 = vmatprep.mubr.f32.mxu0 %v24427_v5  ;;  %v24497_v9 = vand.u32 4294901760, %v24468_v12  ;;  %v7970_v5 = vsel %vm238_vm0, %v17801_v47, 0  ;;  %v554_v7 = vsub.f32 %v24430_v1, %v24456_v38  ;;  %v7973_v14 = vsel %vm238_vm0, %v17802_v36, 0  ;;  %v17805_v1 = vld [vmem:[%s24204_s21 + $0x141] sm:$0xff] }
  0x32   : > { %30019 = vst [vmem:[#allocation57_spill] sm:$0xff] %v24442_v52  ;;  %30020 = vst [vmem:[#allocation58_spill] sm:$0xff] %v24449_v44  ;;  %19746 = vmatmul.mubr.f32.gmra.mrb[8].mxu1 %v24442_v52  ;;  %v24502_v52 = vand.u32 4294901760, %v7967_v50  ;;  %v24513_v58 = vand.u32 4294901760, %v544_v63  ;;  %v24520_v47 = vand.u32 4294901760, %v24491_v45  ;;  %v24523_v61 = vsub.f32 %v7964_v26, %v24493_v54 }
  0x33   : > { %30021 = vst [vmem:[#allocation59_spill] sm:$0xff] %v24456_v38  ;;  %30022 = vst [vmem:[#allocation60_spill] sm:$0xff] %v24459_v24  ;;  %19748 = vmatprep.mubr.f32.mxu1 %v24449_v44  ;;  %v24500_v44 = vsub.f32 %v7961_v59, %v24470_v49  ;;  %v564_v59 = vsub.f32 %v24434_v22, %v24465_v60  ;;  %v24525_v36 = vand.u32 4294901760, %v7970_v5  ;;  %v7979_v22 = vsel %vm238_vm0, %v17804_v53, 0 }
  0x34   : > { %30023 = vst [vmem:[#allocation61_spill] sm:$0xff] %v24461_v57  ;;  %30024 = vst [vmem:[#allocation62_spill] sm:$0xff] %v24465_v60  ;;  %21102 = vmatmul.mubr.f32.gmra.mrb[12].mxu0 %v24456_v38  ;;  %v24538_v38 = vand.u32 4294901760, %v554_v7  ;;  %v574_v26 = vsub.f32 %v24459_v24, %v24488_v25  ;;  %v17807_v24 = vld [vmem:[%s24204_s21 + $0x159] sm:$0xff] }
  0x35   : > { %30025 = vst [vmem:[#allocation63_spill] sm:$0xff] %v24468_v12  ;;  %30026 = vst [vmem:[#allocation64_spill] sm:$0xff] %v24470_v49  ;;  %21104 = vmatprep.mubr.f32.mxu0 %v24465_v60  ;;  %v24529_v63 = vand.u32 4294901760, %v24500_v44  ;;  %v7976_v60 = vsel %vm238_vm0, %v17803_v11, 0  ;;  %v24545_v27 = vand.u32 4294901760, %v564_v59  ;;  %v24552_v11 = vand.u32 4294901760, %v24523_v61 }
  0x36   : > { %30027 = vst [vmem:[#allocation65_spill] sm:$0xff] %v24474_v8  ;;  %30028 = vst [vmem:[#allocation66_spill] sm:$0xff] %v24481_v37  ;;  %19749 = vmatmul.mubr.f32.gmra.mrb[10].mxu1 %v24474_v8  ;;  %v24534_v8 = vand.u32 4294901760, %v7973_v14  ;;  %v24555_v7 = vsub.f32 %v7970_v5, %v24525_v36  ;;  %v24557_v53 = vand.u32 4294901760, %v7976_v60  ;;  %v594_v5 = vsub.f32 %v24491_v45, %v24520_v47 }
  0x37   : > { %30029 = vst [vmem:[#allocation67_spill] sm:$0xff] %v24488_v25  ;;  %30030 = vst [vmem:[#allocation68_spill] sm:$0xff] %v24491_v45  ;;  %19751 = vmatprep.mubr.f32.mxu1 %v24481_v37  ;;  %v24532_v37 = vsub.f32 %v7967_v50, %v24502_v52  ;;  %v584_v50 = vsub.f32 %v24468_v12, %v24497_v9  ;;  %v7985_v12 = vsel %vm238_vm0, %v17806_v17, 0  ;;  %v17809_v45 = vld [vmem:[%s24204_s21 + $0x171] sm:$0xff] }
  0x38   : > { %30031 = vst [vmem:[#allocation69_spill] sm:$0xff] %v24493_v54  ;;  %30032 = vst [vmem:[#allocation70_spill] sm:$0xff] %v24497_v9  ;;  %21105 = vmatmul.mubr.f32.gmra.mrb[14].mxu0 %v24488_v25  ;;  %v24570_v25 = vand.u32 4294901760, %v574_v26  ;;  %v24587_v26 = vsub.f32 %v7976_v60, %v24557_v53  ;;  %v614_v60 = vsub.f32 %v24523_v61, %v24552_v11 }
  0x39   : > { %30033 = vst [vmem:[#allocation71_spill] sm:$0xff] %v24500_v44  ;;  %30034 = vst [vmem:[#allocation72_spill] sm:$0xff] %v24502_v52  ;;  %21107 = vmatprep.mubr.f32.mxu0 %v24497_v9  ;;  %v24561_v59 = vand.u32 4294901760, %v24532_v37  ;;  %v7982_v9 = vsel %vm238_vm0, %v17805_v1, 0  ;;  %v24577_v13 = vand.u32 4294901760, %v584_v50  ;;  %v24584_v1 = vand.u32 4294901760, %v24555_v7 }
  0x3a   : > { %30035 = vst [vmem:[#allocation73_spill] sm:$0xff] %v24506_v56  ;;  %30036 = vst [vmem:[#allocation74_spill] sm:$0xff] %v24513_v58  ;;  %19752 = vmatmul.mubr.f32.gmra.mrb[12].mxu1 %v24506_v56  ;;  %v24566_v56 = vand.u32 4294901760, %v7979_v22  ;;  %v24589_v17 = vand.u32 4294901760, %v7982_v9 }
  0x3b   : > { %30037 = vst [vmem:[#allocation75_spill] sm:$0xff] %v24520_v47  ;;  %30038 = vst [vmem:[#allocation76_spill] sm:$0xff] %v24523_v61  ;;  %19754 = vmatprep.mubr.f32.mxu1 %v24513_v58  ;;  %v24564_v58 = vsub.f32 %v7973_v14, %v24534_v8  ;;  %v604_v14 = vsub.f32 %v24500_v44, %v24529_v63  ;;  %v7991_v44 = vsel %vm238_vm0, %v17808_v51, 0  ;;  %v17811_v61 = vld [vmem:[%s24204_s21 + $0x189] sm:$0xff] }
  0x3c   : > { %30039 = vst [vmem:[#allocation77_spill] sm:$0xff] %v24525_v36  ;;  %30040 = vst [vmem:[#allocation78_spill] sm:$0xff] %v24529_v63  ;;  %21108 = vmatmul.mubr.f32.gmra.mrb[16].mxu0 %v24520_v47  ;;  %v24602_v47 = vand.u32 4294901760, %v594_v5  ;;  %v24619_v5 = vsub.f32 %v7982_v9, %v24589_v17  ;;  %v634_v9 = vsub.f32 %v24555_v7, %v24584_v1 }
  0x3d   : > { %30041 = vst [vmem:[#allocation79_spill] sm:$0xff] %v24532_v37  ;;  %30042 = vst [vmem:[#allocation80_spill] sm:$0xff] %v24534_v8  ;;  %21110 = vmatprep.mubr.f32.mxu0 %v24529_v63  ;;  %v24593_v50 = vand.u32 4294901760, %v24564_v58  ;;  %v7988_v63 = vsel %vm238_vm0, %v17807_v24, 0  ;;  %v24609_v42 = vand.u32 4294901760, %v604_v14  ;;  %v24616_v24 = vand.u32 4294901760, %v24587_v26 }
  0x3e   : > { %30043 = vst [vmem:[#allocation81_spill] sm:$0xff] %v24538_v38  ;;  %30044 = vst [vmem:[#allocation82_spill] sm:$0xff] %v24545_v27  ;;  %19755 = vmatmul.mubr.f32.gmra.mrb[14].mxu1 %v24538_v38  ;;  %v24598_v38 = vand.u32 4294901760, %v7985_v12 }
  0x3f   : > { %30045 = vst [vmem:[#allocation83_spill] sm:$0xff] %v24552_v11  ;;  %30046 = vst [vmem:[#allocation84_spill] sm:$0xff] %v24555_v7  ;;  %19757 = vmatprep.mubr.f32.mxu1 %v24545_v27  ;;  %v24596_v27 = vsub.f32 %v7979_v22, %v24566_v56  ;;  %v624_v22 = vsub.f32 %v24532_v37, %v24561_v59  ;;  %v7997_v37 = vsel %vm238_vm0, %v17810_v41, 0 }
  0x40   : > { %30047 = vst [vmem:[#allocation85_spill] sm:$0xff] %v24557_v53  ;;  %30048 = vst [vmem:[#allocation86_spill] sm:$0xff] %v24561_v59  ;;  %21111 = vmatmul.mubr.f32.gmra.mrb[18].mxu0 %v24552_v11  ;;  %v24628_v14 = vsub.f32 %v7985_v12, %v24598_v38  ;;  %v24634_v11 = vand.u32 4294901760, %v614_v60  ;;  %v644_v12 = vsub.f32 %v24564_v58, %v24593_v50 }
  0x41   : > { %30049 = vst [vmem:[#allocation87_spill] sm:$0xff] %v24564_v58  ;;  %30050 = vst [vmem:[#allocation88_spill] sm:$0xff] %v24566_v56  ;;  %21113 = vmatprep.mubr.f32.mxu0 %v24561_v59  ;;  %v24625_v51 = vand.u32 4294901760, %v24596_v27  ;;  %v7994_v59 = vsel %vm238_vm0, %v17809_v45, 0  ;;  %v24641_v39 = vand.u32 4294901760, %v624_v22  ;;  %v24647_v45 = vand.u32 4294901760, %v24619_v5 }
  0x42   : > { %30051 = vst [vmem:[#allocation89_spill] sm:$0xff] %v24570_v25  ;;  %30052 = vst [vmem:[#allocation90_spill] sm:$0xff] %v24577_v13  ;;  %19758 = vmatmul.mubr.f32.gmra.mrb[16].mxu1 %v24570_v25  ;;  %v24621_v25 = vand.u32 4294901760, %v7988_v63  ;;  %v24656_v41 = vand.u32 4294901760, %v24628_v14  ;;  %v24670_v58 = vand.u32 4294901760, %v644_v12 }
  0x43   : > { %30053 = vst [vmem:[#allocation91_spill] sm:$0xff] %v24584_v1  ;;  %30054 = vst [vmem:[#allocation92_spill] sm:$0xff] %v24587_v26  ;;  %19760 = vmatprep.mubr.f32.mxu1 %v24577_v13  ;;  %v24630_v13 = vand.u32 4294901760, %v7991_v44  ;;  %v664_v7 = vsub.f32 %v24596_v27, %v24625_v51 }
  0x44   : > { %30055 = vst [vmem:[#allocation93_spill] sm:$0xff] %v24589_v17  ;;  %30056 = vst [vmem:[#allocation94_spill] sm:$0xff] %v24593_v50  ;;  %21114 = vmatmul.mubr.f32.gmra.mrb[20].mxu0 %v24584_v1  ;;  %v24650_v60 = vsub.f32 %v7988_v63, %v24621_v25  ;;  %v24665_v1 = vand.u32 4294901760, %v634_v9  ;;  %v654_v63 = vsub.f32 %v24587_v26, %v24616_v24 }
  0x45   : > { %30057 = vst [vmem:[#allocation95_spill] sm:$0xff] %v24596_v27  ;;  %30058 = vst [vmem:[#allocation96_spill] sm:$0xff] %v24598_v38  ;;  %21116 = vmatprep.mubr.f32.mxu0 %v24593_v50  ;;  %v24659_v22 = vsub.f32 %v7991_v44, %v24630_v13  ;;  %v8000_v50 = vsel %vm238_vm0, %v17811_v61, 0 }
  0x46   : > { %30059 = vst [vmem:[#allocation97_spill] sm:$0xff] %v24602_v47  ;;  %30060 = vst [vmem:[#allocation98_spill] sm:$0xff] %v24609_v42  ;;  %19761 = vmatmul.mubr.f32.gmra.mrb[18].mxu1 %v24602_v47  ;;  %v24652_v47 = vand.u32 4294901760, %v7994_v59  ;;  %v24676_v44 = vand.u32 4294901760, %v24650_v60  ;;  %v24681_v9 = vand.u32 4294901760, %v8000_v50 }
  0x47   : > { %30061 = vst [vmem:[#allocation99_spill] sm:$0xff] %v24616_v24  ;;  %30062 = vst [vmem:[#allocation100_spill] sm:$0xff] %v24619_v5  ;;  %19763 = vmatprep.mubr.f32.mxu1 %v24609_v42  ;;  %v24661_v42 = vand.u32 4294901760, %v7997_v37 }
  0x48   : > { %30063 = vst [vmem:[#allocation101_spill] sm:$0xff] %v24621_v25  ;;  %30064 = vst [vmem:[#allocation102_spill] sm:$0xff] %v24625_v51  ;;  %21117 = vmatmul.mubr.f32.gmra.mrb[22].mxu0 %v24616_v24  ;;  %v24679_v61 = vsub.f32 %v7994_v59, %v24652_v47  ;;  %v24696_v59 = vand.u32 4294901760, %v664_v7  ;;  %v684_v24 = vsub.f32 %v24628_v14, %v24656_v41 }
  0x49   : > { %30065 = vst [vmem:[#allocation103_spill] sm:$0xff] %v24628_v14  ;;  %30066 = vst [vmem:[#allocation104_spill] sm:$0xff] %v24630_v13  ;;  %21119 = vmatprep.mubr.f32.mxu0 %v24625_v51  ;;  %v24688_v12 = vsub.f32 %v7997_v37, %v24661_v42  ;;  %v674_v51 = vsub.f32 %v24619_v5, %v24647_v45  ;;  %v24705_v37 = vsub.f32 %v8000_v50, %v24681_v9 }
  0x4a   : > { %30067 = vst [vmem:[#allocation105_spill] sm:$0xff] %v24634_v11  ;;  %30068 = vst [vmem:[#allocation106_spill] sm:$0xff] %v24641_v39  ;;  %19764 = vmatmul.mubr.f32.gmra.mrb[20].mxu1 %v24634_v11  ;;  %v24685_v11 = vand.u32 4294901760, %v24659_v22  ;;  %v24702_v27 = vand.u32 4294901760, %v24679_v61  ;;  %v694_v7 = vsub.f32 %v24650_v60, %v24676_v44 }
  0x4b   : > { %30069 = vst [vmem:[#allocation107_spill] sm:$0xff] %v24650_v60  ;;  %30070 = vst [vmem:[#allocation108_spill] sm:$0xff] %v24652_v47  ;;  %19766 = vmatprep.mubr.f32.mxu1 %v24641_v39  ;;  %v24691_v39 = vand.u32 4294901760, %v654_v63  ;;  %v29069_v63 = vand.u32 4294901760, %v24688_v12  ;;  %v29070_v50 = vand.u32 4294901760, %v24705_v37 }
  0x4c   : > { %30071 = vst [vmem:[#allocation109_spill] sm:$0xff] %v24656_v41  ;;  %30072 = vst [vmem:[#allocation110_spill] sm:$0xff] %v24659_v22  ;;  %21120 = vmatmul.mubr.f32.gmra.mrb[24].mxu0 %v24647_v45 }
  0x4d   : > { %30073 = vst [vmem:[#allocation111_spill] sm:$0xff] %v24661_v42  ;;  %30074 = vst [vmem:[#allocation112_spill] sm:$0xff] %v24665_v1  ;;  %21122 = vmatprep.mubr.f32.mxu0 %v24656_v41  ;;  %v704_v41 = vsub.f32 %v24659_v22, %v24685_v11 }
  0x4e   : > { %30075 = vst [vmem:[#allocation113_spill] sm:$0xff] %v24670_v58  ;;  %30076 = vst [vmem:[#allocation114_spill] sm:$0xff] %v24679_v61  ;;  %19767 = vmatmul.mubr.f32.gmra.mrb[22].mxu1 %v24665_v1  ;;  %v24715_v1 = vand.u32 4294901760, %v684_v24 }
  0x4f   : > { %30077 = vst [vmem:[#allocation115_spill] sm:$0xff] %v24681_v9  ;;  %30078 = vst [vmem:[#allocation116_spill] sm:$0xff] %v24688_v12  ;;  %19769 = vmatprep.mubr.f32.mxu1 %v24670_v58  ;;  %v24710_v58 = vand.u32 4294901760, %v674_v51  ;;  %v24724_v51 = vand.u32 4294901760, %v694_v7  ;;  %v24729_v24 = vand.u32 4294901760, %v704_v41 }
  0x50   : > { %30079 = vst [vmem:[#allocation117_spill] sm:$0xff] %v24691_v39  ;;  %30080 = vst [vmem:[#allocation118_spill] sm:$0xff] %v24696_v59  ;;  %21123 = vmatmul.mubr.f32.gmra.mrb[26].mxu0 %v24676_v44 }
  0x51   : > { %30081 = vst [vmem:[#allocation119_spill] sm:$0xff] %v24705_v37  ;;  %21125 = vmatprep.mubr.f32.mxu0 %v24685_v11  ;;  %30082 = vst [vmem:[#allocation120_spill] sm:$0xff] %v24710_v58  ;;  %v30101_v37 = vld [vmem:[#allocation60_spill] sm:$0xff] }
  0x52   : > { %19770 = vmatmul.mubr.f32.gmra.mrb[24].mxu1 %v24691_v39  ;;  %30083 = vst [vmem:[#allocation121_spill] sm:$0xff] %v24715_v1  ;;  %30084 = vst [vmem:[#allocation122_spill] sm:$0xff] %v24724_v51  ;;  %v714_v39 = vsub.f32 %v24679_v61, %v24702_v27 }
  0x53   : > { %19772 = vmatprep.mubr.f32.mxu1 %v24696_v59  ;;  %30085 = vst [vmem:[#allocation123_spill] sm:$0xff] %v24729_v24  ;;  %v17845_v59 = vld [vmem:[%s28966_s1 + $0x28] sm:$0xff] }
  0x54   : > { %21126 = vmatmul.mubr.f32.gmra.mrb[28].mxu0 %v24702_v27  ;;  %v24738_v7 = vand.u32 4294901760, %v714_v39 }
  0x55   : > { %21128 = vmatprep.mubr.f32.mxu0 %v29069_v63  ;;  %v24740_v63 = vand.u32 4294901760, %v17845_v59 }
  0x56   : > { %19773 = vmatmul.mubr.f32.gmra.mrb[26].mxu1 %v24710_v58  ;;  %30086 = vst [vmem:[#allocation124_spill] sm:$0xff] %v24738_v7  ;;  %v30103_v58 = vld [vmem:[#allocation68_spill] sm:$0xff] }
  0x57   : > { %19775 = vmatprep.mubr.f32.mxu1 %v24715_v1  ;;  %v17816_v1 = vld [vmem:[%s24204_s21 + $0x3a] sm:$0xff] }
  0x58   : > { %21129 = vmatmul.mubr.f32.gmra.mrb[30].mxu0 %v29070_v50  ;;  %v30089_v50 = vld [vmem:[#allocation15_spill] sm:$0xff] }
  0x59   : > { %21133 = vmatprep.mubr.f32.mxu0 %v24218_v18 }
  0x5a   : > { %19776 = vmatmul.mubr.f32.gmra.mrb[28].mxu1 %v24724_v51  ;;  %v30102_v51 = vld [vmem:[#allocation63_spill] sm:$0xff] }
  0x5b   : > { %19778 = vmatprep.mubr.f32.mxu1 %v24729_v24  ;;  %v30092_v24 = vld [vmem:[#allocation28_spill] sm:$0xff] }
  0x5c   : > { %21134 = vmatmul.mubr.f32.vlgmr.msra.gmra.mrb[0].mxu0 %v24220_v19 }
  0x5d   : > { %21136 = vmatprep.mubr.f32.mxu0 %v24242_v31  ;;  %21182 = vmatpush3.msra.mxu0 %v24178_v2 }
  0x5e   : > { %19779 = vmatmul.mubr.f32.gmra.mrb[30].mxu1 %v24738_v7  ;;  %21231 = vmatprep.subr.mxu0 %v24740_v63  ;;  %v30090_v7 = vld [vmem:[#allocation16_spill] sm:$0xff] }
  0x5f   : > { %19783 = vmatprep.mubr.f32.mxu1 %v24222_v20 }
  0x60   : > { %21137 = vmatmul.mubr.f32.gmra.mrb[2].mxu0 %v24246_v33 }
  0x61   : > { %21139 = vmatprep.mubr.f32.mxu0 %v24248_v34 }
  0x62   : > { %19784 = vmatmul.mubr.f32.vlgmr.msra.gmra.mrb[0].mxu1 %v24244_v32 }
  0x63   : > { %19832 = vmatpush3.msra.mxu1 %v24187_v4  ;;  %19786 = vmatprep.mubr.f32.mxu1 %v24218_v18  ;;  %v24799_v4 = vsub.f32 %v17845_v59, %v24740_v63 }
  0x64   : > { %21140 = vmatmul.mubr.f32.gmra.mrb[4].mxu0 %v24270_v43  ;;  %19881 = vmatprep.subr.mxu1 %v24180_v3 }
  0x65   : > { %21142 = vmatprep.mubr.f32.mxu0 %v24311_v62  ;;  %v24806_v39 = vand.u32 4294901760, %v24799_v4 }
  0x66   : > { %19787 = vmatmul.mubr.f32.gmra.mrb[2].mxu1 %v24220_v19 }
  0x67   : > { %19789 = vmatprep.mubr.f32.mxu1 %v24242_v31  ;;  %30087 = vst [vmem:[#allocation125_spill] sm:$0xff] %v24806_v39  ;;  %v10333_v41 = vsub.f32 %v24799_v4, %v24806_v39 }
  0x68   : > { %21143 = vmatmul.mubr.f32.gmra.mrb[6].mxu0 %v24320_v10 }
  0x69   : > { %21145 = vmatprep.mubr.f32.mxu0 %v24331_v15  ;;  %v24818_v59 = vand.u32 4294901760, %v10333_v41  ;;  %v30088_v41 = vld [vmem:[#allocation14_spill] sm:$0xff] }
  0x6a   : > { %19790 = vmatmul.mubr.f32.gmra.mrb[4].mxu1 %v24246_v33 }
  0x6b   : > { %19792 = vmatprep.mubr.f32.mxu1 %v24248_v34 }
  0x6c   : > { %21146 = vmatmul.mubr.f32.gmra.mrb[8].mxu0 %v24350_v35 }
  0x6d   : > { %21148 = vmatprep.mubr.f32.mxu0 %v24357_v21 }
  0x6e   : > { %19793 = vmatmul.mubr.f32.gmra.mrb[6].mxu1 %v24270_v43 }
  0x6f   : > { %19795 = vmatprep.mubr.f32.mxu1 %v24311_v62 }
  0x70   : > { %21149 = vmatmul.mubr.f32.gmra.mrb[10].mxu0 %v24359_v46 }
  0x71   : > { %21151 = vmatprep.mubr.f32.mxu0 %v24370_v55 }
  0x72   : > { %19796 = vmatmul.mubr.f32.gmra.mrb[8].mxu1 %v24320_v10 }
  0x73   : > { %19798 = vmatprep.mubr.f32.mxu1 %v24331_v15 }
  0x74   : > { %21152 = vmatmul.mubr.f32.gmra.mrb[12].mxu0 %v24397_v16 }
  0x75   : > { %21154 = vmatprep.mubr.f32.mxu0 %v24411_v48 }
  0x76   : > { %19799 = vmatmul.mubr.f32.gmra.mrb[10].mxu1 %v24350_v35 }
  0x77   : > { %19801 = vmatprep.mubr.f32.mxu1 %v24357_v21 }
  0x78   : > { %21155 = vmatmul.mubr.f32.gmra.mrb[14].mxu0 %v24436_v0 }
  0x79   : > { %21157 = vmatprep.mubr.f32.mxu0 %v24438_v23 }
  0x7a   : > { %19802 = vmatmul.mubr.f32.gmra.mrb[12].mxu1 %v24359_v46 }
  0x7b   : > { %19804 = vmatprep.mubr.f32.mxu1 %v24370_v55 }
  0x7c   : > { %21158 = vmatmul.mubr.f32.gmra.mrb[16].mxu0 %v24461_v57 }
  0x7d   : > { %21160 = vmatprep.mubr.f32.mxu0 %v24470_v49 }
  0x7e   : > { %19805 = vmatmul.mubr.f32.gmra.mrb[14].mxu1 %v24397_v16 }
  0x7f   : > { %19807 = vmatprep.mubr.f32.mxu1 %v24411_v48 }
  0x80   : > { %21161 = vmatmul.mubr.f32.gmra.mrb[18].mxu0 %v24493_v54 }
  0x81   : > { %21163 = vmatprep.mubr.f32.mxu0 %v24502_v52 }
  0x82   : > { %19808 = vmatmul.mubr.f32.gmra.mrb[16].mxu1 %v24436_v0 }
  0x83   : > { %19810 = vmatprep.mubr.f32.mxu1 %v24438_v23 }
  0x84   : > { %21164 = vmatmul.mubr.f32.gmra.mrb[20].mxu0 %v24525_v36 }
  0x85   : > { %21166 = vmatprep.mubr.f32.mxu0 %v24534_v8 }
  0x86   : > { %19811 = vmatmul.mubr.f32.gmra.mrb[18].mxu1 %v24461_v57 }
  0x87   : > { %19813 = vmatprep.mubr.f32.mxu1 %v24470_v49 }
  0x88   : > { %21167 = vmatmul.mubr.f32.gmra.mrb[22].mxu0 %v24557_v53 }
  0x89   : > { %21169 = vmatprep.mubr.f32.mxu0 %v24566_v56 }
  0x8a   : > { %19814 = vmatmul.mubr.f32.gmra.mrb[20].mxu1 %v24493_v54 }
  0x8b   : > { %19816 = vmatprep.mubr.f32.mxu1 %v24502_v52 }
  0x8c   : > { %21170 = vmatmul.mubr.f32.gmra.mrb[24].mxu0 %v24589_v17 }
  0x8d   : > { %21172 = vmatprep.mubr.f32.mxu0 %v24598_v38 }
  0x8e   : > { %19817 = vmatmul.mubr.f32.gmra.mrb[22].mxu1 %v24525_v36 }
  0x8f   : > { %19819 = vmatprep.mubr.f32.mxu1 %v24534_v8 }
  0x90   : > { %21173 = vmatmul.mubr.f32.gmra.mrb[26].mxu0 %v24621_v25 }
  0x91   : > { %21175 = vmatprep.mubr.f32.mxu0 %v24630_v13 }
  0x92   : > { %19820 = vmatmul.mubr.f32.gmra.mrb[24].mxu1 %v24557_v53 }
  0x93   : > { %19822 = vmatprep.mubr.f32.mxu1 %v24566_v56 }
  0x94   : > { %21176 = vmatmul.mubr.f32.gmra.mrb[28].mxu0 %v24652_v47 }
  0x95   : > { %21178 = vmatprep.mubr.f32.mxu0 %v24661_v42 }
  0x96   : > { %19823 = vmatmul.mubr.f32.gmra.mrb[26].mxu1 %v24589_v17 }
  0x97   : > { %19825 = vmatprep.mubr.f32.mxu1 %v24598_v38 }
  0x98   : > { %21179 = vmatmul.mubr.f32.gmra.mrb[30].mxu0 %v24681_v9 }
  0x99   : > { %21183 = vmatprep.mubr.f32.mxu0 %v24218_v18 }
  0x9a   : > { %19826 = vmatmul.mubr.f32.gmra.mrb[28].mxu1 %v24621_v25 }
  0x9b   : > { %19828 = vmatprep.mubr.f32.mxu1 %v24630_v13 }
  0x9c   : > { %21184 = vmatmul.mubr.f32.vlgmr.msra.gmra.mrb[0].mxu0 %v24220_v19 }
  0x9d   : > { %21186 = vmatprep.mubr.f32.mxu0 %v24242_v31  ;;  %21232 = vmatpush3.msra.mxu0 %v24740_v63 }
  0x9e   : > { %19829 = vmatmul.mubr.f32.gmra.mrb[30].mxu1 %v24652_v47  ;;  %21281 = vmatprep.subr.mxu0 %v24818_v59 }
  0x9f   : > { %19833 = vmatprep.mubr.f32.mxu1 %v24239_v30 }
  0xa0   : > { %21187 = vmatmul.mubr.f32.gmra.mrb[2].mxu0 %v24246_v33 }
  0xa1   : > { %21189 = vmatprep.mubr.f32.mxu0 %v24248_v34 }
  0xa2   : > { %19834 = vmatmul.mubr.f32.vlgmr.msra.gmra.mrb[0].mxu1 %v24262_v40 }
  0xa3   : > { %19882 = vmatpush3.msra.mxu1 %v24180_v3  ;;  %19836 = vmatprep.mubr.f32.mxu1 %v24233_v28  ;;  %v30091_v28 = vld [vmem:[#allocation20_spill] sm:$0xff] }
  0xa4   : > { %21190 = vmatmul.mubr.f32.gmra.mrb[4].mxu0 %v24270_v43  ;;  %19931 = vmatprep.subr.mxu1 %v24196_v6 }
  0xa5   : > { %21192 = vmatprep.mubr.f32.mxu0 %v24311_v62 }
  0xa6   : > { %19837 = vmatmul.mubr.f32.gmra.mrb[2].mxu1 %v24236_v29  ;;  %v30094_v29 = vld [vmem:[#allocation32_spill] sm:$0xff] }
  0xa7   : > { %19839 = vmatprep.mubr.f32.mxu1 %v30088_v41  ;;  %v30093_v41 = vld [vmem:[#allocation30_spill] sm:$0xff] }
  0xa8   : > { %21193 = vmatmul.mubr.f32.gmra.mrb[6].mxu0 %v24320_v10 }
  0xa9   : > { %21195 = vmatprep.mubr.f32.mxu0 %v24331_v15 }
  0xaa   : > { %19840 = vmatmul.mubr.f32.gmra.mrb[4].mxu1 %v30089_v50  ;;  %v30096_v50 = vld [vmem:[#allocation41_spill] sm:$0xff] }
  0xab   : > { %19842 = vmatprep.mubr.f32.mxu1 %v30090_v7  ;;  %v30095_v7 = vld [vmem:[#allocation38_spill] sm:$0xff] }
  0xac   : > { %21196 = vmatmul.mubr.f32.gmra.mrb[8].mxu0 %v24350_v35 }
  0xad   : > { %21198 = vmatprep.mubr.f32.mxu0 %v24357_v21 }
  0xae   : > { %19843 = vmatmul.mubr.f32.gmra.mrb[6].mxu1 %v30091_v28  ;;  %v30098_v28 = vld [vmem:[#allocation45_spill] sm:$0xff] }
  0xaf   : > { %19845 = vmatprep.mubr.f32.mxu1 %v30092_v24  ;;  %v30097_v24 = vld [vmem:[#allocation44_spill] sm:$0xff] }
  0xb0   : > { %21199 = vmatmul.mubr.f32.gmra.mrb[10].mxu0 %v24359_v46 }
  0xb1   : > { %21201 = vmatprep.mubr.f32.mxu0 %v24370_v55 }
  0xb2   : > { %19846 = vmatmul.mubr.f32.gmra.mrb[8].mxu1 %v30093_v41  ;;  %v17813_v41 = vld [vmem:[%s24204_s21 + $0x1a] sm:$0xff] }
  0xb3   : > { %19848 = vmatprep.mubr.f32.mxu1 %v30094_v29  ;;  %v30099_v29 = vld [vmem:[#allocation53_spill] sm:$0xff] }
  0xb4   : > { %21202 = vmatmul.mubr.f32.gmra.mrb[12].mxu0 %v24397_v16  ;;  %v30161_v16 = vld [vmem:[#allocation19_spill] sm:$0xff] }
  0xb5   : > { %21204 = vmatprep.mubr.f32.mxu0 %v24411_v48 }
  0xb6   : > { %19849 = vmatmul.mubr.f32.gmra.mrb[10].mxu1 %v30095_v7  ;;  %v30100_v7 = vld [vmem:[#allocation54_spill] sm:$0xff] }
  0xb7   : > { %19851 = vmatprep.mubr.f32.mxu1 %v30096_v50  ;;  %v9848_v50 = vsel %vm238_vm0, %v17813_v41, 0  ;;  %v17817_v41 = vld [vmem:[%s24204_s21 + $0x4a] sm:$0xff] }
  0xb8   : > { %21205 = vmatmul.mubr.f32.gmra.mrb[14].mxu0 %v24436_v0  ;;  %v17824_v0 = vld [vmem:[%s24204_s21 + $0x9a] sm:$0xff] }
  0xb9   : > { %21207 = vmatprep.mubr.f32.mxu0 %v24438_v23  ;;  %v30119_v23 = vld [vmem:[#allocation95_spill] sm:$0xff] }
  0xba   : > { %19852 = vmatmul.mubr.f32.gmra.mrb[12].mxu1 %v30097_v24  ;;  %v17814_v24 = vld [vmem:[%s24204_s21 + $0x22] sm:$0xff] }
  0xbb   : > { %19854 = vmatprep.mubr.f32.mxu1 %v30098_v28  ;;  %v17815_v28 = vld [vmem:[%s24204_s21 + $0x32] sm:$0xff]  ;;  %v9851_v12 = vsel %vm238_vm0, %v17814_v24, 0  ;;  %v9857_v24 = vsel %vm238_vm0, %v17816_v1, 0 }
  0xbc   : > { %21208 = vmatmul.mubr.f32.gmra.mrb[16].mxu0 %v24461_v57  ;;  %v24879_v2 = vand.u32 4294901760, %v9851_v12  ;;  %v17823_v57 = vld [vmem:[%s24204_s21 + $0x92] sm:$0xff] }
  0xbd   : > { %21210 = vmatprep.mubr.f32.mxu0 %v24470_v49  ;;  %v17821_v49 = vld [vmem:[%s24204_s21 + $0x7a] sm:$0xff] }
  0xbe   : > { %19855 = vmatmul.mubr.f32.gmra.mrb[14].mxu1 %v30099_v29  ;;  %v24870_v29 = vand.u32 4294901760, %v9848_v50  ;;  %v9872_v1 = vsel %vm238_vm0, %v17821_v49, 0 }
  0xbf   : > { %19857 = vmatprep.mubr.f32.mxu1 %v30100_v7  ;;  %v9854_v7 = vsel %vm238_vm0, %v17815_v28, 0  ;;  %v9860_v28 = vsel %vm238_vm0, %v17817_v41, 0 }
  0xc0   : > { %21211 = vmatmul.mubr.f32.gmra.mrb[18].mxu0 %v24493_v54  ;;  %v24885_v39 = vand.u32 4294901760, %v9854_v7  ;;  %v24904_v41 = vand.u32 4294901760, %v9860_v28  ;;  %v30113_v54 = vld [vmem:[#allocation87_spill] sm:$0xff] }
  0xc1   : > { %21213 = vmatprep.mubr.f32.mxu0 %v24502_v52 }
  0xc2   : > { %19858 = vmatmul.mubr.f32.gmra.mrb[16].mxu1 %v30101_v37  ;;  %v30104_v37 = vld [vmem:[#allocation71_spill] sm:$0xff]  ;;  %30111 = vst [vmem:[#allocation130_spill] sm:$0xff] %v24904_v41 }
  0xc3   : > { %19860 = vmatprep.mubr.f32.mxu1 %v30102_v51  ;;  %v24883_v51 = vsub.f32 %v9848_v50, %v24870_v29  ;;  %v24896_v50 = vand.u32 4294901760, %v9857_v24 }
  0xc4   : > { %21214 = vmatmul.mubr.f32.gmra.mrb[20].mxu0 %v24525_v36  ;;  %v24894_v36 = vsub.f32 %v9851_v12, %v24879_v2  ;;  %v30112_v12 = vld [vmem:[#allocation84_spill] sm:$0xff] }
  0xc5   : > { %21216 = vmatprep.mubr.f32.mxu0 %v24534_v8  ;;  %30105 = vst [vmem:[#allocation126_spill] sm:$0xff] %v24883_v51  ;;  %v30106_v8 = vld [vmem:[#allocation76_spill] sm:$0xff]  ;;  %30109 = vst [vmem:[#allocation128_spill] sm:$0xff] %v24896_v50 }
  0xc6   : > { %19861 = vmatmul.mubr.f32.gmra.mrb[18].mxu1 %v30103_v58  ;;  %v17818_v58 = vld [vmem:[%s24204_s21 + $0x52] sm:$0xff]  ;;  %30108 = vst [vmem:[#allocation127_spill] sm:$0xff] %v24894_v36 }
  0xc7   : > { %19863 = vmatprep.mubr.f32.mxu1 %v30104_v37  ;;  %v30107_v37 = vld [vmem:[#allocation79_spill] sm:$0xff] }
  0xc8   : > { %21217 = vmatmul.mubr.f32.gmra.mrb[22].mxu0 %v24557_v53  ;;  %v17819_v53 = vld [vmem:[%s24204_s21 + $0x62] sm:$0xff] }
  0xc9   : > { %21219 = vmatprep.mubr.f32.mxu0 %v24566_v56  ;;  %v24902_v56 = vsub.f32 %v9854_v7, %v24885_v39  ;;  %v9866_v52 = vsel %vm238_vm0, %v17819_v53, 0  ;;  %v24914_v7 = vsub.f32 %v9857_v24, %v24896_v50  ;;  %v24925_v53 = vsub.f32 %v9860_v28, %v24904_v41 }
  0xca   : > { %19864 = vmatmul.mubr.f32.gmra.mrb[20].mxu1 %v30106_v8  ;;  %v9863_v8 = vsel %vm238_vm0, %v17818_v58, 0  ;;  %v30116_v58 = vand.u32 4294901760, %v24883_v51  ;;  %v24929_v24 = vand.u32 4294901760, %v9866_v52 }
  0xcb   : > { %19866 = vmatprep.mubr.f32.mxu1 %v30107_v37  ;;  %30110 = vst [vmem:[#allocation129_spill] sm:$0xff] %v24902_v56  ;;  %v17820_v37 = vld [vmem:[%s24204_s21 + $0x6a] sm:$0xff]  ;;  %30114 = vst [vmem:[#allocation131_spill] sm:$0xff] %v24914_v7 }
  0xcc   : > { %21220 = vmatmul.mubr.f32.gmra.mrb[24].mxu0 %v24589_v17  ;;  %v24916_v17 = vand.u32 4294901760, %v9863_v8  ;;  %30117 = vst [vmem:[#allocation133_spill] sm:$0xff] %v24925_v53  ;;  %30118 = vst [vmem:[#allocation134_spill] sm:$0xff] %v24929_v24 }
  0xcd   : > { %21222 = vmatprep.mubr.f32.mxu0 %v24598_v38 }
  0xce   : > { %19867 = vmatmul.mubr.f32.gmra.mrb[22].mxu1 %v30112_v12  ;;  %30115 = vst [vmem:[#allocation132_spill] sm:$0xff] %v24916_v17  ;;  %v10012_v12 = vsub.f32 %v24883_v51, %v30116_v58  ;;  %v24938_v28 = vsub.f32 %v9863_v8, %v24916_v17  ;;  %v24952_v8 = vsub.f32 %v9866_v52, %v24929_v24  ;;  %v24954_v58 = vand.u32 4294901760, %v9872_v1 }
  0xcf   : > { %19869 = vmatprep.mubr.f32.mxu1 %v30113_v54  ;;  %v9869_v54 = vsel %vm238_vm0, %v17820_v37, 0 }
  0xd0   : > { %21223 = vmatmul.mubr.f32.gmra.mrb[26].mxu0 %v24621_v25  ;;  %v17822_v25 = vld [vmem:[%s24204_s21 + $0x82] sm:$0xff]  ;;  %30120 = vst [vmem:[#allocation135_spill] sm:$0xff] %v24938_v28  ;;  %v24940_v38 = vand.u32 4294901760, %v9869_v54  ;;  %v10013_v37 = vand.u32 4294901760, %v10012_v12  ;;  %30124 = vst [vmem:[#allocation137_spill] sm:$0xff] %v24952_v8  ;;  %v9878_v12 = vsel %vm238_vm0, %v17823_v57, 0 }
  0xd1   : > { %21225 = vmatprep.mubr.f32.mxu0 %v24630_v13  ;;  %v30123_v13 = vand.u32 4294901760, %v24902_v56  ;;  %30125 = vst [vmem:[#allocation138_spill] sm:$0xff] %v24954_v58 }
  0xd2   : > { %19870 = vmatmul.mubr.f32.gmra.mrb[24].mxu1 %v24587_v26  ;;  %30121 = vst [vmem:[#allocation136_spill] sm:$0xff] %v24940_v38  ;;  %v30122_v26 = vand.u32 4294901760, %v24894_v36 }
  0xd3   : > { %19872 = vmatprep.mubr.f32.mxu1 %v30119_v23  ;;  %v10032_v51 = vsub.f32 %v24902_v56, %v30123_v13  ;;  %v30126_v13 = vand.u32 4294901760, %v24914_v7  ;;  %v24966_v23 = vsub.f32 %v9869_v54, %v24940_v38  ;;  %v24980_v54 = vsub.f32 %v9872_v1, %v24954_v58 }
  0xd4   : > { %21226 = vmatmul.mubr.f32.gmra.mrb[28].mxu0 %v24652_v47  ;;  %v10022_v49 = vsub.f32 %v24894_v36, %v30122_v26  ;;  %v9875_v47 = vsel %vm238_vm0, %v17822_v25, 0  ;;  %v30130_v36 = vand.u32 4294901760, %v24925_v53 }
  0xd5   : > { %21228 = vmatprep.mubr.f32.mxu0 %v24661_v42  ;;  %v10042_v26 = vsub.f32 %v24914_v7, %v30126_v13  ;;  %30127 = vst [vmem:[#allocation139_spill] sm:$0xff] %v24966_v23  ;;  %v17825_v42 = vld [vmem:[%s24204_s21 + $0xaa] sm:$0xff]  ;;  %v24970_v25 = vand.u32 4294901760, %v9875_v47  ;;  %v10033_v56 = vand.u32 4294901760, %v10032_v51  ;;  %30131 = vst [vmem:[#allocation142_spill] sm:$0xff] %v24980_v54  ;;  %v17826_v7 = vld [vmem:[%s24204_s21 + $0xb2] sm:$0xff] }
  0xd6   : > { %19873 = vmatmul.mubr.f32.gmra.mrb[26].mxu1 %v24619_v5  ;;  %v10023_v57 = vand.u32 4294901760, %v10022_v49  ;;  %v24972_v5 = vand.u32 4294901760, %v9878_v12  ;;  %v10052_v13 = vsub.f32 %v24925_v53, %v30130_v36  ;;  %v9884_v49 = vsel %vm238_vm0, %v17825_v42, 0 }
  0xd7   : > { %19875 = vmatprep.mubr.f32.mxu1 %v24628_v14  ;;  %30128 = vst [vmem:[#allocation140_spill] sm:$0xff] %v24970_v25  ;;  %v9881_v14 = vsel %vm238_vm0, %v17824_v0, 0  ;;  %v10043_v0 = vand.u32 4294901760, %v10042_v26  ;;  %v30132_v51 = vand.u32 4294901760, %v24938_v28  ;;  %v24994_v1 = vsub.f32 %v9875_v47, %v24970_v25 }
  0xd8   : > { %21229 = vmatmul.mubr.f32.gmra.mrb[30].mxu0 %v24681_v9  ;;  %30129 = vst [vmem:[#allocation141_spill] sm:$0xff] %v24972_v5  ;;  %v17827_v9 = vld [vmem:[%s24204_s21 + $0xc2] sm:$0xff]  ;;  %v24991_v52 = vand.u32 4294901760, %v9881_v14  ;;  %v9887_v42 = vsel %vm238_vm0, %v17826_v7, 0  ;;  %v30136_v36 = vand.u32 4294901760, %v24952_v8  ;;  %v25006_v47 = vand.u32 4294901760, %v9884_v49 }
  0xd9   : > { %21233 = vmatprep.mubr.f32.mxu0 %v10013_v37  ;;  %v10062_v37 = vsub.f32 %v24938_v28, %v30132_v51  ;;  %30134 = vst [vmem:[#allocation144_spill] sm:$0xff] %v24994_v1  ;;  %v9890_v26 = vsel %vm238_vm0, %v17827_v9, 0  ;;  %v10053_v51 = vand.u32 4294901760, %v10052_v13  ;;  %v17828_v28 = vld [vmem:[%s24204_s21 + $0xca] sm:$0xff]  ;;  %v30138_v7 = vand.u32 4294901760, %v24239_v30  ;;  %v17829_v13 = vld [vmem:[%s24204_s21 + $0xda] sm:$0xff] }
  0xda   : > { %19876 = vmatmul.mubr.f32.gmra.mrb[28].mxu1 %v24650_v60  ;;  %30133 = vst [vmem:[#allocation143_spill] sm:$0xff] %v24991_v52  ;;  %v24997_v60 = vsub.f32 %v9878_v12, %v24972_v5  ;;  %30137 = vst [vmem:[#allocation146_spill] sm:$0xff] %v25006_v47  ;;  %v25014_v9 = vsub.f32 %v9881_v14, %v24991_v52  ;;  %v25018_v12 = vand.u32 4294901760, %v9890_v26  ;;  %v30146_v30 = vld [vmem:[#allocation12_spill] sm:$0xff] }
  0xdb   : > { %19878 = vmatprep.mubr.f32.mxu1 %v24659_v22  ;;  %v10072_v22 = vsub.f32 %v24952_v8, %v30136_v36  ;;  %v30142_v36 = vand.u32 4294901760, %v24966_v23  ;;  %v25031_v53 = vsub.f32 %v9884_v49, %v25006_v47 }
  0xdc   : > { %21234 = vmatmul.mubr.f32.vlgmr.msra.gmra.mrb[0].mxu0 %v10023_v57  ;;  %30135 = vst [vmem:[#allocation145_spill] sm:$0xff] %v24997_v60  ;;  %30139 = vst [vmem:[#allocation147_spill] sm:$0xff] %v25014_v9 }
  0xdd   : > { %21236 = vmatprep.mubr.f32.mxu0 %v10033_v56  ;;  %21282 = vmatpush3.msra.mxu0 %v24818_v59  ;;  %v10063_v56 = vand.u32 4294901760, %v10062_v37  ;;  %v25016_v59 = vand.u32 4294901760, %v9887_v42  ;;  %30141 = vst [vmem:[#allocation149_spill] sm:$0xff] %v25018_v12  ;;  %v10082_v57 = vsub.f32 %v24966_v23, %v30142_v36  ;;  %v9893_v37 = vsel %vm238_vm0, %v17828_v28, 0  ;;  %30144 = vst [vmem:[#allocation150_spill] sm:$0xff] %v25031_v53 }
  0xde   : > { %19879 = vmatmul.mubr.f32.gmra.mrb[30].mxu1 %v24679_v61  ;;  %21331 = vmatprep.subr.mxu0 %v24799_v4  ;;  %v10073_v14 = vand.u32 4294901760, %v10072_v22  ;;  %v9896_v36 = vsel %vm238_vm0, %v17829_v13, 0  ;;  %v17830_v61 = vld [vmem:[%s24204_s21 + $0xe2] sm:$0xff]  ;;  %v25046_v49 = vand.u32 4294901760, %v9893_v37  ;;  %v30150_v13 = vand.u32 4294901760, %v24994_v1 }
  0xdf   : > { %19883 = vmatprep.mubr.f32.mxu1 %v30138_v7  ;;  %30140 = vst [vmem:[#allocation148_spill] sm:$0xff] %v25016_v59  ;;  %v30143_v7 = vand.u32 4294901760, %v24980_v54  ;;  %v25041_v22 = vsub.f32 %v9887_v42, %v25016_v59  ;;  %v25057_v28 = vand.u32 4294901760, %v9896_v36 }
  0xe0   : > { %21237 = vmatmul.mubr.f32.gmra.mrb[2].mxu0 %v10043_v0  ;;  %v30145_v0 = vand.u32 4294901760, %v24262_v40  ;;  %30149 = vst [vmem:[#allocation152_spill] sm:$0xff] %v25046_v49  ;;  %v17831_v40 = vld [vmem:[%s24204_s21 + $0xf2] sm:$0xff] }
  0xe1   : > { %21239 = vmatprep.mubr.f32.mxu0 %v10053_v51  ;;  %v10092_v8 = vsub.f32 %v24980_v54, %v30143_v7  ;;  %30147 = vst [vmem:[#allocation12_spill] sm:$0xff] %v25041_v22  ;;  %v25044_v51 = vsub.f32 %v9890_v26, %v25018_v12  ;;  %v10083_v7 = vand.u32 4294901760, %v10082_v57  ;;  %30152 = vst [vmem:[#allocation153_spill] sm:$0xff] %v25057_v28  ;;  %v30153_v57 = vld [vmem:[#allocation13_spill] sm:$0xff]  ;;  %v9902_v54 = vsel %vm238_vm0, %v17831_v40, 0 }
  0xe2   : > { %19884 = vmatmul.mubr.f32.vlgmr.msra.gmra.mrb[0].mxu1 %v30145_v0 }
  0xe3   : > { %19932 = vmatpush3.msra.mxu1 %v24196_v6  ;;  %19886 = vmatprep.mubr.f32.mxu1 %v30146_v30  ;;  %30148 = vst [vmem:[#allocation151_spill] sm:$0xff] %v25044_v51  ;;  %v10102_v6 = vsub.f32 %v24994_v1, %v30150_v13  ;;  %v30151_v30 = vand.u32 4294901760, %v24997_v60  ;;  %v10093_v42 = vand.u32 4294901760, %v10092_v8  ;;  %v17832_v13 = vld [vmem:[%s24204_s21 + $0xfa] sm:$0xff]  ;;  %v25081_v8 = vand.u32 4294901760, %v9902_v54 }
  0xe4   : > { %21240 = vmatmul.mubr.f32.gmra.mrb[4].mxu0 %v10063_v56  ;;  %19981 = vmatprep.subr.mxu1 %v24180_v3  ;;  %v9899_v56 = vsel %vm238_vm0, %v17830_v61, 0  ;;  %v30154_v1 = vld [vmem:[#allocation18_spill] sm:$0xff]  ;;  %v17833_v61 = vld [vmem:[%s24204_s21 + $0x10a] sm:$0xff]  ;;  %v9905_v26 = vsel %vm238_vm0, %v17832_v13, 0 }
  0xe5   : > { %v10112_v0 = vsub.f32 %v24997_v60, %v30151_v30  ;;  %21242 = vmatprep.mubr.f32.mxu0 %v10073_v14  ;;  %v30155_v30 = vand.u32 4294901760, %v25014_v9  ;;  %v25070_v60 = vsub.f32 %v9893_v37, %v25046_v49  ;;  %v25073_v23 = vand.u32 4294901760, %v9899_v56  ;;  %30160 = vst [vmem:[#allocation155_spill] sm:$0xff] %v25081_v8  ;;  %v17834_v37 = vld [vmem:[%s24204_s21 + $0x112] sm:$0xff]  ;;  %v17836_v13 = vld [vmem:[%s24204_s21 + $0x12a] sm:$0xff] }
  0xe6   : > { %19887 = vmatmul.mubr.f32.gmra.mrb[2].mxu1 %v30153_v57  ;;  %v10103_v57 = vand.u32 4294901760, %v10102_v6  ;;  %v30162_v6 = vld [vmem:[#allocation21_spill] sm:$0xff] }
  0xe7   : > { %19889 = vmatprep.mubr.f32.mxu1 %v30154_v1  ;;  %v10122_v14 = vsub.f32 %v25014_v9, %v30155_v30  ;;  %30156 = vst [vmem:[#allocation13_spill] sm:$0xff] %v25070_v60  ;;  %v10113_v40 = vand.u32 4294901760, %v10112_v0  ;;  %30157 = vst [vmem:[#allocation18_spill] sm:$0xff] %v25073_v23  ;;  %v30158_v1 = vand.u32 4294901760, %v25031_v53  ;;  %v25079_v30 = vsub.f32 %v9896_v36, %v25057_v28  ;;  %v17835_v9 = vld [vmem:[%s24204_s21 + $0x122] sm:$0xff] }
  0xe8   : > { %21243 = vmatmul.mubr.f32.gmra.mrb[6].mxu0 %v10083_v7  ;;  %v9908_v7 = vsel %vm238_vm0, %v17833_v61, 0  ;;  %v25099_v61 = vand.u32 4294901760, %v9905_v26 }
  0xe9   : > { %21245 = vmatprep.mubr.f32.mxu0 %v10093_v42  ;;  %v10132_v48 = vsub.f32 %v25031_v53, %v30158_v1  ;;  %30159 = vst [vmem:[#allocation154_spill] sm:$0xff] %v25079_v30  ;;  %v10123_v0 = vand.u32 4294901760, %v10122_v14  ;;  %v30163_v42 = vand.u32 4294901760, %v25041_v22  ;;  %v30164_v1 = vand.u32 4294901760, %v25044_v51 }
  0xea   : > { %19890 = vmatmul.mubr.f32.gmra.mrb[4].mxu1 %v30161_v16  ;;  %v25097_v16 = vsub.f32 %v9899_v56, %v25073_v23  ;;  %30166 = vst [vmem:[#allocation21_spill] sm:$0xff] %v25099_v61  ;;  %v9914_v14 = vsel %vm238_vm0, %v17835_v9, 0  ;;  %v17837_v56 = vld [vmem:[%s24204_s21 + $0x13a] sm:$0xff] }
  0xeb   : > { %19892 = vmatprep.mubr.f32.mxu1 %v30162_v6  ;;  %v10142_v36 = vsub.f32 %v25041_v22, %v30163_v42  ;;  %v10152_v53 = vsub.f32 %v25044_v51, %v30164_v1  ;;  %v9911_v6 = vsel %vm238_vm0, %v17834_v37, 0  ;;  %v10133_v55 = vand.u32 4294901760, %v10132_v48  ;;  %v30170_v51 = vld [vmem:[#allocation31_spill] sm:$0xff] }
  0xec   : > { %21246 = vmatmul.mubr.f32.gmra.mrb[8].mxu0 %v10103_v57  ;;  %30165 = vst [vmem:[#allocation19_spill] sm:$0xff] %v25097_v16  ;;  %v29168_v42 = vand.u32 4294901760, %v25079_v30  ;;  %v25105_v22 = vsub.f32 %v9902_v54, %v25081_v8  ;;  %v25107_v1 = vand.u32 4294901760, %v9908_v7  ;;  %v30169_v57 = vld [vmem:[#allocation25_spill] sm:$0xff]  ;;  %v25113_v46 = vand.u32 4294901760, %v9911_v6 }
  0xed   : > { %21248 = vmatprep.mubr.f32.mxu0 %v10113_v40  ;;  %v10143_v23 = vand.u32 4294901760, %v10142_v36  ;;  %v10153_v37 = vand.u32 4294901760, %v10152_v53  ;;  %v25115_v9 = vand.u32 4294901760, %v9914_v14  ;;  %v30173_v48 = vand.u32 4294901760, %v25070_v60  ;;  %v17838_v40 = vld [vmem:[%s24204_s21 + $0x142] sm:$0xff] }
  0xee   : > { %30167 = vst [vmem:[#allocation156_spill] sm:$0xff] %v25105_v22  ;;  %30168 = vst [vmem:[#allocation157_spill] sm:$0xff] %v25107_v1  ;;  %19893 = vmatmul.mubr.f32.gmra.mrb[6].mxu1 %v30169_v57  ;;  %v25122_v57 = vsub.f32 %v9905_v26, %v25099_v61  ;;  %v10172_v53 = vsub.f32 %v25079_v30, %v29168_v42  ;;  %v9920_v8 = vsel %vm238_vm0, %v17837_v56, 0  ;;  %v17839_v42 = vld [vmem:[%s24204_s21 + $0x152] sm:$0xff]  ;;  %v30181_v36 = vand.u32 4294901760, %v25097_v16 }
  0xef   : > { %19895 = vmatprep.mubr.f32.mxu1 %v30170_v51  ;;  %30171 = vst [vmem:[#allocation25_spill] sm:$0xff] %v25113_v46  ;;  %30172 = vst [vmem:[#allocation31_spill] sm:$0xff] %v25115_v9  ;;  %v10162_v54 = vsub.f32 %v25070_v60, %v30173_v48  ;;  %v9917_v51 = vsel %vm238_vm0, %v17836_v13, 0  ;;  %v30176_v48 = vld [vmem:[#allocation34_spill] sm:$0xff]  ;;  %v30177_v60 = vld [vmem:[#allocation37_spill] sm:$0xff]  ;;  %v25137_v26 = vsub.f32 %v9911_v6, %v25113_v46  ;;  %v30183_v30 = vand.u32 4294901760, %v25105_v22 }
  0xf0   : > { %21249 = vmatmul.mubr.f32.gmra.mrb[10].mxu0 %v10123_v0  ;;  %30174 = vst [vmem:[#allocation158_spill] sm:$0xff] %v25122_v57  ;;  %v25130_v0 = vsub.f32 %v9908_v7, %v25107_v1  ;;  %v25142_v13 = vand.u32 4294901760, %v9917_v51  ;;  %v10182_v56 = vsub.f32 %v25097_v16, %v30181_v36  ;;  %v10173_v6 = vand.u32 4294901760, %v10172_v53  ;;  %v17840_v1 = vld [vmem:[%s24204_s21 + $0x15a] sm:$0xff]  ;;  %v30185_v36 = vld [vmem:[#allocation47_spill] sm:$0xff] }
  0xf1   : > { %21251 = vmatprep.mubr.f32.mxu0 %v10133_v55  ;;  %30178 = vst [vmem:[#allocation34_spill] sm:$0xff] %v25137_v26  ;;  %v25140_v55 = vsub.f32 %v9914_v14, %v25115_v9  ;;  %v10163_v7 = vand.u32 4294901760, %v10162_v54  ;;  %v10192_v14 = vsub.f32 %v25105_v22, %v30183_v30  ;;  %v30184_v54 = vld [vmem:[#allocation43_spill] sm:$0xff]  ;;  %v9926_v46 = vsel %vm238_vm0, %v17839_v42, 0 }
  0xf2   : > { %30175 = vst [vmem:[#allocation159_spill] sm:$0xff] %v25130_v0  ;;  %19896 = vmatmul.mubr.f32.gmra.mrb[8].mxu1 %v30176_v48  ;;  %30180 = vst [vmem:[#allocation160_spill] sm:$0xff] %v25142_v13  ;;  %v25163_v53 = vsub.f32 %v9917_v51, %v25142_v13  ;;  %v17841_v30 = vld [vmem:[%s24204_s21 + $0x16a] sm:$0xff]  ;;  %v10183_v9 = vand.u32 4294901760, %v10182_v56  ;;  %v25177_v22 = vand.u32 4294901760, %v9926_v46 }
  0xf3   : > { %19898 = vmatprep.mubr.f32.mxu1 %v30177_v60  ;;  %30179 = vst [vmem:[#allocation37_spill] sm:$0xff] %v25140_v55  ;;  %v25149_v60 = vand.u32 4294901760, %v9920_v8  ;;  %v10193_v48 = vand.u32 4294901760, %v10192_v14  ;;  %v30192_v56 = vld [vmem:[#allocation51_spill] sm:$0xff]  ;;  %v9932_v16 = vsel %vm238_vm0, %v17841_v30, 0  ;;  %v30195_v14 = vand.u32 4294901760, %v25140_v55 }
  0xf4   : > { %21252 = vmatmul.mubr.f32.gmra.mrb[12].mxu0 %v10143_v23  ;;  %v9923_v23 = vsel %vm238_vm0, %v17838_v40, 0  ;;  %30186 = vst [vmem:[#allocation43_spill] sm:$0xff] %v25163_v53  ;;  %v30187_v40 = vand.u32 4294901760, %v25122_v57  ;;  %30191 = vst [vmem:[#allocation163_spill] sm:$0xff] %v25177_v22 }
  0xf5   : > { %30182 = vst [vmem:[#allocation161_spill] sm:$0xff] %v25149_v60  ;;  %21254 = vmatprep.mubr.f32.mxu0 %v10153_v37  ;;  %v25170_v42 = vsub.f32 %v9920_v8, %v25149_v60  ;;  %v30190_v37 = vand.u32 4294901760, %v25130_v0  ;;  %v30194_v8 = vand.u32 4294901760, %v25137_v26  ;;  %v17843_v60 = vld [vmem:[%s24204_s21 + $0x182] sm:$0xff] }
  0xf6   : > { %19899 = vmatmul.mubr.f32.gmra.mrb[10].mxu1 %v30184_v54  ;;  %v10202_v54 = vsub.f32 %v25122_v57, %v30187_v40  ;;  %v17842_v40 = vld [vmem:[%s24204_s21 + $0x172] sm:$0xff] }
  0xf7   : > { %19901 = vmatprep.mubr.f32.mxu1 %v30185_v36  ;;  %30188 = vst [vmem:[#allocation47_spill] sm:$0xff] %v25170_v42  ;;  %v25172_v36 = vand.u32 4294901760, %v9923_v23  ;;  %v10212_v51 = vsub.f32 %v25130_v0, %v30190_v37  ;;  %v30193_v57 = vld [vmem:[#allocation52_spill] sm:$0xff]  ;;  %v10232_v37 = vsub.f32 %v25140_v55, %v30195_v14  ;;  %v9935_v14 = vsel %vm238_vm0, %v17842_v40, 0  ;;  %v30199_v0 = vld [vmem:[#allocation59_spill] sm:$0xff] }
  0xf8   : > { %21255 = vmatmul.mubr.f32.gmra.mrb[14].mxu0 %v10163_v7  ;;  %v9929_v7 = vsel %vm238_vm0, %v17840_v1, 0  ;;  %v10203_v1 = vand.u32 4294901760, %v10202_v54  ;;  %v17844_v54 = vld [vmem:[%s24204_s21 + $0x18a] sm:$0xff] }
  0xf9   : > { %30189 = vst [vmem:[#allocation162_spill] sm:$0xff] %v25172_v36  ;;  %21257 = vmatprep.mubr.f32.mxu0 %v10173_v6  ;;  %v10222_v6 = vsub.f32 %v25137_v26, %v30194_v8  ;;  %v25194_v30 = vsub.f32 %v9923_v23, %v25172_v36  ;;  %v10213_v13 = vand.u32 4294901760, %v10212_v51  ;;  %v25199_v8 = vsub.f32 %v9926_v46, %v25177_v22 }
  0xfa   : > { %19902 = vmatmul.mubr.f32.gmra.mrb[12].mxu1 %v30192_v56  ;;  %v25201_v26 = vand.u32 4294901760, %v9932_v16  ;;  %v30200_v56 = vld [vmem:[#allocation62_spill] sm:$0xff]  ;;  %v10233_v55 = vand.u32 4294901760, %v10232_v37  ;;  %v30201_v36 = vand.u32 4294901760, %v25163_v53  ;;  %v30202_v46 = vand.u32 4294901760, %v25170_v42 }
  0xfb   : > { %19904 = vmatprep.mubr.f32.mxu1 %v30193_v57  ;;  %30196 = vst [vmem:[#allocation51_spill] sm:$0xff] %v25194_v30  ;;  %v25196_v57 = vand.u32 4294901760, %v9929_v7  ;;  %v10223_v23 = vand.u32 4294901760, %v10222_v6 }
  0xfc   : > { %21258 = vmatmul.mubr.f32.gmra.mrb[16].mxu0 %v10183_v9  ;;  %30198 = vst [vmem:[#allocation164_spill] sm:$0xff] %v25201_v26  ;;  %v9938_v9 = vsel %vm238_vm0, %v17843_v60, 0  ;;  %v10252_v51 = vsub.f32 %v25170_v42, %v30202_v46  ;;  %v25218_v60 = vand.u32 4294901760, %v9935_v14  ;;  %v25222_v37 = vsub.f32 %v9932_v16, %v25201_v26  ;;  %v30207_v46 = vld [vmem:[#allocation70_spill] sm:$0xff] }
  0xfd   : > { %30197 = vst [vmem:[#allocation52_spill] sm:$0xff] %v25196_v57  ;;  %21260 = vmatprep.mubr.f32.mxu0 %v10193_v48  ;;  %v10242_v48 = vsub.f32 %v25163_v53, %v30201_v36  ;;  %v9941_v36 = vsel %vm238_vm0, %v17844_v54, 0  ;;  %v30210_v54 = vand.u32 4294901760, %v25199_v8 }
  0xfe   : > { %19905 = vmatmul.mubr.f32.gmra.mrb[14].mxu1 %v30199_v0  ;;  %v25216_v0 = vsub.f32 %v9929_v7, %v25196_v57  ;;  %30203 = vst [vmem:[#allocation59_spill] sm:$0xff] %v25218_v60  ;;  %30204 = vst [vmem:[#allocation62_spill] sm:$0xff] %v25222_v37  ;;  %v30208_v7 = vand.u32 4294901760, %v25194_v30  ;;  %v25234_v6 = vsub.f32 %v9935_v14, %v25218_v60  ;;  %v25236_v16 = vand.u32 4294901760, %v9941_v36 }
  0xff   : > { %19907 = vmatprep.mubr.f32.mxu1 %v30200_v56  ;;  %v25224_v56 = vand.u32 4294901760, %v9938_v9  ;;  %v10243_v40 = vand.u32 4294901760, %v10242_v48  ;;  %v10253_v53 = vand.u32 4294901760, %v10252_v51  ;;  %v29202_v48 = vand.u32 4294901760, %v25222_v37 }
 0x100   : > { %21261 = vmatmul.mubr.f32.gmra.mrb[18].mxu0 %v10203_v1  ;;  %v30206_v1 = vld [vmem:[#allocation67_spill] sm:$0xff]  ;;  %v10262_v42 = vsub.f32 %v25194_v30, %v30208_v7  ;;  %v30212_v7 = vld [vmem:[#allocation78_spill] sm:$0xff]  ;;  %v29207_v51 = vand.u32 4294901760, %v25234_v6  ;;  %v25252_v30 = vsub.f32 %v9941_v36, %v25236_v16 }
 0x101   : > { %21263 = vmatprep.mubr.f32.mxu0 %v10213_v13  ;;  %30205 = vst [vmem:[#allocation165_spill] sm:$0xff] %v25224_v56  ;;  %v29201_v13 = vand.u32 4294901760, %v25216_v0  ;;  %30209 = vst [vmem:[#allocation67_spill] sm:$0xff] %v25236_v16 }
 0x102   : > { %19908 = vmatmul.mubr.f32.gmra.mrb[16].mxu1 %v30206_v1  ;;  %v10272_v1 = vsub.f32 %v25199_v8, %v30210_v54  ;;  %v10263_v14 = vand.u32 4294901760, %v10262_v42  ;;  %v30214_v42 = vld [vmem:[#allocation86_spill] sm:$0xff]  ;;  %v29205_v36 = vand.u32 4294901760, %v25252_v30 }
 0x103   : > { %19910 = vmatprep.mubr.f32.mxu1 %v30207_v46  ;;  %v30211_v46 = vld [vmem:[#allocation75_spill] sm:$0xff] }
 0x104   : > { %21264 = vmatmul.mubr.f32.gmra.mrb[20].mxu0 %v10223_v23  ;;  %v25243_v23 = vsub.f32 %v9938_v9, %v25224_v56  ;;  %v10273_v54 = vand.u32 4294901760, %v10272_v1  ;;  %v10292_v9 = vsub.f32 %v25222_v37, %v29202_v48  ;;  %v30215_v48 = vld [vmem:[#allocation91_spill] sm:$0xff]  ;;  %v30216_v37 = vld [vmem:[#allocation94_spill] sm:$0xff] }
 0x105   : > { %21266 = vmatprep.mubr.f32.mxu0 %v10233_v55  ;;  %v10282_v55 = vsub.f32 %v25216_v0, %v29201_v13  ;;  %v10302_v13 = vsub.f32 %v25234_v6, %v29207_v51  ;;  %v30239_v51 = vld [vmem:[#allocation77_spill] sm:$0xff] }
 0x106   : > { %19911 = vmatmul.mubr.f32.gmra.mrb[18].mxu1 %v30211_v46  ;;  %v29206_v46 = vand.u32 4294901760, %v25243_v23 }
 0x107   : > { %19913 = vmatprep.mubr.f32.mxu1 %v30212_v7  ;;  %v30213_v7 = vld [vmem:[#allocation83_spill] sm:$0xff] }
 0x108   : > { %21267 = vmatmul.mubr.f32.gmra.mrb[22].mxu0 %v10243_v40  ;;  %v10283_v40 = vand.u32 4294901760, %v10282_v55  ;;  %v10312_v1 = vsub.f32 %v25243_v23, %v29206_v46  ;;  %v30238_v46 = vld [vmem:[#allocation162_spill] sm:$0xff] }
 0x109   : > { %21269 = vmatprep.mubr.f32.mxu0 %v10253_v53  ;;  %v10293_v53 = vand.u32 4294901760, %v10292_v9 }
 0x10a   : > { %19914 = vmatmul.mubr.f32.gmra.mrb[20].mxu1 %v30213_v7  ;;  %v10303_v7 = vand.u32 4294901760, %v10302_v13  ;;  %v10313_v55 = vand.u32 4294901760, %v10312_v1  ;;  %v30226_v13 = vld [vmem:[#allocation49_spill] sm:$0xff]  ;;  %v30229_v1 = vld [vmem:[#allocation56_spill] sm:$0xff] }
 0x10b   : > { %19916 = vmatprep.mubr.f32.mxu1 %v30214_v42  ;;  %v30217_v42 = vld [vmem:[#allocation99_spill] sm:$0xff] }
 0x10c   : > { %21270 = vmatmul.mubr.f32.gmra.mrb[24].mxu0 %v10263_v14  ;;  %v10322_v14 = vsub.f32 %v25252_v30, %v29205_v36  ;;  %v30237_v36 = vld [vmem:[#allocation72_spill] sm:$0xff] }
 0x10d   : > { %21272 = vmatprep.mubr.f32.mxu0 %v10273_v54  ;;  %v30218_v54 = vld [vmem:[#allocation102_spill] sm:$0xff] }
 0x10e   : > { %19917 = vmatmul.mubr.f32.gmra.mrb[22].mxu1 %v30215_v48  ;;  %v10323_v9 = vand.u32 4294901760, %v10322_v14  ;;  %v30219_v48 = vld [vmem:[#allocation109_spill] sm:$0xff]  ;;  %v30231_v14 = vld [vmem:[#allocation31_spill] sm:$0xff] }
 0x10f   : > { %19919 = vmatprep.mubr.f32.mxu1 %v30216_v37  ;;  %v203_v37 = vld [vmem:[%s28966_s1] sm:$0xff] }
 0x110   : > { %21273 = vmatmul.mubr.f32.gmra.mrb[26].mxu0 %v10283_v40  ;;  %v30227_v40 = vld [vmem:[#allocation157_spill] sm:$0xff] }
 0x111   : > { %21275 = vmatprep.mubr.f32.mxu0 %v10293_v53  ;;  %v30228_v53 = vld [vmem:[#allocation55_spill] sm:$0xff] }
 0x112   : > { %19920 = vmatmul.mubr.f32.gmra.mrb[24].mxu1 %v30217_v42  ;;  %v30233_v42 = vld [vmem:[#allocation64_spill] sm:$0xff] }
 0x113   : > { %19922 = vmatprep.mubr.f32.mxu1 %v30218_v54  ;;  %v30234_v54 = vld [vmem:[#allocation160_spill] sm:$0xff] }
 0x114   : > { %21276 = vmatmul.mubr.f32.gmra.mrb[28].mxu0 %v10303_v7  ;;  %v30230_v7 = vld [vmem:[#allocation25_spill] sm:$0xff] }
 0x115   : > { %21278 = vmatprep.mubr.f32.mxu0 %v10313_v55  ;;  %v30232_v55 = vld [vmem:[#allocation61_spill] sm:$0xff] }
 0x116   : > { %19923 = vmatmul.mubr.f32.gmra.mrb[26].mxu1 %v24647_v45  ;;  %v25289_v45 = vand.u32 4294901760, %v203_v37 }
 0x117   : > { %19925 = vmatprep.mubr.f32.mxu1 %v30219_v48  ;;  %v30236_v48 = vld [vmem:[#allocation69_spill] sm:$0xff] }
 0x118   : > { %21279 = vmatmul.mubr.f32.gmra.mrb[30].mxu0 %v10323_v9  ;;  %30220 = vst [vmem:[#allocation70_spill] sm:$0xff] %v25289_v45  ;;  %v30235_v9 = vld [vmem:[#allocation161_spill] sm:$0xff] }
 0x119   : > { %21283 = vmatprep.mubr.f32.mxu0 %v24870_v29 }
 0x11a   : > { %19926 = vmatmul.mubr.f32.gmra.mrb[28].mxu1 %v24676_v44  ;;  %v30224_v44 = vld [vmem:[#allocation155_spill] sm:$0xff] }
 0x11b   : > { %19928 = vmatprep.mubr.f32.mxu1 %v24685_v11  ;;  %v30223_v11 = vld [vmem:[#allocation18_spill] sm:$0xff] }
 0x11c   : > { %21284 = vmatmul.mubr.f32.vlgmr.msra.gmra.mrb[0].mxu0 %v24879_v2 }
 0x11d   : > { %21286 = vmatprep.mubr.f32.mxu0 %v24885_v39  ;;  %21332 = vmatpush3.msra.mxu0 %v24799_v4  ;;  %v30225_v4 = vld [vmem:[#allocation46_spill] sm:$0xff] }
 0x11e   : > { %19929 = vmatmul.mubr.f32.gmra.mrb[30].mxu1 %v24702_v27  ;;  %21381 = vmatprep.subr.mxu0 %v24740_v63  ;;  %v30222_v27 = vld [vmem:[#allocation39_spill] sm:$0xff] }
 0x11f   : > { %19933 = vmatprep.mubr.f32.mxu1 %v24222_v20 }
 0x120   : > { %21287 = vmatmul.mubr.f32.gmra.mrb[2].mxu0 %v24896_v50 }
 0x121   : > { %21289 = vmatprep.mubr.f32.mxu0 %v24904_v41  ;;  %v178_v41 = vld [vmem:[%s24204_s21 + $0x50] sm:$0xff] }
 0x122   : > { %19934 = vmatmul.mubr.f32.vlgmr.msra.gmra.mrb[0].mxu1 %v24244_v32  ;;  %v2136_v50 = vsel %vm238_vm0, %v178_v41, 0 }
 0x123   : > { %19982 = vmatpush3.msra.mxu1 %v24180_v3  ;;  %19936 = vmatprep.mubr.f32.mxu1 %v24218_v18  ;;  %v30221_v3 = vld [vmem:[#allocation36_spill] sm:$0xff]  ;;  %v25488_v41 = vand.u32 4294901760, %v2136_v50 }
 0x124   : > { %21290 = vmatmul.mubr.f32.gmra.mrb[4].mxu0 %v24916_v17  ;;  %20031 = vmatprep.subr.mxu1 %v25289_v45 }
 0x125   : > { %21292 = vmatprep.mubr.f32.mxu0 %v24929_v24  ;;  %v30280_v24 = vld [vmem:[#allocation62_spill] sm:$0xff] }
 0x126   : > { %19937 = vmatmul.mubr.f32.gmra.mrb[2].mxu1 %v24220_v19 }
 0x127   : > { %19939 = vmatprep.mubr.f32.mxu1 %v24242_v31 }
 0x128   : > { %21293 = vmatmul.mubr.f32.gmra.mrb[6].mxu0 %v24940_v38 }
 0x129   : > { %21295 = vmatprep.mubr.f32.mxu0 %v24954_v58 }
 0x12a   : > { %19940 = vmatmul.mubr.f32.gmra.mrb[4].mxu1 %v24246_v33 }
 0x12b   : > { %19942 = vmatprep.mubr.f32.mxu1 %v24248_v34 }
 0x12c   : > { %21296 = vmatmul.mubr.f32.gmra.mrb[8].mxu0 %v24970_v25  ;;  %v30276_v25 = vld [vmem:[#allocation51_spill] sm:$0xff] }
 0x12d   : > { %21298 = vmatprep.mubr.f32.mxu0 %v24972_v5 }
 0x12e   : > { %19943 = vmatmul.mubr.f32.gmra.mrb[6].mxu1 %v24270_v43 }
 0x12f   : > { %19945 = vmatprep.mubr.f32.mxu1 %v24311_v62 }
 0x130   : > { %21299 = vmatmul.mubr.f32.gmra.mrb[10].mxu0 %v24991_v52  ;;  %v173_v52 = vld [vmem:[%s24204_s21 + $0x18] sm:$0xff] }
 0x131   : > { %21301 = vmatprep.mubr.f32.mxu0 %v25006_v47  ;;  %v30273_v47 = vld [vmem:[#allocation43_spill] sm:$0xff] }
 0x132   : > { %19946 = vmatmul.mubr.f32.gmra.mrb[8].mxu1 %v24320_v10 }
 0x133   : > { %19948 = vmatprep.mubr.f32.mxu1 %v24331_v15 }
 0x134   : > { %21302 = vmatmul.mubr.f32.gmra.mrb[12].mxu0 %v25016_v59  ;;  %v30261_v59 = vld [vmem:[#allocation147_spill] sm:$0xff] }
 0x135   : > { %21304 = vmatprep.mubr.f32.mxu0 %v25018_v12  ;;  %v30256_v12 = vld [vmem:[#allocation137_spill] sm:$0xff] }
 0x136   : > { %19949 = vmatmul.mubr.f32.gmra.mrb[10].mxu1 %v24350_v35 }
 0x137   : > { %19951 = vmatprep.mubr.f32.mxu1 %v24357_v21 }
 0x138   : > { %21305 = vmatmul.mubr.f32.gmra.mrb[14].mxu0 %v25046_v49  ;;  %v30254_v49 = vld [vmem:[#allocation133_spill] sm:$0xff] }
 0x139   : > { %21307 = vmatprep.mubr.f32.mxu0 %v25057_v28 }
 0x13a   : > { %19952 = vmatmul.mubr.f32.gmra.mrb[12].mxu1 %v30221_v3 }
 0x13b   : > { %19954 = vmatprep.mubr.f32.mxu1 %v30222_v27 }
 0x13c   : > { %21308 = vmatmul.mubr.f32.gmra.mrb[16].mxu0 %v30223_v11  ;;  %v30253_v11 = vld [vmem:[#allocation131_spill] sm:$0xff] }
 0x13d   : > { %21310 = vmatprep.mubr.f32.mxu0 %v30224_v44  ;;  %v30251_v44 = vld [vmem:[#allocation108_spill] sm:$0xff]  ;;  %30291 = vst [vmem:[#allocation131_spill] sm:$0xff] %v25488_v41 }
 0x13e   : > { %19955 = vmatmul.mubr.f32.gmra.mrb[14].mxu1 %v30225_v4 }
 0x13f   : > { %19957 = vmatprep.mubr.f32.mxu1 %v30226_v13 }
 0x140   : > { %21311 = vmatmul.mubr.f32.gmra.mrb[18].mxu0 %v25099_v61  ;;  %v30248_v61 = vld [vmem:[#allocation104_spill] sm:$0xff] }
 0x141   : > { %21313 = vmatprep.mubr.f32.mxu0 %v30227_v40  ;;  %v30247_v40 = vld [vmem:[#allocation101_spill] sm:$0xff] }
 0x142   : > { %19958 = vmatmul.mubr.f32.gmra.mrb[16].mxu1 %v30228_v53 }
 0x143   : > { %19960 = vmatprep.mubr.f32.mxu1 %v30229_v1 }
 0x144   : > { %21314 = vmatmul.mubr.f32.gmra.mrb[20].mxu0 %v30230_v7  ;;  %v30240_v7 = vld [vmem:[#allocation80_spill] sm:$0xff] }
 0x145   : > { %21316 = vmatprep.mubr.f32.mxu0 %v30231_v14  ;;  %v30241_v14 = vld [vmem:[#allocation85_spill] sm:$0xff] }
 0x146   : > { %19961 = vmatmul.mubr.f32.gmra.mrb[18].mxu1 %v30232_v55 }
 0x147   : > { %19963 = vmatprep.mubr.f32.mxu1 %v30233_v42 }
 0x148   : > { %21317 = vmatmul.mubr.f32.gmra.mrb[22].mxu0 %v30234_v54  ;;  %v30242_v54 = vld [vmem:[#allocation88_spill] sm:$0xff] }
 0x149   : > { %21319 = vmatprep.mubr.f32.mxu0 %v30235_v9  ;;  %v25346_v9 = vsub.f32 %v203_v37, %v25289_v45 }
 0x14a   : > { %19964 = vmatmul.mubr.f32.gmra.mrb[20].mxu1 %v30236_v48 }
 0x14b   : > { %19966 = vmatprep.mubr.f32.mxu1 %v30237_v36 }
 0x14c   : > { %21320 = vmatmul.mubr.f32.gmra.mrb[24].mxu0 %v30238_v46  ;;  %v30244_v46 = vld [vmem:[#allocation96_spill] sm:$0xff] }
 0x14d   : > { %21322 = vmatprep.mubr.f32.mxu0 %v25177_v22  ;;  %v30243_v22 = vld [vmem:[#allocation93_spill] sm:$0xff] }
 0x14e   : > { %19967 = vmatmul.mubr.f32.gmra.mrb[22].mxu1 %v30239_v51 }
 0x14f   : > { %19969 = vmatprep.mubr.f32.mxu1 %v30240_v7 }
 0x150   : > { %21323 = vmatmul.mubr.f32.gmra.mrb[26].mxu0 %v25196_v57  ;;  %v25353_v57 = vand.u32 4294901760, %v25346_v9 }
 0x151   : > { %21325 = vmatprep.mubr.f32.mxu0 %v25201_v26  ;;  %v30246_v26 = vld [vmem:[#allocation126_spill] sm:$0xff] }
 0x152   : > { %19970 = vmatmul.mubr.f32.gmra.mrb[24].mxu1 %v30241_v14  ;;  %30245 = vst [vmem:[#allocation75_spill] sm:$0xff] %v25353_v57  ;;  %v2600_v37 = vsub.f32 %v25346_v9, %v25353_v57  ;;  %v30255_v57 = vld [vmem:[#allocation135_spill] sm:$0xff] }
 0x153   : > { %19972 = vmatprep.mubr.f32.mxu1 %v30242_v54 }
 0x154   : > { %21326 = vmatmul.mubr.f32.gmra.mrb[28].mxu0 %v25218_v60  ;;  %v30249_v60 = vld [vmem:[#allocation127_spill] sm:$0xff]  ;;  %v25367_v28 = vand.u32 4294901760, %v2600_v37  ;;  %v30258_v37 = vld [vmem:[#allocation142_spill] sm:$0xff] }
 0x155   : > { %21328 = vmatprep.mubr.f32.mxu0 %v25224_v56  ;;  %v30250_v56 = vld [vmem:[#allocation129_spill] sm:$0xff] }
 0x156   : > { %19973 = vmatmul.mubr.f32.gmra.mrb[26].mxu1 %v30243_v22 }
 0x157   : > { %19975 = vmatprep.mubr.f32.mxu1 %v30244_v46 }
 0x158   : > { %21329 = vmatmul.mubr.f32.gmra.mrb[30].mxu0 %v25236_v16  ;;  %v30252_v16 = vld [vmem:[#allocation125_spill] sm:$0xff] }
 0x159   : > { %21333 = vmatprep.mubr.f32.mxu0 %v30246_v26 }
 0x15a   : > { %19976 = vmatmul.mubr.f32.gmra.mrb[28].mxu1 %v30247_v40 }
 0x15b   : > { %19978 = vmatprep.mubr.f32.mxu1 %v30248_v61 }
 0x15c   : > { %21334 = vmatmul.mubr.f32.vlgmr.msra.gmra.mrb[0].mxu0 %v30249_v60 }
 0x15d   : > { %21336 = vmatprep.mubr.f32.mxu0 %v30250_v56  ;;  %21382 = vmatpush3.msra.mxu0 %v24740_v63 }
 0x15e   : > { %19979 = vmatmul.mubr.f32.gmra.mrb[30].mxu1 %v30251_v44  ;;  %21431 = vmatprep.subr.mxu0 %v30252_v16 }
 0x15f   : > { %19983 = vmatprep.mubr.f32.mxu1 %v24222_v20  ;;  %v30257_v20 = vld [vmem:[#allocation139_spill] sm:$0xff] }
 0x160   : > { %21337 = vmatmul.mubr.f32.gmra.mrb[2].mxu0 %v30253_v11 }
 0x161   : > { %21339 = vmatprep.mubr.f32.mxu0 %v30254_v49 }
 0x162   : > { %19984 = vmatmul.mubr.f32.vlgmr.msra.gmra.mrb[0].mxu1 %v24244_v32  ;;  %v30259_v32 = vld [vmem:[#allocation144_spill] sm:$0xff] }
 0x163   : > { %20032 = vmatpush3.msra.mxu1 %v25289_v45  ;;  %19986 = vmatprep.mubr.f32.mxu1 %v24218_v18  ;;  %v30260_v18 = vld [vmem:[#allocation145_spill] sm:$0xff] }
 0x164   : > { %21340 = vmatmul.mubr.f32.gmra.mrb[4].mxu0 %v30255_v57  ;;  %20081 = vmatprep.subr.mxu1 %v25367_v28 }
 0x165   : > { %21342 = vmatprep.mubr.f32.mxu0 %v30256_v12 }
 0x166   : > { %19987 = vmatmul.mubr.f32.gmra.mrb[2].mxu1 %v24220_v19  ;;  %v30262_v19 = vld [vmem:[#allocation150_spill] sm:$0xff] }
 0x167   : > { %19989 = vmatprep.mubr.f32.mxu1 %v24242_v31  ;;  %v30263_v31 = vld [vmem:[#allocation12_spill] sm:$0xff] }
 0x168   : > { %21343 = vmatmul.mubr.f32.gmra.mrb[6].mxu0 %v30257_v20 }
 0x169   : > { %21345 = vmatprep.mubr.f32.mxu0 %v30258_v37 }
 0x16a   : > { %19990 = vmatmul.mubr.f32.gmra.mrb[4].mxu1 %v24246_v33  ;;  %v30264_v33 = vld [vmem:[#allocation151_spill] sm:$0xff] }
 0x16b   : > { %19992 = vmatprep.mubr.f32.mxu1 %v24248_v34  ;;  %v30272_v34 = vld [vmem:[#allocation37_spill] sm:$0xff] }
 0x16c   : > { %21346 = vmatmul.mubr.f32.gmra.mrb[8].mxu0 %v30259_v32 }
 0x16d   : > { %21348 = vmatprep.mubr.f32.mxu0 %v30260_v18 }
 0x16e   : > { %19993 = vmatmul.mubr.f32.gmra.mrb[6].mxu1 %v24270_v43  ;;  %v30265_v43 = vld [vmem:[#allocation13_spill] sm:$0xff] }
 0x16f   : > { %19995 = vmatprep.mubr.f32.mxu1 %v24311_v62  ;;  %v30266_v62 = vld [vmem:[#allocation154_spill] sm:$0xff] }
 0x170   : > { %21349 = vmatmul.mubr.f32.gmra.mrb[10].mxu0 %v30261_v59 }
 0x171   : > { %21351 = vmatprep.mubr.f32.mxu0 %v30262_v19 }
 0x172   : > { %19996 = vmatmul.mubr.f32.gmra.mrb[8].mxu1 %v24320_v10  ;;  %v30267_v10 = vld [vmem:[#allocation19_spill] sm:$0xff] }
 0x173   : > { %19998 = vmatprep.mubr.f32.mxu1 %v24331_v15  ;;  %v30268_v15 = vld [vmem:[#allocation156_spill] sm:$0xff] }
 0x174   : > { %21352 = vmatmul.mubr.f32.gmra.mrb[12].mxu0 %v30263_v31 }
 0x175   : > { %21354 = vmatprep.mubr.f32.mxu0 %v30264_v33 }
 0x176   : > { %19999 = vmatmul.mubr.f32.gmra.mrb[10].mxu1 %v24350_v35  ;;  %v30269_v35 = vld [vmem:[#allocation158_spill] sm:$0xff] }
 0x177   : > { %20001 = vmatprep.mubr.f32.mxu1 %v24357_v21  ;;  %v30270_v21 = vld [vmem:[#allocation159_spill] sm:$0xff] }
 0x178   : > { %21355 = vmatmul.mubr.f32.gmra.mrb[14].mxu0 %v30265_v43 }
 0x179   : > { %21357 = vmatprep.mubr.f32.mxu0 %v30266_v62 }
 0x17a   : > { %20002 = vmatmul.mubr.f32.gmra.mrb[12].mxu1 %v30221_v3  ;;  %v30271_v3 = vld [vmem:[#allocation34_spill] sm:$0xff] }
 0x17b   : > { %20004 = vmatprep.mubr.f32.mxu1 %v30222_v27  ;;  %v171_v27 = vld [vmem:[%s24204_s21] sm:$0xff] }
 0x17c   : > { %21358 = vmatmul.mubr.f32.gmra.mrb[16].mxu0 %v30267_v10 }
 0x17d   : > { %21360 = vmatprep.mubr.f32.mxu0 %v30268_v15 }
 0x17e   : > { %20005 = vmatmul.mubr.f32.gmra.mrb[14].mxu1 %v30225_v4  ;;  %v172_v4 = vld [vmem:[%s24204_s21 + $0x8] sm:$0xff] }
 0x17f   : > { %20007 = vmatprep.mubr.f32.mxu1 %v30226_v13  ;;  %v2115_v13 = vsel %vm238_vm0, %v171_v27, 0  ;;  %v2118_v5 = vsel %vm238_vm0, %v172_v4, 0  ;;  %v175_v27 = vld [vmem:[%s24204_s21 + $0x30] sm:$0xff] }
 0x180   : > { %21361 = vmatmul.mubr.f32.gmra.mrb[18].mxu0 %v30269_v35  ;;  %v25426_v58 = vand.u32 4294901760, %v2118_v5 }
 0x181   : > { %21363 = vmatprep.mubr.f32.mxu0 %v30270_v21 }
 0x182   : > { %20008 = vmatmul.mubr.f32.gmra.mrb[16].mxu1 %v30228_v53  ;;  %v30274_v53 = vld [vmem:[#allocation47_spill] sm:$0xff]  ;;  %30277 = vst [vmem:[#allocation83_spill] sm:$0xff] %v25426_v58  ;;  %v25441_v45 = vsub.f32 %v2118_v5, %v25426_v58 }
 0x183   : > { %20010 = vmatprep.mubr.f32.mxu1 %v30229_v1  ;;  %v25417_v1 = vand.u32 4294901760, %v2115_v13 }
 0x184   : > { %21364 = vmatmul.mubr.f32.gmra.mrb[20].mxu0 %v30271_v3  ;;  %30281 = vst [vmem:[#allocation94_spill] sm:$0xff] %v25441_v45 }
 0x185   : > { %21366 = vmatprep.mubr.f32.mxu0 %v30272_v34  ;;  %30275 = vst [vmem:[#allocation78_spill] sm:$0xff] %v25417_v1 }
 0x186   : > { %20011 = vmatmul.mubr.f32.gmra.mrb[18].mxu1 %v30232_v55  ;;  %v2121_v55 = vsel %vm238_vm0, %v173_v52, 0  ;;  %v2127_v52 = vsel %vm238_vm0, %v175_v27, 0 }
 0x187   : > { %20013 = vmatprep.mubr.f32.mxu1 %v30233_v42  ;;  %v174_v42 = vld [vmem:[%s24204_s21 + $0x20] sm:$0xff]  ;;  %v25432_v38 = vand.u32 4294901760, %v2121_v55  ;;  %v25451_v27 = vand.u32 4294901760, %v2127_v52 }
 0x188   : > { %21367 = vmatmul.mubr.f32.gmra.mrb[22].mxu0 %v30273_v47  ;;  %v2124_v4 = vsel %vm238_vm0, %v174_v42, 0 }
 0x189   : > { %21369 = vmatprep.mubr.f32.mxu0 %v30274_v53  ;;  %30279 = vst [vmem:[#allocation91_spill] sm:$0xff] %v25432_v38  ;;  %30284 = vst [vmem:[#allocation109_spill] sm:$0xff] %v25451_v27 }
 0x18a   : > { %20014 = vmatmul.mubr.f32.gmra.mrb[20].mxu1 %v30236_v48  ;;  %v25430_v48 = vsub.f32 %v2115_v13, %v25417_v1  ;;  %v25443_v13 = vand.u32 4294901760, %v2124_v4 }
 0x18b   : > { %20016 = vmatprep.mubr.f32.mxu1 %v30237_v36  ;;  %v176_v36 = vld [vmem:[%s24204_s21 + $0x38] sm:$0xff] }
 0x18c   : > { %21370 = vmatmul.mubr.f32.gmra.mrb[24].mxu0 %v30276_v25  ;;  %30278 = vst [vmem:[#allocation86_spill] sm:$0xff] %v25430_v48  ;;  %30282 = vst [vmem:[#allocation99_spill] sm:$0xff] %v25443_v13  ;;  %v2130_v17 = vsel %vm238_vm0, %v176_v36, 0  ;;  %v30287_v36 = vand.u32 4294901760, %v25430_v48 }
 0x18d   : > { %21372 = vmatprep.mubr.f32.mxu0 %v25199_v8 }
 0x18e   : > { %20017 = vmatmul.mubr.f32.gmra.mrb[22].mxu1 %v30239_v51  ;;  %v177_v51 = vld [vmem:[%s24204_s21 + $0x48] sm:$0xff] }
 0x18f   : > { %20019 = vmatprep.mubr.f32.mxu1 %v30240_v7  ;;  %v25449_v7 = vsub.f32 %v2121_v55, %v25432_v38  ;;  %v2133_v5 = vsel %vm238_vm0, %v177_v51, 0  ;;  %v25461_v55 = vsub.f32 %v2124_v4, %v25443_v13  ;;  %v179_v38 = vld [vmem:[%s24204_s21 + $0x60] sm:$0xff]  ;;  %v25472_v51 = vsub.f32 %v2127_v52, %v25451_v27  ;;  %v181_v13 = vld [vmem:[%s24204_s21 + $0x78] sm:$0xff] }
 0x190   : > { %21373 = vmatmul.mubr.f32.gmra.mrb[26].mxu0 %v25216_v0  ;;  %v25476_v4 = vand.u32 4294901760, %v2133_v5  ;;  %v2139_v42 = vsel %vm238_vm0, %v179_v38, 0 }
 0x191   : > { %21375 = vmatprep.mubr.f32.mxu0 %v30280_v24  ;;  %30283 = vst [vmem:[#allocation102_spill] sm:$0xff] %v25449_v7  ;;  %30285 = vst [vmem:[#allocation126_spill] sm:$0xff] %v25461_v55  ;;  %v30293_v27 = vand.u32 4294901760, %v25449_v7  ;;  %v25504_v58 = vand.u32 4294901760, %v2139_v42 }
 0x192   : > { %20020 = vmatmul.mubr.f32.gmra.mrb[24].mxu1 %v30241_v14  ;;  %v25463_v14 = vand.u32 4294901760, %v2130_v17  ;;  %30288 = vst [vmem:[#allocation129_spill] sm:$0xff] %v25472_v51  ;;  %30289 = vst [vmem:[#allocation125_spill] sm:$0xff] %v25476_v4 }
 0x193   : > { %20022 = vmatprep.mubr.f32.mxu1 %v30242_v54  ;;  %v2279_v54 = vsub.f32 %v25430_v48, %v30287_v36  ;;  %v30290_v36 = vand.u32 4294901760, %v30246_v26  ;;  %v30292_v48 = vand.u32 4294901760, %v25441_v45  ;;  %v2299_v26 = vsub.f32 %v25449_v7, %v30293_v27  ;;  %30296 = vst [vmem:[#allocation137_spill] sm:$0xff] %v25504_v58 }
 0x194   : > { %21376 = vmatmul.mubr.f32.gmra.mrb[28].mxu0 %v25234_v6  ;;  %30286 = vst [vmem:[#allocation127_spill] sm:$0xff] %v25463_v14  ;;  %v25486_v52 = vsub.f32 %v2130_v17, %v25463_v14  ;;  %v25502_v17 = vsub.f32 %v2133_v5, %v25476_v4  ;;  %v182_v14 = vld [vmem:[%s24204_s21 + $0x80] sm:$0xff]  ;;  %v30298_v27 = vand.u32 4294901760, %v30250_v56 }
 0x195   : > { %21378 = vmatprep.mubr.f32.mxu0 %v25243_v23  ;;  %v2289_v38 = vsub.f32 %v25441_v45, %v30292_v48  ;;  %v30297_v48 = vand.u32 4294901760, %v30249_v60  ;;  %v30306_v45 = vand.u32 4294901760, %v30253_v11 }
 0x196   : > { %20023 = vmatmul.mubr.f32.gmra.mrb[26].mxu1 %v30243_v22  ;;  %v180_v22 = vld [vmem:[%s24204_s21 + $0x68] sm:$0xff]  ;;  %30295 = vst [vmem:[#allocation135_spill] sm:$0xff] %v25502_v17  ;;  %v25518_v7 = vand.u32 4294901760, %v25486_v52 }
 0x197   : > { %20025 = vmatprep.mubr.f32.mxu1 %v30244_v46  ;;  %v2280_v46 = vand.u32 4294901760, %v2279_v54  ;;  %v2142_v54 = vsel %vm238_vm0, %v180_v22, 0  ;;  %v25521_v22 = vsub.f32 %v2136_v50, %v25488_v41  ;;  %v2290_v60 = vand.u32 4294901760, %v2289_v38  ;;  %v184_v38 = vld [vmem:[%s24204_s21 + $0x98] sm:$0xff] }
 0x198   : > { %21379 = vmatmul.mubr.f32.gmra.mrb[30].mxu0 %v25252_v30  ;;  %30300 = vst [vmem:[#allocation139_spill] sm:$0xff] %v25518_v7  ;;  %v25525_v56 = vand.u32 4294901760, %v2142_v54  ;;  %v25534_v50 = vand.u32 4294901760, %v25502_v17  ;;  %v30307_v41 = vand.u32 4294901760, %v30254_v49  ;;  %v2154_v49 = vsel %vm238_vm0, %v184_v38, 0 }
 0x199   : > { %21383 = vmatprep.mubr.f32.mxu0 %v30290_v36  ;;  %v25498_v36 = vand.u32 4294901760, %v25472_v51  ;;  %30301 = vst [vmem:[#allocation142_spill] sm:$0xff] %v25521_v22 }
 0x19a   : > { %20026 = vmatmul.mubr.f32.gmra.mrb[28].mxu1 %v30247_v40  ;;  %v2145_v40 = vsel %vm238_vm0, %v181_v13, 0  ;;  %v183_v13 = vld [vmem:[%s24204_s21 + $0x90] sm:$0xff]  ;;  %30302 = vst [vmem:[#allocation144_spill] sm:$0xff] %v25525_v56  ;;  %30304 = vst [vmem:[#allocation147_spill] sm:$0xff] %v25534_v50 }
 0x19b   : > { %30294 = vst [vmem:[#allocation133_spill] sm:$0xff] %v25498_v36  ;;  %20028 = vmatprep.mubr.f32.mxu1 %v30248_v61  ;;  %v30299_v61 = vand.u32 4294901760, %v25461_v55 }
 0x19c   : > { %21384 = vmatmul.mubr.f32.vlgmr.msra.gmra.mrb[0].mxu0 %v30297_v48  ;;  %v25527_v48 = vand.u32 4294901760, %v2145_v40 }
 0x19d   : > { %21386 = vmatprep.mubr.f32.mxu0 %v30298_v27  ;;  %21432 = vmatpush3.msra.mxu0 %v30252_v16  ;;  %v2309_v5 = vsub.f32 %v25461_v55, %v30299_v61  ;;  %v2148_v16 = vsel %vm238_vm0, %v182_v14, 0  ;;  %v2300_v61 = vand.u32 4294901760, %v2299_v26  ;;  %v2319_v27 = vsub.f32 %v25472_v51, %v25498_v36 }
 0x19e   : > { %20029 = vmatmul.mubr.f32.gmra.mrb[30].mxu1 %v30251_v44  ;;  %30303 = vst [vmem:[#allocation145_spill] sm:$0xff] %v25527_v48  ;;  %21481 = vmatprep.subr.mxu0 %v24740_v63  ;;  %v25537_v55 = vsub.f32 %v2139_v42, %v25504_v58  ;;  %v185_v44 = vld [vmem:[%s24204_s21 + $0xa8] sm:$0xff]  ;;  %v2151_v14 = vsel %vm238_vm0, %v183_v13, 0  ;;  %v2329_v26 = vsub.f32 %v25486_v52, %v25518_v7  ;;  %v25549_v36 = vand.u32 4294901760, %v25521_v22 }
 0x19f   : > { %20033 = vmatprep.mubr.f32.mxu1 %v2280_v46  ;;  %v2310_v46 = vand.u32 4294901760, %v2309_v5  ;;  %v25551_v42 = vand.u32 4294901760, %v2148_v16  ;;  %v25554_v51 = vsub.f32 %v2142_v54, %v25525_v56  ;;  %v2157_v11 = vsel %vm238_vm0, %v185_v44, 0 }
 0x1a0   : > { %30305 = vst [vmem:[#allocation150_spill] sm:$0xff] %v25537_v55  ;;  %21387 = vmatmul.mubr.f32.gmra.mrb[2].mxu0 %v30306_v45  ;;  %30308 = vst [vmem:[#allocation12_spill] sm:$0xff] %v25549_v36  ;;  %v25557_v45 = vsub.f32 %v2145_v40, %v25527_v48  ;;  %v2339_v5 = vsub.f32 %v25502_v17, %v25534_v50  ;;  %v25567_v13 = vand.u32 4294901760, %v25537_v55  ;;  %v25569_v54 = vand.u32 4294901760, %v2151_v14  ;;  %v186_v40 = vld [vmem:[%s24204_s21 + $0xb0] sm:$0xff]  ;;  %v187_v50 = vld [vmem:[%s24204_s21 + $0xc0] sm:$0xff] }
 0x1a1   : > { %21389 = vmatprep.mubr.f32.mxu0 %v30307_v41  ;;  %30309 = vst [vmem:[#allocation151_spill] sm:$0xff] %v25551_v42  ;;  %30310 = vst [vmem:[#allocation13_spill] sm:$0xff] %v25554_v51  ;;  %v25562_v41 = vand.u32 4294901760, %v2319_v27  ;;  %v30316_v44 = vand.u32 4294901760, %v30256_v12  ;;  %v25582_v27 = vand.u32 4294901760, %v2154_v49  ;;  %v25584_v38 = vand.u32 4294901760, %v2157_v11 }
 0x1a2   : > { %20034 = vmatmul.mubr.f32.vlgmr.msra.gmra.mrb[0].mxu1 %v2290_v60  ;;  %30311 = vst [vmem:[#allocation154_spill] sm:$0xff] %v25557_v45  ;;  %30313 = vst [vmem:[#allocation156_spill] sm:$0xff] %v25567_v13  ;;  %v30315_v60 = vand.u32 4294901760, %v30255_v57  ;;  %v2349_v57 = vsub.f32 %v25521_v22, %v25549_v36  ;;  %v25593_v12 = vand.u32 4294901760, %v25557_v45  ;;  %v30324_v36 = vand.u32 4294901760, %v30257_v20  ;;  %v188_v22 = vld [vmem:[%s24204_s21 + $0xc8] sm:$0xff] }
 0x1a3   : > { %20082 = vmatpush3.msra.mxu1 %v25367_v28  ;;  %20036 = vmatprep.mubr.f32.mxu1 %v2300_v61  ;;  %30312 = vst [vmem:[#allocation19_spill] sm:$0xff] %v25562_v41  ;;  %30314 = vst [vmem:[#allocation158_spill] sm:$0xff] %v25569_v54  ;;  %v25577_v28 = vand.u32 4294901760, %v2329_v26  ;;  %v25580_v61 = vsub.f32 %v2148_v16, %v25551_v42  ;;  %v2160_v26 = vsel %vm238_vm0, %v186_v40, 0  ;;  %v25597_v16 = vand.u32 4294901760, %v2339_v5  ;;  %v189_v20 = vld [vmem:[%s24204_s21 + $0xd8] sm:$0xff] }
 0x1a4   : > { %21390 = vmatmul.mubr.f32.gmra.mrb[4].mxu0 %v30315_v60  ;;  %20131 = vmatprep.subr.mxu1 %v25346_v9  ;;  %30319 = vst [vmem:[#allocation37_spill] sm:$0xff] %v25582_v27  ;;  %30320 = vst [vmem:[#allocation43_spill] sm:$0xff] %v25584_v38  ;;  %v25590_v60 = vand.u32 4294901760, %v25554_v51  ;;  %v2163_v7 = vsel %vm238_vm0, %v187_v50, 0  ;;  %v30325_v17 = vand.u32 4294901760, %v30258_v37  ;;  %v25614_v5 = vsub.f32 %v2154_v49, %v25582_v27 }
 0x1a5   : > { %21392 = vmatprep.mubr.f32.mxu0 %v30316_v44  ;;  %30317 = vst [vmem:[#allocation159_spill] sm:$0xff] %v25577_v28  ;;  %30318 = vst [vmem:[#allocation34_spill] sm:$0xff] %v25580_v61  ;;  %v2359_v44 = vsub.f32 %v25537_v55, %v25567_v13  ;;  %v25611_v40 = vand.u32 4294901760, %v25580_v61  ;;  %v25617_v13 = vsub.f32 %v2157_v11, %v25584_v38  ;;  %v25635_v11 = vand.u32 4294901760, %v2163_v7 }
 0x1a6   : > { %20037 = vmatmul.mubr.f32.gmra.mrb[2].mxu1 %v2310_v46  ;;  %30321 = vst [vmem:[#allocation47_spill] sm:$0xff] %v25590_v60  ;;  %30322 = vst [vmem:[#allocation51_spill] sm:$0xff] %v25593_v12  ;;  %v25602_v46 = vsub.f32 %v2151_v14, %v25569_v54  ;;  %v25619_v14 = vand.u32 4294901760, %v2160_v26  ;;  %v2369_v37 = vsub.f32 %v25554_v51, %v25590_v60  ;;  %v190_v60 = vld [vmem:[%s24204_s21 + $0xe0] sm:$0xff]  ;;  %v30335_v51 = vand.u32 4294901760, %v30260_v18 }
 0x1a7   : > { %20039 = vmatprep.mubr.f32.mxu1 %v25562_v41  ;;  %30323 = vst [vmem:[#allocation62_spill] sm:$0xff] %v25597_v16  ;;  %30326 = vst [vmem:[#allocation166_spill] sm:$0xff] %v25611_v40  ;;  %v25630_v50 = vand.u32 4294901760, %v2359_v44  ;;  %v2169_v41 = vsel %vm238_vm0, %v189_v20, 0  ;;  %v2389_v44 = vsub.f32 %v25580_v61, %v25611_v40  ;;  %v25667_v40 = vsub.f32 %v2163_v7, %v25635_v11 }
 0x1a8   : > { %21393 = vmatmul.mubr.f32.gmra.mrb[6].mxu0 %v30324_v36  ;;  %30327 = vst [vmem:[#allocation167_spill] sm:$0xff] %v25614_v5  ;;  %30328 = vst [vmem:[#allocation168_spill] sm:$0xff] %v25617_v13  ;;  %v25623_v36 = vand.u32 4294901760, %v2349_v57  ;;  %v25633_v49 = vand.u32 4294901760, %v25602_v46  ;;  %v30334_v57 = vand.u32 4294901760, %v30259_v32  ;;  %v25653_v32 = vsub.f32 %v2160_v26, %v25619_v14 }
 0x1a9   : > { %21395 = vmatprep.mubr.f32.mxu0 %v30325_v17  ;;  %30329 = vst [vmem:[#allocation169_spill] sm:$0xff] %v25619_v14  ;;  %v2379_v17 = vsub.f32 %v25557_v45, %v25593_v12  ;;  %30331 = vst [vmem:[#allocation171_spill] sm:$0xff] %v25630_v50  ;;  %v25647_v12 = vand.u32 4294901760, %v25614_v5  ;;  %v25657_v20 = vand.u32 4294901760, %v2369_v37  ;;  %v25669_v61 = vand.u32 4294901760, %v2169_v41  ;;  %v192_v45 = vld [vmem:[%s24204_s21 + $0xf8] sm:$0xff] }
 0x1aa   : > { %20040 = vmatmul.mubr.f32.gmra.mrb[4].mxu1 %v25577_v28  ;;  %30330 = vst [vmem:[#allocation170_spill] sm:$0xff] %v25623_v36  ;;  %30332 = vst [vmem:[#allocation172_spill] sm:$0xff] %v25633_v49  ;;  %v2166_v28 = vsel %vm238_vm0, %v188_v22, 0  ;;  %v191_v22 = vld [vmem:[%s24204_s21 + $0xf0] sm:$0xff]  ;;  %v2172_v26 = vsel %vm238_vm0, %v190_v60, 0  ;;  %v30344_v37 = vand.u32 4294901760, %v30261_v59 }
 0x1ab   : > { %20042 = vmatprep.mubr.f32.mxu1 %v25597_v16  ;;  %30333 = vst [vmem:[#allocation173_spill] sm:$0xff] %v25635_v11  ;;  %30336 = vst [vmem:[#allocation174_spill] sm:$0xff] %v25647_v12  ;;  %v25650_v16 = vand.u32 4294901760, %v25617_v13  ;;  %v25659_v18 = vand.u32 4294901760, %v2379_v17  ;;  %v2175_v17 = vsel %vm238_vm0, %v191_v22, 0  ;;  %v30345_v55 = vand.u32 4294901760, %v30262_v19 }
 0x1ac   : > { %21396 = vmatmul.mubr.f32.gmra.mrb[8].mxu0 %v30334_v57  ;;  %30338 = vst [vmem:[#allocation176_spill] sm:$0xff] %v25653_v32  ;;  %30339 = vst [vmem:[#allocation177_spill] sm:$0xff] %v25657_v20  ;;  %v2399_v57 = vsub.f32 %v25602_v46, %v25633_v49  ;;  %v2409_v7 = vsub.f32 %v25614_v5, %v25647_v12  ;;  %v25686_v49 = vand.u32 4294901760, %v25653_v32  ;;  %v25692_v19 = vand.u32 4294901760, %v2172_v26 }
 0x1ad   : > { %21398 = vmatprep.mubr.f32.mxu0 %v30335_v51  ;;  %30337 = vst [vmem:[#allocation175_spill] sm:$0xff] %v25650_v16  ;;  %30340 = vst [vmem:[#allocation178_spill] sm:$0xff] %v25659_v18  ;;  %v25661_v51 = vand.u32 4294901760, %v2166_v28  ;;  %v2419_v60 = vsub.f32 %v25617_v13, %v25650_v16  ;;  %v25703_v16 = vsub.f32 %v2169_v41, %v25669_v61  ;;  %v25705_v12 = vand.u32 4294901760, %v2175_v17  ;;  %v195_v13 = vld [vmem:[%s24204_s21 + $0x120] sm:$0xff] }
 0x1ae   : > { %20043 = vmatmul.mubr.f32.gmra.mrb[6].mxu1 %v25623_v36  ;;  %30342 = vst [vmem:[#allocation180_spill] sm:$0xff] %v25667_v40  ;;  %30343 = vst [vmem:[#allocation181_spill] sm:$0xff] %v25669_v61  ;;  %v193_v36 = vld [vmem:[%s24204_s21 + $0x108] sm:$0xff]  ;;  %v25697_v22 = vand.u32 4294901760, %v2399_v57 }
 0x1af   : > { %30341 = vst [vmem:[#allocation179_spill] sm:$0xff] %v25661_v51  ;;  %20045 = vmatprep.mubr.f32.mxu1 %v25630_v50  ;;  %v25679_v50 = vand.u32 4294901760, %v2389_v44  ;;  %30347 = vst [vmem:[#allocation183_spill] sm:$0xff] %v25686_v49  ;;  %v25690_v59 = vsub.f32 %v2166_v28, %v25661_v51  ;;  %v2181_v44 = vsel %vm238_vm0, %v193_v36, 0  ;;  %v194_v28 = vld [vmem:[%s24204_s21 + $0x110] sm:$0xff]  ;;  %v25713_v36 = vand.u32 4294901760, %v2409_v7 }
 0x1b0   : > { %21399 = vmatmul.mubr.f32.gmra.mrb[10].mxu0 %v30344_v37  ;;  %30349 = vst [vmem:[#allocation185_spill] sm:$0xff] %v25692_v19  ;;  %30350 = vst [vmem:[#allocation186_spill] sm:$0xff] %v25697_v22  ;;  %v25700_v37 = vand.u32 4294901760, %v25667_v40  ;;  %v25715_v57 = vand.u32 4294901760, %v2419_v60  ;;  %v25719_v5 = vand.u32 4294901760, %v2181_v44  ;;  %v25735_v60 = vand.u32 4294901760, %v25703_v16 }
 0x1b1   : > { %21401 = vmatprep.mubr.f32.mxu0 %v30345_v55  ;;  %30346 = vst [vmem:[#allocation182_spill] sm:$0xff] %v25679_v50  ;;  %30348 = vst [vmem:[#allocation184_spill] sm:$0xff] %v25690_v59  ;;  %v2178_v55 = vsel %vm238_vm0, %v192_v45, 0  ;;  %v30355_v45 = vand.u32 4294901760, %v30264_v33  ;;  %v25725_v41 = vand.u32 4294901760, %v25690_v59  ;;  %v25728_v33 = vsub.f32 %v2172_v26, %v25692_v19  ;;  %v196_v26 = vld [vmem:[%s24204_s21 + $0x128] sm:$0xff] }
 0x1b2   : > { %20046 = vmatmul.mubr.f32.gmra.mrb[8].mxu1 %v25657_v20  ;;  %30351 = vst [vmem:[#allocation187_spill] sm:$0xff] %v25700_v37  ;;  %30352 = vst [vmem:[#allocation188_spill] sm:$0xff] %v25703_v16  ;;  %v30354_v20 = vand.u32 4294901760, %v30263_v31  ;;  %v2429_v31 = vsub.f32 %v25653_v32, %v25686_v49  ;;  %v2439_v7 = vsub.f32 %v25667_v40, %v25700_v37  ;;  %v2187_v49 = vsel %vm238_vm0, %v195_v13, 0 }
 0x1b3   : > { %20048 = vmatprep.mubr.f32.mxu1 %v25659_v18  ;;  %30353 = vst [vmem:[#allocation189_spill] sm:$0xff] %v25705_v12  ;;  %30356 = vst [vmem:[#allocation190_spill] sm:$0xff] %v25713_v36  ;;  %v25717_v18 = vand.u32 4294901760, %v2178_v55  ;;  %v30365_v32 = vand.u32 4294901760, %v30266_v62  ;;  %v25750_v37 = vsub.f32 %v2181_v44, %v25719_v5  ;;  %v25761_v62 = vand.u32 4294901760, %v25728_v33 }
 0x1b4   : > { %21402 = vmatmul.mubr.f32.gmra.mrb[12].mxu0 %v30354_v20  ;;  %30357 = vst [vmem:[#allocation191_spill] sm:$0xff] %v25715_v57  ;;  %30359 = vst [vmem:[#allocation193_spill] sm:$0xff] %v25719_v5  ;;  %v2184_v20 = vsel %vm238_vm0, %v194_v28, 0  ;;  %v25756_v13 = vand.u32 4294901760, %v2429_v31  ;;  %v2190_v31 = vsel %vm238_vm0, %v196_v26, 0  ;;  %v30375_v40 = vand.u32 4294901760, %v30268_v15 }
 0x1b5   : > { %21404 = vmatprep.mubr.f32.mxu0 %v30355_v45  ;;  %30358 = vst [vmem:[#allocation192_spill] sm:$0xff] %v25717_v18  ;;  %30360 = vst [vmem:[#allocation194_spill] sm:$0xff] %v25725_v41  ;;  %v25738_v45 = vsub.f32 %v2175_v17, %v25705_v12  ;;  %v25747_v28 = vsub.f32 %v2178_v55, %v25717_v18  ;;  %v197_v17 = vld [vmem:[%s24204_s21 + $0x138] sm:$0xff]  ;;  %v2459_v55 = vsub.f32 %v25703_v16, %v25735_v60  ;;  %v199_v26 = vld [vmem:[%s24204_s21 + $0x150] sm:$0xff] }
 0x1b6   : > { %20049 = vmatmul.mubr.f32.gmra.mrb[10].mxu1 %v25679_v50  ;;  %30361 = vst [vmem:[#allocation195_spill] sm:$0xff] %v25728_v33  ;;  %30362 = vst [vmem:[#allocation196_spill] sm:$0xff] %v25735_v60  ;;  %v30364_v50 = vand.u32 4294901760, %v30265_v43  ;;  %v2449_v43 = vsub.f32 %v25690_v59, %v25725_v41  ;;  %v2193_v41 = vsel %vm238_vm0, %v197_v17, 0  ;;  %v198_v59 = vld [vmem:[%s24204_s21 + $0x140] sm:$0xff]  ;;  %v25784_v60 = vand.u32 4294901760, %v25750_v37 }
 0x1b7   : > { %20051 = vmatprep.mubr.f32.mxu1 %v25697_v22  ;;  %30363 = vst [vmem:[#allocation197_spill] sm:$0xff] %v25738_v45  ;;  %30366 = vst [vmem:[#allocation198_spill] sm:$0xff] %v25747_v28  ;;  %v25752_v22 = vand.u32 4294901760, %v2184_v20  ;;  %v25771_v44 = vand.u32 4294901760, %v25738_v45  ;;  %v2469_v15 = vsub.f32 %v25728_v33, %v25761_v62  ;;  %v25801_v17 = vand.u32 4294901760, %v2459_v55 }
 0x1b8   : > { %21405 = vmatmul.mubr.f32.gmra.mrb[14].mxu0 %v30364_v50  ;;  %30367 = vst [vmem:[#allocation199_spill] sm:$0xff] %v25750_v37  ;;  %30369 = vst [vmem:[#allocation201_spill] sm:$0xff] %v25756_v13  ;;  %v25763_v50 = vand.u32 4294901760, %v2187_v49  ;;  %v25805_v16 = vand.u32 4294901760, %v2193_v41  ;;  %v30382_v33 = vand.u32 4294901760, %v30270_v21 }
 0x1b9   : > { %21407 = vmatprep.mubr.f32.mxu0 %v30365_v32  ;;  %30368 = vst [vmem:[#allocation200_spill] sm:$0xff] %v25752_v22  ;;  %30370 = vst [vmem:[#allocation202_spill] sm:$0xff] %v25761_v62  ;;  %v25766_v32 = vand.u32 4294901760, %v2439_v7  ;;  %v25781_v7 = vand.u32 4294901760, %v25747_v28  ;;  %v2199_v62 = vsel %vm238_vm0, %v199_v26, 0 }
 0x1ba   : > { %20052 = vmatmul.mubr.f32.gmra.mrb[12].mxu1 %v25713_v36  ;;  %30371 = vst [vmem:[#allocation203_spill] sm:$0xff] %v25763_v50  ;;  %30373 = vst [vmem:[#allocation205_spill] sm:$0xff] %v25771_v44  ;;  %v30374_v36 = vand.u32 4294901760, %v30267_v10  ;;  %v25791_v10 = vand.u32 4294901760, %v2449_v43  ;;  %v2196_v43 = vsel %vm238_vm0, %v198_v59, 0  ;;  %v201_v59 = vld [vmem:[%s24204_s21 + $0x168] sm:$0xff] }
 0x1bb   : > { %20054 = vmatprep.mubr.f32.mxu1 %v25715_v57  ;;  %30372 = vst [vmem:[#allocation204_spill] sm:$0xff] %v25766_v32  ;;  %30376 = vst [vmem:[#allocation206_spill] sm:$0xff] %v25781_v7  ;;  %v25787_v57 = vsub.f32 %v2184_v20, %v25752_v22  ;;  %v2479_v20 = vsub.f32 %v25738_v45, %v25771_v44  ;;  %v2489_v55 = vsub.f32 %v25747_v28, %v25781_v7 }
 0x1bc   : > { %21408 = vmatmul.mubr.f32.gmra.mrb[16].mxu0 %v30374_v36  ;;  %30377 = vst [vmem:[#allocation207_spill] sm:$0xff] %v25784_v60  ;;  %30378 = vst [vmem:[#allocation208_spill] sm:$0xff] %v25791_v10  ;;  %v25798_v36 = vand.u32 4294901760, %v2190_v31  ;;  %v2499_v44 = vsub.f32 %v25750_v37, %v25784_v60  ;;  %v25837_v60 = vsub.f32 %v2193_v41, %v25805_v16  ;;  %v25839_v7 = vand.u32 4294901760, %v2199_v62 }
 0x1bd   : > { %21410 = vmatprep.mubr.f32.mxu0 %v30375_v40  ;;  %v25796_v40 = vsub.f32 %v2187_v49, %v25763_v50  ;;  %30380 = vst [vmem:[#allocation210_spill] sm:$0xff] %v25805_v16  ;;  %v200_v49 = vld [vmem:[%s24204_s21 + $0x158] sm:$0xff]  ;;  %v25834_v26 = vand.u32 4294901760, %v2479_v20  ;;  %v2205_v37 = vsel %vm238_vm0, %v201_v59, 0  ;;  %v30390_v28 = vand.u32 4294901760, %v30272_v34 }
 0x1be   : > { %20055 = vmatmul.mubr.f32.gmra.mrb[14].mxu1 %v25756_v13  ;;  %30379 = vst [vmem:[#allocation209_spill] sm:$0xff] %v25798_v36  ;;  %v30381_v13 = vand.u32 4294901760, %v30269_v35  ;;  %v25823_v35 = vand.u32 4294901760, %v2469_v15  ;;  %v25829_v21 = vsub.f32 %v2190_v31, %v25798_v36  ;;  %30388 = vst [vmem:[#allocation216_spill] sm:$0xff] %v25839_v7  ;;  %v2202_v15 = vsel %vm238_vm0, %v200_v49, 0  ;;  %v202_v31 = vld [vmem:[%s24204_s21 + $0x170] sm:$0xff] }
 0x1bf   : > { %20057 = vmatprep.mubr.f32.mxu1 %v25766_v32  ;;  %v25819_v32 = vand.u32 4294901760, %v25787_v57  ;;  %30387 = vst [vmem:[#allocation215_spill] sm:$0xff] %v25834_v26  ;;  %v25848_v45 = vand.u32 4294901760, %v2489_v55  ;;  %v25850_v20 = vand.u32 4294901760, %v2499_v44  ;;  %v25863_v34 = vand.u32 4294901760, %v2202_v15 }
 0x1c0   : > { %21411 = vmatmul.mubr.f32.gmra.mrb[18].mxu0 %v30381_v13  ;;  %30384 = vst [vmem:[#allocation212_spill] sm:$0xff] %v25823_v35  ;;  %v25826_v13 = vand.u32 4294901760, %v25796_v40  ;;  %v25870_v44 = vsub.f32 %v2199_v62, %v25839_v7  ;;  %v25872_v55 = vand.u32 4294901760, %v2205_v37  ;;  %v2208_v59 = vsel %vm238_vm0, %v202_v31, 0 }
 0x1c1   : > { %21413 = vmatprep.mubr.f32.mxu0 %v30382_v33  ;;  %30383 = vst [vmem:[#allocation211_spill] sm:$0xff] %v25819_v32  ;;  %v25831_v33 = vand.u32 4294901760, %v2196_v43  ;;  %30391 = vst [vmem:[#allocation217_spill] sm:$0xff] %v25850_v20  ;;  %v2509_v41 = vsub.f32 %v25787_v57, %v25819_v32  ;;  %v25890_v31 = vand.u32 4294901760, %v2208_v59 }
 0x1c2   : > { %20058 = vmatmul.mubr.f32.gmra.mrb[16].mxu1 %v25791_v10  ;;  %30385 = vst [vmem:[#allocation213_spill] sm:$0xff] %v25826_v13  ;;  %v30389_v10 = vand.u32 4294901760, %v30271_v3  ;;  %v2519_v49 = vsub.f32 %v25796_v40, %v25826_v13  ;;  %v25858_v3 = vand.u32 4294901760, %v25829_v21  ;;  %30393 = vst [vmem:[#allocation219_spill] sm:$0xff] %v25863_v34  ;;  %v30396_v13 = vand.u32 4294901760, %v30273_v47 }
 0x1c3   : > { %30386 = vst [vmem:[#allocation214_spill] sm:$0xff] %v25831_v33  ;;  %20060 = vmatprep.mubr.f32.mxu1 %v25801_v17  ;;  %30395 = vst [vmem:[#allocation221_spill] sm:$0xff] %v25872_v55  ;;  %v25879_v32 = vand.u32 4294901760, %v2509_v41  ;;  %v25901_v41 = vsub.f32 %v2205_v37, %v25872_v55 }
 0x1c4   : > { %21414 = vmatmul.mubr.f32.gmra.mrb[20].mxu0 %v30389_v10  ;;  %30392 = vst [vmem:[#allocation218_spill] sm:$0xff] %v25858_v3  ;;  %v25861_v10 = vsub.f32 %v2196_v43, %v25831_v33  ;;  %v30397_v43 = vand.u32 4294901760, %v30274_v53  ;;  %30400 = vst [vmem:[#allocation224_spill] sm:$0xff] %v25890_v31  ;;  %v25893_v47 = vand.u32 4294901760, %v2519_v49 }
 0x1c5   : > { %21416 = vmatprep.mubr.f32.mxu0 %v30390_v28  ;;  %v25867_v28 = vand.u32 4294901760, %v25837_v60  ;;  %30402 = vst [vmem:[#allocation226_spill] sm:$0xff] %v25901_v41  ;;  %v25924_v37 = vand.u32 4294901760, %v25901_v41 }
 0x1c6   : > { %20061 = vmatmul.mubr.f32.gmra.mrb[18].mxu1 %v25823_v35  ;;  %v25885_v62 = vand.u32 4294901760, %v25861_v10  ;;  %v25888_v35 = vsub.f32 %v2202_v15, %v25863_v34  ;;  %v30404_v15 = vand.u32 4294901760, %v25199_v8 }
 0x1c7   : > { %20063 = vmatprep.mubr.f32.mxu1 %v25834_v26  ;;  %30394 = vst [vmem:[#allocation220_spill] sm:$0xff] %v25867_v28  ;;  %v2529_v26 = vsub.f32 %v25829_v21, %v25858_v3  ;;  %v2539_v53 = vsub.f32 %v25837_v60, %v25867_v28  ;;  %30407 = vst [vmem:[#allocation229_spill] sm:$0xff] %v25924_v37 }
 0x1c8   : > { %21417 = vmatmul.mubr.f32.gmra.mrb[22].mxu0 %v30396_v13  ;;  %30398 = vst [vmem:[#allocation222_spill] sm:$0xff] %v25885_v62  ;;  %30399 = vst [vmem:[#allocation223_spill] sm:$0xff] %v25888_v35  ;;  %v25898_v13 = vand.u32 4294901760, %v25870_v44  ;;  %v2549_v49 = vsub.f32 %v25861_v10, %v25885_v62  ;;  %v25913_v28 = vand.u32 4294901760, %v25888_v35  ;;  %v30427_v62 = vld [vmem:[#allocation138_spill] sm:$0xff] }
 0x1c9   : > { %21419 = vmatprep.mubr.f32.mxu0 %v30397_v43  ;;  %v30403_v43 = vand.u32 4294901760, %v30276_v25  ;;  %v25908_v3 = vand.u32 4294901760, %v2529_v26  ;;  %v25919_v25 = vand.u32 4294901760, %v2539_v53  ;;  %v30408_v26 = vand.u32 4294901760, %v25216_v0 }
 0x1ca   : > { %20064 = vmatmul.mubr.f32.gmra.mrb[20].mxu1 %v25848_v45  ;;  %30401 = vst [vmem:[#allocation225_spill] sm:$0xff] %v25898_v13  ;;  %30405 = vst [vmem:[#allocation227_spill] sm:$0xff] %v25913_v28  ;;  %v2559_v8 = vsub.f32 %v25870_v44, %v25898_v13  ;;  %v2569_v53 = vsub.f32 %v25888_v35, %v25913_v28  ;;  %v2579_v0 = vsub.f32 %v25901_v41, %v25924_v37  ;;  %v17878_v37 = vld [vmem:[%s28966_s1 + $0x30] sm:$0xff]  ;;  %v30425_v28 = vld [vmem:[#allocation109_spill] sm:$0xff] }
 0x1cb   : > { %20066 = vmatprep.mubr.f32.mxu1 %v25850_v20  ;;  %v25916_v20 = vsub.f32 %v2208_v59, %v25890_v31  ;;  %v25931_v59 = vand.u32 4294901760, %v2549_v49 }
 0x1cc   : > { %21420 = vmatmul.mubr.f32.gmra.mrb[24].mxu0 %v30403_v43  ;;  %v30409_v43 = vand.u32 4294901760, %v30280_v24  ;;  %v25939_v13 = vand.u32 4294901760, %v2559_v8  ;;  %v30411_v24 = vand.u32 4294901760, %v25234_v6  ;;  %v25948_v49 = vand.u32 4294901760, %v2569_v53 }
 0x1cd   : > { %21422 = vmatprep.mubr.f32.mxu0 %v30404_v15  ;;  %30406 = vst [vmem:[#allocation228_spill] sm:$0xff] %v25916_v20  ;;  %v25936_v15 = vand.u32 4294901760, %v25916_v20  ;;  %v25953_v8 = vand.u32 4294901760, %v2579_v0  ;;  %v30415_v6 = vand.u32 4294901760, %v25252_v30  ;;  %v25964_v53 = vand.u32 4294901760, %v17878_v37  ;;  %v30417_v30 = vld [vmem:[#allocation128_spill] sm:$0xff] }
 0x1ce   : > { %20067 = vmatmul.mubr.f32.gmra.mrb[22].mxu1 %v25879_v32  ;;  %30413 = vst [vmem:[#allocation231_spill] sm:$0xff] %v25948_v49  ;;  %v30418_v0 = vld [vmem:[#allocation130_spill] sm:$0xff] }
 0x1cf   : > { %20069 = vmatprep.mubr.f32.mxu1 %v25893_v47  ;;  %30410 = vst [vmem:[#allocation230_spill] sm:$0xff] %v25936_v15  ;;  %30414 = vst [vmem:[#allocation232_spill] sm:$0xff] %v25953_v8 }
 0x1d0   : > { %21423 = vmatmul.mubr.f32.gmra.mrb[26].mxu0 %v30408_v26  ;;  %v30412_v26 = vand.u32 4294901760, %v25243_v23 }
 0x1d1   : > { %21425 = vmatprep.mubr.f32.mxu0 %v30409_v43  ;;  %v2589_v43 = vsub.f32 %v25916_v20, %v25936_v15  ;;  %v30424_v15 = vld [vmem:[#allocation99_spill] sm:$0xff] }
 0x1d2   : > { %20070 = vmatmul.mubr.f32.gmra.mrb[24].mxu1 %v25908_v3 }
 0x1d3   : > { %20072 = vmatprep.mubr.f32.mxu1 %v25919_v25  ;;  %v25962_v23 = vand.u32 4294901760, %v2589_v43  ;;  %v30421_v43 = vld [vmem:[#allocation132_spill] sm:$0xff] }
 0x1d4   : > { %21426 = vmatmul.mubr.f32.gmra.mrb[28].mxu0 %v30411_v24  ;;  %v30419_v24 = vld [vmem:[#allocation83_spill] sm:$0xff] }
 0x1d5   : > { %21428 = vmatprep.mubr.f32.mxu0 %v30412_v26  ;;  %30416 = vst [vmem:[#allocation233_spill] sm:$0xff] %v25962_v23  ;;  %v30420_v26 = vld [vmem:[#allocation91_spill] sm:$0xff] }
 0x1d6   : > { %20073 = vmatmul.mubr.f32.gmra.mrb[26].mxu1 %v25931_v59 }
 0x1d7   : > { %20075 = vmatprep.mubr.f32.mxu1 %v25939_v13 }
 0x1d8   : > { %21429 = vmatmul.mubr.f32.gmra.mrb[30].mxu0 %v30415_v6  ;;  %v30422_v6 = vld [vmem:[#allocation70_spill] sm:$0xff] }
 0x1d9   : > { %21433 = vmatprep.mubr.f32.mxu0 %v24870_v29 }
 0x1da   : > { %20076 = vmatmul.mubr.f32.gmra.mrb[28].mxu1 %v25948_v49  ;;  %v30452_v49 = vld [vmem:[#allocation165_spill] sm:$0xff] }
 0x1db   : > { %20078 = vmatprep.mubr.f32.mxu1 %v25953_v8  ;;  %v30432_v8 = vld [vmem:[#allocation143_spill] sm:$0xff] }
 0x1dc   : > { %21434 = vmatmul.mubr.f32.vlgmr.msra.gmra.mrb[0].mxu0 %v24879_v2 }
 0x1dd   : > { %21436 = vmatprep.mubr.f32.mxu0 %v24885_v39  ;;  %21482 = vmatpush3.msra.mxu0 %v24740_v63  ;;  %v30423_v63 = vld [vmem:[#allocation134_spill] sm:$0xff] }
 0x1de   : > { %20079 = vmatmul.mubr.f32.gmra.mrb[30].mxu1 %v25962_v23  ;;  %21531 = vmatprep.subr.mxu0 %v25964_v53  ;;  %v30428_v23 = vld [vmem:[#allocation127_spill] sm:$0xff] }
 0x1df   : > { %20083 = vmatprep.mubr.f32.mxu1 %v25417_v1  ;;  %v30426_v1 = vld [vmem:[#allocation136_spill] sm:$0xff] }
 0x1e0   : > { %21437 = vmatmul.mubr.f32.gmra.mrb[2].mxu0 %v30417_v30 }
 0x1e1   : > { %21439 = vmatprep.mubr.f32.mxu0 %v30418_v0 }
 0x1e2   : > { %20084 = vmatmul.mubr.f32.vlgmr.msra.gmra.mrb[0].mxu1 %v30419_v24  ;;  %v30431_v24 = vld [vmem:[#allocation131_spill] sm:$0xff] }
 0x1e3   : > { %20132 = vmatpush3.msra.mxu1 %v25346_v9  ;;  %20086 = vmatprep.mubr.f32.mxu1 %v30420_v26  ;;  %v30429_v9 = vld [vmem:[#allocation140_spill] sm:$0xff]  ;;  %v30430_v26 = vld [vmem:[#allocation141_spill] sm:$0xff] }
 0x1e4   : > { %21440 = vmatmul.mubr.f32.gmra.mrb[4].mxu0 %v30421_v43  ;;  %20181 = vmatprep.subr.mxu1 %v30422_v6 }
 0x1e5   : > { %21442 = vmatprep.mubr.f32.mxu0 %v30423_v63 }
 0x1e6   : > { %20087 = vmatmul.mubr.f32.gmra.mrb[2].mxu1 %v30424_v15  ;;  %v30433_v15 = vld [vmem:[#allocation146_spill] sm:$0xff] }
 0x1e7   : > { %20089 = vmatprep.mubr.f32.mxu1 %v30425_v28  ;;  %v30434_v28 = vld [vmem:[#allocation148_spill] sm:$0xff] }
 0x1e8   : > { %21443 = vmatmul.mubr.f32.gmra.mrb[6].mxu0 %v30426_v1 }
 0x1e9   : > { %21445 = vmatprep.mubr.f32.mxu0 %v30427_v62 }
 0x1ea   : > { %20090 = vmatmul.mubr.f32.gmra.mrb[4].mxu1 %v30428_v23  ;;  %v30435_v23 = vld [vmem:[#allocation149_spill] sm:$0xff] }
 0x1eb   : > { %20092 = vmatprep.mubr.f32.mxu1 %v25476_v4  ;;  %v30436_v4 = vld [vmem:[#allocation152_spill] sm:$0xff] }
 0x1ec   : > { %21446 = vmatmul.mubr.f32.gmra.mrb[8].mxu0 %v30429_v9 }
 0x1ed   : > { %21448 = vmatprep.mubr.f32.mxu0 %v30430_v26 }
 0x1ee   : > { %20093 = vmatmul.mubr.f32.gmra.mrb[6].mxu1 %v30431_v24  ;;  %v30437_v24 = vld [vmem:[#allocation153_spill] sm:$0xff] }
 0x1ef   : > { %20095 = vmatprep.mubr.f32.mxu1 %v25504_v58  ;;  %v30438_v58 = vld [vmem:[#allocation18_spill] sm:$0xff] }
 0x1f0   : > { %21449 = vmatmul.mubr.f32.gmra.mrb[10].mxu0 %v30432_v8 }
 0x1f1   : > { %21451 = vmatprep.mubr.f32.mxu0 %v30433_v15 }
 0x1f2   : > { %20096 = vmatmul.mubr.f32.gmra.mrb[8].mxu1 %v25525_v56  ;;  %v30439_v56 = vld [vmem:[#allocation155_spill] sm:$0xff] }
 0x1f3   : > { %20098 = vmatprep.mubr.f32.mxu1 %v25527_v48  ;;  %v30440_v48 = vld [vmem:[#allocation21_spill] sm:$0xff] }
 0x1f4   : > { %21452 = vmatmul.mubr.f32.gmra.mrb[12].mxu0 %v30434_v28 }
 0x1f5   : > { %21454 = vmatprep.mubr.f32.mxu0 %v30435_v23 }
 0x1f6   : > { %20099 = vmatmul.mubr.f32.gmra.mrb[10].mxu1 %v25551_v42  ;;  %v30441_v42 = vld [vmem:[#allocation157_spill] sm:$0xff] }
 0x1f7   : > { %20101 = vmatprep.mubr.f32.mxu1 %v25569_v54  ;;  %v30442_v54 = vld [vmem:[#allocation25_spill] sm:$0xff] }
 0x1f8   : > { %21455 = vmatmul.mubr.f32.gmra.mrb[14].mxu0 %v30436_v4 }
 0x1f9   : > { %21457 = vmatprep.mubr.f32.mxu0 %v30437_v24 }
 0x1fa   : > { %20102 = vmatmul.mubr.f32.gmra.mrb[12].mxu1 %v25582_v27  ;;  %v30443_v27 = vld [vmem:[#allocation31_spill] sm:$0xff] }
 0x1fb   : > { %20104 = vmatprep.mubr.f32.mxu1 %v25584_v38  ;;  %v30444_v38 = vld [vmem:[#allocation160_spill] sm:$0xff] }
 0x1fc   : > { %21458 = vmatmul.mubr.f32.gmra.mrb[16].mxu0 %v30438_v58 }
 0x1fd   : > { %21460 = vmatprep.mubr.f32.mxu0 %v30439_v56 }
 0x1fe   : > { %20105 = vmatmul.mubr.f32.gmra.mrb[14].mxu1 %v25619_v14  ;;  %v30445_v14 = vld [vmem:[#allocation161_spill] sm:$0xff] }
 0x1ff   : > { %20107 = vmatprep.mubr.f32.mxu1 %v25635_v11  ;;  %v30446_v11 = vld [vmem:[#allocation162_spill] sm:$0xff] }
 0x200   : > { %21461 = vmatmul.mubr.f32.gmra.mrb[18].mxu0 %v30440_v48 }
 0x201   : > { %21463 = vmatprep.mubr.f32.mxu0 %v30441_v42 }
 0x202   : > { %20108 = vmatmul.mubr.f32.gmra.mrb[16].mxu1 %v25661_v51  ;;  %v30447_v51 = vld [vmem:[#allocation163_spill] sm:$0xff] }
 0x203   : > { %20110 = vmatprep.mubr.f32.mxu1 %v25669_v61  ;;  %v26023_v61 = vsub.f32 %v17878_v37, %v25964_v53 }
 0x204   : > { %21464 = vmatmul.mubr.f32.gmra.mrb[20].mxu0 %v30442_v54 }
 0x205   : > { %21466 = vmatprep.mubr.f32.mxu0 %v30443_v27 }
 0x206   : > { %20111 = vmatmul.mubr.f32.gmra.mrb[18].mxu1 %v25692_v19  ;;  %v30449_v19 = vld [vmem:[#allocation164_spill] sm:$0xff] }
 0x207   : > { %20113 = vmatprep.mubr.f32.mxu1 %v25705_v12  ;;  %v30448_v12 = vld [vmem:[#allocation52_spill] sm:$0xff] }
 0x208   : > { %21467 = vmatmul.mubr.f32.gmra.mrb[22].mxu0 %v30444_v38 }
 0x209   : > { %21469 = vmatprep.mubr.f32.mxu0 %v30445_v14 }
 0x20a   : > { %20114 = vmatmul.mubr.f32.gmra.mrb[20].mxu1 %v25717_v18  ;;  %v26030_v18 = vand.u32 4294901760, %v26023_v61 }
 0x20b   : > { %20116 = vmatprep.mubr.f32.mxu1 %v25719_v5  ;;  %v30451_v5 = vld [vmem:[#allocation59_spill] sm:$0xff] }
 0x20c   : > { %21470 = vmatmul.mubr.f32.gmra.mrb[24].mxu0 %v30446_v11  ;;  %30450 = vst [vmem:[#allocation128_spill] sm:$0xff] %v26030_v18  ;;  %v12275_v37 = vsub.f32 %v26023_v61, %v26030_v18  ;;  %v30454_v18 = vld [vmem:[#allocation86_spill] sm:$0xff] }
 0x20d   : > { %21472 = vmatprep.mubr.f32.mxu0 %v30447_v51 }
 0x20e   : > { %20117 = vmatmul.mubr.f32.gmra.mrb[22].mxu1 %v25752_v22 }
 0x20f   : > { %20119 = vmatprep.mubr.f32.mxu1 %v25763_v50  ;;  %v30453_v50 = vld [vmem:[#allocation67_spill] sm:$0xff] }
 0x210   : > { %21473 = vmatmul.mubr.f32.gmra.mrb[26].mxu0 %v30448_v12 }
 0x211   : > { %21475 = vmatprep.mubr.f32.mxu0 %v30449_v19 }
 0x212   : > { %20120 = vmatmul.mubr.f32.gmra.mrb[24].mxu1 %v25798_v36  ;;  %v26042_v36 = vand.u32 4294901760, %v12275_v37  ;;  %v30456_v37 = vld [vmem:[#allocation102_spill] sm:$0xff] }
 0x213   : > { %20122 = vmatprep.mubr.f32.mxu1 %v25805_v16 }
 0x214   : > { %21476 = vmatmul.mubr.f32.gmra.mrb[28].mxu0 %v30451_v5 }
 0x215   : > { %21478 = vmatprep.mubr.f32.mxu0 %v30452_v49 }
 0x216   : > { %20123 = vmatmul.mubr.f32.gmra.mrb[26].mxu1 %v25831_v33 }
 0x217   : > { %20125 = vmatprep.mubr.f32.mxu1 %v25839_v7 }
 0x218   : > { %21479 = vmatmul.mubr.f32.gmra.mrb[30].mxu0 %v30453_v50 }
 0x219   : > { %21483 = vmatprep.mubr.f32.mxu0 %v24870_v29  ;;  %v30455_v29 = vld [vmem:[#allocation94_spill] sm:$0xff] }
 0x21a   : > { %20126 = vmatmul.mubr.f32.gmra.mrb[28].mxu1 %v25863_v34 }
 0x21b   : > { %20128 = vmatprep.mubr.f32.mxu1 %v25872_v55 }
 0x21c   : > { %21484 = vmatmul.mubr.f32.vlgmr.msra.gmra.mrb[0].mxu0 %v24879_v2  ;;  %v30457_v2 = vld [vmem:[#allocation75_spill] sm:$0xff] }
 0x21d   : > { %21486 = vmatprep.mubr.f32.mxu0 %v24885_v39  ;;  %21532 = vmatpush3.msra.mxu0 %v25964_v53  ;;  %v30458_v39 = vld [vmem:[#allocation126_spill] sm:$0xff] }
 0x21e   : > { %20129 = vmatmul.mubr.f32.gmra.mrb[30].mxu1 %v25890_v31  ;;  %21581 = vmatprep.subr.mxu0 %v26042_v36  ;;  %v30459_v31 = vld [vmem:[#allocation129_spill] sm:$0xff] }
 0x21f   : > { %20133 = vmatprep.mubr.f32.mxu1 %v30454_v18 }
 0x220   : > { %21487 = vmatmul.mubr.f32.gmra.mrb[2].mxu0 %v30417_v30  ;;  %v30460_v30 = vld [vmem:[#allocation135_spill] sm:$0xff] }
 0x221   : > { %21489 = vmatprep.mubr.f32.mxu0 %v30418_v0  ;;  %v30461_v0 = vld [vmem:[#allocation142_spill] sm:$0xff] }
 0x222   : > { %20134 = vmatmul.mubr.f32.vlgmr.msra.gmra.mrb[0].mxu1 %v30455_v29 }
 0x223   : > { %20182 = vmatpush3.msra.mxu1 %v30422_v6  ;;  %20136 = vmatprep.mubr.f32.mxu1 %v30456_v37 }
 0x224   : > { %21490 = vmatmul.mubr.f32.gmra.mrb[4].mxu0 %v30421_v43  ;;  %20231 = vmatprep.subr.mxu1 %v30457_v2  ;;  %v30462_v43 = vld [vmem:[#allocation150_spill] sm:$0xff] }
 0x225   : > { %21492 = vmatprep.mubr.f32.mxu0 %v30423_v63  ;;  %v30463_v63 = vld [vmem:[#allocation13_spill] sm:$0xff] }
 0x226   : > { %20137 = vmatmul.mubr.f32.gmra.mrb[2].mxu1 %v30458_v39 }
 0x227   : > { %20139 = vmatprep.mubr.f32.mxu1 %v30459_v31 }
 0x228   : > { %21493 = vmatmul.mubr.f32.gmra.mrb[6].mxu0 %v30426_v1  ;;  %v30464_v1 = vld [vmem:[#allocation154_spill] sm:$0xff] }
 0x229   : > { %21495 = vmatprep.mubr.f32.mxu0 %v30427_v62  ;;  %v30465_v62 = vld [vmem:[#allocation34_spill] sm:$0xff] }
 0x22a   : > { %20140 = vmatmul.mubr.f32.gmra.mrb[4].mxu1 %v25486_v52 }
 0x22b   : > { %20142 = vmatprep.mubr.f32.mxu1 %v30460_v30 }
 0x22c   : > { %21496 = vmatmul.mubr.f32.gmra.mrb[8].mxu0 %v30429_v9  ;;  %v30490_v9 = vld [vmem:[#allocation139_spill] sm:$0xff] }
 0x22d   : > { %21498 = vmatprep.mubr.f32.mxu0 %v30430_v26  ;;  %v30466_v26 = vld [vmem:[#allocation167_spill] sm:$0xff] }
 0x22e   : > { %20143 = vmatmul.mubr.f32.gmra.mrb[6].mxu1 %v30461_v0 }
 0x22f   : > { %20145 = vmatprep.mubr.f32.mxu1 %v30462_v43 }
 0x230   : > { %21499 = vmatmul.mubr.f32.gmra.mrb[10].mxu0 %v30432_v8  ;;  %v30467_v8 = vld [vmem:[#allocation168_spill] sm:$0xff] }
 0x231   : > { %21501 = vmatprep.mubr.f32.mxu0 %v30433_v15  ;;  %v30468_v15 = vld [vmem:[#allocation176_spill] sm:$0xff] }
 0x232   : > { %20146 = vmatmul.mubr.f32.gmra.mrb[8].mxu1 %v30463_v63 }
 0x233   : > { %20148 = vmatprep.mubr.f32.mxu1 %v30464_v1 }
 0x234   : > { %21502 = vmatmul.mubr.f32.gmra.mrb[12].mxu0 %v30434_v28  ;;  %v30469_v28 = vld [vmem:[#allocation180_spill] sm:$0xff] }
 0x235   : > { %21504 = vmatprep.mubr.f32.mxu0 %v30435_v23  ;;  %v30470_v23 = vld [vmem:[#allocation184_spill] sm:$0xff] }
 0x236   : > { %20149 = vmatmul.mubr.f32.gmra.mrb[10].mxu1 %v30465_v62 }
 0x237   : > { %20151 = vmatprep.mubr.f32.mxu1 %v25602_v46 }
 0x238   : > { %21505 = vmatmul.mubr.f32.gmra.mrb[14].mxu0 %v30436_v4  ;;  %v30471_v4 = vld [vmem:[#allocation188_spill] sm:$0xff] }
 0x239   : > { %21507 = vmatprep.mubr.f32.mxu0 %v30437_v24  ;;  %v30472_v24 = vld [vmem:[#allocation195_spill] sm:$0xff] }
 0x23a   : > { %20152 = vmatmul.mubr.f32.gmra.mrb[12].mxu1 %v30466_v26 }
 0x23b   : > { %20154 = vmatprep.mubr.f32.mxu1 %v30467_v8 }
 0x23c   : > { %21508 = vmatmul.mubr.f32.gmra.mrb[16].mxu0 %v30438_v58  ;;  %v30473_v58 = vld [vmem:[#allocation197_spill] sm:$0xff] }
 0x23d   : > { %21510 = vmatprep.mubr.f32.mxu0 %v30439_v56  ;;  %v30474_v56 = vld [vmem:[#allocation198_spill] sm:$0xff] }
 0x23e   : > { %20155 = vmatmul.mubr.f32.gmra.mrb[14].mxu1 %v30468_v15 }
 0x23f   : > { %20157 = vmatprep.mubr.f32.mxu1 %v30469_v28 }
 0x240   : > { %21511 = vmatmul.mubr.f32.gmra.mrb[18].mxu0 %v30440_v48  ;;  %v30475_v48 = vld [vmem:[#allocation199_spill] sm:$0xff] }
 0x241   : > { %21513 = vmatprep.mubr.f32.mxu0 %v30441_v42  ;;  %v30476_v42 = vld [vmem:[#allocation19_spill] sm:$0xff] }
 0x242   : > { %20158 = vmatmul.mubr.f32.gmra.mrb[16].mxu1 %v30470_v23 }
 0x243   : > { %20160 = vmatprep.mubr.f32.mxu1 %v30471_v4 }
 0x244   : > { %21514 = vmatmul.mubr.f32.gmra.mrb[20].mxu0 %v30442_v54  ;;  %v30477_v54 = vld [vmem:[#allocation159_spill] sm:$0xff] }
 0x245   : > { %21516 = vmatprep.mubr.f32.mxu0 %v30443_v27  ;;  %v30478_v27 = vld [vmem:[#allocation62_spill] sm:$0xff] }
 0x246   : > { %20161 = vmatmul.mubr.f32.gmra.mrb[18].mxu1 %v30472_v24 }
 0x247   : > { %20163 = vmatprep.mubr.f32.mxu1 %v30473_v58 }
 0x248   : > { %21517 = vmatmul.mubr.f32.gmra.mrb[22].mxu0 %v30444_v38  ;;  %v30479_v38 = vand.u32 4294901760, %v30454_v18  ;;  %v30486_v18 = vand.u32 4294901760, %v30458_v39  ;;  %v30495_v39 = vld [vmem:[#allocation156_spill] sm:$0xff] }
 0x249   : > { %21519 = vmatprep.mubr.f32.mxu0 %v30445_v14  ;;  %v30482_v14 = vand.u32 4294901760, %v30455_v29  ;;  %v30491_v29 = vld [vmem:[#allocation147_spill] sm:$0xff] }
 0x24a   : > { %20164 = vmatmul.mubr.f32.gmra.mrb[20].mxu1 %v30474_v56 }
 0x24b   : > { %20166 = vmatprep.mubr.f32.mxu1 %v30475_v48 }
 0x24c   : > { %21520 = vmatmul.mubr.f32.gmra.mrb[24].mxu0 %v30446_v11  ;;  %v30483_v11 = vand.u32 4294901760, %v30456_v37  ;;  %v30492_v37 = vld [vmem:[#allocation190_spill] sm:$0xff] }
 0x24d   : > { %21522 = vmatprep.mubr.f32.mxu0 %v30447_v51  ;;  %v30484_v51 = vld [vmem:[#allocation177_spill] sm:$0xff] }
 0x24e   : > { %20167 = vmatmul.mubr.f32.gmra.mrb[22].mxu1 %v25787_v57 }
 0x24f   : > { %20169 = vmatprep.mubr.f32.mxu1 %v25796_v40 }
 0x250   : > { %21523 = vmatmul.mubr.f32.gmra.mrb[26].mxu0 %v30448_v12  ;;  %v30480_v12 = vld [vmem:[#allocation170_spill] sm:$0xff] }
 0x251   : > { %21525 = vmatprep.mubr.f32.mxu0 %v30449_v19  ;;  %v30485_v19 = vld [vmem:[#allocation178_spill] sm:$0xff] }
 0x252   : > { %20170 = vmatmul.mubr.f32.gmra.mrb[24].mxu1 %v25829_v21 }
 0x253   : > { %20172 = vmatprep.mubr.f32.mxu1 %v25837_v60 }
 0x254   : > { %21526 = vmatmul.mubr.f32.gmra.mrb[28].mxu0 %v30451_v5  ;;  %v30481_v5 = vld [vmem:[#allocation171_spill] sm:$0xff] }
 0x255   : > { %21528 = vmatprep.mubr.f32.mxu0 %v30452_v49  ;;  %v30489_v49 = vld [vmem:[#allocation186_spill] sm:$0xff] }
 0x256   : > { %20173 = vmatmul.mubr.f32.gmra.mrb[26].mxu1 %v25861_v10 }
 0x257   : > { %20175 = vmatprep.mubr.f32.mxu1 %v25870_v44 }
 0x258   : > { %21529 = vmatmul.mubr.f32.gmra.mrb[30].mxu0 %v30453_v50  ;;  %v30487_v50 = vld [vmem:[#allocation133_spill] sm:$0xff] }
 0x259   : > { %21533 = vmatprep.mubr.f32.mxu0 %v30476_v42  ;;  %v30494_v42 = vld [vmem:[#allocation12_spill] sm:$0xff] }
 0x25a   : > { %20176 = vmatmul.mubr.f32.gmra.mrb[28].mxu1 %v25888_v35  ;;  %v30561_v35 = vld [vmem:[#allocation224_spill] sm:$0xff] }
 0x25b   : > { %20178 = vmatprep.mubr.f32.mxu1 %v25901_v41  ;;  %v30560_v41 = vld [vmem:[#allocation209_spill] sm:$0xff] }
 0x25c   : > { %21534 = vmatmul.mubr.f32.vlgmr.msra.gmra.mrb[0].mxu0 %v30477_v54  ;;  %v30496_v54 = vld [vmem:[#allocation201_spill] sm:$0xff] }
 0x25d   : > { %21536 = vmatprep.mubr.f32.mxu0 %v30478_v27  ;;  %21582 = vmatpush3.msra.mxu0 %v26042_v36  ;;  %v30488_v36 = vld [vmem:[#allocation182_spill] sm:$0xff]  ;;  %v30497_v27 = vld [vmem:[#allocation204_spill] sm:$0xff] }
 0x25e   : > { %20179 = vmatmul.mubr.f32.gmra.mrb[30].mxu1 %v25916_v20  ;;  %21631 = vmatprep.subr.mxu0 %v26023_v61  ;;  %v30559_v20 = vld [vmem:[#allocation203_spill] sm:$0xff] }
 0x25f   : > { %20183 = vmatprep.mubr.f32.mxu1 %v30479_v38  ;;  %v30498_v38 = vld [vmem:[#allocation47_spill] sm:$0xff] }
 0x260   : > { %21537 = vmatmul.mubr.f32.gmra.mrb[2].mxu0 %v30480_v12  ;;  %v30499_v12 = vld [vmem:[#allocation51_spill] sm:$0xff] }
 0x261   : > { %21539 = vmatprep.mubr.f32.mxu0 %v30481_v5  ;;  %v30500_v5 = vld [vmem:[#allocation208_spill] sm:$0xff] }
 0x262   : > { %20184 = vmatmul.mubr.f32.vlgmr.msra.gmra.mrb[0].mxu1 %v30482_v14  ;;  %v30501_v14 = vld [vmem:[#allocation166_spill] sm:$0xff] }
 0x263   : > { %20232 = vmatpush3.msra.mxu1 %v30457_v2  ;;  %20186 = vmatprep.mubr.f32.mxu1 %v30483_v11  ;;  %v30493_v2 = vld [vmem:[#allocation191_spill] sm:$0xff]  ;;  %v30502_v11 = vld [vmem:[#allocation172_spill] sm:$0xff] }
 0x264   : > { %21540 = vmatmul.mubr.f32.gmra.mrb[4].mxu0 %v30484_v51  ;;  %20281 = vmatprep.subr.mxu1 %v30422_v6  ;;  %v17874_v51 = vld [vmem:[%s24204_s21 + $0x180] sm:$0xff] }
 0x265   : > { %21542 = vmatprep.mubr.f32.mxu0 %v30485_v19  ;;  %v30503_v19 = vld [vmem:[#allocation212_spill] sm:$0xff] }
 0x266   : > { %20187 = vmatmul.mubr.f32.gmra.mrb[2].mxu1 %v30486_v18  ;;  %v30504_v18 = vld [vmem:[#allocation215_spill] sm:$0xff] }
 0x267   : > { %20189 = vmatprep.mubr.f32.mxu1 %v30487_v50  ;;  %v30554_v50 = vld [vmem:[#allocation181_spill] sm:$0xff] }
 0x268   : > { %21543 = vmatmul.mubr.f32.gmra.mrb[6].mxu0 %v30488_v36  ;;  %v30505_v36 = vld [vmem:[#allocation174_spill] sm:$0xff] }
 0x269   : > { %21545 = vmatprep.mubr.f32.mxu0 %v30489_v49  ;;  %v11874_v49 = vsel %vm238_vm0, %v17874_v51, 0 }
 0x26a   : > { %20190 = vmatmul.mubr.f32.gmra.mrb[4].mxu1 %v30490_v9  ;;  %v30553_v9 = vld [vmem:[#allocation179_spill] sm:$0xff] }
 0x26b   : > { %20192 = vmatprep.mubr.f32.mxu1 %v30491_v29  ;;  %v30552_v29 = vld [vmem:[#allocation173_spill] sm:$0xff] }
 0x26c   : > { %21546 = vmatmul.mubr.f32.gmra.mrb[8].mxu0 %v30492_v37  ;;  %v17875_v37 = vld [vmem:[%s24204_s21 + $0x188] sm:$0xff] }
 0x26d   : > { %21548 = vmatprep.mubr.f32.mxu0 %v30493_v2  ;;  %v30506_v2 = vld [vmem:[#allocation175_spill] sm:$0xff] }
 0x26e   : > { %20193 = vmatmul.mubr.f32.gmra.mrb[6].mxu1 %v30494_v42  ;;  %v30551_v42 = vld [vmem:[#allocation169_spill] sm:$0xff] }
 0x26f   : > { %20195 = vmatprep.mubr.f32.mxu1 %v30495_v39  ;;  %v30550_v39 = vld [vmem:[#allocation43_spill] sm:$0xff] }
 0x270   : > { %21549 = vmatmul.mubr.f32.gmra.mrb[10].mxu0 %v30496_v54  ;;  %v17876_v54 = vld [vmem:[%s24204_s21 + $0x198] sm:$0xff] }
 0x271   : > { %21551 = vmatprep.mubr.f32.mxu0 %v30497_v27  ;;  %v26159_v27 = vand.u32 4294901760, %v11874_v49 }
 0x272   : > { %20196 = vmatmul.mubr.f32.gmra.mrb[8].mxu1 %v30498_v38  ;;  %v30529_v38 = vld [vmem:[#allocation218_spill] sm:$0xff] }
 0x273   : > { %20198 = vmatprep.mubr.f32.mxu1 %v30499_v12  ;;  %30508 = vst [vmem:[#allocation130_spill] sm:$0xff] %v26159_v27 }
 0x274   : > { %21552 = vmatmul.mubr.f32.gmra.mrb[12].mxu0 %v30500_v5  ;;  %v11877_v5 = vsel %vm238_vm0, %v17875_v37, 0 }
 0x275   : > { %21554 = vmatprep.mubr.f32.mxu0 %v25801_v17  ;;  %v30507_v17 = vld [vmem:[#allocation217_spill] sm:$0xff]  ;;  %v26167_v51 = vand.u32 4294901760, %v11877_v5 }
 0x276   : > { %20199 = vmatmul.mubr.f32.gmra.mrb[10].mxu1 %v30501_v14  ;;  %v30526_v14 = vld [vmem:[#allocation211_spill] sm:$0xff] }
 0x277   : > { %20201 = vmatprep.mubr.f32.mxu1 %v30502_v11  ;;  %v30509_v11 = vld [vmem:[#allocation183_spill] sm:$0xff]  ;;  %30511 = vst [vmem:[#allocation132_spill] sm:$0xff] %v26167_v51 }
 0x278   : > { %21555 = vmatmul.mubr.f32.gmra.mrb[14].mxu0 %v30503_v19  ;;  %v11880_v19 = vsel %vm238_vm0, %v17876_v54, 0  ;;  %v26180_v54 = vsub.f32 %v11877_v5, %v26167_v51 }
 0x279   : > { %21557 = vmatprep.mubr.f32.mxu0 %v30504_v18  ;;  %v17877_v18 = vld [vmem:[%s24204_s21 + $0x1a0] sm:$0xff] }
 0x27a   : > { %20202 = vmatmul.mubr.f32.gmra.mrb[12].mxu1 %v30505_v36  ;;  %v30510_v36 = vld [vmem:[#allocation187_spill] sm:$0xff]  ;;  %v11883_v37 = vsel %vm238_vm0, %v17877_v18, 0  ;;  %30516 = vst [vmem:[#allocation136_spill] sm:$0xff] %v26180_v54  ;;  %v30520_v18 = vld [vmem:[#allocation205_spill] sm:$0xff] }
 0x27b   : > { %20204 = vmatprep.mubr.f32.mxu1 %v30506_v2  ;;  %v30514_v2 = vld [vmem:[#allocation194_spill] sm:$0xff] }
 0x27c   : > { %21558 = vmatmul.mubr.f32.gmra.mrb[16].mxu0 %v25848_v45  ;;  %v26171_v45 = vsub.f32 %v11874_v49, %v26159_v27 }
 0x27d   : > { %21560 = vmatprep.mubr.f32.mxu0 %v30507_v17  ;;  %v26173_v17 = vand.u32 4294901760, %v11880_v19 }
 0x27e   : > { %20205 = vmatmul.mubr.f32.gmra.mrb[14].mxu1 %v30509_v11  ;;  %30512 = vst [vmem:[#allocation70_spill] sm:$0xff] %v26171_v45  ;;  %v30515_v11 = vld [vmem:[#allocation196_spill] sm:$0xff] }
 0x27f   : > { %20207 = vmatprep.mubr.f32.mxu1 %v30510_v36  ;;  %30513 = vst [vmem:[#allocation134_spill] sm:$0xff] %v26173_v17  ;;  %v26187_v49 = vsub.f32 %v11880_v19, %v26173_v17  ;;  %v30519_v36 = vld [vmem:[#allocation202_spill] sm:$0xff] }
 0x280   : > { %21561 = vmatmul.mubr.f32.gmra.mrb[18].mxu0 %v25879_v32  ;;  %v26182_v32 = vand.u32 4294901760, %v11883_v37 }
 0x281   : > { %21563 = vmatprep.mubr.f32.mxu0 %v25893_v47  ;;  %v29456_v47 = vand.u32 4294901760, %v26171_v45  ;;  %30518 = vst [vmem:[#allocation140_spill] sm:$0xff] %v26187_v49  ;;  %v29458_v19 = vand.u32 4294901760, %v26187_v49 }
 0x282   : > { %20208 = vmatmul.mubr.f32.gmra.mrb[16].mxu1 %v30514_v2  ;;  %30517 = vst [vmem:[#allocation138_spill] sm:$0xff] %v26182_v32  ;;  %v26194_v5 = vsub.f32 %v11883_v37, %v26182_v32  ;;  %v30525_v2 = vld [vmem:[#allocation232_spill] sm:$0xff] }
 0x283   : > { %20210 = vmatprep.mubr.f32.mxu1 %v30515_v11  ;;  %v30522_v11 = vld [vmem:[#allocation206_spill] sm:$0xff] }
 0x284   : > { %21564 = vmatmul.mubr.f32.gmra.mrb[20].mxu0 %v25908_v3  ;;  %v29457_v3 = vand.u32 4294901760, %v26180_v54  ;;  %30521 = vst [vmem:[#allocation141_spill] sm:$0xff] %v26194_v5  ;;  %v29459_v37 = vand.u32 4294901760, %v26194_v5 }
 0x285   : > { %21566 = vmatprep.mubr.f32.mxu0 %v25919_v25  ;;  %v12234_v25 = vsub.f32 %v26171_v45, %v29456_v47  ;;  %v12254_v47 = vsub.f32 %v26187_v49, %v29458_v19  ;;  %v30531_v19 = vld [vmem:[#allocation222_spill] sm:$0xff]  ;;  %v30556_v49 = vld [vmem:[#allocation189_spill] sm:$0xff] }
 0x286   : > { %20211 = vmatmul.mubr.f32.gmra.mrb[18].mxu1 %v30519_v36  ;;  %v30523_v36 = vld [vmem:[#allocation207_spill] sm:$0xff]  ;;  %v30558_v45 = vld [vmem:[#allocation193_spill] sm:$0xff] }
 0x287   : > { %20213 = vmatprep.mubr.f32.mxu1 %v30520_v18  ;;  %v30524_v18 = vld [vmem:[#allocation231_spill] sm:$0xff]  ;;  %v12255_v12 = vand.u32 4294901760, %v12254_v47  ;;  %v30537_v47 = vld [vmem:[#allocation125_spill] sm:$0xff] }
 0x288   : > { %21567 = vmatmul.mubr.f32.gmra.mrb[22].mxu0 %v25931_v59  ;;  %v12244_v59 = vsub.f32 %v26180_v54, %v29457_v3  ;;  %v12264_v3 = vsub.f32 %v26194_v5, %v29459_v37  ;;  %v30555_v5 = vld [vmem:[#allocation185_spill] sm:$0xff]  ;;  %v30557_v54 = vld [vmem:[#allocation192_spill] sm:$0xff] }
 0x289   : > { %21569 = vmatprep.mubr.f32.mxu0 %v25939_v13  ;;  %v12235_v13 = vand.u32 4294901760, %v12234_v25 }
 0x28a   : > { %20214 = vmatmul.mubr.f32.gmra.mrb[20].mxu1 %v30522_v11  ;;  %v30527_v11 = vld [vmem:[#allocation213_spill] sm:$0xff]  ;;  %v12265_v25 = vand.u32 4294901760, %v12264_v3  ;;  %v30538_v3 = vld [vmem:[#allocation230_spill] sm:$0xff] }
 0x28b   : > { %20216 = vmatprep.mubr.f32.mxu1 %v30523_v36  ;;  %v30528_v36 = vld [vmem:[#allocation233_spill] sm:$0xff] }
 0x28c   : > { %21570 = vmatmul.mubr.f32.gmra.mrb[24].mxu0 %v30524_v18  ;;  %v12245_v18 = vand.u32 4294901760, %v12244_v59  ;;  %v30534_v59 = vld [vmem:[#allocation227_spill] sm:$0xff] }
 0x28d   : > { %21572 = vmatprep.mubr.f32.mxu0 %v30525_v2  ;;  %v30530_v2 = vld [vmem:[#allocation220_spill] sm:$0xff] }
 0x28e   : > { %20217 = vmatmul.mubr.f32.gmra.mrb[22].mxu1 %v30526_v14  ;;  %v30532_v14 = vld [vmem:[#allocation225_spill] sm:$0xff] }
 0x28f   : > { %20219 = vmatprep.mubr.f32.mxu1 %v30527_v11  ;;  %v30535_v11 = vld [vmem:[#allocation229_spill] sm:$0xff] }
 0x290   : > { %21573 = vmatmul.mubr.f32.gmra.mrb[26].mxu0 %v30528_v36  ;;  %v30533_v36 = vld [vmem:[#allocation109_spill] sm:$0xff] }
 0x291   : > { %21575 = vmatprep.mubr.f32.mxu0 %v12235_v13  ;;  %v30536_v13 = vld [vmem:[#allocation127_spill] sm:$0xff] }
 0x292   : > { %20220 = vmatmul.mubr.f32.gmra.mrb[24].mxu1 %v30529_v38  ;;  %v30548_v38 = vld [vmem:[#allocation158_spill] sm:$0xff] }
 0x293   : > { %20222 = vmatprep.mubr.f32.mxu1 %v30530_v2  ;;  %v30547_v2 = vld [vmem:[#allocation151_spill] sm:$0xff] }
 0x294   : > { %21576 = vmatmul.mubr.f32.gmra.mrb[28].mxu0 %v12245_v18  ;;  %v30539_v18 = vld [vmem:[#allocation78_spill] sm:$0xff] }
 0x295   : > { %21578 = vmatprep.mubr.f32.mxu0 %v12255_v12  ;;  %v17746_v12 = vld [vmem:[%s28966_s1 + $0x10] sm:$0xff] }
 0x296   : > { %20223 = vmatmul.mubr.f32.gmra.mrb[26].mxu1 %v30531_v19  ;;  %v26235_v37 = vand.u32 4294901760, %v17746_v12  ;;  %v30546_v19 = vld [vmem:[#allocation99_spill] sm:$0xff] }
 0x297   : > { %20225 = vmatprep.mubr.f32.mxu1 %v30532_v14  ;;  %v30544_v14 = vld [vmem:[#allocation144_spill] sm:$0xff] }
 0x298   : > { %21579 = vmatmul.mubr.f32.gmra.mrb[30].mxu0 %v12265_v25  ;;  %v30540_v25 = vld [vmem:[#allocation131_spill] sm:$0xff] }
 0x299   : > { %21583 = vmatprep.mubr.f32.mxu0 %v30533_v36 }
 0x29a   : > { %20226 = vmatmul.mubr.f32.gmra.mrb[28].mxu1 %v30534_v59  ;;  %v30542_v59 = vld [vmem:[#allocation83_spill] sm:$0xff] }
 0x29b   : > { %20228 = vmatprep.mubr.f32.mxu1 %v30535_v11  ;;  %v30541_v11 = vld [vmem:[#allocation137_spill] sm:$0xff] }
 0x29c   : > { %21584 = vmatmul.mubr.f32.vlgmr.msra.gmra.mrb[0].mxu0 %v30536_v13 }
 0x29d   : > { %21586 = vmatprep.mubr.f32.mxu0 %v30537_v47  ;;  %21632 = vmatpush3.msra.mxu0 %v26023_v61  ;;  %v30543_v61 = vld [vmem:[#allocation91_spill] sm:$0xff] }
 0x29e   : > { %20229 = vmatmul.mubr.f32.gmra.mrb[30].mxu1 %v30538_v3  ;;  %21681 = vmatprep.subr.mxu0 %v25964_v53  ;;  %v30545_v3 = vld [vmem:[#allocation145_spill] sm:$0xff] }
 0x29f   : > { %20233 = vmatprep.mubr.f32.mxu1 %v30539_v18 }
 0x2a0   : > { %21587 = vmatmul.mubr.f32.gmra.mrb[2].mxu0 %v30540_v25 }
 0x2a1   : > { %21589 = vmatprep.mubr.f32.mxu0 %v30541_v11 }
 0x2a2   : > { %20234 = vmatmul.mubr.f32.vlgmr.msra.gmra.mrb[0].mxu1 %v30542_v59 }
 0x2a3   : > { %20282 = vmatpush3.msra.mxu1 %v30422_v6  ;;  %20236 = vmatprep.mubr.f32.mxu1 %v30543_v61  ;;  %v30549_v6 = vld [vmem:[#allocation37_spill] sm:$0xff] }
 0x2a4   : > { %21590 = vmatmul.mubr.f32.gmra.mrb[4].mxu0 %v30544_v14  ;;  %20331 = vmatprep.subr.mxu1 %v26235_v37 }
 0x2a5   : > { %21592 = vmatprep.mubr.f32.mxu0 %v30545_v3 }
 0x2a6   : > { %20237 = vmatmul.mubr.f32.gmra.mrb[2].mxu1 %v30546_v19 }
 0x2a7   : > { %20239 = vmatprep.mubr.f32.mxu1 %v30533_v36 }
 0x2a8   : > { %21593 = vmatmul.mubr.f32.gmra.mrb[6].mxu0 %v30547_v2 }
 0x2a9   : > { %21595 = vmatprep.mubr.f32.mxu0 %v30548_v38 }
 0x2aa   : > { %20240 = vmatmul.mubr.f32.gmra.mrb[4].mxu1 %v30536_v13 }
 0x2ab   : > { %20242 = vmatprep.mubr.f32.mxu1 %v30537_v47 }
 0x2ac   : > { %21596 = vmatmul.mubr.f32.gmra.mrb[8].mxu0 %v30549_v6 }
 0x2ad   : > { %21598 = vmatprep.mubr.f32.mxu0 %v30550_v39 }
 0x2ae   : > { %20243 = vmatmul.mubr.f32.gmra.mrb[6].mxu1 %v30540_v25 }
 0x2af   : > { %20245 = vmatprep.mubr.f32.mxu1 %v30541_v11 }
 0x2b0   : > { %21599 = vmatmul.mubr.f32.gmra.mrb[10].mxu0 %v30551_v42 }
 0x2b1   : > { %21601 = vmatprep.mubr.f32.mxu0 %v30552_v29 }
 0x2b2   : > { %20246 = vmatmul.mubr.f32.gmra.mrb[8].mxu1 %v30544_v14 }
 0x2b3   : > { %20248 = vmatprep.mubr.f32.mxu1 %v30545_v3 }
 0x2b4   : > { %21602 = vmatmul.mubr.f32.gmra.mrb[12].mxu0 %v30553_v9 }
 0x2b5   : > { %21604 = vmatprep.mubr.f32.mxu0 %v30554_v50 }
 0x2b6   : > { %20249 = vmatmul.mubr.f32.gmra.mrb[10].mxu1 %v30547_v2 }
 0x2b7   : > { %20251 = vmatprep.mubr.f32.mxu1 %v30548_v38 }
 0x2b8   : > { %21605 = vmatmul.mubr.f32.gmra.mrb[14].mxu0 %v30555_v5 }
 0x2b9   : > { %21607 = vmatprep.mubr.f32.mxu0 %v30556_v49 }
 0x2ba   : > { %20252 = vmatmul.mubr.f32.gmra.mrb[12].mxu1 %v30549_v6 }
 0x2bb   : > { %20254 = vmatprep.mubr.f32.mxu1 %v30550_v39 }
 0x2bc   : > { %21608 = vmatmul.mubr.f32.gmra.mrb[16].mxu0 %v30557_v54 }
 0x2bd   : > { %21610 = vmatprep.mubr.f32.mxu0 %v30558_v45 }
 0x2be   : > { %20255 = vmatmul.mubr.f32.gmra.mrb[14].mxu1 %v30551_v42 }
 0x2bf   : > { %20257 = vmatprep.mubr.f32.mxu1 %v30552_v29 }
 0x2c0   : > { %21611 = vmatmul.mubr.f32.gmra.mrb[18].mxu0 %v25752_v22 }
 0x2c1   : > { %21613 = vmatprep.mubr.f32.mxu0 %v30559_v20 }
 0x2c2   : > { %20258 = vmatmul.mubr.f32.gmra.mrb[16].mxu1 %v30553_v9 }
 0x2c3   : > { %20260 = vmatprep.mubr.f32.mxu1 %v30554_v50 }
 0x2c4   : > { %21614 = vmatmul.mubr.f32.gmra.mrb[20].mxu0 %v30560_v41 }
 0x2c5   : > { %21616 = vmatprep.mubr.f32.mxu0 %v25805_v16 }
 0x2c6   : > { %20261 = vmatmul.mubr.f32.gmra.mrb[18].mxu1 %v30555_v5 }
 0x2c7   : > { %20263 = vmatprep.mubr.f32.mxu1 %v30556_v49 }
 0x2c8   : > { %21617 = vmatmul.mubr.f32.gmra.mrb[22].mxu0 %v25831_v33 }
 0x2c9   : > { %21619 = vmatprep.mubr.f32.mxu0 %v25839_v7 }
 0x2ca   : > { %20264 = vmatmul.mubr.f32.gmra.mrb[20].mxu1 %v30557_v54 }
 0x2cb   : > { %20266 = vmatprep.mubr.f32.mxu1 %v30558_v45  ;;  %v26292_v45 = vsub.f32 %v17746_v12, %v26235_v37 }
 0x2cc   : > { %21620 = vmatmul.mubr.f32.gmra.mrb[24].mxu0 %v25863_v34 }
 0x2cd   : > { %21622 = vmatprep.mubr.f32.mxu0 %v25872_v55 }
 0x2ce   : > { %20267 = vmatmul.mubr.f32.gmra.mrb[22].mxu1 %v25752_v22 }
 0x2cf   : > { %20269 = vmatprep.mubr.f32.mxu1 %v30559_v20  ;;  %v26299_v20 = vand.u32 4294901760, %v26292_v45 }
 0x2d0   : > { %21623 = vmatmul.mubr.f32.gmra.mrb[26].mxu0 %v30561_v35 }
 0x2d1   : > { %21625 = vmatprep.mubr.f32.mxu0 %v26159_v27  ;;  %30562 = vst [vmem:[#allocation143_spill] sm:$0xff] %v26299_v20  ;;  %v4509_v12 = vsub.f32 %v26292_v45, %v26299_v20  ;;  %v3999_v20 = vld [vmem:[%s24204_s21 + $0x7a] sm:$0xff] }
 0x2d2   : > { %20270 = vmatmul.mubr.f32.gmra.mrb[24].mxu1 %v30560_v41 }
 0x2d3   : > { %20272 = vmatprep.mubr.f32.mxu1 %v25805_v16 }
 0x2d4   : > { %21626 = vmatmul.mubr.f32.gmra.mrb[28].mxu0 %v26167_v51 }
 0x2d5   : > { %21628 = vmatprep.mubr.f32.mxu0 %v26173_v17  ;;  %v30585_v17 = vld [vmem:[#allocation133_spill] sm:$0xff] }
 0x2d6   : > { %20273 = vmatmul.mubr.f32.gmra.mrb[26].mxu1 %v25831_v33 }
 0x2d7   : > { %20275 = vmatprep.mubr.f32.mxu1 %v25839_v7 }
 0x2d8   : > { %21629 = vmatmul.mubr.f32.gmra.mrb[30].mxu0 %v26182_v32  ;;  %v30563_v32 = vld [vmem:[#allocation128_spill] sm:$0xff] }
 0x2d9   : > { %21633 = vmatprep.mubr.f32.mxu0 %v30459_v31  ;;  %v26313_v31 = vand.u32 4294901760, %v4509_v12  ;;  %v3996_v12 = vld [vmem:[%s24204_s21 + $0x52] sm:$0xff] }
 0x2da   : > { %20276 = vmatmul.mubr.f32.gmra.mrb[28].mxu1 %v25863_v34 }
 0x2db   : > { %20278 = vmatprep.mubr.f32.mxu1 %v25872_v55 }
 0x2dc   : > { %21634 = vmatmul.mubr.f32.vlgmr.msra.gmra.mrb[0].mxu0 %v25486_v52  ;;  %v3989_v52 = vld [vmem:[%s24204_s21 + $0x2] sm:$0xff] }
 0x2dd   : > { %21636 = vmatprep.mubr.f32.mxu0 %v30460_v30  ;;  %21682 = vmatpush3.msra.mxu0 %v25964_v53 }
 0x2de   : > { %20279 = vmatmul.mubr.f32.gmra.mrb[30].mxu1 %v30561_v35  ;;  %21731 = vmatprep.subr.mxu0 %v30563_v32 }
 0x2df   : > { %20283 = vmatprep.mubr.f32.mxu1 %v30539_v18 }
 0x2e0   : > { %21637 = vmatmul.mubr.f32.gmra.mrb[2].mxu0 %v30461_v0 }
 0x2e1   : > { %21639 = vmatprep.mubr.f32.mxu0 %v30462_v43  ;;  %v3992_v43 = vld [vmem:[%s24204_s21 + $0x22] sm:$0xff] }
 0x2e2   : > { %20284 = vmatmul.mubr.f32.vlgmr.msra.gmra.mrb[0].mxu1 %v30542_v59 }
 0x2e3   : > { %20332 = vmatpush3.msra.mxu1 %v26235_v37  ;;  %20286 = vmatprep.mubr.f32.mxu1 %v30543_v61 }
 0x2e4   : > { %21640 = vmatmul.mubr.f32.gmra.mrb[4].mxu0 %v30463_v63  ;;  %20381 = vmatprep.subr.mxu1 %v26313_v31  ;;  %v30566_v63 = vld [vmem:[#allocation223_spill] sm:$0xff] }
 0x2e5   : > { %21642 = vmatprep.mubr.f32.mxu0 %v30464_v1  ;;  %v3993_v1 = vld [vmem:[%s24204_s21 + $0x32] sm:$0xff] }
 0x2e6   : > { %20287 = vmatmul.mubr.f32.gmra.mrb[2].mxu1 %v30546_v19 }
 0x2e7   : > { %20289 = vmatprep.mubr.f32.mxu1 %v30533_v36 }
 0x2e8   : > { %21643 = vmatmul.mubr.f32.gmra.mrb[6].mxu0 %v30465_v62 }
 0x2e9   : > { %21645 = vmatprep.mubr.f32.mxu0 %v25602_v46  ;;  %v4024_v46 = vsel %vm238_vm0, %v3989_v52, 0  ;;  %v30578_v52 = vld [vmem:[#allocation136_spill] sm:$0xff] }
 0x2ea   : > { %20290 = vmatmul.mubr.f32.gmra.mrb[4].mxu1 %v30536_v13 }
 0x2eb   : > { %20292 = vmatprep.mubr.f32.mxu1 %v30537_v47 }
 0x2ec   : > { %21646 = vmatmul.mubr.f32.gmra.mrb[8].mxu0 %v30466_v26 }
 0x2ed   : > { %21648 = vmatprep.mubr.f32.mxu0 %v30467_v8  ;;  %v4033_v8 = vsel %vm238_vm0, %v3992_v43, 0  ;;  %v3997_v43 = vld [vmem:[%s24204_s21 + $0x62] sm:$0xff] }
 0x2ee   : > { %20293 = vmatmul.mubr.f32.gmra.mrb[6].mxu1 %v30540_v25 }
 0x2ef   : > { %20295 = vmatprep.mubr.f32.mxu1 %v30541_v11 }
 0x2f0   : > { %21649 = vmatmul.mubr.f32.gmra.mrb[10].mxu0 %v30468_v15  ;;  %v30571_v15 = vld [vmem:[#allocation203_spill] sm:$0xff] }
 0x2f1   : > { %21651 = vmatprep.mubr.f32.mxu0 %v30469_v28  ;;  %v4036_v28 = vsel %vm238_vm0, %v3993_v1, 0 }
 0x2f2   : > { %20296 = vmatmul.mubr.f32.gmra.mrb[8].mxu1 %v30544_v14  ;;  %v26397_v18 = vand.u32 4294901760, %v4036_v28 }
 0x2f3   : > { %20298 = vmatprep.mubr.f32.mxu1 %v30545_v3 }
 0x2f4   : > { %21652 = vmatmul.mubr.f32.gmra.mrb[12].mxu0 %v30470_v23  ;;  %v3994_v23 = vld [vmem:[%s24204_s21 + $0x3a] sm:$0xff]  ;;  %30577 = vst [vmem:[#allocation21_spill] sm:$0xff] %v26397_v18 }
 0x2f5   : > { %21654 = vmatprep.mubr.f32.mxu0 %v30471_v4  ;;  %v30572_v4 = vld [vmem:[#allocation228_spill] sm:$0xff]  ;;  %v4039_v61 = vsel %vm238_vm0, %v3994_v23, 0  ;;  %v4045_v23 = vsel %vm238_vm0, %v3996_v12, 0 }
 0x2f6   : > { %20299 = vmatmul.mubr.f32.gmra.mrb[10].mxu1 %v30547_v2  ;;  %v26433_v1 = vand.u32 4294901760, %v4045_v23 }
 0x2f7   : > { %20301 = vmatprep.mubr.f32.mxu1 %v30548_v38 }
 0x2f8   : > { %21655 = vmatmul.mubr.f32.gmra.mrb[14].mxu0 %v30472_v24  ;;  %v30573_v24 = vld [vmem:[#allocation70_spill] sm:$0xff]  ;;  %30587 = vst [vmem:[#allocation162_spill] sm:$0xff] %v26433_v1 }
 0x2f9   : > { %21657 = vmatprep.mubr.f32.mxu0 %v30473_v58 }
 0x2fa   : > { %20302 = vmatmul.mubr.f32.gmra.mrb[12].mxu1 %v30549_v6 }
 0x2fb   : > { %20304 = vmatprep.mubr.f32.mxu1 %v30550_v39 }
 0x2fc   : > { %21658 = vmatmul.mubr.f32.gmra.mrb[16].mxu0 %v30474_v56  ;;  %v26389_v56 = vand.u32 4294901760, %v4033_v8 }
 0x2fd   : > { %21660 = vmatprep.mubr.f32.mxu0 %v30475_v48  ;;  %v3995_v48 = vld [vmem:[%s24204_s21 + $0x4a] sm:$0xff] }
 0x2fe   : > { %20305 = vmatmul.mubr.f32.gmra.mrb[14].mxu1 %v30551_v42  ;;  %30575 = vst [vmem:[#allocation18_spill] sm:$0xff] %v26389_v56 }
 0x2ff   : > { %20307 = vmatprep.mubr.f32.mxu1 %v30552_v29 }
 0x300   : > { %21661 = vmatmul.mubr.f32.gmra.mrb[18].mxu0 %v25787_v57  ;;  %v3990_v57 = vld [vmem:[%s24204_s21 + $0xa] sm:$0xff] }
 0x301   : > { %21663 = vmatprep.mubr.f32.mxu0 %v25796_v40  ;;  %v3991_v40 = vld [vmem:[%s24204_s21 + $0x1a] sm:$0xff]  ;;  %v4027_v30 = vsel %vm238_vm0, %v3990_v57, 0  ;;  %v30579_v57 = vld [vmem:[#allocation140_spill] sm:$0xff] }
 0x302   : > { %20308 = vmatmul.mubr.f32.gmra.mrb[16].mxu1 %v30553_v9  ;;  %v4030_v0 = vsel %vm238_vm0, %v3991_v40, 0  ;;  %v26372_v62 = vand.u32 4294901760, %v4027_v30  ;;  %v3998_v40 = vld [vmem:[%s24204_s21 + $0x6a] sm:$0xff] }
 0x303   : > { %20310 = vmatprep.mubr.f32.mxu1 %v30554_v50  ;;  %v26378_v26 = vand.u32 4294901760, %v4030_v0 }
 0x304   : > { %21664 = vmatmul.mubr.f32.gmra.mrb[20].mxu0 %v25829_v21  ;;  %v26363_v21 = vand.u32 4294901760, %v4024_v46  ;;  %30568 = vst [vmem:[#allocation148_spill] sm:$0xff] %v26372_v62  ;;  %v26387_v58 = vsub.f32 %v4027_v30, %v26372_v62  ;;  %v26407_v30 = vsub.f32 %v4033_v8, %v26389_v56 }
 0x305   : > { %21666 = vmatprep.mubr.f32.mxu0 %v25837_v60  ;;  %v30565_v60 = vld [vmem:[#allocation193_spill] sm:$0xff]  ;;  %30570 = vst [vmem:[#allocation152_spill] sm:$0xff] %v26378_v26  ;;  %v26395_v59 = vsub.f32 %v4030_v0, %v26378_v26  ;;  %v26409_v0 = vand.u32 4294901760, %v4039_v61 }
 0x306   : > { %20311 = vmatmul.mubr.f32.gmra.mrb[18].mxu1 %v30555_v5  ;;  %30564 = vst [vmem:[#allocation146_spill] sm:$0xff] %v26363_v21  ;;  %30574 = vst [vmem:[#allocation153_spill] sm:$0xff] %v26387_v58 }
 0x307   : > { %20313 = vmatprep.mubr.f32.mxu1 %v30556_v49  ;;  %30576 = vst [vmem:[#allocation155_spill] sm:$0xff] %v26395_v59  ;;  %30580 = vst [vmem:[#allocation157_spill] sm:$0xff] %v26407_v30  ;;  %v30589_v51 = vand.u32 4294901760, %v26395_v59 }
 0x308   : > { %21667 = vmatmul.mubr.f32.gmra.mrb[22].mxu0 %v25861_v10  ;;  %v30567_v10 = vld [vmem:[#allocation226_spill] sm:$0xff]  ;;  %30581 = vst [vmem:[#allocation25_spill] sm:$0xff] %v26409_v0 }
 0x309   : > { %21669 = vmatprep.mubr.f32.mxu0 %v25870_v44  ;;  %v26376_v44 = vsub.f32 %v4024_v46, %v26363_v21  ;;  %v4042_v46 = vsel %vm238_vm0, %v3995_v48, 0  ;;  %v4048_v48 = vsel %vm238_vm0, %v3997_v43, 0  ;;  %v4208_v27 = vsub.f32 %v26395_v59, %v30589_v51 }
 0x30a   : > { %20314 = vmatmul.mubr.f32.gmra.mrb[20].mxu1 %v30557_v54  ;;  %v26422_v8 = vand.u32 4294901760, %v4042_v46  ;;  %v30594_v51 = vand.u32 4294901760, %v26407_v30  ;;  %v26460_v59 = vsub.f32 %v4045_v23, %v26433_v1  ;;  %v30623_v54 = vld [vmem:[#allocation174_spill] sm:$0xff] }
 0x30b   : > { %20316 = vmatprep.mubr.f32.mxu1 %v30565_v60  ;;  %30569 = vst [vmem:[#allocation149_spill] sm:$0xff] %v26376_v44  ;;  %v29479_v19 = vand.u32 4294901760, %v26376_v44  ;;  %v30617_v60 = vld [vmem:[#allocation172_spill] sm:$0xff] }
 0x30c   : > { %21670 = vmatmul.mubr.f32.gmra.mrb[24].mxu0 %v30566_v63  ;;  %30583 = vst [vmem:[#allocation160_spill] sm:$0xff] %v26422_v8  ;;  %30595 = vst [vmem:[#allocation164_spill] sm:$0xff] %v26460_v59 }
 0x30d   : > { %21672 = vmatprep.mubr.f32.mxu0 %v30567_v10  ;;  %v4188_v63 = vsub.f32 %v26376_v44, %v29479_v19  ;;  %v26418_v10 = vsub.f32 %v4036_v28, %v26397_v18  ;;  %v26431_v28 = vsub.f32 %v4039_v61, %v26409_v0  ;;  %v30588_v44 = vand.u32 4294901760, %v26387_v58 }
 0x30e   : > { %20317 = vmatmul.mubr.f32.gmra.mrb[22].mxu1 %v25752_v22  ;;  %v26445_v61 = vsub.f32 %v4042_v46, %v26422_v8  ;;  %v26447_v19 = vand.u32 4294901760, %v4048_v48 }
 0x30f   : > { %20319 = vmatprep.mubr.f32.mxu1 %v30571_v15  ;;  %30582 = vst [vmem:[#allocation31_spill] sm:$0xff] %v26418_v10  ;;  %30586 = vst [vmem:[#allocation161_spill] sm:$0xff] %v26431_v28  ;;  %v4189_v12 = vand.u32 4294901760, %v4188_v63  ;;  %v4198_v43 = vsub.f32 %v26387_v58, %v30588_v44  ;;  %v4051_v63 = vsel %vm238_vm0, %v3998_v40, 0  ;;  %v30593_v44 = vld [vmem:[#allocation147_spill] sm:$0xff]  ;;  %v4001_v40 = vld [vmem:[%s24204_s21 + $0x92] sm:$0xff] }
 0x310   : > { %21673 = vmatmul.mubr.f32.gmra.mrb[26].mxu0 %v30572_v4  ;;  %v30584_v4 = vld [vmem:[#allocation141_spill] sm:$0xff]  ;;  %30590 = vst [vmem:[#allocation163_spill] sm:$0xff] %v26445_v61  ;;  %30591 = vst [vmem:[#allocation52_spill] sm:$0xff] %v26447_v19  ;;  %v26475_v58 = vsub.f32 %v4048_v48, %v26447_v19 }
 0x311   : > { %21675 = vmatprep.mubr.f32.mxu0 %v30573_v24 }
 0x312   : > { %20320 = vmatmul.mubr.f32.gmra.mrb[24].mxu1 %v30560_v41  ;;  %30599 = vst [vmem:[#allocation67_spill] sm:$0xff] %v26475_v58 }
 0x313   : > { %20322 = vmatprep.mubr.f32.mxu1 %v25805_v16  ;;  %v4060_v16 = vsel %vm238_vm0, %v4001_v40, 0 }
 0x314   : > { %21676 = vmatmul.mubr.f32.gmra.mrb[28].mxu0 %v30578_v52 }
 0x315   : > { %21678 = vmatprep.mubr.f32.mxu0 %v30579_v57 }
 0x316   : > { %20323 = vmatmul.mubr.f32.gmra.mrb[26].mxu1 %v25831_v33  ;;  %v30592_v33 = vld [vmem:[#allocation139_spill] sm:$0xff] }
 0x317   : > { %20325 = vmatprep.mubr.f32.mxu1 %v25839_v7  ;;  %v4000_v7 = vld [vmem:[%s24204_s21 + $0x82] sm:$0xff] }
 0x318   : > { %21679 = vmatmul.mubr.f32.gmra.mrb[30].mxu0 %v30584_v4 }
 0x319   : > { %21683 = vmatprep.mubr.f32.mxu0 %v30585_v17  ;;  %v4218_v17 = vsub.f32 %v26407_v30, %v30594_v51  ;;  %v4209_v51 = vand.u32 4294901760, %v4208_v27  ;;  %v30598_v30 = vand.u32 4294901760, %v26418_v10  ;;  %v30602_v27 = vand.u32 4294901760, %v26431_v28 }
 0x31a   : > { %20326 = vmatmul.mubr.f32.gmra.mrb[28].mxu1 %v25863_v34  ;;  %v4054_v34 = vsel %vm238_vm0, %v3999_v20, 0  ;;  %v4199_v20 = vand.u32 4294901760, %v4198_v43  ;;  %v4002_v43 = vld [vmem:[%s24204_s21 + $0x9a] sm:$0xff] }
 0x31b   : > { %20328 = vmatprep.mubr.f32.mxu1 %v25872_v55  ;;  %v4228_v46 = vsub.f32 %v26418_v10, %v30598_v30  ;;  %v30600_v55 = vld [vmem:[#allocation12_spill] sm:$0xff]  ;;  %v4238_v41 = vsub.f32 %v26431_v28, %v30602_v27  ;;  %v4063_v40 = vsel %vm238_vm0, %v4002_v43, 0  ;;  %v30606_v27 = vand.u32 4294901760, %v26445_v61  ;;  %v30609_v43 = vld [vmem:[#allocation51_spill] sm:$0xff] }
 0x31c   : > { %21684 = vmatmul.mubr.f32.vlgmr.msra.gmra.mrb[0].mxu0 %v30592_v33  ;;  %v26464_v33 = vand.u32 4294901760, %v4051_v63  ;;  %v4004_v28 = vld [vmem:[%s24204_s21 + $0xb2] sm:$0xff]  ;;  %v30614_v10 = vand.u32 4294901760, %v26475_v58 }
 0x31d   : > { %21686 = vmatprep.mubr.f32.mxu0 %v30593_v44  ;;  %21732 = vmatpush3.msra.mxu0 %v30563_v32  ;;  %v26466_v44 = vand.u32 4294901760, %v4054_v34  ;;  %v4057_v32 = vsel %vm238_vm0, %v4000_v7, 0  ;;  %v30601_v7 = vld [vmem:[#allocation156_spill] sm:$0xff]  ;;  %v4248_v30 = vsub.f32 %v26445_v61, %v30606_v27  ;;  %v4005_v27 = vld [vmem:[%s24204_s21 + $0xc2] sm:$0xff] }
 0x31e   : > { %20329 = vmatmul.mubr.f32.gmra.mrb[30].mxu1 %v30561_v35  ;;  %30596 = vst [vmem:[#allocation59_spill] sm:$0xff] %v26464_v33  ;;  %21781 = vmatprep.subr.mxu0 %v25964_v53  ;;  %v4003_v35 = vld [vmem:[%s24204_s21 + $0xaa] sm:$0xff]  ;;  %v26486_v23 = vand.u32 4294901760, %v4057_v32  ;;  %v26489_v48 = vsub.f32 %v4051_v63, %v26464_v33  ;;  %v26501_v63 = vand.u32 4294901760, %v4060_v16  ;;  %v4268_v15 = vsub.f32 %v26475_v58, %v30614_v10 }
 0x31f   : > { %30597 = vst [vmem:[#allocation165_spill] sm:$0xff] %v26466_v44  ;;  %20333 = vmatprep.mubr.f32.mxu1 %v4189_v12  ;;  %v4219_v12 = vand.u32 4294901760, %v4218_v17  ;;  %v4066_v17 = vsel %vm238_vm0, %v4003_v35, 0  ;;  %v4239_v35 = vand.u32 4294901760, %v4238_v41  ;;  %v4069_v41 = vsel %vm238_vm0, %v4004_v28, 0 }
 0x320   : > { %21687 = vmatmul.mubr.f32.gmra.mrb[2].mxu0 %v30600_v55  ;;  %30603 = vst [vmem:[#allocation86_spill] sm:$0xff] %v26486_v23  ;;  %30604 = vst [vmem:[#allocation94_spill] sm:$0xff] %v26489_v48  ;;  %v26492_v55 = vsub.f32 %v4054_v34, %v26466_v44  ;;  %v30608_v34 = vld [vmem:[#allocation47_spill] sm:$0xff]  ;;  %v26525_v22 = vsub.f32 %v4060_v16, %v26501_v63  ;;  %v26538_v10 = vand.u32 4294901760, %v4069_v41  ;;  %v4007_v16 = vld [vmem:[%s24204_s21 + $0xda] sm:$0xff] }
 0x321   : > { %21689 = vmatprep.mubr.f32.mxu0 %v30601_v7  ;;  %v4229_v7 = vand.u32 4294901760, %v4228_v46  ;;  %30607 = vst [vmem:[#allocation75_spill] sm:$0xff] %v26501_v63  ;;  %v26510_v46 = vand.u32 4294901760, %v4063_v40 }
 0x322   : > { %20334 = vmatmul.mubr.f32.vlgmr.msra.gmra.mrb[0].mxu1 %v4199_v20  ;;  %30605 = vst [vmem:[#allocation102_spill] sm:$0xff] %v26492_v55  ;;  %v30613_v20 = vand.u32 4294901760, %v26460_v59  ;;  %30615 = vst [vmem:[#allocation142_spill] sm:$0xff] %v26525_v22 }
 0x323   : > { %20382 = vmatpush3.msra.mxu1 %v26313_v31  ;;  %20336 = vmatprep.mubr.f32.mxu1 %v4209_v51  ;;  %v26508_v31 = vsub.f32 %v4057_v32, %v26486_v23  ;;  %30611 = vst [vmem:[#allocation129_spill] sm:$0xff] %v26510_v46  ;;  %v26512_v51 = vand.u32 4294901760, %v4066_v17  ;;  %v4249_v32 = vand.u32 4294901760, %v4248_v30  ;;  %v26533_v28 = vsub.f32 %v4063_v40, %v26510_v46 }
 0x324   : > { %21690 = vmatmul.mubr.f32.gmra.mrb[4].mxu0 %v30608_v34  ;;  %20431 = vmatprep.subr.mxu1 %v26292_v45  ;;  %v4258_v61 = vsub.f32 %v26460_v59, %v30613_v20  ;;  %v29519_v34 = vand.u32 4294901760, %v26489_v48  ;;  %v4072_v20 = vsel %vm238_vm0, %v4005_v27, 0  ;;  %v4006_v59 = vld [vmem:[%s24204_s21 + $0xca] sm:$0xff]  ;;  %30620 = vst [vmem:[#allocation154_spill] sm:$0xff] %v26538_v10  ;;  %v4269_v40 = vand.u32 4294901760, %v4268_v15 }
 0x325   : > { %21692 = vmatprep.mubr.f32.mxu0 %v30609_v43  ;;  %30610 = vst [vmem:[#allocation126_spill] sm:$0xff] %v26508_v31  ;;  %30612 = vst [vmem:[#allocation135_spill] sm:$0xff] %v26512_v51  ;;  %v26536_v30 = vsub.f32 %v4066_v17, %v26512_v51  ;;  %v26548_v17 = vand.u32 4294901760, %v4072_v20  ;;  %v4075_v58 = vsel %vm238_vm0, %v4006_v59, 0  ;;  %v30624_v51 = vld [vmem:[#allocation175_spill] sm:$0xff]  ;;  %v26561_v43 = vsub.f32 %v4069_v41, %v26538_v10  ;;  %v4009_v59 = vld [vmem:[%s24204_s21 + $0xf2] sm:$0xff] }
 0x326   : > { %20337 = vmatmul.mubr.f32.gmra.mrb[2].mxu1 %v4219_v12  ;;  %v30616_v12 = vld [vmem:[#allocation166_spill] sm:$0xff]  ;;  %30618 = vst [vmem:[#allocation150_spill] sm:$0xff] %v26533_v28  ;;  %v4278_v27 = vsub.f32 %v26489_v48, %v29519_v34  ;;  %v30625_v34 = vand.u32 4294901760, %v26508_v31  ;;  %v30631_v10 = vld [vmem:[#allocation183_spill] sm:$0xff] }
 0x327   : > { %20339 = vmatprep.mubr.f32.mxu1 %v4229_v7  ;;  %30619 = vst [vmem:[#allocation13_spill] sm:$0xff] %v26536_v30  ;;  %v4259_v7 = vand.u32 4294901760, %v4258_v61  ;;  %30622 = vst [vmem:[#allocation34_spill] sm:$0xff] %v26548_v17  ;;  %v4078_v61 = vsel %vm238_vm0, %v4007_v16, 0  ;;  %v4010_v41 = vld [vmem:[%s24204_s21 + $0xfa] sm:$0xff] }
 0x328   : > { %21693 = vmatmul.mubr.f32.gmra.mrb[6].mxu0 %v30616_v12  ;;  %30626 = vst [vmem:[#allocation167_spill] sm:$0xff] %v26561_v43  ;;  %v26572_v15 = vand.u32 4294901760, %v4078_v61 }
 0x329   : > { %21695 = vmatprep.mubr.f32.mxu0 %v30617_v60  ;;  %v30621_v60 = vand.u32 4294901760, %v26492_v55 }
 0x32a   : > { %20340 = vmatmul.mubr.f32.gmra.mrb[4].mxu1 %v4239_v35  ;;  %v4008_v35 = vld [vmem:[%s24204_s21 + $0xe2] sm:$0xff]  ;;  %30630 = vst [vmem:[#allocation180_spill] sm:$0xff] %v26572_v15 }
 0x32b   : > { %v4288_v12 = vsub.f32 %v26492_v55, %v30621_v60  ;;  %20342 = vmatprep.mubr.f32.mxu1 %v4249_v32  ;;  %v4298_v32 = vsub.f32 %v26508_v31, %v30625_v34  ;;  %v26564_v55 = vand.u32 4294901760, %v4075_v58  ;;  %v26570_v34 = vsub.f32 %v4072_v20, %v26548_v17  ;;  %v4011_v31 = vld [vmem:[%s24204_s21 + $0x10a] sm:$0xff] }
 0x32c   : > { %21696 = vmatmul.mubr.f32.gmra.mrb[8].mxu0 %v30623_v54  ;;  %v4279_v54 = vand.u32 4294901760, %v4278_v27  ;;  %v4081_v60 = vsel %vm238_vm0, %v4008_v35, 0  ;;  %v30632_v27 = vld [vmem:[#allocation187_spill] sm:$0xff]  ;;  %v4012_v35 = vld [vmem:[%s24204_s21 + $0x112] sm:$0xff] }
 0x32d   : > { %21698 = vmatprep.mubr.f32.mxu0 %v30624_v51  ;;  %v4289_v16 = vand.u32 4294901760, %v4288_v12  ;;  %30627 = vst [vmem:[#allocation168_spill] sm:$0xff] %v26564_v55  ;;  %v30628_v51 = vand.u32 4294901760, %v26525_v22  ;;  %30629 = vst [vmem:[#allocation176_spill] sm:$0xff] %v26570_v34  ;;  %v4299_v12 = vand.u32 4294901760, %v4298_v32  ;;  %v4090_v32 = vsel %vm238_vm0, %v4011_v31, 0 }
 0x32e   : > { %20343 = vmatmul.mubr.f32.gmra.mrb[6].mxu1 %v4259_v7  ;;  %v4084_v7 = vsel %vm238_vm0, %v4009_v59, 0  ;;  %v26590_v59 = vand.u32 4294901760, %v4081_v60  ;;  %v26606_v31 = vand.u32 4294901760, %v4090_v32 }
 0x32f   : > { %20345 = vmatprep.mubr.f32.mxu1 %v4269_v40  ;;  %v4308_v48 = vsub.f32 %v26525_v22, %v30628_v51  ;;  %v30633_v40 = vand.u32 4294901760, %v26533_v28  ;;  %v30634_v51 = vand.u32 4294901760, %v26536_v30 }
 0x330   : > { %21699 = vmatmul.mubr.f32.gmra.mrb[10].mxu0 %v30631_v10  ;;  %v26588_v10 = vsub.f32 %v4075_v58, %v26564_v55  ;;  %30636 = vst [vmem:[#allocation188_spill] sm:$0xff] %v26590_v59  ;;  %v4013_v58 = vld [vmem:[%s24204_s21 + $0x122] sm:$0xff]  ;;  %30642 = vst [vmem:[#allocation199_spill] sm:$0xff] %v26606_v31 }
 0x331   : > { %21701 = vmatprep.mubr.f32.mxu0 %v30632_v27  ;;  %v4318_v20 = vsub.f32 %v26533_v28, %v30633_v40  ;;  %v4328_v22 = vsub.f32 %v26536_v30, %v30634_v51  ;;  %v4087_v27 = vsel %vm238_vm0, %v4010_v41, 0  ;;  %v4309_v17 = vand.u32 4294901760, %v4308_v48  ;;  %v30640_v30 = vld [vmem:[#allocation196_spill] sm:$0xff] }
 0x332   : > { %20346 = vmatmul.mubr.f32.gmra.mrb[8].mxu1 %v4279_v54  ;;  %30635 = vst [vmem:[#allocation184_spill] sm:$0xff] %v26588_v10  ;;  %v29544_v40 = vand.u32 4294901760, %v26570_v34  ;;  %v26596_v28 = vsub.f32 %v4078_v61, %v26572_v15  ;;  %v26598_v51 = vand.u32 4294901760, %v4084_v7  ;;  %v30639_v54 = vld [vmem:[#allocation194_spill] sm:$0xff]  ;;  %v26604_v46 = vand.u32 4294901760, %v4087_v27 }
 0x333   : > { %20348 = vmatprep.mubr.f32.mxu1 %v4289_v16  ;;  %v4319_v55 = vand.u32 4294901760, %v4318_v20  ;;  %v4329_v41 = vand.u32 4294901760, %v4328_v22  ;;  %v30643_v48 = vand.u32 4294901760, %v26561_v43  ;;  %v4096_v15 = vsel %vm238_vm0, %v4013_v58, 0  ;;  %v4014_v16 = vld [vmem:[%s24204_s21 + $0x12a] sm:$0xff] }
 0x334   : > { %30637 = vst [vmem:[#allocation195_spill] sm:$0xff] %v26596_v28  ;;  %30638 = vst [vmem:[#allocation197_spill] sm:$0xff] %v26598_v51  ;;  %21702 = vmatmul.mubr.f32.gmra.mrb[12].mxu0 %v30639_v54  ;;  %v26613_v54 = vsub.f32 %v4081_v60, %v26590_v59  ;;  %v4348_v22 = vsub.f32 %v26570_v34, %v29544_v40  ;;  %v26628_v60 = vsub.f32 %v4087_v27, %v26604_v46  ;;  %v4015_v40 = vld [vmem:[%s24204_s21 + $0x13a] sm:$0xff] }
 0x335   : > { %21704 = vmatprep.mubr.f32.mxu0 %v30640_v30  ;;  %30641 = vst [vmem:[#allocation198_spill] sm:$0xff] %v26604_v46  ;;  %v4338_v61 = vsub.f32 %v26561_v43, %v30643_v48  ;;  %v4093_v30 = vsel %vm238_vm0, %v4012_v35, 0  ;;  %v30646_v48 = vld [vmem:[#allocation202_spill] sm:$0xff]  ;;  %v30647_v43 = vld [vmem:[#allocation205_spill] sm:$0xff]  ;;  %v30651_v20 = vand.u32 4294901760, %v26588_v10  ;;  %v30653_v34 = vand.u32 4294901760, %v26596_v28 }
 0x336   : > { %20349 = vmatmul.mubr.f32.gmra.mrb[10].mxu1 %v4299_v12  ;;  %30644 = vst [vmem:[#allocation19_spill] sm:$0xff] %v26613_v54  ;;  %v26621_v12 = vsub.f32 %v4084_v7, %v26598_v51  ;;  %30648 = vst [vmem:[#allocation62_spill] sm:$0xff] %v26628_v60  ;;  %v26633_v35 = vand.u32 4294901760, %v4093_v30  ;;  %v4349_v27 = vand.u32 4294901760, %v4348_v22  ;;  %v4102_v46 = vsel %vm238_vm0, %v4015_v40, 0  ;;  %v4016_v51 = vld [vmem:[%s24204_s21 + $0x142] sm:$0xff] }
 0x337   : > { %20351 = vmatprep.mubr.f32.mxu1 %v4309_v17  ;;  %v26631_v17 = vsub.f32 %v4090_v32, %v26606_v31  ;;  %v4339_v7 = vand.u32 4294901760, %v4338_v61  ;;  %v4358_v58 = vsub.f32 %v26588_v10, %v30651_v20  ;;  %v4368_v32 = vsub.f32 %v26596_v28, %v30653_v34  ;;  %v30654_v61 = vld [vmem:[#allocation206_spill] sm:$0xff]  ;;  %v30655_v20 = vld [vmem:[#allocation207_spill] sm:$0xff]  ;;  %v4017_v34 = vld [vmem:[%s24204_s21 + $0x152] sm:$0xff] }
 0x338   : > { %30645 = vst [vmem:[#allocation159_spill] sm:$0xff] %v26621_v12  ;;  %21705 = vmatmul.mubr.f32.gmra.mrb[14].mxu0 %v30646_v48  ;;  %30650 = vst [vmem:[#allocation171_spill] sm:$0xff] %v26633_v35  ;;  %v26654_v22 = vsub.f32 %v4093_v30, %v26633_v35  ;;  %v26668_v28 = vand.u32 4294901760, %v4102_v46  ;;  %v4108_v10 = vsel %vm238_vm0, %v4017_v34, 0 }
 0x339   : > { %21707 = vmatprep.mubr.f32.mxu0 %v30647_v43  ;;  %30649 = vst [vmem:[#allocation170_spill] sm:$0xff] %v26631_v17  ;;  %v26640_v43 = vand.u32 4294901760, %v4096_v15  ;;  %v4359_v31 = vand.u32 4294901760, %v4358_v58  ;;  %v4369_v48 = vand.u32 4294901760, %v4368_v32  ;;  %v30662_v58 = vld [vmem:[#allocation211_spill] sm:$0xff]  ;;  %v30665_v32 = vand.u32 4294901760, %v26631_v17 }
 0x33a   : > { %20352 = vmatmul.mubr.f32.gmra.mrb[12].mxu1 %v4319_v55  ;;  %v4099_v55 = vsel %vm238_vm0, %v4014_v16, 0  ;;  %30656 = vst [vmem:[#allocation178_spill] sm:$0xff] %v26654_v22  ;;  %v30657_v16 = vand.u32 4294901760, %v26613_v54  ;;  %30661 = vst [vmem:[#allocation190_spill] sm:$0xff] %v26668_v28 }
 0x33b   : > { %30652 = vst [vmem:[#allocation177_spill] sm:$0xff] %v26640_v43  ;;  %20354 = vmatprep.mubr.f32.mxu1 %v4329_v41  ;;  %v26661_v40 = vsub.f32 %v4096_v15, %v26640_v43  ;;  %v30660_v41 = vand.u32 4294901760, %v26621_v12  ;;  %v30664_v15 = vand.u32 4294901760, %v26628_v60  ;;  %v4019_v43 = vld [vmem:[%s24204_s21 + $0x16a] sm:$0xff] }
 0x33c   : > { %21708 = vmatmul.mubr.f32.gmra.mrb[16].mxu0 %v30654_v61  ;;  %v4378_v61 = vsub.f32 %v26613_v54, %v30657_v16  ;;  %v4018_v16 = vld [vmem:[%s24204_s21 + $0x15a] sm:$0xff] }
 0x33d   : > { %21710 = vmatprep.mubr.f32.mxu0 %v30655_v20  ;;  %30658 = vst [vmem:[#allocation182_spill] sm:$0xff] %v26661_v40  ;;  %v26663_v20 = vand.u32 4294901760, %v4099_v55  ;;  %v4388_v30 = vsub.f32 %v26621_v12, %v30660_v41  ;;  %v30663_v54 = vld [vmem:[#allocation213_spill] sm:$0xff]  ;;  %v4408_v41 = vsub.f32 %v26631_v17, %v30665_v32  ;;  %v4111_v32 = vsel %vm238_vm0, %v4018_v16, 0  ;;  %v30669_v12 = vld [vmem:[#allocation218_spill] sm:$0xff] }
 0x33e   : > { %20355 = vmatmul.mubr.f32.gmra.mrb[14].mxu1 %v4339_v7  ;;  %v4105_v7 = vsel %vm238_vm0, %v4016_v51, 0  ;;  %v4379_v51 = vand.u32 4294901760, %v4378_v61  ;;  %v4020_v61 = vld [vmem:[%s24204_s21 + $0x172] sm:$0xff] }
 0x33f   : > { %30659 = vst [vmem:[#allocation186_spill] sm:$0xff] %v26663_v20  ;;  %20357 = vmatprep.mubr.f32.mxu1 %v4349_v27  ;;  %v4398_v27 = vsub.f32 %v26628_v60, %v30664_v15  ;;  %v26685_v34 = vsub.f32 %v4099_v55, %v26663_v20  ;;  %v4389_v35 = vand.u32 4294901760, %v4388_v30  ;;  %v26690_v15 = vsub.f32 %v4102_v46, %v26668_v28 }
 0x340   : > { %21711 = vmatmul.mubr.f32.gmra.mrb[18].mxu0 %v30662_v58  ;;  %v26692_v60 = vand.u32 4294901760, %v4108_v10  ;;  %v30670_v58 = vld [vmem:[#allocation220_spill] sm:$0xff]  ;;  %v4409_v17 = vand.u32 4294901760, %v4408_v41  ;;  %v30671_v20 = vand.u32 4294901760, %v26654_v22  ;;  %v30672_v46 = vand.u32 4294901760, %v26661_v40 }
 0x341   : > { %21713 = vmatprep.mubr.f32.mxu0 %v30663_v54  ;;  %30666 = vst [vmem:[#allocation191_spill] sm:$0xff] %v26685_v34  ;;  %v26687_v54 = vand.u32 4294901760, %v4105_v7  ;;  %v4399_v55 = vand.u32 4294901760, %v4398_v27 }
 0x342   : > { %20358 = vmatmul.mubr.f32.gmra.mrb[16].mxu1 %v4359_v31  ;;  %30668 = vst [vmem:[#allocation204_spill] sm:$0xff] %v26692_v60  ;;  %v4114_v31 = vsel %vm238_vm0, %v4019_v43, 0  ;;  %v4428_v30 = vsub.f32 %v26661_v40, %v30672_v46  ;;  %v26709_v43 = vand.u32 4294901760, %v4111_v32  ;;  %v26713_v41 = vsub.f32 %v4108_v10, %v26692_v60  ;;  %v30676_v46 = vld [vmem:[#allocation225_spill] sm:$0xff] }
 0x343   : > { %30667 = vst [vmem:[#allocation201_spill] sm:$0xff] %v26687_v54  ;;  %20360 = vmatprep.mubr.f32.mxu1 %v4369_v48  ;;  %v4418_v48 = vsub.f32 %v26654_v22, %v30671_v20  ;;  %v4117_v20 = vsel %vm238_vm0, %v4020_v61, 0  ;;  %v30679_v61 = vand.u32 4294901760, %v26690_v15 }
 0x344   : > { %21714 = vmatmul.mubr.f32.gmra.mrb[20].mxu0 %v30669_v12  ;;  %v26707_v12 = vsub.f32 %v4105_v7, %v26687_v54  ;;  %30673 = vst [vmem:[#allocation208_spill] sm:$0xff] %v26709_v43  ;;  %v30677_v7 = vand.u32 4294901760, %v26685_v34  ;;  %v26725_v27 = vsub.f32 %v4111_v32, %v26709_v43  ;;  %v26727_v10 = vand.u32 4294901760, %v4117_v20 }
 0x345   : > { %21716 = vmatprep.mubr.f32.mxu0 %v30670_v58  ;;  %v26715_v58 = vand.u32 4294901760, %v4114_v31  ;;  %v4419_v16 = vand.u32 4294901760, %v4418_v48  ;;  %v4429_v22 = vand.u32 4294901760, %v4428_v30  ;;  %v29577_v48 = vand.u32 4294901760, %v26713_v41 }
 0x346   : > { %20361 = vmatmul.mubr.f32.gmra.mrb[18].mxu1 %v4379_v51  ;;  %v30675_v51 = vld [vmem:[#allocation222_spill] sm:$0xff]  ;;  %v4438_v40 = vsub.f32 %v26685_v34, %v30677_v7  ;;  %30678 = vst [vmem:[#allocation215_spill] sm:$0xff] %v26727_v10  ;;  %v30681_v7 = vld [vmem:[#allocation229_spill] sm:$0xff]  ;;  %v29581_v30 = vand.u32 4294901760, %v26725_v27  ;;  %v26743_v34 = vsub.f32 %v4117_v20, %v26727_v10 }
 0x347   : > { %20363 = vmatprep.mubr.f32.mxu1 %v4389_v35  ;;  %30674 = vst [vmem:[#allocation212_spill] sm:$0xff] %v26715_v58  ;;  %v29578_v35 = vand.u32 4294901760, %v26707_v12 }
 0x348   : > { %21717 = vmatmul.mubr.f32.gmra.mrb[22].mxu0 %v30675_v51  ;;  %v4448_v51 = vsub.f32 %v26690_v15, %v30679_v61  ;;  %v4439_v32 = vand.u32 4294901760, %v4438_v40  ;;  %v30683_v40 = vand.u32 4294901760, %v30573_v24  ;;  %v4478_v20 = vsub.f32 %v26725_v27, %v29581_v30  ;;  %v30705_v30 = vld [vmem:[#allocation219_spill] sm:$0xff] }
 0x349   : > { %21719 = vmatprep.mubr.f32.mxu0 %v30676_v46  ;;  %v30680_v46 = vld [vmem:[#allocation227_spill] sm:$0xff]  ;;  %v30685_v24 = vand.u32 4294901760, %v30579_v57 }
 0x34a   : > { %20364 = vmatmul.mubr.f32.gmra.mrb[20].mxu1 %v4399_v55  ;;  %v26734_v55 = vsub.f32 %v4114_v31, %v26715_v58  ;;  %v4449_v61 = vand.u32 4294901760, %v4448_v51  ;;  %v4468_v31 = vsub.f32 %v26713_v41, %v29577_v48 }
 0x34b   : > { %20366 = vmatprep.mubr.f32.mxu1 %v4409_v17  ;;  %v4458_v17 = vsub.f32 %v26707_v12, %v29578_v35  ;;  %v30684_v35 = vand.u32 4294901760, %v30578_v52 }
 0x34c   : > { %21720 = vmatmul.mubr.f32.gmra.mrb[24].mxu0 %v30680_v46  ;;  %v29580_v46 = vand.u32 4294901760, %v26734_v55  ;;  %v4469_v51 = vand.u32 4294901760, %v4468_v31  ;;  %v30686_v31 = vand.u32 4294901760, %v30584_v4  ;;  %v30690_v4 = vld [vmem:[#allocation192_spill] sm:$0xff] }
 0x34d   : > { %21722 = vmatprep.mubr.f32.mxu0 %v30681_v7  ;;  %v30682_v7 = vld [vmem:[#allocation230_spill] sm:$0xff] }
 0x34e   : > { %20367 = vmatmul.mubr.f32.gmra.mrb[22].mxu1 %v4419_v16  ;;  %v4459_v16 = vand.u32 4294901760, %v4458_v17  ;;  %v4488_v48 = vsub.f32 %v26734_v55, %v29580_v46  ;;  %v30704_v46 = vld [vmem:[#allocation199_spill] sm:$0xff] }
 0x34f   : > { %20369 = vmatprep.mubr.f32.mxu1 %v4429_v22  ;;  %v29579_v22 = vand.u32 4294901760, %v26743_v34 }
 0x350   : > { %21723 = vmatmul.mubr.f32.gmra.mrb[26].mxu0 %v30682_v7  ;;  %v4489_v7 = vand.u32 4294901760, %v4488_v48  ;;  %v30692_v48 = vld [vmem:[#allocation154_spill] sm:$0xff] }
 0x351   : > { %21725 = vmatprep.mubr.f32.mxu0 %v30683_v40  ;;  %v4498_v17 = vsub.f32 %v26743_v34, %v29579_v22  ;;  %v30693_v40 = vld [vmem:[#allocation34_spill] sm:$0xff] }
 0x352   : > { %20370 = vmatmul.mubr.f32.gmra.mrb[24].mxu1 %v4439_v32  ;;  %v4479_v32 = vand.u32 4294901760, %v4478_v20  ;;  %v30695_v20 = vld [vmem:[#allocation203_spill] sm:$0xff]  ;;  %v30703_v22 = vld [vmem:[#allocation198_spill] sm:$0xff] }
 0x353   : > { %20372 = vmatprep.mubr.f32.mxu1 %v4449_v61  ;;  %v17911_v61 = vld [vmem:[%s28966_s1 + $0x38] sm:$0xff]  ;;  %v4499_v52 = vand.u32 4294901760, %v4498_v17  ;;  %v30699_v17 = vld [vmem:[#allocation210_spill] sm:$0xff] }
 0x354   : > { %21726 = vmatmul.mubr.f32.gmra.mrb[28].mxu0 %v30684_v35  ;;  %v26772_v57 = vand.u32 4294901760, %v17911_v61  ;;  %v30691_v35 = vld [vmem:[#allocation193_spill] sm:$0xff] }
 0x355   : > { %21728 = vmatprep.mubr.f32.mxu0 %v30685_v24  ;;  %v30697_v24 = vld [vmem:[#allocation180_spill] sm:$0xff] }
 0x356   : > { %20373 = vmatmul.mubr.f32.gmra.mrb[26].mxu1 %v4459_v16  ;;  %30687 = vst [vmem:[#allocation217_spill] sm:$0xff] %v26772_v57  ;;  %v30694_v16 = vld [vmem:[#allocation200_spill] sm:$0xff] }
 0x357   : > { %20375 = vmatprep.mubr.f32.mxu1 %v4469_v51  ;;  %v30696_v51 = vld [vmem:[#allocation168_spill] sm:$0xff] }
 0x358   : > { %21729 = vmatmul.mubr.f32.gmra.mrb[30].mxu0 %v30686_v31  ;;  %v30701_v31 = vld [vmem:[#allocation214_spill] sm:$0xff] }
 0x359   : > { %21733 = vmatprep.mubr.f32.mxu0 %v30533_v36 }
 0x35a   : > { %20376 = vmatmul.mubr.f32.gmra.mrb[28].mxu1 %v4479_v32  ;;  %v30698_v32 = vld [vmem:[#allocation209_spill] sm:$0xff] }
 0x35b   : > { %20378 = vmatprep.mubr.f32.mxu1 %v4489_v7  ;;  %v30700_v7 = vld [vmem:[#allocation197_spill] sm:$0xff] }
 0x35c   : > { %21734 = vmatmul.mubr.f32.vlgmr.msra.gmra.mrb[0].mxu0 %v30536_v13 }
 0x35d   : > { %21736 = vmatprep.mubr.f32.mxu0 %v30537_v47  ;;  %21782 = vmatpush3.msra.mxu0 %v25964_v53  ;;  %v30688_v53 = vld [vmem:[#allocation129_spill] sm:$0xff] }
 0x35e   : > { %20379 = vmatmul.mubr.f32.gmra.mrb[30].mxu1 %v4499_v52  ;;  %21831 = vmatprep.subr.mxu0 %v26772_v57  ;;  %v30702_v52 = vld [vmem:[#allocation216_spill] sm:$0xff] }
 0x35f   : > { %20383 = vmatprep.mubr.f32.mxu1 %v26363_v21  ;;  %v17889_v21 = vld [vmem:[%s24204_s21 + $0xa9] sm:$0xff] }
 0x360   : > { %21737 = vmatmul.mubr.f32.gmra.mrb[2].mxu0 %v30540_v25 }
 0x361   : > { %21739 = vmatprep.mubr.f32.mxu0 %v30541_v11 }
 0x362   : > { %20384 = vmatmul.mubr.f32.vlgmr.msra.gmra.mrb[0].mxu1 %v26372_v62 }
 0x363   : > { %20432 = vmatpush3.msra.mxu1 %v26292_v45  ;;  %20386 = vmatprep.mubr.f32.mxu1 %v26378_v26  ;;  %v30689_v45 = vld [vmem:[#allocation135_spill] sm:$0xff] }
 0x364   : > { %21740 = vmatmul.mubr.f32.gmra.mrb[4].mxu0 %v30544_v14  ;;  %20481 = vmatprep.subr.mxu1 %v26235_v37 }
 0x365   : > { %21742 = vmatprep.mubr.f32.mxu0 %v30545_v3 }
 0x366   : > { %20387 = vmatmul.mubr.f32.gmra.mrb[2].mxu1 %v26389_v56  ;;  %v17887_v56 = vld [vmem:[%s24204_s21 + $0x91] sm:$0xff] }
 0x367   : > { %20389 = vmatprep.mubr.f32.mxu1 %v26397_v18  ;;  %v30747_v18 = vld [vmem:[#allocation182_spill] sm:$0xff] }
 0x368   : > { %21743 = vmatmul.mubr.f32.gmra.mrb[6].mxu0 %v30547_v2 }
 0x369   : > { %21745 = vmatprep.mubr.f32.mxu0 %v30548_v38 }
 0x36a   : > { %20390 = vmatmul.mubr.f32.gmra.mrb[4].mxu1 %v26409_v0 }
 0x36b   : > { %20392 = vmatprep.mubr.f32.mxu1 %v26422_v8  ;;  %v17886_v8 = vld [vmem:[%s24204_s21 + $0x81] sm:$0xff] }
 0x36c   : > { %21746 = vmatmul.mubr.f32.gmra.mrb[8].mxu0 %v30549_v6  ;;  %v13752_v62 = vsel %vm238_vm0, %v17886_v8, 0 }
 0x36d   : > { %21748 = vmatprep.mubr.f32.mxu0 %v30550_v39  ;;  %v26970_v26 = vand.u32 4294901760, %v13752_v62 }
 0x36e   : > { %20393 = vmatmul.mubr.f32.gmra.mrb[6].mxu1 %v26433_v1 }
 0x36f   : > { %20395 = vmatprep.mubr.f32.mxu1 %v26447_v19  ;;  %30755 = vst [vmem:[#allocation145_spill] sm:$0xff] %v26970_v26 }
 0x370   : > { %21749 = vmatmul.mubr.f32.gmra.mrb[10].mxu0 %v30551_v42 }
 0x371   : > { %21751 = vmatprep.mubr.f32.mxu0 %v30552_v29 }
 0x372   : > { %20396 = vmatmul.mubr.f32.gmra.mrb[8].mxu1 %v26464_v33  ;;  %v30741_v33 = vld [vmem:[#allocation170_spill] sm:$0xff] }
 0x373   : > { %20398 = vmatprep.mubr.f32.mxu1 %v26466_v44  ;;  %v30740_v44 = vld [vmem:[#allocation62_spill] sm:$0xff] }
 0x374   : > { %21752 = vmatmul.mubr.f32.gmra.mrb[12].mxu0 %v30553_v9 }
 0x375   : > { %21754 = vmatprep.mubr.f32.mxu0 %v30554_v50 }
 0x376   : > { %20399 = vmatmul.mubr.f32.gmra.mrb[10].mxu1 %v26486_v23 }
 0x377   : > { %20401 = vmatprep.mubr.f32.mxu1 %v26501_v63 }
 0x378   : > { %21755 = vmatmul.mubr.f32.gmra.mrb[14].mxu0 %v30555_v5 }
 0x379   : > { %21757 = vmatprep.mubr.f32.mxu0 %v30556_v49 }
 0x37a   : > { %20402 = vmatmul.mubr.f32.gmra.mrb[12].mxu1 %v30688_v53  ;;  %v30714_v53 = vld [vmem:[#allocation134_spill] sm:$0xff] }
 0x37b   : > { %20404 = vmatprep.mubr.f32.mxu1 %v30689_v45  ;;  %v30711_v45 = vld [vmem:[#allocation186_spill] sm:$0xff] }
 0x37c   : > { %21758 = vmatmul.mubr.f32.gmra.mrb[16].mxu0 %v30690_v4 }
 0x37d   : > { %21760 = vmatprep.mubr.f32.mxu0 %v30691_v35 }
 0x37e   : > { %20405 = vmatmul.mubr.f32.gmra.mrb[14].mxu1 %v30692_v48  ;;  %v30710_v48 = vld [vmem:[#allocation130_spill] sm:$0xff] }
 0x37f   : > { %20407 = vmatprep.mubr.f32.mxu1 %v30693_v40  ;;  %v26829_v40 = vsub.f32 %v17911_v61, %v26772_v57 }
 0x380   : > { %21761 = vmatmul.mubr.f32.gmra.mrb[18].mxu0 %v30694_v16 }
 0x381   : > { %21763 = vmatprep.mubr.f32.mxu0 %v30695_v20 }
 0x382   : > { %20408 = vmatmul.mubr.f32.gmra.mrb[16].mxu1 %v30696_v51  ;;  %v30706_v51 = vld [vmem:[#allocation221_spill] sm:$0xff] }
 0x383   : > { %20410 = vmatprep.mubr.f32.mxu1 %v30697_v24  ;;  %v30707_v24 = vld [vmem:[#allocation171_spill] sm:$0xff] }
 0x384   : > { %21764 = vmatmul.mubr.f32.gmra.mrb[20].mxu0 %v30698_v32 }
 0x385   : > { %21766 = vmatprep.mubr.f32.mxu0 %v30699_v17 }
 0x386   : > { %20411 = vmatmul.mubr.f32.gmra.mrb[18].mxu1 %v26590_v59  ;;  %v30708_v59 = vld [vmem:[#allocation177_spill] sm:$0xff] }
 0x387   : > { %20413 = vmatprep.mubr.f32.mxu1 %v30700_v7  ;;  %v30709_v7 = vld [vmem:[#allocation224_spill] sm:$0xff] }
 0x388   : > { %21767 = vmatmul.mubr.f32.gmra.mrb[22].mxu0 %v30701_v31 }
 0x389   : > { %21769 = vmatprep.mubr.f32.mxu0 %v30702_v52 }
 0x38a   : > { %20414 = vmatmul.mubr.f32.gmra.mrb[20].mxu1 %v30703_v22  ;;  %v26836_v22 = vand.u32 4294901760, %v26829_v40 }
 0x38b   : > { %20416 = vmatprep.mubr.f32.mxu1 %v30704_v46  ;;  %v30713_v46 = vld [vmem:[#allocation132_spill] sm:$0xff] }
 0x38c   : > { %21770 = vmatmul.mubr.f32.gmra.mrb[24].mxu0 %v30705_v30  ;;  %30712 = vst [vmem:[#allocation231_spill] sm:$0xff] %v26836_v22  ;;  %v14216_v61 = vsub.f32 %v26829_v40, %v26836_v22  ;;  %v30716_v22 = vld [vmem:[#allocation149_spill] sm:$0xff] }
 0x38d   : > { %21772 = vmatprep.mubr.f32.mxu0 %v30706_v51 }
 0x38e   : > { %20417 = vmatmul.mubr.f32.gmra.mrb[22].mxu1 %v30707_v24  ;;  %v30737_v24 = vld [vmem:[#allocation159_spill] sm:$0xff] }
 0x38f   : > { %20419 = vmatprep.mubr.f32.mxu1 %v30708_v59  ;;  %v30715_v59 = vld [vmem:[#allocation138_spill] sm:$0xff] }
 0x390   : > { %21773 = vmatmul.mubr.f32.gmra.mrb[26].mxu0 %v30709_v7 }
 0x391   : > { %21775 = vmatprep.mubr.f32.mxu0 %v30710_v48 }
 0x392   : > { %20420 = vmatmul.mubr.f32.gmra.mrb[24].mxu1 %v30711_v45  ;;  %v26848_v45 = vand.u32 4294901760, %v14216_v61  ;;  %v30718_v61 = vld [vmem:[#allocation155_spill] sm:$0xff] }
 0x393   : > { %20422 = vmatprep.mubr.f32.mxu1 %v26668_v28  ;;  %v30736_v28 = vld [vmem:[#allocation19_spill] sm:$0xff] }
 0x394   : > { %21776 = vmatmul.mubr.f32.gmra.mrb[28].mxu0 %v30713_v46 }
 0x395   : > { %21778 = vmatprep.mubr.f32.mxu0 %v30714_v53 }
 0x396   : > { %20423 = vmatmul.mubr.f32.gmra.mrb[26].mxu1 %v26687_v54 }
 0x397   : > { %20425 = vmatprep.mubr.f32.mxu1 %v26692_v60  ;;  %v17881_v60 = vld [vmem:[%s24204_s21 + $0x49] sm:$0xff] }
 0x398   : > { %21779 = vmatmul.mubr.f32.gmra.mrb[30].mxu0 %v30715_v59 }
 0x399   : > { %21783 = vmatprep.mubr.f32.mxu0 %v30533_v36  ;;  %v30717_v36 = vld [vmem:[#allocation153_spill] sm:$0xff] }
 0x39a   : > { %20426 = vmatmul.mubr.f32.gmra.mrb[28].mxu1 %v26709_v43  ;;  %v30734_v43 = vld [vmem:[#allocation184_spill] sm:$0xff] }
 0x39b   : > { %20428 = vmatprep.mubr.f32.mxu1 %v26715_v58  ;;  %v30725_v58 = vld [vmem:[#allocation67_spill] sm:$0xff] }
 0x39c   : > { %21784 = vmatmul.mubr.f32.vlgmr.msra.gmra.mrb[0].mxu0 %v30536_v13  ;;  %v30719_v13 = vld [vmem:[#allocation143_spill] sm:$0xff] }
 0x39d   : > { %21786 = vmatprep.mubr.f32.mxu0 %v30537_v47  ;;  %21832 = vmatpush3.msra.mxu0 %v26772_v57  ;;  %v30720_v47 = vld [vmem:[#allocation157_spill] sm:$0xff]  ;;  %v17891_v57 = vld [vmem:[%s24204_s21 + $0xc1] sm:$0xff] }
 0x39e   : > { %20429 = vmatmul.mubr.f32.gmra.mrb[30].mxu1 %v26727_v10  ;;  %21881 = vmatprep.subr.mxu0 %v26848_v45  ;;  %v30721_v10 = vld [vmem:[#allocation31_spill] sm:$0xff] }
 0x39f   : > { %20433 = vmatprep.mubr.f32.mxu1 %v30716_v22 }
 0x3a0   : > { %21787 = vmatmul.mubr.f32.gmra.mrb[2].mxu0 %v30540_v25  ;;  %v30723_v25 = vld [vmem:[#allocation163_spill] sm:$0xff] }
 0x3a1   : > { %21789 = vmatprep.mubr.f32.mxu0 %v30541_v11  ;;  %v30722_v11 = vld [vmem:[#allocation161_spill] sm:$0xff] }
 0x3a2   : > { %20434 = vmatmul.mubr.f32.vlgmr.msra.gmra.mrb[0].mxu1 %v30717_v36 }
 0x3a3   : > { %20482 = vmatpush3.msra.mxu1 %v26235_v37  ;;  %20436 = vmatprep.mubr.f32.mxu1 %v30718_v61 }
 0x3a4   : > { %21790 = vmatmul.mubr.f32.gmra.mrb[4].mxu0 %v30544_v14  ;;  %20531 = vmatprep.subr.mxu1 %v30719_v13  ;;  %v30724_v14 = vld [vmem:[#allocation164_spill] sm:$0xff] }
 0x3a5   : > { %21792 = vmatprep.mubr.f32.mxu0 %v30545_v3  ;;  %v30728_v3 = vld [vmem:[#allocation126_spill] sm:$0xff] }
 0x3a6   : > { %20437 = vmatmul.mubr.f32.gmra.mrb[2].mxu1 %v30720_v47 }
 0x3a7   : > { %20439 = vmatprep.mubr.f32.mxu1 %v30721_v10 }
 0x3a8   : > { %21793 = vmatmul.mubr.f32.gmra.mrb[6].mxu0 %v30547_v2  ;;  %v30726_v2 = vld [vmem:[#allocation94_spill] sm:$0xff] }
 0x3a9   : > { %21795 = vmatprep.mubr.f32.mxu0 %v30548_v38  ;;  %v30727_v38 = vld [vmem:[#allocation102_spill] sm:$0xff] }
 0x3aa   : > { %20440 = vmatmul.mubr.f32.gmra.mrb[4].mxu1 %v30722_v11 }
 0x3ab   : > { %20442 = vmatprep.mubr.f32.mxu1 %v30723_v25 }
 0x3ac   : > { %21796 = vmatmul.mubr.f32.gmra.mrb[8].mxu0 %v30549_v6  ;;  %v30733_v6 = vld [vmem:[#allocation176_spill] sm:$0xff] }
 0x3ad   : > { %21798 = vmatprep.mubr.f32.mxu0 %v30550_v39  ;;  %v30729_v39 = vld [vmem:[#allocation142_spill] sm:$0xff] }
 0x3ae   : > { %20443 = vmatmul.mubr.f32.gmra.mrb[6].mxu1 %v30724_v14 }
 0x3af   : > { %20445 = vmatprep.mubr.f32.mxu1 %v30725_v58 }
 0x3b0   : > { %21799 = vmatmul.mubr.f32.gmra.mrb[10].mxu0 %v30551_v42  ;;  %v30730_v42 = vld [vmem:[#allocation150_spill] sm:$0xff] }
 0x3b1   : > { %21801 = vmatprep.mubr.f32.mxu0 %v30552_v29  ;;  %v30731_v29 = vld [vmem:[#allocation13_spill] sm:$0xff] }
 0x3b2   : > { %20446 = vmatmul.mubr.f32.gmra.mrb[8].mxu1 %v30726_v2 }
 0x3b3   : > { %20448 = vmatprep.mubr.f32.mxu1 %v30727_v38 }
 0x3b4   : > { %21802 = vmatmul.mubr.f32.gmra.mrb[12].mxu0 %v30553_v9  ;;  %v30732_v9 = vld [vmem:[#allocation167_spill] sm:$0xff] }
 0x3b5   : > { %21804 = vmatprep.mubr.f32.mxu0 %v30554_v50  ;;  %v17879_v50 = vld [vmem:[%s24204_s21 + $0x31] sm:$0xff] }
 0x3b6   : > { %20449 = vmatmul.mubr.f32.gmra.mrb[10].mxu1 %v30728_v3 }
 0x3b7   : > { %20451 = vmatprep.mubr.f32.mxu1 %v30729_v39 }
 0x3b8   : > { %21805 = vmatmul.mubr.f32.gmra.mrb[14].mxu0 %v30555_v5  ;;  %v17880_v5 = vld [vmem:[%s24204_s21 + $0x39] sm:$0xff] }
 0x3b9   : > { %21807 = vmatprep.mubr.f32.mxu0 %v30556_v49  ;;  %v13731_v49 = vsel %vm238_vm0, %v17879_v50, 0  ;;  %v13734_v54 = vsel %vm238_vm0, %v17880_v5, 0  ;;  %v17883_v50 = vld [vmem:[%s24204_s21 + $0x61] sm:$0xff]  ;;  %v17884_v5 = vld [vmem:[%s24204_s21 + $0x69] sm:$0xff] }
 0x3ba   : > { %20452 = vmatmul.mubr.f32.gmra.mrb[12].mxu1 %v30730_v42  ;;  %v26909_v63 = vand.u32 4294901760, %v13734_v54  ;;  %v13746_v1 = vsel %vm238_vm0, %v17884_v5, 0 }
 0x3bb   : > { %20454 = vmatprep.mubr.f32.mxu1 %v30731_v29 }
 0x3bc   : > { %21808 = vmatmul.mubr.f32.gmra.mrb[16].mxu0 %v30690_v4  ;;  %v30735_v4 = vld [vmem:[#allocation195_spill] sm:$0xff]  ;;  %v26924_v19 = vsub.f32 %v13734_v54, %v26909_v63  ;;  %v30746_v54 = vld [vmem:[#allocation178_spill] sm:$0xff] }
 0x3bd   : > { %21810 = vmatprep.mubr.f32.mxu0 %v30691_v35  ;;  %v26900_v35 = vand.u32 4294901760, %v13731_v49 }
 0x3be   : > { %20455 = vmatmul.mubr.f32.gmra.mrb[14].mxu1 %v30732_v9  ;;  %30742 = vst [vmem:[#allocation109_spill] sm:$0xff] %v26924_v19 }
 0x3bf   : > { %20457 = vmatprep.mubr.f32.mxu1 %v30733_v6 }
 0x3c0   : > { %21811 = vmatmul.mubr.f32.gmra.mrb[18].mxu0 %v30694_v16  ;;  %v13737_v16 = vsel %vm238_vm0, %v17881_v60, 0  ;;  %v13743_v60 = vsel %vm238_vm0, %v17883_v50, 0 }
 0x3c1   : > { %21813 = vmatprep.mubr.f32.mxu0 %v30695_v20  ;;  %v17882_v20 = vld [vmem:[%s24204_s21 + $0x51] sm:$0xff]  ;;  %v26915_v23 = vand.u32 4294901760, %v13737_v16  ;;  %v26934_v50 = vand.u32 4294901760, %v13743_v60 }
 0x3c2   : > { %20458 = vmatmul.mubr.f32.gmra.mrb[16].mxu1 %v30734_v43 }
 0x3c3   : > { %20460 = vmatprep.mubr.f32.mxu1 %v30735_v4  ;;  %30739 = vst [vmem:[#allocation233_spill] sm:$0xff] %v26915_v23  ;;  %30745 = vst [vmem:[#allocation78_spill] sm:$0xff] %v26934_v50 }
 0x3c4   : > { %21814 = vmatmul.mubr.f32.gmra.mrb[20].mxu0 %v30698_v32  ;;  %v26913_v32 = vsub.f32 %v13731_v49, %v26900_v35  ;;  %v17885_v49 = vld [vmem:[%s24204_s21 + $0x79] sm:$0xff] }
 0x3c5   : > { %21816 = vmatprep.mubr.f32.mxu0 %v30699_v17  ;;  %v13740_v17 = vsel %vm238_vm0, %v17882_v20, 0  ;;  %v13749_v0 = vsel %vm238_vm0, %v17885_v49, 0  ;;  %v26946_v20 = vand.u32 4294901760, %v13746_v1  ;;  %v26955_v49 = vsub.f32 %v13743_v60, %v26934_v50 }
 0x3c6   : > { %20461 = vmatmul.mubr.f32.gmra.mrb[18].mxu1 %v30736_v28  ;;  %30738 = vst [vmem:[#allocation232_spill] sm:$0xff] %v26913_v32 }
 0x3c7   : > { %20463 = vmatprep.mubr.f32.mxu1 %v30737_v24  ;;  %30749 = vst [vmem:[#allocation137_spill] sm:$0xff] %v26946_v20  ;;  %30751 = vst [vmem:[#allocation83_spill] sm:$0xff] %v26955_v49  ;;  %v26968_v60 = vsub.f32 %v13746_v1, %v26946_v20  ;;  %v17890_v20 = vld [vmem:[%s24204_s21 + $0xb1] sm:$0xff] }
 0x3c8   : > { %21817 = vmatmul.mubr.f32.gmra.mrb[22].mxu0 %v30701_v31  ;;  %v26926_v31 = vand.u32 4294901760, %v13740_v17 }
 0x3c9   : > { %21819 = vmatprep.mubr.f32.mxu0 %v30702_v52  ;;  %v26932_v52 = vsub.f32 %v13737_v16, %v26915_v23  ;;  %30754 = vst [vmem:[#allocation144_spill] sm:$0xff] %v26968_v60  ;;  %v30763_v23 = vand.u32 4294901760, %v26955_v49 }
 0x3ca   : > { %20464 = vmatmul.mubr.f32.gmra.mrb[20].mxu1 %v30740_v44  ;;  %30743 = vst [vmem:[#allocation127_spill] sm:$0xff] %v26926_v31  ;;  %v26944_v16 = vsub.f32 %v13740_v17, %v26926_v31  ;;  %v26959_v17 = vand.u32 4294901760, %v13749_v0  ;;  %v13755_v31 = vsel %vm238_vm0, %v17887_v56, 0 }
 0x3cb   : > { %20466 = vmatprep.mubr.f32.mxu1 %v30741_v33  ;;  %30744 = vst [vmem:[#allocation125_spill] sm:$0xff] %v26932_v52 }
 0x3cc   : > { %21820 = vmatmul.mubr.f32.gmra.mrb[24].mxu0 %v30705_v30  ;;  %30748 = vst [vmem:[#allocation131_spill] sm:$0xff] %v26944_v16  ;;  %30752 = vst [vmem:[#allocation91_spill] sm:$0xff] %v26959_v17  ;;  %v30753_v30 = vld [vmem:[#allocation191_spill] sm:$0xff]  ;;  %v26982_v1 = vsub.f32 %v13749_v0, %v26959_v17 }
 0x3cd   : > { %21822 = vmatprep.mubr.f32.mxu0 %v30706_v51  ;;  %v30750_v51 = vand.u32 4294901760, %v26913_v32 }
 0x3ce   : > { %20467 = vmatmul.mubr.f32.gmra.mrb[22].mxu1 %v30746_v54  ;;  %30758 = vst [vmem:[#allocation99_spill] sm:$0xff] %v26982_v1 }
 0x3cf   : > { %20469 = vmatprep.mubr.f32.mxu1 %v30747_v18  ;;  %v13895_v5 = vsub.f32 %v26913_v32, %v30750_v51  ;;  %v30757_v32 = vand.u32 4294901760, %v26932_v52  ;;  %v26984_v51 = vand.u32 4294901760, %v13755_v31 }
 0x3d0   : > { %21823 = vmatmul.mubr.f32.gmra.mrb[26].mxu0 %v30709_v7  ;;  %v17888_v7 = vld [vmem:[%s24204_s21 + $0x99] sm:$0xff] }
 0x3d1   : > { %21825 = vmatprep.mubr.f32.mxu0 %v30710_v48  ;;  %v13896_v8 = vand.u32 4294901760, %v13895_v5  ;;  %v30756_v48 = vand.u32 4294901760, %v26924_v19  ;;  %v13915_v50 = vsub.f32 %v26932_v52, %v30757_v32  ;;  %30759 = vst [vmem:[#allocation151_spill] sm:$0xff] %v26984_v51  ;;  %v13761_v5 = vsel %vm238_vm0, %v17889_v21, 0 }
 0x3d2   : > { %20470 = vmatmul.mubr.f32.gmra.mrb[24].mxu1 %v30753_v30  ;;  %v30760_v32 = vand.u32 4294901760, %v26944_v16  ;;  %v27002_v52 = vand.u32 4294901760, %v13761_v5 }
 0x3d3   : > { %20472 = vmatprep.mubr.f32.mxu1 %v26690_v15  ;;  %v13905_v56 = vsub.f32 %v26924_v19, %v30756_v48  ;;  %v26996_v48 = vsub.f32 %v13752_v62, %v26970_v26  ;;  %v13764_v19 = vsel %vm238_vm0, %v17890_v20, 0  ;;  %v13916_v17 = vand.u32 4294901760, %v13915_v50 }
 0x3d4   : > { %21826 = vmatmul.mubr.f32.gmra.mrb[28].mxu0 %v30713_v46  ;;  %v13758_v46 = vsel %vm238_vm0, %v17888_v7, 0  ;;  %30762 = vst [vmem:[#allocation37_spill] sm:$0xff] %v27002_v52  ;;  %v27010_v62 = vsub.f32 %v13755_v31, %v26984_v51  ;;  %v30765_v50 = vand.u32 4294901760, %v26968_v60  ;;  %v27021_v0 = vand.u32 4294901760, %v13764_v19 }
 0x3d5   : > { %21828 = vmatprep.mubr.f32.mxu0 %v30714_v53  ;;  %v13925_v53 = vsub.f32 %v26944_v16, %v30760_v32  ;;  %v13906_v21 = vand.u32 4294901760, %v13905_v56  ;;  %v27000_v7 = vand.u32 4294901760, %v13758_v46  ;;  %v13935_v32 = vsub.f32 %v26955_v49, %v30763_v23  ;;  %v17892_v16 = vld [vmem:[%s24204_s21 + $0xc9] sm:$0xff] }
 0x3d6   : > { %20473 = vmatmul.mubr.f32.gmra.mrb[26].mxu1 %v26707_v12  ;;  %30764 = vst [vmem:[#allocation43_spill] sm:$0xff] %v27010_v62  ;;  %v13767_v56 = vsel %vm238_vm0, %v17891_v57, 0  ;;  %30766 = vst [vmem:[#allocation169_spill] sm:$0xff] %v27021_v0  ;;  %v27027_v49 = vsub.f32 %v13761_v5, %v27002_v52  ;;  %v13770_v57 = vsel %vm238_vm0, %v17892_v16, 0  ;;  %v30769_v23 = vand.u32 4294901760, %v26982_v1 }
 0x3d7   : > { %20475 = vmatprep.mubr.f32.mxu1 %v26713_v41  ;;  %30761 = vst [vmem:[#allocation158_spill] sm:$0xff] %v27000_v7  ;;  %v13926_v20 = vand.u32 4294901760, %v13925_v53  ;;  %v27024_v31 = vsub.f32 %v13758_v46, %v27000_v7  ;;  %v27036_v46 = vand.u32 4294901760, %v13767_v56  ;;  %v17894_v7 = vld [vmem:[%s24204_s21 + $0xe1] sm:$0xff]  ;;  %v30771_v16 = vand.u32 4294901760, %v30716_v22 }
 0x3d8   : > { %21829 = vmatmul.mubr.f32.gmra.mrb[30].mxu0 %v30715_v59  ;;  %v17893_v59 = vld [vmem:[%s24204_s21 + $0xd9] sm:$0xff]  ;;  %30768 = vst [vmem:[#allocation179_spill] sm:$0xff] %v27027_v49  ;;  %v27046_v5 = vand.u32 4294901760, %v13770_v57  ;;  %v30779_v22 = vand.u32 4294901760, %v30718_v61  ;;  %v30784_v61 = vand.u32 4294901760, %v27027_v49 }
 0x3d9   : > { %21833 = vmatprep.mubr.f32.mxu0 %v13896_v8  ;;  %v13945_v8 = vsub.f32 %v26968_v60, %v30765_v50  ;;  %30767 = vst [vmem:[#allocation173_spill] sm:$0xff] %v27024_v31  ;;  %v13773_v53 = vsel %vm238_vm0, %v17893_v59, 0  ;;  %v13936_v50 = vand.u32 4294901760, %v13935_v32  ;;  %v13955_v60 = vsub.f32 %v26982_v1, %v30769_v23  ;;  %30770 = vst [vmem:[#allocation181_spill] sm:$0xff] %v27036_v46  ;;  %v17895_v59 = vld [vmem:[%s24204_s21 + $0xf1] sm:$0xff]  ;;  %v17896_v1 = vld [vmem:[%s24204_s21 + $0xf9] sm:$0xff] }
 0x3da   : > { %20476 = vmatmul.mubr.f32.gmra.mrb[28].mxu1 %v26725_v27  ;;  %30773 = vst [vmem:[#allocation189_spill] sm:$0xff] %v27046_v5  ;;  %v27048_v32 = vand.u32 4294901760, %v13773_v53  ;;  %v30775_v23 = vand.u32 4294901760, %v26996_v48  ;;  %v27061_v52 = vsub.f32 %v13767_v56, %v27036_v46 }
 0x3db   : > { %20478 = vmatprep.mubr.f32.mxu1 %v26734_v55 }
 0x3dc   : > { %21834 = vmatmul.mubr.f32.vlgmr.msra.gmra.mrb[0].mxu0 %v13906_v21  ;;  %30774 = vst [vmem:[#allocation128_spill] sm:$0xff] %v27048_v32  ;;  %v13965_v21 = vsub.f32 %v26996_v48, %v30775_v23  ;;  %30777 = vst [vmem:[#allocation223_spill] sm:$0xff] %v27061_v52  ;;  %v13779_v23 = vsel %vm238_vm0, %v17895_v59, 0  ;;  %v27075_v56 = vsub.f32 %v13773_v53, %v27048_v32 }
 0x3dd   : > { %21836 = vmatprep.mubr.f32.mxu0 %v13916_v17  ;;  %21882 = vmatpush3.msra.mxu0 %v26848_v45  ;;  %v13946_v17 = vand.u32 4294901760, %v13945_v8  ;;  %v27044_v45 = vsub.f32 %v13764_v19, %v27021_v0  ;;  %v13776_v8 = vsel %vm238_vm0, %v17894_v7, 0  ;;  %v13956_v19 = vand.u32 4294901760, %v13955_v60  ;;  %v17898_v60 = vld [vmem:[%s24204_s21 + $0x111] sm:$0xff] }
 0x3de   : > { %20479 = vmatmul.mubr.f32.gmra.mrb[30].mxu1 %v26743_v34  ;;  %21931 = vmatprep.subr.mxu0 %v26829_v40  ;;  %v27072_v7 = vsub.f32 %v13770_v57, %v27046_v5  ;;  %30781 = vst [vmem:[#allocation228_spill] sm:$0xff] %v27075_v56  ;;  %v13966_v59 = vand.u32 4294901760, %v13965_v21  ;;  %v30786_v21 = vand.u32 4294901760, %v30720_v47  ;;  %v17899_v47 = vld [vmem:[%s24204_s21 + $0x121] sm:$0xff]  ;;  %v13788_v53 = vsel %vm238_vm0, %v17898_v60, 0 }
 0x3df   : > { %20483 = vmatprep.mubr.f32.mxu1 %v30771_v16  ;;  %30772 = vst [vmem:[#allocation185_spill] sm:$0xff] %v27044_v45  ;;  %v30776_v16 = vand.u32 4294901760, %v27010_v62 }
 0x3e0   : > { %21837 = vmatmul.mubr.f32.gmra.mrb[2].mxu0 %v13926_v20  ;;  %v30778_v20 = vand.u32 4294901760, %v30717_v36  ;;  %30780 = vst [vmem:[#allocation226_spill] sm:$0xff] %v27072_v7  ;;  %v17897_v36 = vld [vmem:[%s24204_s21 + $0x109] sm:$0xff] }
 0x3e1   : > { %21839 = vmatprep.mubr.f32.mxu0 %v13936_v50  ;;  %v13975_v0 = vsub.f32 %v27010_v62, %v30776_v16  ;;  %v27077_v50 = vand.u32 4294901760, %v13776_v8  ;;  %v30783_v16 = vand.u32 4294901760, %v27024_v31  ;;  %v17902_v62 = vld [vmem:[%s24204_s21 + $0x141] sm:$0xff] }
 0x3e2   : > { %20484 = vmatmul.mubr.f32.vlgmr.msra.gmra.mrb[0].mxu1 %v30778_v20  ;;  %v27088_v20 = vand.u32 4294901760, %v13779_v23 }
 0x3e3   : > { %20532 = vmatpush3.msra.mxu1 %v30719_v13  ;;  %20486 = vmatprep.mubr.f32.mxu1 %v30779_v22  ;;  %30782 = vst [vmem:[#allocation70_spill] sm:$0xff] %v27077_v50  ;;  %v13985_v13 = vsub.f32 %v27024_v31, %v30783_v16  ;;  %v13995_v22 = vsub.f32 %v27027_v49, %v30784_v61  ;;  %v13976_v57 = vand.u32 4294901760, %v13975_v0  ;;  %v13785_v16 = vsel %vm238_vm0, %v17897_v36, 0 }
 0x3e4   : > { %21840 = vmatmul.mubr.f32.gmra.mrb[4].mxu0 %v13946_v17  ;;  %20581 = vmatprep.subr.mxu1 %v26235_v37  ;;  %30785 = vst [vmem:[#allocation136_spill] sm:$0xff] %v27088_v20  ;;  %v13782_v17 = vsel %vm238_vm0, %v17896_v1, 0  ;;  %v30787_v31 = vand.u32 4294901760, %v30721_v10  ;;  %v30788_v61 = vand.u32 4294901760, %v27044_v45  ;;  %v27103_v1 = vsub.f32 %v13776_v8, %v27077_v50  ;;  %v17900_v8 = vld [vmem:[%s24204_s21 + $0x129] sm:$0xff] }
 0x3e5   : > { %21842 = vmatprep.mubr.f32.mxu0 %v13956_v19  ;;  %v13986_v36 = vand.u32 4294901760, %v13985_v13  ;;  %v27106_v49 = vand.u32 4294901760, %v13782_v17  ;;  %v30791_v10 = vand.u32 4294901760, %v27061_v52  ;;  %v27114_v19 = vand.u32 4294901760, %v13785_v16 }
 0x3e6   : > { %20487 = vmatmul.mubr.f32.gmra.mrb[2].mxu1 %v30786_v21  ;;  %v14005_v0 = vsub.f32 %v27044_v45, %v30788_v61  ;;  %30789 = vst [vmem:[#allocation140_spill] sm:$0xff] %v27103_v1  ;;  %v13996_v21 = vand.u32 4294901760, %v13995_v22  ;;  %v27112_v61 = vsub.f32 %v13779_v23, %v27088_v20  ;;  %v17901_v45 = vld [vmem:[%s24204_s21 + $0x139] sm:$0xff]  ;;  %v13791_v13 = vsel %vm238_vm0, %v17899_v47, 0 }
 0x3e7   : > { %20489 = vmatprep.mubr.f32.mxu1 %v30787_v31  ;;  %30790 = vst [vmem:[#allocation141_spill] sm:$0xff] %v27106_v49  ;;  %v14015_v31 = vsub.f32 %v27061_v52, %v30791_v10  ;;  %30793 = vst [vmem:[#allocation139_spill] sm:$0xff] %v27114_v19  ;;  %v30795_v22 = vand.u32 4294901760, %v30723_v25  ;;  %v30796_v10 = vand.u32 4294901760, %v27072_v7  ;;  %v30797_v52 = vand.u32 4294901760, %v27075_v56 }
 0x3e8   : > { %21843 = vmatmul.mubr.f32.gmra.mrb[6].mxu0 %v13966_v59  ;;  %30792 = vst [vmem:[#allocation133_spill] sm:$0xff] %v27112_v61  ;;  %v30794_v59 = vand.u32 4294901760, %v30722_v11  ;;  %v27132_v11 = vsub.f32 %v13782_v17, %v27106_v49  ;;  %v27134_v47 = vand.u32 4294901760, %v13788_v53  ;;  %v13794_v25 = vsel %vm238_vm0, %v17900_v8, 0  ;;  %v17903_v17 = vld [vmem:[%s24204_s21 + $0x151] sm:$0xff] }
 0x3e9   : > { %21845 = vmatprep.mubr.f32.mxu0 %v13976_v57  ;;  %v14006_v57 = vand.u32 4294901760, %v14005_v0  ;;  %v14025_v23 = vsub.f32 %v27072_v7, %v30796_v10  ;;  %v14035_v60 = vsub.f32 %v27075_v56, %v30797_v52  ;;  %v13797_v0 = vsel %vm238_vm0, %v17901_v45, 0 }
 0x3ea   : > { %20490 = vmatmul.mubr.f32.gmra.mrb[4].mxu1 %v30794_v59  ;;  %30798 = vst [vmem:[#allocation147_spill] sm:$0xff] %v27134_v47  ;;  %v14016_v59 = vand.u32 4294901760, %v14015_v31  ;;  %v27140_v10 = vsub.f32 %v13785_v16, %v27114_v19  ;;  %v27142_v52 = vand.u32 4294901760, %v13791_v13  ;;  %v30802_v56 = vand.u32 4294901760, %v30725_v58 }
 0x3eb   : > { %20492 = vmatprep.mubr.f32.mxu1 %v30795_v22  ;;  %v14026_v8 = vand.u32 4294901760, %v14025_v23  ;;  %v14036_v45 = vand.u32 4294901760, %v14035_v60  ;;  %v27152_v31 = vand.u32 4294901760, %v13797_v0  ;;  %v30805_v16 = vand.u32 4294901760, %v27103_v1 }
 0x3ec   : > { %21846 = vmatmul.mubr.f32.gmra.mrb[8].mxu0 %v13986_v36  ;;  %30799 = vst [vmem:[#allocation12_spill] sm:$0xff] %v27140_v10  ;;  %30800 = vst [vmem:[#allocation156_spill] sm:$0xff] %v27142_v52  ;;  %v30801_v36 = vand.u32 4294901760, %v30724_v14  ;;  %v13800_v58 = vsel %vm238_vm0, %v17902_v62, 0  ;;  %v13803_v7 = vsel %vm238_vm0, %v17903_v17, 0  ;;  %v17904_v14 = vld [vmem:[%s24204_s21 + $0x159] sm:$0xff] }
 0x3ed   : > { %21848 = vmatprep.mubr.f32.mxu0 %v13996_v21  ;;  %v27150_v21 = vand.u32 4294901760, %v13794_v25  ;;  %30804 = vst [vmem:[#allocation51_spill] sm:$0xff] %v27152_v31  ;;  %v14045_v22 = vsub.f32 %v27103_v1, %v30805_v16  ;;  %v30809_v16 = vand.u32 4294901760, %v30726_v2  ;;  %v30814_v17 = vand.u32 4294901760, %v27132_v11 }
 0x3ee   : > { %20493 = vmatmul.mubr.f32.gmra.mrb[6].mxu1 %v30801_v36  ;;  %v27159_v36 = vsub.f32 %v13788_v53, %v27134_v47  ;;  %v30810_v53 = vand.u32 4294901760, %v30727_v38  ;;  %v30818_v38 = vand.u32 4294901760, %v30729_v39 }
 0x3ef   : > { %20495 = vmatprep.mubr.f32.mxu1 %v30802_v56  ;;  %30803 = vst [vmem:[#allocation47_spill] sm:$0xff] %v27150_v21  ;;  %v30807_v56 = vand.u32 4294901760, %v27112_v61  ;;  %v27176_v62 = vsub.f32 %v13794_v25, %v27150_v21  ;;  %v14046_v60 = vand.u32 4294901760, %v14045_v22  ;;  %v14065_v2 = vsub.f32 %v27132_v11, %v30814_v17  ;;  %v17906_v17 = vld [vmem:[%s24204_s21 + $0x171] sm:$0xff] }
 0x3f0   : > { %21849 = vmatmul.mubr.f32.gmra.mrb[10].mxu0 %v14006_v57  ;;  %30806 = vst [vmem:[#allocation166_spill] sm:$0xff] %v27159_v36  ;;  %v27167_v57 = vsub.f32 %v13791_v13, %v27142_v52  ;;  %v17905_v13 = vld [vmem:[%s24204_s21 + $0x169] sm:$0xff]  ;;  %v30817_v22 = vand.u32 4294901760, %v30728_v3  ;;  %v30819_v3 = vand.u32 4294901760, %v27159_v36 }
 0x3f1   : > { %21851 = vmatprep.mubr.f32.mxu0 %v14016_v59  ;;  %v14055_v23 = vsub.f32 %v27112_v61, %v30807_v56  ;;  %30811 = vst [vmem:[#allocation174_spill] sm:$0xff] %v27176_v62  ;;  %v27179_v59 = vsub.f32 %v13797_v0, %v27152_v31  ;;  %v27181_v56 = vand.u32 4294901760, %v13800_v58  ;;  %v13809_v1 = vsel %vm238_vm0, %v17905_v13, 0  ;;  %v17907_v61 = vld [vmem:[%s24204_s21 + $0x181] sm:$0xff] }
 0x3f2   : > { %30808 = vst [vmem:[#allocation172_spill] sm:$0xff] %v27167_v57  ;;  %20496 = vmatmul.mubr.f32.gmra.mrb[8].mxu1 %v30809_v16  ;;  %v27188_v16 = vand.u32 4294901760, %v13803_v7  ;;  %v14085_v13 = vsub.f32 %v27159_v36, %v30819_v3  ;;  %v13815_v3 = vsel %vm238_vm0, %v17907_v61, 0  ;;  %v17908_v36 = vld [vmem:[%s24204_s21 + $0x189] sm:$0xff] }
 0x3f3   : > { %20498 = vmatprep.mubr.f32.mxu1 %v30810_v53  ;;  %30812 = vst [vmem:[#allocation175_spill] sm:$0xff] %v27179_v59  ;;  %30813 = vst [vmem:[#allocation183_spill] sm:$0xff] %v27181_v56  ;;  %v14056_v25 = vand.u32 4294901760, %v14055_v23  ;;  %v30816_v53 = vand.u32 4294901760, %v27140_v10  ;;  %v30821_v23 = vand.u32 4294901760, %v27167_v57 }
 0x3f4   : > { %21852 = vmatmul.mubr.f32.gmra.mrb[12].mxu0 %v14026_v8  ;;  %30815 = vst [vmem:[#allocation187_spill] sm:$0xff] %v27188_v16  ;;  %v13806_v8 = vsel %vm238_vm0, %v17904_v14, 0  ;;  %v14066_v14 = vand.u32 4294901760, %v14065_v2  ;;  %v30823_v2 = vand.u32 4294901760, %v30730_v42  ;;  %v14086_v42 = vand.u32 4294901760, %v14085_v13  ;;  %v17910_v13 = vld [vmem:[%s24204_s21 + $0x1a1] sm:$0xff] }
 0x3f5   : > { %21854 = vmatprep.mubr.f32.mxu0 %v14036_v45  ;;  %v14075_v0 = vsub.f32 %v27140_v10, %v30816_v53  ;;  %v27204_v53 = vsub.f32 %v13800_v58, %v27181_v56  ;;  %v27213_v39 = vand.u32 4294901760, %v13806_v8  ;;  %v14095_v58 = vsub.f32 %v27167_v57, %v30821_v23  ;;  %v17909_v57 = vld [vmem:[%s24204_s21 + $0x199] sm:$0xff] }
 0x3f6   : > { %20499 = vmatmul.mubr.f32.gmra.mrb[10].mxu1 %v30817_v22  ;;  %v27211_v22 = vsub.f32 %v13803_v7, %v27188_v16  ;;  %v27218_v45 = vand.u32 4294901760, %v13809_v1  ;;  %v30824_v7 = vand.u32 4294901760, %v30731_v29  ;;  %v30826_v10 = vand.u32 4294901760, %v27179_v59 }
 0x3f7   : > { %20501 = vmatprep.mubr.f32.mxu1 %v30818_v38  ;;  %30820 = vst [vmem:[#allocation194_spill] sm:$0xff] %v27213_v39  ;;  %v14076_v38 = vand.u32 4294901760, %v14075_v0 }
 0x3f8   : > { %21855 = vmatmul.mubr.f32.gmra.mrb[14].mxu0 %v14046_v60  ;;  %30822 = vst [vmem:[#allocation196_spill] sm:$0xff] %v27218_v45  ;;  %v13812_v60 = vsel %vm238_vm0, %v17906_v17, 0  ;;  %v14115_v23 = vsub.f32 %v27179_v59, %v30826_v10  ;;  %v13818_v10 = vsel %vm238_vm0, %v17908_v36, 0  ;;  %v30829_v17 = vand.u32 4294901760, %v30732_v9 }
 0x3f9   : > { %21857 = vmatprep.mubr.f32.mxu0 %v14056_v25  ;;  %v30825_v25 = vand.u32 4294901760, %v27176_v62  ;;  %v27239_v29 = vand.u32 4294901760, %v13812_v60 }
 0x3fa   : > { %20502 = vmatmul.mubr.f32.gmra.mrb[12].mxu1 %v30823_v2  ;;  %v27237_v2 = vsub.f32 %v13806_v8, %v27213_v39  ;;  %v30830_v8 = vand.u32 4294901760, %v30733_v6  ;;  %v14116_v59 = vand.u32 4294901760, %v14115_v23 }
 0x3fb   : > { %20504 = vmatprep.mubr.f32.mxu1 %v30824_v7  ;;  %v14105_v0 = vsub.f32 %v27176_v62, %v30825_v25  ;;  %30827 = vst [vmem:[#allocation202_spill] sm:$0xff] %v27239_v29  ;;  %v14096_v7 = vand.u32 4294901760, %v14095_v58  ;;  %v27242_v25 = vsub.f32 %v13809_v1, %v27218_v45  ;;  %v27244_v62 = vand.u32 4294901760, %v13815_v3 }
 0x3fc   : > { %21858 = vmatmul.mubr.f32.gmra.mrb[16].mxu0 %v14066_v14  ;;  %v13821_v14 = vsel %vm238_vm0, %v17909_v57, 0  ;;  %v30832_v58 = vand.u32 4294901760, %v27211_v22  ;;  %v29689_v9 = vand.u32 4294901760, %v27237_v2  ;;  %v27263_v57 = vand.u32 4294901760, %v13818_v10 }
 0x3fd   : > { %21860 = vmatprep.mubr.f32.mxu0 %v14076_v38  ;;  %30828 = vst [vmem:[#allocation205_spill] sm:$0xff] %v27244_v62  ;;  %v14106_v61 = vand.u32 4294901760, %v14105_v0  ;;  %v30831_v38 = vand.u32 4294901760, %v27204_v53  ;;  %v27267_v0 = vsub.f32 %v13815_v3, %v27244_v62  ;;  %v27269_v23 = vand.u32 4294901760, %v13821_v14 }
 0x3fe   : > { %20505 = vmatmul.mubr.f32.gmra.mrb[14].mxu1 %v30829_v17  ;;  %v14135_v36 = vsub.f32 %v27211_v22, %v30832_v58  ;;  %v27261_v17 = vsub.f32 %v13812_v60, %v27239_v29  ;;  %30833 = vst [vmem:[#allocation206_spill] sm:$0xff] %v27263_v57  ;;  %v27281_v3 = vsub.f32 %v13818_v10, %v27263_v57 }
 0x3ff   : > { %20507 = vmatprep.mubr.f32.mxu1 %v30830_v8  ;;  %v14125_v1 = vsub.f32 %v27204_v53, %v30831_v38  ;;  %30834 = vst [vmem:[#allocation207_spill] sm:$0xff] %v27269_v23  ;;  %v30835_v8 = vand.u32 4294901760, %v30734_v43  ;;  %v30836_v38 = vand.u32 4294901760, %v30735_v4  ;;  %v30838_v43 = vand.u32 4294901760, %v27242_v25 }
 0x400   : > { %21861 = vmatmul.mubr.f32.gmra.mrb[18].mxu0 %v14086_v42  ;;  %v13824_v42 = vsel %vm238_vm0, %v17910_v13, 0  ;;  %v29688_v58 = vand.u32 4294901760, %v27261_v17  ;;  %v14136_v13 = vand.u32 4294901760, %v14135_v36  ;;  %v29686_v36 = vand.u32 4294901760, %v27281_v3 }
 0x401   : > { %21863 = vmatprep.mubr.f32.mxu0 %v14096_v7  ;;  %v14126_v60 = vand.u32 4294901760, %v14125_v1  ;;  %v14145_v7 = vsub.f32 %v27237_v2, %v29689_v9  ;;  %v27283_v6 = vand.u32 4294901760, %v13824_v42  ;;  %v14155_v4 = vsub.f32 %v27242_v25, %v30838_v43  ;;  %v30879_v9 = vld [vmem:[#allocation168_spill] sm:$0xff] }
 0x402   : > { %20508 = vmatmul.mubr.f32.gmra.mrb[16].mxu1 %v30835_v8  ;;  %v29687_v1 = vand.u32 4294901760, %v27267_v0  ;;  %v30839_v8 = vand.u32 4294901760, %v30736_v28 }
 0x403   : > { %20510 = vmatprep.mubr.f32.mxu1 %v30836_v38  ;;  %30837 = vst [vmem:[#allocation211_spill] sm:$0xff] %v27283_v6  ;;  %v30840_v38 = vand.u32 4294901760, %v30737_v24  ;;  %v14146_v10 = vand.u32 4294901760, %v14145_v7  ;;  %v27301_v43 = vsub.f32 %v13824_v42, %v27283_v6  ;;  %v30842_v7 = vand.u32 4294901760, %v30741_v33 }
 0x404   : > { %21864 = vmatmul.mubr.f32.gmra.mrb[20].mxu0 %v14106_v61  ;;  %v27290_v61 = vsub.f32 %v13821_v14, %v27269_v23  ;;  %v14156_v14 = vand.u32 4294901760, %v14155_v4  ;;  %v14175_v28 = vsub.f32 %v27267_v0, %v29687_v1  ;;  %v14185_v42 = vsub.f32 %v27281_v3, %v29686_v36  ;;  %v30876_v36 = vld [vmem:[#allocation135_spill] sm:$0xff]  ;;  %v30877_v1 = vld [vmem:[#allocation154_spill] sm:$0xff] }
 0x405   : > { %21866 = vmatprep.mubr.f32.mxu0 %v14116_v59  ;;  %v14165_v59 = vsub.f32 %v27261_v17, %v29688_v58  ;;  %v30844_v33 = vand.u32 4294901760, %v30747_v18  ;;  %v30847_v18 = vand.u32 4294901760, %v26707_v12  ;;  %v17779_v12 = vld [vmem:[%s28966_s1 + $0x18] sm:$0xff]  ;;  %v30878_v58 = vld [vmem:[#allocation34_spill] sm:$0xff] }
 0x406   : > { %20511 = vmatmul.mubr.f32.gmra.mrb[18].mxu1 %v30839_v8  ;;  %v29685_v24 = vand.u32 4294901760, %v27290_v61  ;;  %v14176_v4 = vand.u32 4294901760, %v14175_v28  ;;  %v30846_v28 = vand.u32 4294901760, %v26690_v15  ;;  %v30851_v15 = vld [vmem:[#allocation233_spill] sm:$0xff] }
 0x407   : > { %20513 = vmatprep.mubr.f32.mxu1 %v30840_v38  ;;  %v14166_v8 = vand.u32 4294901760, %v14165_v59 }
 0x408   : > { %21867 = vmatmul.mubr.f32.gmra.mrb[22].mxu0 %v14126_v60  ;;  %v30841_v60 = vand.u32 4294901760, %v30740_v44  ;;  %v14195_v38 = vsub.f32 %v27290_v61, %v29685_v24  ;;  %v30843_v44 = vand.u32 4294901760, %v30746_v54  ;;  %v30875_v24 = vld [vmem:[#allocation129_spill] sm:$0xff] }
 0x409   : > { %21869 = vmatprep.mubr.f32.mxu0 %v14136_v13  ;;  %v29684_v13 = vand.u32 4294901760, %v27301_v43 }
 0x40a   : > { %20514 = vmatmul.mubr.f32.gmra.mrb[20].mxu1 %v30841_v60  ;;  %v14196_v60 = vand.u32 4294901760, %v14195_v38  ;;  %v30857_v38 = vld [vmem:[#allocation78_spill] sm:$0xff] }
 0x40b   : > { %20516 = vmatprep.mubr.f32.mxu1 %v30842_v7  ;;  %v14205_v59 = vsub.f32 %v27301_v43, %v29684_v13  ;;  %v30848_v7 = vand.u32 4294901760, %v26713_v41  ;;  %v30852_v41 = vand.u32 4294901760, %v26743_v34  ;;  %v30861_v34 = vld [vmem:[#allocation91_spill] sm:$0xff] }
 0x40c   : > { %21870 = vmatmul.mubr.f32.gmra.mrb[24].mxu0 %v14146_v10  ;;  %v14186_v10 = vand.u32 4294901760, %v14185_v42  ;;  %v30853_v42 = vld [vmem:[#allocation217_spill] sm:$0xff]  ;;  %v30874_v13 = vld [vmem:[#allocation75_spill] sm:$0xff] }
 0x40d   : > { %21872 = vmatprep.mubr.f32.mxu0 %v14156_v14  ;;  %v30845_v14 = vand.u32 4294901760, %v30753_v30  ;;  %v14206_v54 = vand.u32 4294901760, %v14205_v59  ;;  %v30850_v30 = vand.u32 4294901760, %v26734_v55  ;;  %v27349_v55 = vand.u32 4294901760, %v17779_v12  ;;  %v30863_v59 = vld [vmem:[#allocation21_spill] sm:$0xff] }
 0x40e   : > { %20517 = vmatmul.mubr.f32.gmra.mrb[22].mxu1 %v30843_v44  ;;  %v30858_v44 = vld [vmem:[#allocation148_spill] sm:$0xff] }
 0x40f   : > { %20519 = vmatprep.mubr.f32.mxu1 %v30844_v33  ;;  %30856 = vst [vmem:[#allocation213_spill] sm:$0xff] %v27349_v55  ;;  %v30860_v33 = vld [vmem:[#allocation137_spill] sm:$0xff] }
 0x410   : > { %21873 = vmatmul.mubr.f32.gmra.mrb[26].mxu0 %v14166_v8  ;;  %v30849_v8 = vand.u32 4294901760, %v26725_v27  ;;  %v30854_v27 = vld [vmem:[#allocation146_spill] sm:$0xff] }
 0x411   : > { %21875 = vmatprep.mubr.f32.mxu0 %v14176_v4  ;;  %v30855_v4 = vld [vmem:[#allocation127_spill] sm:$0xff] }
 0x412   : > { %20520 = vmatmul.mubr.f32.gmra.mrb[24].mxu1 %v30845_v14  ;;  %v30865_v14 = vld [vmem:[#allocation160_spill] sm:$0xff] }
 0x413   : > { %20522 = vmatprep.mubr.f32.mxu1 %v30846_v28  ;;  %v30867_v28 = vld [vmem:[#allocation37_spill] sm:$0xff] }
 0x414   : > { %21876 = vmatmul.mubr.f32.gmra.mrb[28].mxu0 %v14186_v10  ;;  %v30862_v10 = vld [vmem:[#allocation18_spill] sm:$0xff] }
 0x415   : > { %21878 = vmatprep.mubr.f32.mxu0 %v14196_v60  ;;  %v30864_v60 = vld [vmem:[#allocation25_spill] sm:$0xff] }
 0x416   : > { %20523 = vmatmul.mubr.f32.gmra.mrb[26].mxu1 %v30847_v18  ;;  %v30869_v18 = vld [vmem:[#allocation52_spill] sm:$0xff] }
 0x417   : > { %20525 = vmatprep.mubr.f32.mxu1 %v30848_v7  ;;  %v30870_v7 = vld [vmem:[#allocation169_spill] sm:$0xff] }
 0x418   : > { %21879 = vmatmul.mubr.f32.gmra.mrb[30].mxu0 %v14206_v54  ;;  %v30868_v54 = vld [vmem:[#allocation162_spill] sm:$0xff] }
 0x419   : > { %21883 = vmatprep.mubr.f32.mxu0 %v26900_v35 }
 0x41a   : > { %20526 = vmatmul.mubr.f32.gmra.mrb[28].mxu1 %v30849_v8  ;;  %v30871_v8 = vld [vmem:[#allocation59_spill] sm:$0xff] }
 0x41b   : > { %20528 = vmatprep.mubr.f32.mxu1 %v30850_v30  ;;  %v30872_v30 = vld [vmem:[#allocation165_spill] sm:$0xff] }
 0x41c   : > { %21884 = vmatmul.mubr.f32.vlgmr.msra.gmra.mrb[0].mxu0 %v26909_v63 }
 0x41d   : > { %21886 = vmatprep.mubr.f32.mxu0 %v30851_v15  ;;  %21932 = vmatpush3.msra.mxu0 %v26829_v40  ;;  %v30859_v40 = vld [vmem:[#allocation152_spill] sm:$0xff] }
 0x41e   : > { %20529 = vmatmul.mubr.f32.gmra.mrb[30].mxu1 %v30852_v41  ;;  %21981 = vmatprep.subr.mxu0 %v30853_v42  ;;  %v30873_v41 = vld [vmem:[#allocation86_spill] sm:$0xff] }
 0x41f   : > { %20533 = vmatprep.mubr.f32.mxu1 %v30854_v27 }
 0x420   : > { %21887 = vmatmul.mubr.f32.gmra.mrb[2].mxu0 %v30855_v4 }
 0x421   : > { %21889 = vmatprep.mubr.f32.mxu0 %v30857_v38  ;;  %v17754_v38 = vld [vmem:[%s24204_s21 + $0x68] sm:$0xff] }
 0x422   : > { %20534 = vmatmul.mubr.f32.vlgmr.msra.gmra.mrb[0].mxu1 %v30858_v44  ;;  %v5987_v4 = vsel %vm238_vm0, %v17754_v38, 0 }
 0x423   : > { %20582 = vmatpush3.msra.mxu1 %v26235_v37  ;;  %20536 = vmatprep.mubr.f32.mxu1 %v30859_v40  ;;  %v30866_v37 = vld [vmem:[#allocation158_spill] sm:$0xff]  ;;  %v27548_v38 = vand.u32 4294901760, %v5987_v4 }
 0x424   : > { %21890 = vmatmul.mubr.f32.gmra.mrb[4].mxu0 %v30860_v33  ;;  %20631 = vmatprep.subr.mxu1 %v27349_v55 }
 0x425   : > { %21892 = vmatprep.mubr.f32.mxu0 %v30861_v34  ;;  %30931 = vst [vmem:[#allocation214_spill] sm:$0xff] %v27548_v38 }
 0x426   : > { %20537 = vmatmul.mubr.f32.gmra.mrb[2].mxu1 %v30862_v10 }
 0x427   : > { %20539 = vmatprep.mubr.f32.mxu1 %v30863_v59 }
 0x428   : > { %21893 = vmatmul.mubr.f32.gmra.mrb[6].mxu0 %v26970_v26 }
 0x429   : > { %21895 = vmatprep.mubr.f32.mxu0 %v26984_v51  ;;  %v30902_v51 = vld [vmem:[#allocation99_spill] sm:$0xff] }
 0x42a   : > { %20540 = vmatmul.mubr.f32.gmra.mrb[4].mxu1 %v30864_v60 }
 0x42b   : > { %20542 = vmatprep.mubr.f32.mxu1 %v30865_v14 }
 0x42c   : > { %21896 = vmatmul.mubr.f32.gmra.mrb[8].mxu0 %v30866_v37  ;;  %v30900_v37 = vld [vmem:[#allocation83_spill] sm:$0xff] }
 0x42d   : > { %21898 = vmatprep.mubr.f32.mxu0 %v30867_v28 }
 0x42e   : > { %20543 = vmatmul.mubr.f32.gmra.mrb[6].mxu1 %v30868_v54 }
 0x42f   : > { %20545 = vmatprep.mubr.f32.mxu1 %v30869_v18 }
 0x430   : > { %21899 = vmatmul.mubr.f32.gmra.mrb[10].mxu0 %v30870_v7  ;;  %v30899_v7 = vld [vmem:[#allocation131_spill] sm:$0xff] }
 0x431   : > { %21901 = vmatprep.mubr.f32.mxu0 %v27036_v46  ;;  %v30897_v46 = vld [vmem:[#allocation215_spill] sm:$0xff] }
 0x432   : > { %20546 = vmatmul.mubr.f32.gmra.mrb[8].mxu1 %v30871_v8 }
 0x433   : > { %20548 = vmatprep.mubr.f32.mxu1 %v30872_v30 }
 0x434   : > { %21902 = vmatmul.mubr.f32.gmra.mrb[12].mxu0 %v27046_v5  ;;  %v30894_v5 = vld [vmem:[#allocation212_spill] sm:$0xff] }
 0x435   : > { %21904 = vmatprep.mubr.f32.mxu0 %v27048_v32  ;;  %v30893_v32 = vld [vmem:[#allocation208_spill] sm:$0xff] }
 0x436   : > { %20549 = vmatmul.mubr.f32.gmra.mrb[10].mxu1 %v30873_v41 }
 0x437   : > { %20551 = vmatprep.mubr.f32.mxu1 %v30874_v13 }
 0x438   : > { %21905 = vmatmul.mubr.f32.gmra.mrb[14].mxu0 %v27077_v50  ;;  %v30880_v50 = vld [vmem:[#allocation180_spill] sm:$0xff] }
 0x439   : > { %21907 = vmatprep.mubr.f32.mxu0 %v27088_v20  ;;  %v30881_v20 = vld [vmem:[#allocation188_spill] sm:$0xff] }
 0x43a   : > { %20552 = vmatmul.mubr.f32.gmra.mrb[12].mxu1 %v30875_v24 }
 0x43b   : > { %20554 = vmatprep.mubr.f32.mxu1 %v30876_v36 }
 0x43c   : > { %21908 = vmatmul.mubr.f32.gmra.mrb[16].mxu0 %v27106_v49  ;;  %v30882_v49 = vld [vmem:[#allocation197_spill] sm:$0xff] }
 0x43d   : > { %21910 = vmatprep.mubr.f32.mxu0 %v27114_v19  ;;  %v30883_v19 = vld [vmem:[#allocation198_spill] sm:$0xff] }
 0x43e   : > { %20555 = vmatmul.mubr.f32.gmra.mrb[14].mxu1 %v30877_v1 }
 0x43f   : > { %20557 = vmatprep.mubr.f32.mxu1 %v30878_v58 }
 0x440   : > { %21911 = vmatmul.mubr.f32.gmra.mrb[18].mxu0 %v27134_v47  ;;  %v30884_v47 = vld [vmem:[#allocation199_spill] sm:$0xff] }
 0x441   : > { %21913 = vmatprep.mubr.f32.mxu0 %v27142_v52  ;;  %v30885_v52 = vld [vmem:[#allocation171_spill] sm:$0xff] }
 0x442   : > { %20558 = vmatmul.mubr.f32.gmra.mrb[16].mxu1 %v30879_v9 }
 0x443   : > { %20560 = vmatprep.mubr.f32.mxu1 %v30880_v50 }
 0x444   : > { %21914 = vmatmul.mubr.f32.gmra.mrb[20].mxu0 %v27150_v21  ;;  %v30886_v21 = vld [vmem:[#allocation177_spill] sm:$0xff] }
 0x445   : > { %21916 = vmatprep.mubr.f32.mxu0 %v27152_v31  ;;  %v30887_v31 = vld [vmem:[#allocation186_spill] sm:$0xff] }
 0x446   : > { %20561 = vmatmul.mubr.f32.gmra.mrb[18].mxu1 %v30881_v20 }
 0x447   : > { %20563 = vmatprep.mubr.f32.mxu1 %v30882_v49 }
 0x448   : > { %21917 = vmatmul.mubr.f32.gmra.mrb[22].mxu0 %v27181_v56  ;;  %v30888_v56 = vld [vmem:[#allocation190_spill] sm:$0xff] }
 0x449   : > { %21919 = vmatprep.mubr.f32.mxu0 %v27188_v16  ;;  %v27406_v16 = vsub.f32 %v17779_v12, %v27349_v55 }
 0x44a   : > { %20564 = vmatmul.mubr.f32.gmra.mrb[20].mxu1 %v30883_v19 }
 0x44b   : > { %20566 = vmatprep.mubr.f32.mxu1 %v30884_v47 }
 0x44c   : > { %21920 = vmatmul.mubr.f32.gmra.mrb[24].mxu0 %v27213_v39  ;;  %v30890_v39 = vld [vmem:[#allocation204_spill] sm:$0xff] }
 0x44d   : > { %21922 = vmatprep.mubr.f32.mxu0 %v27218_v45  ;;  %v30889_v45 = vld [vmem:[#allocation201_spill] sm:$0xff] }
 0x44e   : > { %20567 = vmatmul.mubr.f32.gmra.mrb[22].mxu1 %v30885_v52 }
 0x44f   : > { %20569 = vmatprep.mubr.f32.mxu1 %v30886_v21 }
 0x450   : > { %21923 = vmatmul.mubr.f32.gmra.mrb[26].mxu0 %v27239_v29  ;;  %v27413_v29 = vand.u32 4294901760, %v27406_v16 }
 0x451   : > { %21925 = vmatprep.mubr.f32.mxu0 %v27244_v62  ;;  %v30892_v62 = vld [vmem:[#allocation232_spill] sm:$0xff] }
 0x452   : > { %20570 = vmatmul.mubr.f32.gmra.mrb[24].mxu1 %v30887_v31  ;;  %30891 = vst [vmem:[#allocation218_spill] sm:$0xff] %v27413_v29  ;;  %v6451_v12 = vsub.f32 %v27406_v16, %v27413_v29  ;;  %v30901_v29 = vld [vmem:[#allocation144_spill] sm:$0xff] }
 0x453   : > { %20572 = vmatprep.mubr.f32.mxu1 %v30888_v56 }
 0x454   : > { %21926 = vmatmul.mubr.f32.gmra.mrb[28].mxu0 %v27263_v57  ;;  %v30895_v57 = vld [vmem:[#allocation109_spill] sm:$0xff]  ;;  %v27427_v28 = vand.u32 4294901760, %v6451_v12 }
 0x455   : > { %21928 = vmatprep.mubr.f32.mxu0 %v27269_v23  ;;  %v30896_v23 = vld [vmem:[#allocation125_spill] sm:$0xff] }
 0x456   : > { %20573 = vmatmul.mubr.f32.gmra.mrb[26].mxu1 %v30889_v45  ;;  %v30906_v12 = vld [vmem:[#allocation185_spill] sm:$0xff] }
 0x457   : > { %20575 = vmatprep.mubr.f32.mxu1 %v30890_v39 }
 0x458   : > { %21929 = vmatmul.mubr.f32.gmra.mrb[30].mxu0 %v27283_v6  ;;  %v30898_v6 = vld [vmem:[#allocation231_spill] sm:$0xff] }
 0x459   : > { %21933 = vmatprep.mubr.f32.mxu0 %v30892_v62 }
 0x45a   : > { %20576 = vmatmul.mubr.f32.gmra.mrb[28].mxu1 %v30893_v32 }
 0x45b   : > { %20578 = vmatprep.mubr.f32.mxu1 %v30894_v5 }
 0x45c   : > { %21934 = vmatmul.mubr.f32.vlgmr.msra.gmra.mrb[0].mxu0 %v30895_v57 }
 0x45d   : > { %21936 = vmatprep.mubr.f32.mxu0 %v30896_v23  ;;  %21982 = vmatpush3.msra.mxu0 %v30853_v42 }
 0x45e   : > { %20579 = vmatmul.mubr.f32.gmra.mrb[30].mxu1 %v30897_v46  ;;  %22031 = vmatprep.subr.mxu0 %v30898_v6 }
 0x45f   : > { %20583 = vmatprep.mubr.f32.mxu1 %v30854_v27  ;;  %v30903_v27 = vld [vmem:[#allocation43_spill] sm:$0xff] }
 0x460   : > { %21937 = vmatmul.mubr.f32.gmra.mrb[2].mxu0 %v30899_v7 }
 0x461   : > { %21939 = vmatprep.mubr.f32.mxu0 %v30900_v37 }
 0x462   : > { %20584 = vmatmul.mubr.f32.vlgmr.msra.gmra.mrb[0].mxu1 %v30858_v44  ;;  %v30904_v44 = vld [vmem:[#allocation173_spill] sm:$0xff] }
 0x463   : > { %20632 = vmatpush3.msra.mxu1 %v27349_v55  ;;  %20586 = vmatprep.mubr.f32.mxu1 %v30859_v40  ;;  %v30905_v40 = vld [vmem:[#allocation179_spill] sm:$0xff] }
 0x464   : > { %21940 = vmatmul.mubr.f32.gmra.mrb[4].mxu0 %v30901_v29  ;;  %20681 = vmatprep.subr.mxu1 %v27427_v28 }
 0x465   : > { %21942 = vmatprep.mubr.f32.mxu0 %v30902_v51 }
 0x466   : > { %20587 = vmatmul.mubr.f32.gmra.mrb[2].mxu1 %v30862_v10  ;;  %v30907_v10 = vld [vmem:[#allocation223_spill] sm:$0xff] }
 0x467   : > { %20589 = vmatprep.mubr.f32.mxu1 %v30863_v59  ;;  %v30908_v59 = vld [vmem:[#allocation226_spill] sm:$0xff] }
 0x468   : > { %21943 = vmatmul.mubr.f32.gmra.mrb[6].mxu0 %v26996_v48 }
 0x469   : > { %21945 = vmatprep.mubr.f32.mxu0 %v30903_v27 }
 0x46a   : > { %20590 = vmatmul.mubr.f32.gmra.mrb[4].mxu1 %v30864_v60  ;;  %v30909_v60 = vld [vmem:[#allocation228_spill] sm:$0xff] }
 0x46b   : > { %20592 = vmatprep.mubr.f32.mxu1 %v30865_v14  ;;  %v30910_v14 = vld [vmem:[#allocation140_spill] sm:$0xff] }
 0x46c   : > { %21946 = vmatmul.mubr.f32.gmra.mrb[8].mxu0 %v30904_v44 }
 0x46d   : > { %21948 = vmatprep.mubr.f32.mxu0 %v30905_v40 }
 0x46e   : > { %20593 = vmatmul.mubr.f32.gmra.mrb[6].mxu1 %v30868_v54  ;;  %v30911_v54 = vld [vmem:[#allocation133_spill] sm:$0xff] }
 0x46f   : > { %20595 = vmatprep.mubr.f32.mxu1 %v30869_v18  ;;  %v30912_v18 = vld [vmem:[#allocation12_spill] sm:$0xff] }
 0x470   : > { %21949 = vmatmul.mubr.f32.gmra.mrb[10].mxu0 %v30906_v12 }
 0x471   : > { %21951 = vmatprep.mubr.f32.mxu0 %v30907_v10 }
 0x472   : > { %20596 = vmatmul.mubr.f32.gmra.mrb[8].mxu1 %v30871_v8  ;;  %v30913_v8 = vld [vmem:[#allocation166_spill] sm:$0xff] }
 0x473   : > { %20598 = vmatprep.mubr.f32.mxu1 %v30872_v30  ;;  %v30916_v30 = vld [vmem:[#allocation175_spill] sm:$0xff] }
 0x474   : > { %21952 = vmatmul.mubr.f32.gmra.mrb[12].mxu0 %v30908_v59 }
 0x475   : > { %21954 = vmatprep.mubr.f32.mxu0 %v30909_v60 }
 0x476   : > { %20599 = vmatmul.mubr.f32.gmra.mrb[10].mxu1 %v30873_v41  ;;  %v17749_v41 = vld [vmem:[%s24204_s21 + $0x30] sm:$0xff] }
 0x477   : > { %20601 = vmatprep.mubr.f32.mxu1 %v30874_v13  ;;  %v30914_v13 = vld [vmem:[#allocation172_spill] sm:$0xff] }
 0x478   : > { %21955 = vmatmul.mubr.f32.gmra.mrb[14].mxu0 %v30910_v14 }
 0x479   : > { %21957 = vmatprep.mubr.f32.mxu0 %v30911_v54 }
 0x47a   : > { %20602 = vmatmul.mubr.f32.gmra.mrb[12].mxu1 %v30875_v24  ;;  %v30915_v24 = vld [vmem:[#allocation174_spill] sm:$0xff] }
 0x47b   : > { %20604 = vmatprep.mubr.f32.mxu1 %v30876_v36  ;;  %v17747_v36 = vld [vmem:[%s24204_s21 + $0x18] sm:$0xff] }
 0x47c   : > { %21958 = vmatmul.mubr.f32.gmra.mrb[16].mxu0 %v27132_v11 }
 0x47d   : > { %21960 = vmatprep.mubr.f32.mxu0 %v30912_v18 }
 0x47e   : > { %20605 = vmatmul.mubr.f32.gmra.mrb[14].mxu1 %v30877_v1  ;;  %v17748_v1 = vld [vmem:[%s24204_s21 + $0x20] sm:$0xff] }
 0x47f   : > { %20607 = vmatprep.mubr.f32.mxu1 %v30878_v58  ;;  %v5966_v58 = vsel %vm238_vm0, %v17747_v36, 0  ;;  %v17751_v36 = vld [vmem:[%s24204_s21 + $0x48] sm:$0xff] }
 0x480   : > { %21961 = vmatmul.mubr.f32.gmra.mrb[18].mxu0 %v30913_v8 }
 0x481   : > { %21963 = vmatprep.mubr.f32.mxu0 %v30914_v13 }
 0x482   : > { %20608 = vmatmul.mubr.f32.gmra.mrb[16].mxu1 %v30879_v9  ;;  %v5969_v9 = vsel %vm238_vm0, %v17748_v1, 0  ;;  %v5978_v1 = vsel %vm238_vm0, %v17751_v36, 0 }
 0x483   : > { %20610 = vmatprep.mubr.f32.mxu1 %v30880_v50  ;;  %v27477_v50 = vand.u32 4294901760, %v5966_v58  ;;  %v27486_v26 = vand.u32 4294901760, %v5969_v9  ;;  %v27511_v36 = vand.u32 4294901760, %v5978_v1 }
 0x484   : > { %21964 = vmatmul.mubr.f32.gmra.mrb[20].mxu0 %v30915_v24 }
 0x485   : > { %21966 = vmatprep.mubr.f32.mxu0 %v30916_v30  ;;  %30917 = vst [vmem:[#allocation220_spill] sm:$0xff] %v27477_v50  ;;  %30918 = vst [vmem:[#allocation222_spill] sm:$0xff] %v27486_v26  ;;  %v27501_v55 = vsub.f32 %v5969_v9, %v27486_v26 }
 0x486   : > { %20611 = vmatmul.mubr.f32.gmra.mrb[18].mxu1 %v30881_v20  ;;  %v5972_v20 = vsel %vm238_vm0, %v17749_v41, 0  ;;  %v17752_v41 = vld [vmem:[%s24204_s21 + $0x50] sm:$0xff]  ;;  %30924 = vst [vmem:[#allocation193_spill] sm:$0xff] %v27511_v36 }
 0x487   : > { %20613 = vmatprep.mubr.f32.mxu1 %v30882_v49  ;;  %v17750_v49 = vld [vmem:[%s24204_s21 + $0x38] sm:$0xff]  ;;  %v27492_v34 = vand.u32 4294901760, %v5972_v20  ;;  %30921 = vst [vmem:[#allocation229_spill] sm:$0xff] %v27501_v55  ;;  %v5981_v33 = vsel %vm238_vm0, %v17752_v41, 0 }
 0x488   : > { %21967 = vmatmul.mubr.f32.gmra.mrb[22].mxu0 %v27204_v53 }
 0x489   : > { %21969 = vmatprep.mubr.f32.mxu0 %v27211_v22  ;;  %30920 = vst [vmem:[#allocation227_spill] sm:$0xff] %v27492_v34 }
 0x48a   : > { %20614 = vmatmul.mubr.f32.gmra.mrb[20].mxu1 %v30883_v19  ;;  %v27490_v19 = vsub.f32 %v5966_v58, %v27477_v50  ;;  %v17753_v58 = vld [vmem:[%s24204_s21 + $0x60] sm:$0xff] }
 0x48b   : > { %20616 = vmatprep.mubr.f32.mxu1 %v30884_v47  ;;  %v5975_v47 = vsel %vm238_vm0, %v17750_v49, 0  ;;  %v5984_v9 = vsel %vm238_vm0, %v17753_v58, 0  ;;  %v27523_v49 = vand.u32 4294901760, %v5981_v33  ;;  %v27532_v58 = vsub.f32 %v5978_v1, %v27511_v36 }
 0x48c   : > { %21970 = vmatmul.mubr.f32.gmra.mrb[24].mxu0 %v27237_v2  ;;  %30919 = vst [vmem:[#allocation225_spill] sm:$0xff] %v27490_v19 }
 0x48d   : > { %21972 = vmatprep.mubr.f32.mxu0 %v27242_v25  ;;  %30926 = vst [vmem:[#allocation203_spill] sm:$0xff] %v27523_v49  ;;  %30928 = vst [vmem:[#allocation209_spill] sm:$0xff] %v27532_v58  ;;  %v27546_v1 = vsub.f32 %v5981_v33, %v27523_v49  ;;  %v17758_v49 = vld [vmem:[%s24204_s21 + $0x98] sm:$0xff] }
 0x48e   : > { %20617 = vmatmul.mubr.f32.gmra.mrb[22].mxu1 %v30885_v52  ;;  %v27503_v52 = vand.u32 4294901760, %v5975_v47 }
 0x48f   : > { %20619 = vmatprep.mubr.f32.mxu1 %v30886_v21  ;;  %v27509_v21 = vsub.f32 %v5972_v20, %v27492_v34  ;;  %v17755_v34 = vld [vmem:[%s24204_s21 + $0x78] sm:$0xff] }
 0x490   : > { %21973 = vmatmul.mubr.f32.gmra.mrb[26].mxu0 %v27261_v17  ;;  %30922 = vst [vmem:[#allocation230_spill] sm:$0xff] %v27503_v52  ;;  %v27521_v20 = vsub.f32 %v5975_v47, %v27503_v52  ;;  %v27536_v47 = vand.u32 4294901760, %v5984_v9  ;;  %v17757_v52 = vld [vmem:[%s24204_s21 + $0x90] sm:$0xff] }
 0x491   : > { %21975 = vmatprep.mubr.f32.mxu0 %v27267_v0  ;;  %30923 = vst [vmem:[#allocation192_spill] sm:$0xff] %v27509_v21  ;;  %v30933_v36 = vand.u32 4294901760, %v27509_v21 }
 0x492   : > { %20620 = vmatmul.mubr.f32.gmra.mrb[24].mxu1 %v30887_v31  ;;  %30925 = vst [vmem:[#allocation200_spill] sm:$0xff] %v27521_v20  ;;  %30929 = vst [vmem:[#allocation210_spill] sm:$0xff] %v27536_v47  ;;  %v5990_v31 = vsel %vm238_vm0, %v17755_v34, 0  ;;  %v27560_v33 = vsub.f32 %v5984_v9, %v27536_v47 }
 0x493   : > { %20622 = vmatprep.mubr.f32.mxu1 %v30888_v56  ;;  %v30927_v56 = vand.u32 4294901760, %v27490_v19  ;;  %v27562_v26 = vand.u32 4294901760, %v5990_v31 }
 0x494   : > { %21976 = vmatmul.mubr.f32.gmra.mrb[28].mxu0 %v27281_v3  ;;  %30934 = vst [vmem:[#allocation216_spill] sm:$0xff] %v27560_v33 }
 0x495   : > { %21978 = vmatprep.mubr.f32.mxu0 %v27290_v61  ;;  %v6130_v41 = vsub.f32 %v27490_v19, %v30927_v56  ;;  %v30930_v56 = vand.u32 4294901760, %v30892_v62  ;;  %v30932_v19 = vand.u32 4294901760, %v27501_v55  ;;  %v6150_v62 = vsub.f32 %v27509_v21, %v30933_v36  ;;  %30935 = vst [vmem:[#allocation219_spill] sm:$0xff] %v27562_v26 }
 0x496   : > { %20623 = vmatmul.mubr.f32.gmra.mrb[26].mxu1 %v30889_v45  ;;  %v17756_v45 = vld [vmem:[%s24204_s21 + $0x80] sm:$0xff]  ;;  %v27592_v9 = vsub.f32 %v5990_v31, %v27562_v26  ;;  %v30944_v21 = vand.u32 4294901760, %v30900_v37 }
 0x497   : > { %20625 = vmatprep.mubr.f32.mxu1 %v30890_v39  ;;  %v6131_v39 = vand.u32 4294901760, %v6130_v41  ;;  %v6140_v34 = vsub.f32 %v27501_v55, %v30932_v19  ;;  %v5996_v41 = vsel %vm238_vm0, %v17757_v52, 0  ;;  %v30936_v19 = vand.u32 4294901760, %v30895_v57  ;;  %v17759_v52 = vld [vmem:[%s24204_s21 + $0xa8] sm:$0xff] }
 0x498   : > { %21979 = vmatmul.mubr.f32.gmra.mrb[30].mxu0 %v27301_v43  ;;  %v30937_v55 = vand.u32 4294901760, %v30896_v23  ;;  %v27583_v23 = vand.u32 4294901760, %v5996_v41  ;;  %30942 = vst [vmem:[#allocation132_spill] sm:$0xff] %v27592_v9 }
 0x499   : > { %21983 = vmatprep.mubr.f32.mxu0 %v30930_v56  ;;  %v29756_v56 = vand.u32 4294901760, %v27532_v58  ;;  %v6141_v57 = vand.u32 4294901760, %v6140_v34  ;;  %v17761_v34 = vld [vmem:[%s24204_s21 + $0xc0] sm:$0xff] }
 0x49a   : > { %20626 = vmatmul.mubr.f32.gmra.mrb[28].mxu1 %v30893_v32  ;;  %v5993_v32 = vsel %vm238_vm0, %v17756_v45, 0  ;;  %v27577_v45 = vsub.f32 %v5987_v4, %v27548_v38  ;;  %30941 = vst [vmem:[#allocation130_spill] sm:$0xff] %v27583_v23 }
 0x49b   : > { %20628 = vmatprep.mubr.f32.mxu1 %v30894_v5  ;;  %v30938_v5 = vand.u32 4294901760, %v27521_v20 }
 0x49c   : > { %21984 = vmatmul.mubr.f32.vlgmr.msra.gmra.mrb[0].mxu0 %v30936_v19  ;;  %30939 = vst [vmem:[#allocation221_spill] sm:$0xff] %v27577_v45  ;;  %v27581_v19 = vand.u32 4294901760, %v5993_v32  ;;  %v29761_v4 = vand.u32 4294901760, %v27577_v45 }
 0x49d   : > { %21986 = vmatprep.mubr.f32.mxu0 %v30937_v55  ;;  %22032 = vmatpush3.msra.mxu0 %v30898_v6  ;;  %v6160_v36 = vsub.f32 %v27521_v20, %v30938_v5  ;;  %v5999_v6 = vsel %vm238_vm0, %v17758_v49, 0  ;;  %v6151_v55 = vand.u32 4294901760, %v6150_v62  ;;  %v6170_v5 = vsub.f32 %v27532_v58, %v29756_v56 }
 0x49e   : > { %20629 = vmatmul.mubr.f32.gmra.mrb[30].mxu1 %v30897_v46  ;;  %30940 = vst [vmem:[#allocation224_spill] sm:$0xff] %v27581_v19  ;;  %22081 = vmatprep.subr.mxu0 %v30853_v42  ;;  %v17760_v46 = vld [vmem:[%s24204_s21 + $0xb0] sm:$0xff]  ;;  %v30943_v20 = vand.u32 4294901760, %v30899_v7  ;;  %v6002_v49 = vsel %vm238_vm0, %v17759_v52, 0  ;;  %v30945_v62 = vand.u32 4294901760, %v27546_v1  ;;  %v27605_v31 = vand.u32 4294901760, %v5999_v6 }
 0x49f   : > { %20633 = vmatprep.mubr.f32.mxu1 %v6131_v39  ;;  %v6161_v39 = vand.u32 4294901760, %v6160_v36  ;;  %v27608_v58 = vsub.f32 %v5993_v32, %v27581_v19  ;;  %v27611_v7 = vsub.f32 %v5996_v41, %v27583_v23  ;;  %v6005_v37 = vsel %vm238_vm0, %v17760_v46, 0 }
 0x4a0   : > { %21987 = vmatmul.mubr.f32.gmra.mrb[2].mxu0 %v30943_v20  ;;  %v6180_v56 = vsub.f32 %v27546_v1, %v30945_v62  ;;  %30946 = vst [vmem:[#allocation134_spill] sm:$0xff] %v27605_v31  ;;  %v6171_v20 = vand.u32 4294901760, %v6170_v5  ;;  %v30949_v36 = vand.u32 4294901760, %v27560_v33  ;;  %v27620_v32 = vand.u32 4294901760, %v6002_v49  ;;  %v17762_v62 = vld [vmem:[%s24204_s21 + $0xc8] sm:$0xff] }
 0x4a1   : > { %21989 = vmatprep.mubr.f32.mxu0 %v30944_v21  ;;  %30947 = vst [vmem:[#allocation138_spill] sm:$0xff] %v27608_v58  ;;  %30948 = vst [vmem:[#allocation149_spill] sm:$0xff] %v27611_v7  ;;  %v6008_v21 = vsel %vm238_vm0, %v17761_v34, 0  ;;  %v30951_v41 = vand.u32 4294901760, %v30901_v29  ;;  %v30952_v46 = vand.u32 4294901760, %v30902_v51  ;;  %v27631_v5 = vand.u32 4294901760, %v6005_v37 }
 0x4a2   : > { %20634 = vmatmul.mubr.f32.vlgmr.msra.gmra.mrb[0].mxu1 %v6141_v57  ;;  %v6190_v52 = vsub.f32 %v27560_v33, %v30949_v36  ;;  %v29764_v57 = vand.u32 4294901760, %v27592_v9  ;;  %30950 = vst [vmem:[#allocation153_spill] sm:$0xff] %v27620_v32  ;;  %v27633_v34 = vand.u32 4294901760, %v6008_v21  ;;  %v17763_v36 = vld [vmem:[%s24204_s21 + $0xd8] sm:$0xff]  ;;  %v6200_v29 = vsub.f32 %v27577_v45, %v29761_v4  ;;  %v17764_v45 = vld [vmem:[%s24204_s21 + $0xe0] sm:$0xff] }
 0x4a3   : > { %20682 = vmatpush3.msra.mxu1 %v27427_v28  ;;  %20636 = vmatprep.mubr.f32.mxu1 %v6151_v55  ;;  %v6181_v28 = vand.u32 4294901760, %v6180_v56  ;;  %v27629_v55 = vsub.f32 %v5999_v6, %v27605_v31  ;;  %30954 = vst [vmem:[#allocation143_spill] sm:$0xff] %v27631_v5  ;;  %v29767_v51 = vand.u32 4294901760, %v27611_v7  ;;  %v6011_v56 = vsel %vm238_vm0, %v17762_v62, 0 }
 0x4a4   : > { %21990 = vmatmul.mubr.f32.gmra.mrb[4].mxu0 %v30951_v41  ;;  %20731 = vmatprep.subr.mxu1 %v27406_v16  ;;  %30955 = vst [vmem:[#allocation157_spill] sm:$0xff] %v27633_v34  ;;  %v6191_v6 = vand.u32 4294901760, %v6190_v52  ;;  %v27646_v33 = vsub.f32 %v6002_v49, %v27620_v32  ;;  %v6014_v4 = vsel %vm238_vm0, %v17763_v36, 0  ;;  %v30958_v41 = vand.u32 4294901760, %v30903_v27 }
 0x4a5   : > { %21992 = vmatprep.mubr.f32.mxu0 %v30952_v46  ;;  %30953 = vst [vmem:[#allocation155_spill] sm:$0xff] %v27629_v55  ;;  %v6210_v46 = vsub.f32 %v27592_v9, %v29764_v57  ;;  %v27659_v52 = vsub.f32 %v6008_v21, %v27633_v34  ;;  %v27661_v49 = vand.u32 4294901760, %v6011_v56  ;;  %v17765_v57 = vld [vmem:[%s24204_s21 + $0xf0] sm:$0xff]  ;;  %v30962_v36 = vand.u32 4294901760, %v27608_v58  ;;  %v17766_v9 = vld [vmem:[%s24204_s21 + $0xf8] sm:$0xff] }
 0x4a6   : > { %20637 = vmatmul.mubr.f32.gmra.mrb[2].mxu1 %v6161_v39  ;;  %30956 = vst [vmem:[#allocation31_spill] sm:$0xff] %v27646_v33  ;;  %v30957_v39 = vand.u32 4294901760, %v26996_v48  ;;  %v6201_v48 = vand.u32 4294901760, %v6200_v29  ;;  %v27671_v21 = vand.u32 4294901760, %v6014_v4  ;;  %v6017_v62 = vsel %vm238_vm0, %v17764_v45, 0 }
 0x4a7   : > { %20639 = vmatprep.mubr.f32.mxu1 %v6171_v20  ;;  %v27656_v20 = vsub.f32 %v6005_v37, %v27631_v5  ;;  %30960 = vst [vmem:[#allocation163_spill] sm:$0xff] %v27659_v52  ;;  %30961 = vst [vmem:[#allocation164_spill] sm:$0xff] %v27661_v49  ;;  %v6220_v27 = vsub.f32 %v27608_v58, %v30962_v36  ;;  %v6211_v37 = vand.u32 4294901760, %v6210_v46  ;;  %v6020_v29 = vsel %vm238_vm0, %v17765_v57, 0  ;;  %v17770_v58 = vld [vmem:[%s24204_s21 + $0x128] sm:$0xff] }
 0x4a8   : > { %21993 = vmatmul.mubr.f32.gmra.mrb[6].mxu0 %v30957_v39  ;;  %30963 = vst [vmem:[#allocation67_spill] sm:$0xff] %v27671_v21  ;;  %v30965_v36 = vand.u32 4294901760, %v30905_v40  ;;  %v27686_v45 = vsub.f32 %v6011_v56, %v27661_v49  ;;  %v30969_v40 = vand.u32 4294901760, %v27646_v33  ;;  %v27697_v46 = vand.u32 4294901760, %v6020_v29  ;;  %v17768_v56 = vld [vmem:[%s24204_s21 + $0x110] sm:$0xff] }
 0x4a9   : > { %21995 = vmatprep.mubr.f32.mxu0 %v30958_v41  ;;  %30959 = vst [vmem:[#allocation161_spill] sm:$0xff] %v27656_v20  ;;  %v6230_v41 = vsub.f32 %v27611_v7, %v29767_v51  ;;  %v30966_v51 = vand.u32 4294901760, %v27629_v55  ;;  %v6221_v57 = vand.u32 4294901760, %v6220_v27  ;;  %v27689_v7 = vand.u32 4294901760, %v6017_v62 }
 0x4aa   : > { %20640 = vmatmul.mubr.f32.gmra.mrb[4].mxu1 %v6181_v28  ;;  %v30964_v28 = vand.u32 4294901760, %v30904_v44  ;;  %30967 = vst [vmem:[#allocation94_spill] sm:$0xff] %v27686_v45  ;;  %v17767_v44 = vld [vmem:[%s24204_s21 + $0x108] sm:$0xff]  ;;  %30971 = vst [vmem:[#allocation142_spill] sm:$0xff] %v27697_v46  ;;  %v6023_v39 = vsel %vm238_vm0, %v17766_v9, 0 }
 0x4ab   : > { %20642 = vmatprep.mubr.f32.mxu1 %v6191_v6  ;;  %v6240_v6 = vsub.f32 %v27629_v55, %v30966_v51  ;;  %30968 = vst [vmem:[#allocation102_spill] sm:$0xff] %v27689_v7  ;;  %v27695_v51 = vsub.f32 %v6014_v4, %v27671_v21  ;;  %v17769_v55 = vld [vmem:[%s24204_s21 + $0x120] sm:$0xff]  ;;  %v6026_v27 = vsel %vm238_vm0, %v17767_v44, 0  ;;  %v27717_v44 = vand.u32 4294901760, %v6023_v39 }
 0x4ac   : > { %21996 = vmatmul.mubr.f32.gmra.mrb[8].mxu0 %v30964_v28  ;;  %v6231_v28 = vand.u32 4294901760, %v6230_v41  ;;  %v30973_v41 = vand.u32 4294901760, %v30907_v10  ;;  %v6029_v10 = vsel %vm238_vm0, %v17768_v56, 0 }
 0x4ad   : > { %21998 = vmatprep.mubr.f32.mxu0 %v30965_v36  ;;  %v6250_v36 = vsub.f32 %v27646_v33, %v30969_v40  ;;  %30970 = vst [vmem:[#allocation126_spill] sm:$0xff] %v27695_v51  ;;  %v30974_v40 = vand.u32 4294901760, %v27656_v20  ;;  %v30975_v33 = vand.u32 4294901760, %v27659_v52  ;;  %30976 = vst [vmem:[#allocation150_spill] sm:$0xff] %v27717_v44 }
 0x4ae   : > { %20643 = vmatmul.mubr.f32.gmra.mrb[6].mxu1 %v6201_v48  ;;  %v30972_v48 = vand.u32 4294901760, %v30906_v12  ;;  %v27715_v12 = vsub.f32 %v6017_v62, %v27689_v7  ;;  %v17771_v62 = vld [vmem:[%s24204_s21 + $0x138] sm:$0xff] }
 0x4af   : > { %20645 = vmatprep.mubr.f32.mxu1 %v6211_v37  ;;  %v6241_v37 = vand.u32 4294901760, %v6240_v6  ;;  %v6260_v4 = vsub.f32 %v27656_v20, %v30974_v40  ;;  %v6270_v9 = vsub.f32 %v27659_v52, %v30975_v33  ;;  %v6032_v6 = vsel %vm238_vm0, %v17769_v55, 0 }
 0x4b0   : > { %21999 = vmatmul.mubr.f32.gmra.mrb[10].mxu0 %v30972_v48  ;;  %v6251_v48 = vand.u32 4294901760, %v6250_v36  ;;  %v27723_v40 = vsub.f32 %v6020_v29, %v27697_v46  ;;  %v27725_v33 = vand.u32 4294901760, %v6026_v27  ;;  %v30980_v52 = vand.u32 4294901760, %v30909_v60 }
 0x4b1   : > { %22001 = vmatprep.mubr.f32.mxu0 %v30973_v41  ;;  %v6261_v56 = vand.u32 4294901760, %v6260_v4  ;;  %v6271_v55 = vand.u32 4294901760, %v6270_v9  ;;  %v27735_v36 = vand.u32 4294901760, %v6032_v6  ;;  %v30983_v29 = vand.u32 4294901760, %v27686_v45 }
 0x4b2   : > { %20646 = vmatmul.mubr.f32.gmra.mrb[8].mxu1 %v6221_v57  ;;  %30977 = vst [vmem:[#allocation13_spill] sm:$0xff] %v27723_v40  ;;  %30978 = vst [vmem:[#allocation167_spill] sm:$0xff] %v27725_v33  ;;  %v30979_v57 = vand.u32 4294901760, %v30908_v59  ;;  %v6035_v60 = vsel %vm238_vm0, %v17770_v58, 0  ;;  %v6038_v20 = vsel %vm238_vm0, %v17771_v62, 0  ;;  %v17772_v59 = vld [vmem:[%s24204_s21 + $0x140] sm:$0xff] }
 0x4b3   : > { %20648 = vmatprep.mubr.f32.mxu1 %v6231_v28  ;;  %v27733_v28 = vand.u32 4294901760, %v6029_v10  ;;  %30982 = vst [vmem:[#allocation184_spill] sm:$0xff] %v27735_v36  ;;  %v6280_v41 = vsub.f32 %v27686_v45, %v30983_v29  ;;  %v30987_v29 = vand.u32 4294901760, %v30910_v14  ;;  %v30992_v62 = vand.u32 4294901760, %v27715_v12 }
 0x4b4   : > { %22002 = vmatmul.mubr.f32.gmra.mrb[12].mxu0 %v30979_v57  ;;  %v27742_v57 = vsub.f32 %v6023_v39, %v27717_v44  ;;  %v30988_v39 = vand.u32 4294901760, %v30911_v54  ;;  %v30996_v54 = vand.u32 4294901760, %v30912_v18 }
 0x4b5   : > { %22004 = vmatprep.mubr.f32.mxu0 %v30980_v52  ;;  %30981 = vst [vmem:[#allocation176_spill] sm:$0xff] %v27733_v28  ;;  %v30985_v52 = vand.u32 4294901760, %v27695_v51  ;;  %v27759_v58 = vsub.f32 %v6029_v10, %v27733_v28  ;;  %v6281_v9 = vand.u32 4294901760, %v6280_v41  ;;  %v6300_v14 = vsub.f32 %v27715_v12, %v30992_v62  ;;  %v17774_v62 = vld [vmem:[%s24204_s21 + $0x158] sm:$0xff] }
 0x4b6   : > { %20649 = vmatmul.mubr.f32.gmra.mrb[10].mxu1 %v6241_v37  ;;  %30984 = vst [vmem:[#allocation195_spill] sm:$0xff] %v27742_v57  ;;  %v27750_v37 = vsub.f32 %v6026_v27, %v27725_v33  ;;  %v17773_v27 = vld [vmem:[%s24204_s21 + $0x150] sm:$0xff]  ;;  %v30995_v41 = vand.u32 4294901760, %v27132_v11  ;;  %v30997_v11 = vand.u32 4294901760, %v27742_v57 }
 0x4b7   : > { %20651 = vmatprep.mubr.f32.mxu1 %v6251_v48  ;;  %v6290_v4 = vsub.f32 %v27695_v51, %v30985_v52  ;;  %30989 = vst [vmem:[#allocation159_spill] sm:$0xff] %v27759_v58  ;;  %v27762_v48 = vsub.f32 %v6032_v6, %v27735_v36  ;;  %v27764_v52 = vand.u32 4294901760, %v6035_v60  ;;  %v6044_v45 = vsel %vm238_vm0, %v17773_v27, 0  ;;  %v17775_v51 = vld [vmem:[%s24204_s21 + $0x168] sm:$0xff] }
 0x4b8   : > { %30986 = vst [vmem:[#allocation19_spill] sm:$0xff] %v27750_v37  ;;  %22005 = vmatmul.mubr.f32.gmra.mrb[14].mxu0 %v30987_v29  ;;  %v27771_v29 = vand.u32 4294901760, %v6038_v20  ;;  %v6320_v27 = vsub.f32 %v27742_v57, %v30997_v11  ;;  %v6050_v11 = vsel %vm238_vm0, %v17775_v51, 0  ;;  %v17776_v57 = vld [vmem:[%s24204_s21 + $0x170] sm:$0xff] }
 0x4b9   : > { %22007 = vmatprep.mubr.f32.mxu0 %v30988_v39  ;;  %30990 = vst [vmem:[#allocation62_spill] sm:$0xff] %v27762_v48  ;;  %30991 = vst [vmem:[#allocation170_spill] sm:$0xff] %v27764_v52  ;;  %v6291_v10 = vand.u32 4294901760, %v6290_v4  ;;  %v30994_v39 = vand.u32 4294901760, %v27723_v40  ;;  %v30999_v4 = vand.u32 4294901760, %v27750_v37 }
 0x4ba   : > { %20652 = vmatmul.mubr.f32.gmra.mrb[12].mxu1 %v6261_v56  ;;  %30993 = vst [vmem:[#allocation178_spill] sm:$0xff] %v27771_v29  ;;  %v6041_v56 = vsel %vm238_vm0, %v17772_v59, 0  ;;  %v6301_v59 = vand.u32 4294901760, %v6300_v14  ;;  %v31001_v14 = vand.u32 4294901760, %v30913_v8  ;;  %v6321_v8 = vand.u32 4294901760, %v6320_v27  ;;  %v17778_v27 = vld [vmem:[%s24204_s21 + $0x188] sm:$0xff] }
 0x4bb   : > { %20654 = vmatprep.mubr.f32.mxu1 %v6271_v55  ;;  %v6310_v6 = vsub.f32 %v27723_v40, %v30994_v39  ;;  %v27787_v39 = vsub.f32 %v6035_v60, %v27764_v52  ;;  %v27796_v18 = vand.u32 4294901760, %v6041_v56  ;;  %v6330_v60 = vsub.f32 %v27750_v37, %v30999_v4  ;;  %v17777_v37 = vld [vmem:[%s24204_s21 + $0x180] sm:$0xff] }
 0x4bc   : > { %22008 = vmatmul.mubr.f32.gmra.mrb[16].mxu0 %v30995_v41  ;;  %v27794_v41 = vsub.f32 %v6038_v20, %v27771_v29  ;;  %v27801_v55 = vand.u32 4294901760, %v6044_v45  ;;  %v31002_v20 = vand.u32 4294901760, %v30914_v13  ;;  %v31004_v40 = vand.u32 4294901760, %v27762_v48 }
 0x4bd   : > { %22010 = vmatprep.mubr.f32.mxu0 %v30996_v54  ;;  %30998 = vst [vmem:[#allocation182_spill] sm:$0xff] %v27796_v18  ;;  %v6311_v54 = vand.u32 4294901760, %v6310_v6 }
 0x4be   : > { %20655 = vmatmul.mubr.f32.gmra.mrb[14].mxu1 %v6281_v9  ;;  %31000 = vst [vmem:[#allocation191_spill] sm:$0xff] %v27801_v55  ;;  %v6047_v9 = vsel %vm238_vm0, %v17774_v62, 0  ;;  %v6350_v4 = vsub.f32 %v27762_v48, %v31004_v40  ;;  %v6053_v40 = vsel %vm238_vm0, %v17776_v57, 0  ;;  %v31007_v62 = vand.u32 4294901760, %v30915_v24 }
 0x4bf   : > { %20657 = vmatprep.mubr.f32.mxu1 %v6291_v10  ;;  %v31003_v10 = vand.u32 4294901760, %v27759_v58  ;;  %v27822_v13 = vand.u32 4294901760, %v6047_v9 }
 0x4c0   : > { %22011 = vmatmul.mubr.f32.gmra.mrb[18].mxu0 %v31001_v14  ;;  %v27820_v14 = vsub.f32 %v6041_v56, %v27796_v18  ;;  %v31008_v56 = vand.u32 4294901760, %v30916_v30  ;;  %v6351_v48 = vand.u32 4294901760, %v6350_v4 }
 0x4c1   : > { %22013 = vmatprep.mubr.f32.mxu0 %v31002_v20  ;;  %v6340_v6 = vsub.f32 %v27759_v58, %v31003_v10  ;;  %31005 = vst [vmem:[#allocation233_spill] sm:$0xff] %v27822_v13  ;;  %v6331_v20 = vand.u32 4294901760, %v6330_v60  ;;  %v27825_v10 = vsub.f32 %v6044_v45, %v27801_v55  ;;  %v27827_v58 = vand.u32 4294901760, %v6050_v11 }
 0x4c2   : > { %20658 = vmatmul.mubr.f32.gmra.mrb[16].mxu1 %v6301_v59  ;;  %v6056_v59 = vsel %vm238_vm0, %v17777_v37, 0  ;;  %v31010_v60 = vand.u32 4294901760, %v27794_v41  ;;  %v29799_v24 = vand.u32 4294901760, %v27820_v14  ;;  %v27846_v37 = vand.u32 4294901760, %v6053_v40 }
 0x4c3   : > { %20660 = vmatprep.mubr.f32.mxu1 %v6311_v54  ;;  %31006 = vst [vmem:[#allocation217_spill] sm:$0xff] %v27827_v58  ;;  %v6341_v51 = vand.u32 4294901760, %v6340_v6  ;;  %v31009_v54 = vand.u32 4294901760, %v27787_v39  ;;  %v27850_v6 = vsub.f32 %v6050_v11, %v27827_v58  ;;  %v27852_v4 = vand.u32 4294901760, %v6056_v59 }
 0x4c4   : > { %22014 = vmatmul.mubr.f32.gmra.mrb[20].mxu0 %v31007_v62  ;;  %v6370_v57 = vsub.f32 %v27794_v41, %v31010_v60  ;;  %v27844_v62 = vsub.f32 %v6047_v9, %v27822_v13  ;;  %31011 = vst [vmem:[#allocation146_spill] sm:$0xff] %v27846_v37  ;;  %v27864_v11 = vsub.f32 %v6053_v40, %v27846_v37 }
 0x4c5   : > { %22016 = vmatprep.mubr.f32.mxu0 %v31008_v56  ;;  %v6360_v45 = vsub.f32 %v27787_v39, %v31009_v54  ;;  %31012 = vst [vmem:[#allocation148_spill] sm:$0xff] %v27852_v4  ;;  %v31013_v56 = vand.u32 4294901760, %v27204_v53  ;;  %v31014_v54 = vand.u32 4294901760, %v27211_v22  ;;  %v31016_v53 = vand.u32 4294901760, %v27825_v10 }
 0x4c6   : > { %20661 = vmatmul.mubr.f32.gmra.mrb[18].mxu1 %v6321_v8  ;;  %v6059_v8 = vsel %vm238_vm0, %v17778_v27, 0  ;;  %v29798_v60 = vand.u32 4294901760, %v27844_v62  ;;  %v6371_v27 = vand.u32 4294901760, %v6370_v57  ;;  %v29796_v57 = vand.u32 4294901760, %v27864_v11 }
 0x4c7   : > { %20663 = vmatprep.mubr.f32.mxu1 %v6331_v20  ;;  %v6361_v9 = vand.u32 4294901760, %v6360_v45  ;;  %v6380_v20 = vsub.f32 %v27820_v14, %v29799_v24  ;;  %v27866_v30 = vand.u32 4294901760, %v6059_v8  ;;  %v6390_v22 = vsub.f32 %v27825_v10, %v31016_v53  ;;  %v31045_v24 = vld [vmem:[#allocation141_spill] sm:$0xff] }
 0x4c8   : > { %22017 = vmatmul.mubr.f32.gmra.mrb[22].mxu0 %v31013_v56  ;;  %v29797_v45 = vand.u32 4294901760, %v27850_v6  ;;  %v31017_v56 = vand.u32 4294901760, %v27237_v2 }
 0x4c9   : > { %22019 = vmatprep.mubr.f32.mxu0 %v31014_v54  ;;  %31015 = vst [vmem:[#allocation152_spill] sm:$0xff] %v27866_v30  ;;  %v31018_v54 = vand.u32 4294901760, %v27242_v25  ;;  %v6381_v40 = vand.u32 4294901760, %v6380_v20  ;;  %v27884_v53 = vsub.f32 %v6059_v8, %v27866_v30  ;;  %v31020_v20 = vand.u32 4294901760, %v27267_v0 }
 0x4ca   : > { %20664 = vmatmul.mubr.f32.gmra.mrb[20].mxu1 %v6341_v51  ;;  %v27873_v51 = vsub.f32 %v6056_v59, %v27852_v4  ;;  %v6391_v59 = vand.u32 4294901760, %v6390_v22  ;;  %v6410_v2 = vsub.f32 %v27850_v6, %v29797_v45  ;;  %v6420_v8 = vsub.f32 %v27864_v11, %v29796_v57  ;;  %v31042_v57 = vld [vmem:[#allocation128_spill] sm:$0xff]  ;;  %v31043_v45 = vld [vmem:[#allocation70_spill] sm:$0xff] }
 0x4cb   : > { %20666 = vmatprep.mubr.f32.mxu1 %v6351_v48  ;;  %v6400_v48 = vsub.f32 %v27844_v62, %v29798_v60  ;;  %v31022_v0 = vand.u32 4294901760, %v27290_v61  ;;  %v31044_v60 = vld [vmem:[#allocation136_spill] sm:$0xff] }
 0x4cc   : > { %22020 = vmatmul.mubr.f32.gmra.mrb[24].mxu0 %v31017_v56  ;;  %v29795_v25 = vand.u32 4294901760, %v27873_v51  ;;  %v6411_v22 = vand.u32 4294901760, %v6410_v2  ;;  %v31023_v2 = vand.u32 4294901760, %v27301_v43  ;;  %v31025_v43 = vld [vmem:[#allocation127_spill] sm:$0xff] }
 0x4cd   : > { %22022 = vmatprep.mubr.f32.mxu0 %v31018_v54  ;;  %v6401_v56 = vand.u32 4294901760, %v6400_v48 }
 0x4ce   : > { %20667 = vmatmul.mubr.f32.gmra.mrb[22].mxu1 %v6361_v9  ;;  %v31019_v9 = vand.u32 4294901760, %v27261_v17  ;;  %v6430_v54 = vsub.f32 %v27873_v51, %v29795_v25  ;;  %v31021_v17 = vand.u32 4294901760, %v27281_v3  ;;  %v31041_v25 = vld [vmem:[#allocation189_spill] sm:$0xff] }
 0x4cf   : > { %20669 = vmatprep.mubr.f32.mxu1 %v6371_v27  ;;  %v29794_v27 = vand.u32 4294901760, %v27884_v53 }
 0x4d0   : > { %22023 = vmatmul.mubr.f32.gmra.mrb[26].mxu0 %v31019_v9  ;;  %v6431_v9 = vand.u32 4294901760, %v6430_v54  ;;  %v31030_v54 = vld [vmem:[#allocation213_spill] sm:$0xff] }
 0x4d1   : > { %22025 = vmatprep.mubr.f32.mxu0 %v31020_v20  ;;  %v6440_v48 = vsub.f32 %v27884_v53, %v29794_v27  ;;  %v31026_v20 = vld [vmem:[#allocation78_spill] sm:$0xff]  ;;  %v31040_v27 = vld [vmem:[#allocation181_spill] sm:$0xff] }
 0x4d2   : > { %20670 = vmatmul.mubr.f32.gmra.mrb[24].mxu1 %v6381_v40  ;;  %v6421_v40 = vand.u32 4294901760, %v6420_v8  ;;  %v31028_v8 = vld [vmem:[#allocation227_spill] sm:$0xff] }
 0x4d3   : > { %20672 = vmatprep.mubr.f32.mxu1 %v6391_v59  ;;  %v17944_v59 = vld [vmem:[%s28966_s1 + $0x40] sm:$0xff]  ;;  %v6441_v3 = vand.u32 4294901760, %v6440_v48  ;;  %v31035_v48 = vld [vmem:[#allocation151_spill] sm:$0xff] }
 0x4d4   : > { %22026 = vmatmul.mubr.f32.gmra.mrb[28].mxu0 %v31021_v17  ;;  %v27914_v61 = vand.u32 4294901760, %v17944_v59  ;;  %v31032_v17 = vld [vmem:[#allocation230_spill] sm:$0xff] }
 0x4d5   : > { %22028 = vmatprep.mubr.f32.mxu0 %v31022_v0  ;;  %v31033_v0 = vld [vmem:[#allocation193_spill] sm:$0xff] }
 0x4d6   : > { %20673 = vmatmul.mubr.f32.gmra.mrb[26].mxu1 %v6401_v56  ;;  %31024 = vst [vmem:[#allocation18_spill] sm:$0xff] %v27914_v61  ;;  %v31027_v56 = vld [vmem:[#allocation222_spill] sm:$0xff] }
 0x4d7   : > { %20675 = vmatprep.mubr.f32.mxu1 %v6411_v22  ;;  %v31029_v22 = vld [vmem:[#allocation137_spill] sm:$0xff] }
 0x4d8   : > { %22029 = vmatmul.mubr.f32.gmra.mrb[30].mxu0 %v31023_v2  ;;  %v31038_v2 = vld [vmem:[#allocation37_spill] sm:$0xff] }
 0x4d9   : > { %22033 = vmatprep.mubr.f32.mxu0 %v26900_v35 }
 0x4da   : > { %20676 = vmatmul.mubr.f32.gmra.mrb[28].mxu1 %v6421_v40  ;;  %v31034_v40 = vld [vmem:[#allocation145_spill] sm:$0xff] }
 0x4db   : > { %20678 = vmatprep.mubr.f32.mxu1 %v6431_v9  ;;  %v31036_v9 = vld [vmem:[#allocation203_spill] sm:$0xff] }
 0x4dc   : > { %22034 = vmatmul.mubr.f32.vlgmr.msra.gmra.mrb[0].mxu0 %v26909_v63 }
 0x4dd   : > { %22036 = vmatprep.mubr.f32.mxu0 %v30851_v15  ;;  %22082 = vmatpush3.msra.mxu0 %v30853_v42  ;;  %v31031_v42 = vld [vmem:[#allocation91_spill] sm:$0xff] }
 0x4de   : > { %20679 = vmatmul.mubr.f32.gmra.mrb[30].mxu1 %v6441_v3  ;;  %22131 = vmatprep.subr.mxu0 %v27914_v61  ;;  %v31039_v3 = vld [vmem:[#allocation169_spill] sm:$0xff] }
 0x4df   : > { %20683 = vmatprep.mubr.f32.mxu1 %v27477_v50 }
 0x4e0   : > { %22037 = vmatmul.mubr.f32.gmra.mrb[2].mxu0 %v31025_v43 }
 0x4e1   : > { %22039 = vmatprep.mubr.f32.mxu0 %v31026_v20 }
 0x4e2   : > { %20684 = vmatmul.mubr.f32.vlgmr.msra.gmra.mrb[0].mxu1 %v31027_v56 }
 0x4e3   : > { %20732 = vmatpush3.msra.mxu1 %v27406_v16  ;;  %20686 = vmatprep.mubr.f32.mxu1 %v31028_v8  ;;  %v31037_v16 = vld [vmem:[#allocation158_spill] sm:$0xff]  ;;  %v17920_v8 = vld [vmem:[%s24204_s21 + $0x92] sm:$0xff] }
 0x4e4   : > { %22040 = vmatmul.mubr.f32.gmra.mrb[4].mxu0 %v31029_v22  ;;  %20781 = vmatprep.subr.mxu1 %v31030_v54 }
 0x4e5   : > { %22042 = vmatprep.mubr.f32.mxu0 %v31031_v42 }
 0x4e6   : > { %20687 = vmatmul.mubr.f32.gmra.mrb[2].mxu1 %v31032_v17  ;;  %v17919_v17 = vld [vmem:[%s24204_s21 + $0x82] sm:$0xff] }
 0x4e7   : > { %20689 = vmatprep.mubr.f32.mxu1 %v31033_v0  ;;  %v15693_v50 = vsel %vm238_vm0, %v17919_v17, 0 }
 0x4e8   : > { %22043 = vmatmul.mubr.f32.gmra.mrb[6].mxu0 %v31034_v40  ;;  %v28112_v56 = vand.u32 4294901760, %v15693_v50 }
 0x4e9   : > { %22045 = vmatprep.mubr.f32.mxu0 %v31035_v48 }
 0x4ea   : > { %20690 = vmatmul.mubr.f32.gmra.mrb[4].mxu1 %v31036_v9 }
 0x4eb   : > { %20692 = vmatprep.mubr.f32.mxu1 %v27536_v47  ;;  %v31084_v47 = vld [vmem:[#allocation62_spill] sm:$0xff] }
 0x4ec   : > { %22046 = vmatmul.mubr.f32.gmra.mrb[8].mxu0 %v31037_v16 }
 0x4ed   : > { %22048 = vmatprep.mubr.f32.mxu0 %v31038_v2 }
 0x4ee   : > { %20693 = vmatmul.mubr.f32.gmra.mrb[6].mxu1 %v27548_v38  ;;  %v31083_v38 = vld [vmem:[#allocation159_spill] sm:$0xff] }
 0x4ef   : > { %20695 = vmatprep.mubr.f32.mxu1 %v27562_v26  ;;  %v31059_v26 = vld [vmem:[#allocation207_spill] sm:$0xff] }
 0x4f0   : > { %22049 = vmatmul.mubr.f32.gmra.mrb[10].mxu0 %v31039_v3 }
 0x4f1   : > { %22051 = vmatprep.mubr.f32.mxu0 %v31040_v27 }
 0x4f2   : > { %20696 = vmatmul.mubr.f32.gmra.mrb[8].mxu1 %v27581_v19  ;;  %v31046_v19 = vld [vmem:[#allocation139_spill] sm:$0xff] }
 0x4f3   : > { %20698 = vmatprep.mubr.f32.mxu1 %v27583_v23  ;;  %v31047_v23 = vld [vmem:[#allocation147_spill] sm:$0xff] }
 0x4f4   : > { %22052 = vmatmul.mubr.f32.gmra.mrb[12].mxu0 %v31041_v25 }
 0x4f5   : > { %22054 = vmatprep.mubr.f32.mxu0 %v31042_v57 }
 0x4f6   : > { %20699 = vmatmul.mubr.f32.gmra.mrb[10].mxu1 %v27605_v31  ;;  %v31048_v31 = vld [vmem:[#allocation156_spill] sm:$0xff] }
 0x4f7   : > { %20701 = vmatprep.mubr.f32.mxu1 %v27620_v32  ;;  %v31049_v32 = vld [vmem:[#allocation47_spill] sm:$0xff] }
 0x4f8   : > { %22055 = vmatmul.mubr.f32.gmra.mrb[14].mxu0 %v31043_v45 }
 0x4f9   : > { %22057 = vmatprep.mubr.f32.mxu0 %v31044_v60 }
 0x4fa   : > { %20702 = vmatmul.mubr.f32.gmra.mrb[12].mxu1 %v27631_v5  ;;  %v31050_v5 = vld [vmem:[#allocation51_spill] sm:$0xff] }
 0x4fb   : > { %20704 = vmatprep.mubr.f32.mxu1 %v27633_v34  ;;  %v31051_v34 = vld [vmem:[#allocation183_spill] sm:$0xff] }
 0x4fc   : > { %22058 = vmatmul.mubr.f32.gmra.mrb[16].mxu0 %v31045_v24 }
 0x4fd   : > { %22060 = vmatprep.mubr.f32.mxu0 %v31046_v19 }
 0x4fe   : > { %20705 = vmatmul.mubr.f32.gmra.mrb[14].mxu1 %v27661_v49  ;;  %v31052_v49 = vld [vmem:[#allocation187_spill] sm:$0xff] }
 0x4ff   : > { %20707 = vmatprep.mubr.f32.mxu1 %v27671_v21  ;;  %v31053_v21 = vld [vmem:[#allocation194_spill] sm:$0xff] }
 0x500   : > { %22061 = vmatmul.mubr.f32.gmra.mrb[18].mxu0 %v31047_v23 }
 0x501   : > { %22063 = vmatprep.mubr.f32.mxu0 %v31048_v31 }
 0x502   : > { %20708 = vmatmul.mubr.f32.gmra.mrb[16].mxu1 %v27689_v7  ;;  %v31054_v7 = vld [vmem:[#allocation196_spill] sm:$0xff] }
 0x503   : > { %20710 = vmatprep.mubr.f32.mxu1 %v27697_v46  ;;  %v27971_v46 = vsub.f32 %v17944_v59, %v27914_v61 }
 0x504   : > { %22064 = vmatmul.mubr.f32.gmra.mrb[20].mxu0 %v31049_v32 }
 0x505   : > { %22066 = vmatprep.mubr.f32.mxu0 %v31050_v5 }
 0x506   : > { %20711 = vmatmul.mubr.f32.gmra.mrb[18].mxu1 %v27717_v44  ;;  %v31056_v44 = vld [vmem:[#allocation205_spill] sm:$0xff] }
 0x507   : > { %20713 = vmatprep.mubr.f32.mxu1 %v27725_v33  ;;  %v31055_v33 = vld [vmem:[#allocation202_spill] sm:$0xff] }
 0x508   : > { %22067 = vmatmul.mubr.f32.gmra.mrb[22].mxu0 %v31051_v34 }
 0x509   : > { %22069 = vmatprep.mubr.f32.mxu0 %v31052_v49 }
 0x50a   : > { %20714 = vmatmul.mubr.f32.gmra.mrb[20].mxu1 %v27733_v28  ;;  %v27978_v28 = vand.u32 4294901760, %v27971_v46 }
 0x50b   : > { %20716 = vmatprep.mubr.f32.mxu1 %v27735_v36  ;;  %v31058_v36 = vld [vmem:[#allocation206_spill] sm:$0xff] }
 0x50c   : > { %22070 = vmatmul.mubr.f32.gmra.mrb[24].mxu0 %v31053_v21  ;;  %31057 = vst [vmem:[#allocation21_spill] sm:$0xff] %v27978_v28  ;;  %v16157_v59 = vsub.f32 %v27971_v46, %v27978_v28  ;;  %v31061_v28 = vld [vmem:[#allocation225_spill] sm:$0xff] }
 0x50d   : > { %22072 = vmatprep.mubr.f32.mxu0 %v31054_v7 }
 0x50e   : > { %20717 = vmatmul.mubr.f32.gmra.mrb[22].mxu1 %v27764_v52 }
 0x50f   : > { %20719 = vmatprep.mubr.f32.mxu1 %v27771_v29  ;;  %v31060_v29 = vld [vmem:[#allocation211_spill] sm:$0xff] }
 0x510   : > { %22073 = vmatmul.mubr.f32.gmra.mrb[26].mxu0 %v31055_v33 }
 0x511   : > { %22075 = vmatprep.mubr.f32.mxu0 %v31056_v44 }
 0x512   : > { %20720 = vmatmul.mubr.f32.gmra.mrb[24].mxu1 %v27796_v18  ;;  %v27990_v18 = vand.u32 4294901760, %v16157_v59  ;;  %v31063_v59 = vld [vmem:[#allocation192_spill] sm:$0xff] }
 0x513   : > { %20722 = vmatprep.mubr.f32.mxu1 %v27801_v55 }
 0x514   : > { %22076 = vmatmul.mubr.f32.gmra.mrb[28].mxu0 %v31058_v36 }
 0x515   : > { %22078 = vmatprep.mubr.f32.mxu0 %v31059_v26 }
 0x516   : > { %20723 = vmatmul.mubr.f32.gmra.mrb[26].mxu1 %v27822_v13  ;;  %v31080_v13 = vld [vmem:[#allocation19_spill] sm:$0xff] }
 0x517   : > { %20725 = vmatprep.mubr.f32.mxu1 %v27827_v58  ;;  %v31079_v58 = vld [vmem:[#allocation195_spill] sm:$0xff] }
 0x518   : > { %22079 = vmatmul.mubr.f32.gmra.mrb[30].mxu0 %v31060_v29 }
 0x519   : > { %22083 = vmatprep.mubr.f32.mxu0 %v26900_v35  ;;  %v31062_v35 = vld [vmem:[#allocation229_spill] sm:$0xff] }
 0x51a   : > { %20726 = vmatmul.mubr.f32.gmra.mrb[28].mxu1 %v27846_v37 }
 0x51b   : > { %20728 = vmatprep.mubr.f32.mxu1 %v27852_v4  ;;  %v17914_v4 = vld [vmem:[%s24204_s21 + $0x4a] sm:$0xff] }
 0x51c   : > { %22084 = vmatmul.mubr.f32.vlgmr.msra.gmra.mrb[0].mxu0 %v26909_v63  ;;  %v31064_v63 = vld [vmem:[#allocation218_spill] sm:$0xff] }
 0x51d   : > { %22086 = vmatprep.mubr.f32.mxu0 %v30851_v15  ;;  %22132 = vmatpush3.msra.mxu0 %v27914_v61  ;;  %v31065_v15 = vld [vmem:[#allocation200_spill] sm:$0xff]  ;;  %v17924_v61 = vld [vmem:[%s24204_s21 + $0xc2] sm:$0xff] }
 0x51e   : > { %20729 = vmatmul.mubr.f32.gmra.mrb[30].mxu1 %v27866_v30  ;;  %22181 = vmatprep.subr.mxu0 %v27990_v18  ;;  %v31066_v30 = vld [vmem:[#allocation209_spill] sm:$0xff] }
 0x51f   : > { %20733 = vmatprep.mubr.f32.mxu1 %v31061_v28 }
 0x520   : > { %22087 = vmatmul.mubr.f32.gmra.mrb[2].mxu0 %v31025_v43  ;;  %v31067_v43 = vld [vmem:[#allocation216_spill] sm:$0xff] }
 0x521   : > { %22089 = vmatprep.mubr.f32.mxu0 %v31026_v20  ;;  %v31068_v20 = vld [vmem:[#allocation221_spill] sm:$0xff] }
 0x522   : > { %20734 = vmatmul.mubr.f32.vlgmr.msra.gmra.mrb[0].mxu1 %v31062_v35 }
 0x523   : > { %20782 = vmatpush3.msra.mxu1 %v31030_v54  ;;  %20736 = vmatprep.mubr.f32.mxu1 %v31063_v59 }
 0x524   : > { %22090 = vmatmul.mubr.f32.gmra.mrb[4].mxu0 %v31029_v22  ;;  %20831 = vmatprep.subr.mxu1 %v31064_v63  ;;  %v31069_v22 = vld [vmem:[#allocation132_spill] sm:$0xff] }
 0x525   : > { %22092 = vmatprep.mubr.f32.mxu0 %v31031_v42  ;;  %v31070_v42 = vld [vmem:[#allocation138_spill] sm:$0xff] }
 0x526   : > { %20737 = vmatmul.mubr.f32.gmra.mrb[2].mxu1 %v31065_v15 }
 0x527   : > { %20739 = vmatprep.mubr.f32.mxu1 %v31066_v30 }
 0x528   : > { %22093 = vmatmul.mubr.f32.gmra.mrb[6].mxu0 %v31034_v40  ;;  %v31071_v40 = vld [vmem:[#allocation149_spill] sm:$0xff] }
 0x529   : > { %22095 = vmatprep.mubr.f32.mxu0 %v31035_v48  ;;  %v31072_v48 = vld [vmem:[#allocation155_spill] sm:$0xff] }
 0x52a   : > { %20740 = vmatmul.mubr.f32.gmra.mrb[4].mxu1 %v27546_v1 }
 0x52b   : > { %20742 = vmatprep.mubr.f32.mxu1 %v31067_v43 }
 0x52c   : > { %22096 = vmatmul.mubr.f32.gmra.mrb[8].mxu0 %v31037_v16  ;;  %v31073_v16 = vld [vmem:[#allocation31_spill] sm:$0xff] }
 0x52d   : > { %22098 = vmatprep.mubr.f32.mxu0 %v31038_v2  ;;  %v31074_v2 = vld [vmem:[#allocation161_spill] sm:$0xff] }
 0x52e   : > { %20743 = vmatmul.mubr.f32.gmra.mrb[6].mxu1 %v31068_v20 }
 0x52f   : > { %20745 = vmatprep.mubr.f32.mxu1 %v31069_v22 }
 0x530   : > { %22099 = vmatmul.mubr.f32.gmra.mrb[10].mxu0 %v31039_v3  ;;  %v31077_v3 = vld [vmem:[#allocation126_spill] sm:$0xff] }
 0x531   : > { %22101 = vmatprep.mubr.f32.mxu0 %v31040_v27  ;;  %v31075_v27 = vld [vmem:[#allocation163_spill] sm:$0xff] }
 0x532   : > { %20746 = vmatmul.mubr.f32.gmra.mrb[8].mxu1 %v31070_v42 }
 0x533   : > { %20748 = vmatprep.mubr.f32.mxu1 %v31071_v40 }
 0x534   : > { %22102 = vmatmul.mubr.f32.gmra.mrb[12].mxu0 %v31041_v25  ;;  %v31076_v25 = vld [vmem:[#allocation94_spill] sm:$0xff] }
 0x535   : > { %22104 = vmatprep.mubr.f32.mxu0 %v31042_v57  ;;  %v17912_v57 = vld [vmem:[%s24204_s21 + $0x32] sm:$0xff] }
 0x536   : > { %20749 = vmatmul.mubr.f32.gmra.mrb[10].mxu1 %v31072_v48 }
 0x537   : > { %20751 = vmatprep.mubr.f32.mxu1 %v31073_v16 }
 0x538   : > { %22105 = vmatmul.mubr.f32.gmra.mrb[14].mxu0 %v31043_v45  ;;  %v17913_v45 = vld [vmem:[%s24204_s21 + $0x3a] sm:$0xff] }
 0x539   : > { %22107 = vmatprep.mubr.f32.mxu0 %v31044_v60  ;;  %v15672_v60 = vsel %vm238_vm0, %v17912_v57, 0  ;;  %v15675_v37 = vsel %vm238_vm0, %v17913_v45, 0  ;;  %v17916_v57 = vld [vmem:[%s24204_s21 + $0x62] sm:$0xff]  ;;  %v17917_v45 = vld [vmem:[%s24204_s21 + $0x6a] sm:$0xff] }
 0x53a   : > { %20752 = vmatmul.mubr.f32.gmra.mrb[12].mxu1 %v31074_v2  ;;  %v28051_v55 = vand.u32 4294901760, %v15675_v37  ;;  %v15687_v0 = vsel %vm238_vm0, %v17917_v45, 0 }
 0x53b   : > { %20754 = vmatprep.mubr.f32.mxu1 %v31075_v27 }
 0x53c   : > { %22108 = vmatmul.mubr.f32.gmra.mrb[16].mxu0 %v31045_v24  ;;  %v31078_v24 = vld [vmem:[#allocation13_spill] sm:$0xff]  ;;  %v28066_v9 = vsub.f32 %v15675_v37, %v28051_v55 }
 0x53d   : > { %22110 = vmatprep.mubr.f32.mxu0 %v31046_v19  ;;  %v28042_v19 = vand.u32 4294901760, %v15672_v60 }
 0x53e   : > { %20755 = vmatmul.mubr.f32.gmra.mrb[14].mxu1 %v31076_v25  ;;  %31085 = vst [vmem:[#allocation162_spill] sm:$0xff] %v28066_v9  ;;  %v31095_v17 = vand.u32 4294901760, %v28066_v9 }
 0x53f   : > { %20757 = vmatprep.mubr.f32.mxu1 %v31077_v3 }
 0x540   : > { %22111 = vmatmul.mubr.f32.gmra.mrb[18].mxu0 %v31047_v23  ;;  %v15678_v23 = vsel %vm238_vm0, %v17914_v4, 0  ;;  %v15684_v4 = vsel %vm238_vm0, %v17916_v57, 0 }
 0x541   : > { %22113 = vmatprep.mubr.f32.mxu0 %v31048_v31  ;;  %v17915_v31 = vld [vmem:[%s24204_s21 + $0x52] sm:$0xff]  ;;  %v28057_v52 = vand.u32 4294901760, %v15678_v23  ;;  %v28076_v57 = vand.u32 4294901760, %v15684_v4 }
 0x542   : > { %20758 = vmatmul.mubr.f32.gmra.mrb[16].mxu1 %v27715_v12 }
 0x543   : > { %20760 = vmatprep.mubr.f32.mxu1 %v31078_v24  ;;  %31082 = vst [vmem:[#allocation160_spill] sm:$0xff] %v28057_v52  ;;  %31088 = vst [vmem:[#allocation165_spill] sm:$0xff] %v28076_v57 }
 0x544   : > { %22114 = vmatmul.mubr.f32.gmra.mrb[20].mxu0 %v31049_v32  ;;  %v28055_v32 = vsub.f32 %v15672_v60, %v28042_v19  ;;  %v17918_v60 = vld [vmem:[%s24204_s21 + $0x7a] sm:$0xff] }
 0x545   : > { %22116 = vmatprep.mubr.f32.mxu0 %v31050_v5  ;;  %v15681_v5 = vsel %vm238_vm0, %v17915_v31, 0  ;;  %v15690_v37 = vsel %vm238_vm0, %v17918_v60, 0  ;;  %v28088_v31 = vand.u32 4294901760, %v15687_v0  ;;  %v28097_v60 = vsub.f32 %v15684_v4, %v28076_v57 }
 0x546   : > { %20761 = vmatmul.mubr.f32.gmra.mrb[18].mxu1 %v31079_v58  ;;  %31081 = vst [vmem:[#allocation25_spill] sm:$0xff] %v28055_v32 }
 0x547   : > { %20763 = vmatprep.mubr.f32.mxu1 %v31080_v13  ;;  %31090 = vst [vmem:[#allocation75_spill] sm:$0xff] %v28088_v31  ;;  %31092 = vst [vmem:[#allocation129_spill] sm:$0xff] %v28097_v60  ;;  %v28110_v4 = vsub.f32 %v15687_v0, %v28088_v31  ;;  %v17923_v31 = vld [vmem:[%s24204_s21 + $0xb2] sm:$0xff] }
 0x548   : > { %22117 = vmatmul.mubr.f32.gmra.mrb[22].mxu0 %v31051_v34  ;;  %v28068_v34 = vand.u32 4294901760, %v15681_v5 }
 0x549   : > { %22119 = vmatprep.mubr.f32.mxu0 %v31052_v49  ;;  %v28074_v49 = vsub.f32 %v15678_v23, %v28057_v52  ;;  %31094 = vst [vmem:[#allocation154_spill] sm:$0xff] %v28110_v4  ;;  %v31102_v52 = vand.u32 4294901760, %v28097_v60 }
 0x54a   : > { %20764 = vmatmul.mubr.f32.gmra.mrb[20].mxu1 %v31083_v38  ;;  %31086 = vst [vmem:[#allocation52_spill] sm:$0xff] %v28068_v34  ;;  %v28086_v23 = vsub.f32 %v15681_v5, %v28068_v34  ;;  %v28101_v5 = vand.u32 4294901760, %v15690_v37  ;;  %v17922_v34 = vld [vmem:[%s24204_s21 + $0xaa] sm:$0xff] }
 0x54b   : > { %20766 = vmatprep.mubr.f32.mxu1 %v31084_v47  ;;  %31087 = vst [vmem:[#allocation59_spill] sm:$0xff] %v28074_v49 }
 0x54c   : > { %22120 = vmatmul.mubr.f32.gmra.mrb[24].mxu0 %v31053_v21  ;;  %31089 = vst [vmem:[#allocation86_spill] sm:$0xff] %v28086_v23  ;;  %31093 = vst [vmem:[#allocation135_spill] sm:$0xff] %v28101_v5  ;;  %v15696_v21 = vsel %vm238_vm0, %v17920_v8, 0  ;;  %v15846_v8 = vsub.f32 %v28066_v9, %v31095_v17  ;;  %v28124_v0 = vsub.f32 %v15690_v37, %v28101_v5  ;;  %v15705_v9 = vsel %vm238_vm0, %v17923_v31, 0 }
 0x54d   : > { %22122 = vmatprep.mubr.f32.mxu0 %v31054_v7  ;;  %v31091_v7 = vand.u32 4294901760, %v28055_v32  ;;  %v28138_v17 = vsub.f32 %v15693_v50, %v28112_v56  ;;  %v28163_v37 = vand.u32 4294901760, %v15705_v9 }
 0x54e   : > { %20767 = vmatmul.mubr.f32.gmra.mrb[22].mxu1 %v27787_v39  ;;  %31097 = vst [vmem:[#allocation34_spill] sm:$0xff] %v28124_v0 }
 0x54f   : > { %20769 = vmatprep.mubr.f32.mxu1 %v27794_v41  ;;  %v15836_v45 = vsub.f32 %v28055_v32, %v31091_v7  ;;  %v31096_v32 = vand.u32 4294901760, %v28074_v49  ;;  %v28126_v7 = vand.u32 4294901760, %v15696_v21  ;;  %31105 = vst [vmem:[#allocation198_spill] sm:$0xff] %v28163_v37 }
 0x550   : > { %22123 = vmatmul.mubr.f32.gmra.mrb[26].mxu0 %v31055_v33  ;;  %v17921_v33 = vld [vmem:[%s24204_s21 + $0x9a] sm:$0xff] }
 0x551   : > { %22125 = vmatprep.mubr.f32.mxu0 %v31056_v44  ;;  %v15837_v44 = vand.u32 4294901760, %v15836_v45  ;;  %v15856_v57 = vsub.f32 %v28074_v49, %v31096_v32  ;;  %31098 = vst [vmem:[#allocation168_spill] sm:$0xff] %v28126_v7  ;;  %v15702_v45 = vsel %vm238_vm0, %v17922_v34, 0  ;;  %v31099_v32 = vand.u32 4294901760, %v28086_v23 }
 0x552   : > { %20770 = vmatmul.mubr.f32.gmra.mrb[24].mxu1 %v27820_v14  ;;  %v15847_v34 = vand.u32 4294901760, %v15846_v8  ;;  %v28144_v49 = vand.u32 4294901760, %v15702_v45  ;;  %v28152_v50 = vsub.f32 %v15696_v21, %v28126_v7  ;;  %v15708_v8 = vsel %vm238_vm0, %v17924_v61, 0 }
 0x553   : > { %20772 = vmatprep.mubr.f32.mxu1 %v27825_v10  ;;  %v15857_v5 = vand.u32 4294901760, %v15856_v57  ;;  %v31104_v57 = vand.u32 4294901760, %v28110_v4 }
 0x554   : > { %22126 = vmatmul.mubr.f32.gmra.mrb[28].mxu0 %v31058_v36  ;;  %v15699_v36 = vsel %vm238_vm0, %v17921_v33, 0  ;;  %31101 = vst [vmem:[#allocation188_spill] sm:$0xff] %v28144_v49  ;;  %31103 = vst [vmem:[#allocation197_spill] sm:$0xff] %v28152_v50 }
 0x555   : > { %22128 = vmatprep.mubr.f32.mxu0 %v31059_v26  ;;  %v15866_v26 = vsub.f32 %v28086_v23, %v31099_v32  ;;  %v28142_v33 = vand.u32 4294901760, %v15699_v36  ;;  %v15876_v32 = vsub.f32 %v28097_v60, %v31102_v52  ;;  %v17925_v23 = vld [vmem:[%s24204_s21 + $0xca] sm:$0xff]  ;;  %v28169_v60 = vsub.f32 %v15702_v45, %v28144_v49 }
 0x556   : > { %20773 = vmatmul.mubr.f32.gmra.mrb[26].mxu1 %v27844_v62  ;;  %v15711_v61 = vsel %vm238_vm0, %v17925_v23, 0  ;;  %v31108_v52 = vand.u32 4294901760, %v28124_v0  ;;  %v31110_v23 = vand.u32 4294901760, %v31061_v28  ;;  %v31118_v28 = vand.u32 4294901760, %v31063_v59 }
 0x557   : > { %20775 = vmatprep.mubr.f32.mxu1 %v27850_v6  ;;  %31100 = vst [vmem:[#allocation180_spill] sm:$0xff] %v28142_v33  ;;  %v15867_v31 = vand.u32 4294901760, %v15866_v26  ;;  %v28166_v21 = vsub.f32 %v15699_v36, %v28142_v33  ;;  %31107 = vst [vmem:[#allocation171_spill] sm:$0xff] %v28169_v60  ;;  %v28178_v36 = vand.u32 4294901760, %v15708_v8  ;;  %v17927_v33 = vld [vmem:[%s24204_s21 + $0xe2] sm:$0xff]  ;;  %v28188_v45 = vand.u32 4294901760, %v15711_v61 }
 0x558   : > { %22129 = vmatmul.mubr.f32.gmra.mrb[30].mxu0 %v31060_v29  ;;  %v17926_v29 = vld [vmem:[%s24204_s21 + $0xda] sm:$0xff]  ;;  %v31123_v59 = vand.u32 4294901760, %v28169_v60 }
 0x559   : > { %22133 = vmatprep.mubr.f32.mxu0 %v15837_v44  ;;  %v15886_v44 = vsub.f32 %v28110_v4, %v31104_v57  ;;  %31106 = vst [vmem:[#allocation199_spill] sm:$0xff] %v28166_v21  ;;  %v15714_v26 = vsel %vm238_vm0, %v17926_v29, 0  ;;  %v15877_v57 = vand.u32 4294901760, %v15876_v32  ;;  %v15896_v4 = vsub.f32 %v28124_v0, %v31108_v52  ;;  %31109 = vst [vmem:[#allocation177_spill] sm:$0xff] %v28178_v36  ;;  %v17928_v29 = vld [vmem:[%s24204_s21 + $0xf2] sm:$0xff]  ;;  %v17929_v0 = vld [vmem:[%s24204_s21 + $0xfa] sm:$0xff] }
 0x55a   : > { %20776 = vmatmul.mubr.f32.gmra.mrb[28].mxu1 %v27864_v11  ;;  %31112 = vst [vmem:[#allocation190_spill] sm:$0xff] %v28188_v45  ;;  %v28190_v32 = vand.u32 4294901760, %v15714_v26  ;;  %v31114_v52 = vand.u32 4294901760, %v28138_v17  ;;  %v28203_v49 = vsub.f32 %v15708_v8, %v28178_v36 }
 0x55b   : > { %20778 = vmatprep.mubr.f32.mxu1 %v27873_v51 }
 0x55c   : > { %22134 = vmatmul.mubr.f32.vlgmr.msra.gmra.mrb[0].mxu0 %v15847_v34  ;;  %31113 = vst [vmem:[#allocation201_spill] sm:$0xff] %v28190_v32  ;;  %v15906_v34 = vsub.f32 %v28138_v17, %v31114_v52  ;;  %31116 = vst [vmem:[#allocation204_spill] sm:$0xff] %v28203_v49  ;;  %v15720_v52 = vsel %vm238_vm0, %v17928_v29, 0  ;;  %v28217_v8 = vsub.f32 %v15714_v26, %v28190_v32 }
 0x55d   : > { %22136 = vmatprep.mubr.f32.mxu0 %v15857_v5  ;;  %22182 = vmatpush3.msra.mxu0 %v27990_v18  ;;  %v15887_v5 = vand.u32 4294901760, %v15886_v44  ;;  %v28186_v18 = vsub.f32 %v15705_v9, %v28163_v37  ;;  %v15717_v44 = vsel %vm238_vm0, %v17927_v33, 0  ;;  %v15897_v9 = vand.u32 4294901760, %v15896_v4  ;;  %v17931_v4 = vld [vmem:[%s24204_s21 + $0x112] sm:$0xff] }
 0x55e   : > { %20779 = vmatmul.mubr.f32.gmra.mrb[30].mxu1 %v27884_v53  ;;  %22231 = vmatprep.subr.mxu0 %v27971_v46  ;;  %v28214_v33 = vsub.f32 %v15711_v61, %v28188_v45  ;;  %31120 = vst [vmem:[#allocation208_spill] sm:$0xff] %v28217_v8  ;;  %v15907_v29 = vand.u32 4294901760, %v15906_v34  ;;  %v31125_v34 = vand.u32 4294901760, %v31065_v15  ;;  %v17932_v15 = vld [vmem:[%s24204_s21 + $0x122] sm:$0xff]  ;;  %v15729_v26 = vsel %vm238_vm0, %v17931_v4, 0 }
 0x55f   : > { %20783 = vmatprep.mubr.f32.mxu1 %v31110_v23  ;;  %31111 = vst [vmem:[#allocation186_spill] sm:$0xff] %v28186_v18  ;;  %v31115_v23 = vand.u32 4294901760, %v28152_v50 }
 0x560   : > { %22137 = vmatmul.mubr.f32.gmra.mrb[2].mxu0 %v15867_v31  ;;  %v31117_v31 = vand.u32 4294901760, %v31062_v35  ;;  %31119 = vst [vmem:[#allocation232_spill] sm:$0xff] %v28214_v33  ;;  %v17930_v35 = vld [vmem:[%s24204_s21 + $0x10a] sm:$0xff] }
 0x561   : > { %22139 = vmatprep.mubr.f32.mxu0 %v15877_v57  ;;  %v15916_v37 = vsub.f32 %v28152_v50, %v31115_v23  ;;  %v28219_v57 = vand.u32 4294901760, %v15717_v44  ;;  %v31122_v23 = vand.u32 4294901760, %v28166_v21  ;;  %v17935_v50 = vld [vmem:[%s24204_s21 + $0x142] sm:$0xff] }
 0x562   : > { %20784 = vmatmul.mubr.f32.vlgmr.msra.gmra.mrb[0].mxu1 %v31117_v31  ;;  %v28230_v31 = vand.u32 4294901760, %v15720_v52 }
 0x563   : > { %20832 = vmatpush3.msra.mxu1 %v31064_v63  ;;  %20786 = vmatprep.mubr.f32.mxu1 %v31118_v28  ;;  %31121 = vst [vmem:[#allocation212_spill] sm:$0xff] %v28219_v57  ;;  %v15926_v63 = vsub.f32 %v28166_v21, %v31122_v23  ;;  %v15936_v28 = vsub.f32 %v28169_v60, %v31123_v59  ;;  %v15917_v61 = vand.u32 4294901760, %v15916_v37  ;;  %v15726_v23 = vsel %vm238_vm0, %v17930_v35, 0 }
 0x564   : > { %22140 = vmatmul.mubr.f32.gmra.mrb[4].mxu0 %v15887_v5  ;;  %20881 = vmatprep.subr.mxu1 %v31030_v54  ;;  %31124 = vst [vmem:[#allocation109_spill] sm:$0xff] %v28230_v31  ;;  %v15723_v5 = vsel %vm238_vm0, %v17929_v0, 0  ;;  %v31126_v21 = vand.u32 4294901760, %v31066_v30  ;;  %v31127_v59 = vand.u32 4294901760, %v28186_v18  ;;  %v28245_v0 = vsub.f32 %v15717_v44, %v28219_v57  ;;  %v17933_v44 = vld [vmem:[%s24204_s21 + $0x12a] sm:$0xff] }
 0x565   : > { %22142 = vmatprep.mubr.f32.mxu0 %v15897_v9  ;;  %v15927_v35 = vand.u32 4294901760, %v15926_v63  ;;  %v28248_v60 = vand.u32 4294901760, %v15723_v5  ;;  %v31130_v30 = vand.u32 4294901760, %v28203_v49  ;;  %v28256_v9 = vand.u32 4294901760, %v15726_v23 }
 0x566   : > { %20787 = vmatmul.mubr.f32.gmra.mrb[2].mxu1 %v31125_v34  ;;  %v15946_v37 = vsub.f32 %v28186_v18, %v31127_v59  ;;  %31128 = vst [vmem:[#allocation125_spill] sm:$0xff] %v28245_v0  ;;  %v15937_v34 = vand.u32 4294901760, %v15936_v28  ;;  %v28254_v59 = vsub.f32 %v15720_v52, %v28230_v31  ;;  %v17934_v18 = vld [vmem:[%s24204_s21 + $0x13a] sm:$0xff]  ;;  %v15732_v63 = vsel %vm238_vm0, %v17932_v15, 0 }
 0x567   : > { %20789 = vmatprep.mubr.f32.mxu1 %v31126_v21  ;;  %31129 = vst [vmem:[#allocation215_spill] sm:$0xff] %v28248_v60  ;;  %v15956_v21 = vsub.f32 %v28203_v49, %v31130_v30  ;;  %31132 = vst [vmem:[#allocation131_spill] sm:$0xff] %v28256_v9  ;;  %v31134_v28 = vand.u32 4294901760, %v31067_v43  ;;  %v31135_v30 = vand.u32 4294901760, %v28214_v33  ;;  %v31136_v49 = vand.u32 4294901760, %v28217_v8 }
 0x568   : > { %22143 = vmatmul.mubr.f32.gmra.mrb[6].mxu0 %v15907_v29  ;;  %31131 = vst [vmem:[#allocation231_spill] sm:$0xff] %v28254_v59  ;;  %v31133_v29 = vand.u32 4294901760, %v27546_v1  ;;  %v28274_v1 = vsub.f32 %v15723_v5, %v28248_v60  ;;  %v28276_v15 = vand.u32 4294901760, %v15729_v26  ;;  %v15735_v43 = vsel %vm238_vm0, %v17933_v44, 0  ;;  %v17936_v5 = vld [vmem:[%s24204_s21 + $0x152] sm:$0xff] }
 0x569   : > { %22145 = vmatprep.mubr.f32.mxu0 %v15917_v61  ;;  %v15947_v61 = vand.u32 4294901760, %v15946_v37  ;;  %v15966_v52 = vsub.f32 %v28214_v33, %v31135_v30  ;;  %v15976_v4 = vsub.f32 %v28217_v8, %v31136_v49  ;;  %v15738_v37 = vsel %vm238_vm0, %v17934_v18, 0 }
 0x56a   : > { %20790 = vmatmul.mubr.f32.gmra.mrb[4].mxu1 %v31133_v29  ;;  %31137 = vst [vmem:[#allocation83_spill] sm:$0xff] %v28276_v15  ;;  %v15957_v29 = vand.u32 4294901760, %v15956_v21  ;;  %v28282_v30 = vsub.f32 %v15726_v23, %v28256_v9  ;;  %v28284_v49 = vand.u32 4294901760, %v15732_v63  ;;  %v31141_v8 = vand.u32 4294901760, %v31069_v22 }
 0x56b   : > { %20792 = vmatprep.mubr.f32.mxu1 %v31134_v28  ;;  %v15967_v44 = vand.u32 4294901760, %v15966_v52  ;;  %v15977_v18 = vand.u32 4294901760, %v15976_v4  ;;  %v28294_v21 = vand.u32 4294901760, %v15738_v37  ;;  %v31144_v23 = vand.u32 4294901760, %v28245_v0 }
 0x56c   : > { %22146 = vmatmul.mubr.f32.gmra.mrb[8].mxu0 %v15927_v35  ;;  %31138 = vst [vmem:[#allocation144_spill] sm:$0xff] %v28282_v30  ;;  %31139 = vst [vmem:[#allocation99_spill] sm:$0xff] %v28284_v49  ;;  %v31140_v35 = vand.u32 4294901760, %v31068_v20  ;;  %v15741_v22 = vsel %vm238_vm0, %v17935_v50, 0  ;;  %v15744_v33 = vsel %vm238_vm0, %v17936_v5, 0  ;;  %v17937_v20 = vld [vmem:[%s24204_s21 + $0x15a] sm:$0xff] }
 0x56d   : > { %22148 = vmatprep.mubr.f32.mxu0 %v15937_v34  ;;  %v28292_v34 = vand.u32 4294901760, %v15735_v43  ;;  %31143 = vst [vmem:[#allocation173_spill] sm:$0xff] %v28294_v21  ;;  %v15986_v28 = vsub.f32 %v28245_v0, %v31144_v23  ;;  %v31148_v23 = vand.u32 4294901760, %v31070_v42  ;;  %v31153_v5 = vand.u32 4294901760, %v28274_v1 }
 0x56e   : > { %20793 = vmatmul.mubr.f32.gmra.mrb[6].mxu1 %v31140_v35  ;;  %v28301_v35 = vsub.f32 %v15729_v26, %v28276_v15  ;;  %v31149_v26 = vand.u32 4294901760, %v31071_v40  ;;  %v31157_v40 = vand.u32 4294901760, %v31073_v16 }
 0x56f   : > { %20795 = vmatprep.mubr.f32.mxu1 %v31141_v8  ;;  %31142 = vst [vmem:[#allocation43_spill] sm:$0xff] %v28292_v34  ;;  %v31146_v8 = vand.u32 4294901760, %v28254_v59  ;;  %v28318_v50 = vsub.f32 %v15735_v43, %v28292_v34  ;;  %v15987_v4 = vand.u32 4294901760, %v15986_v28  ;;  %v16006_v42 = vsub.f32 %v28274_v1, %v31153_v5  ;;  %v17939_v5 = vld [vmem:[%s24204_s21 + $0x172] sm:$0xff] }
 0x570   : > { %22149 = vmatmul.mubr.f32.gmra.mrb[10].mxu0 %v15947_v61  ;;  %31145 = vst [vmem:[#allocation179_spill] sm:$0xff] %v28301_v35  ;;  %v28309_v61 = vsub.f32 %v15732_v63, %v28284_v49  ;;  %v17938_v63 = vld [vmem:[%s24204_s21 + $0x16a] sm:$0xff]  ;;  %v31156_v28 = vand.u32 4294901760, %v31072_v48  ;;  %v31158_v48 = vand.u32 4294901760, %v28301_v35 }
 0x571   : > { %22151 = vmatprep.mubr.f32.mxu0 %v15957_v29  ;;  %v15996_v52 = vsub.f32 %v28254_v59, %v31146_v8  ;;  %31150 = vst [vmem:[#allocation223_spill] sm:$0xff] %v28318_v50  ;;  %v28321_v29 = vsub.f32 %v15738_v37, %v28294_v21  ;;  %v28323_v8 = vand.u32 4294901760, %v15741_v22  ;;  %v15750_v0 = vsel %vm238_vm0, %v17938_v63, 0  ;;  %v17940_v59 = vld [vmem:[%s24204_s21 + $0x182] sm:$0xff] }
 0x572   : > { %31147 = vst [vmem:[#allocation185_spill] sm:$0xff] %v28309_v61  ;;  %20796 = vmatmul.mubr.f32.gmra.mrb[8].mxu1 %v31148_v23  ;;  %v28330_v23 = vand.u32 4294901760, %v15744_v33  ;;  %v16026_v63 = vsub.f32 %v28301_v35, %v31158_v48  ;;  %v15756_v48 = vsel %vm238_vm0, %v17940_v59, 0  ;;  %v17941_v35 = vld [vmem:[%s24204_s21 + $0x18a] sm:$0xff] }
 0x573   : > { %20798 = vmatprep.mubr.f32.mxu1 %v31149_v26  ;;  %31151 = vst [vmem:[#allocation226_spill] sm:$0xff] %v28321_v29  ;;  %31152 = vst [vmem:[#allocation228_spill] sm:$0xff] %v28323_v8  ;;  %v15997_v43 = vand.u32 4294901760, %v15996_v52  ;;  %v31155_v26 = vand.u32 4294901760, %v28282_v30  ;;  %v31160_v52 = vand.u32 4294901760, %v28309_v61 }
 0x574   : > { %22152 = vmatmul.mubr.f32.gmra.mrb[12].mxu0 %v15967_v44  ;;  %31154 = vst [vmem:[#allocation140_spill] sm:$0xff] %v28330_v23  ;;  %v15747_v44 = vsel %vm238_vm0, %v17937_v20, 0  ;;  %v16007_v20 = vand.u32 4294901760, %v16006_v42  ;;  %v31162_v42 = vand.u32 4294901760, %v31074_v2  ;;  %v16027_v2 = vand.u32 4294901760, %v16026_v63  ;;  %v17943_v63 = vld [vmem:[%s24204_s21 + $0x1a2] sm:$0xff] }
 0x575   : > { %22154 = vmatprep.mubr.f32.mxu0 %v15977_v18  ;;  %v16016_v37 = vsub.f32 %v28282_v30, %v31155_v26  ;;  %v28346_v26 = vsub.f32 %v15741_v22, %v28323_v8  ;;  %v28355_v16 = vand.u32 4294901760, %v15747_v44  ;;  %v16036_v22 = vsub.f32 %v28309_v61, %v31160_v52  ;;  %v17942_v61 = vld [vmem:[%s24204_s21 + $0x19a] sm:$0xff] }
 0x576   : > { %20799 = vmatmul.mubr.f32.gmra.mrb[10].mxu1 %v31156_v28  ;;  %v28353_v28 = vsub.f32 %v15744_v33, %v28330_v23  ;;  %v28360_v18 = vand.u32 4294901760, %v15750_v0  ;;  %v31163_v33 = vand.u32 4294901760, %v31075_v27  ;;  %v31165_v30 = vand.u32 4294901760, %v28321_v29 }
 0x577   : > { %20801 = vmatprep.mubr.f32.mxu1 %v31157_v40  ;;  %31159 = vst [vmem:[#allocation133_spill] sm:$0xff] %v28355_v16  ;;  %v16017_v40 = vand.u32 4294901760, %v16016_v37 }
 0x578   : > { %22155 = vmatmul.mubr.f32.gmra.mrb[14].mxu0 %v15987_v4  ;;  %31161 = vst [vmem:[#allocation12_spill] sm:$0xff] %v28360_v18  ;;  %v15753_v4 = vsel %vm238_vm0, %v17939_v5, 0  ;;  %v16056_v52 = vsub.f32 %v28321_v29, %v31165_v30  ;;  %v15759_v30 = vsel %vm238_vm0, %v17941_v35, 0  ;;  %v31168_v5 = vand.u32 4294901760, %v31076_v25 }
 0x579   : > { %22157 = vmatprep.mubr.f32.mxu0 %v15997_v43  ;;  %v31164_v43 = vand.u32 4294901760, %v28318_v50  ;;  %v28381_v27 = vand.u32 4294901760, %v15753_v4 }
 0x57a   : > { %20802 = vmatmul.mubr.f32.gmra.mrb[12].mxu1 %v31162_v42  ;;  %v28379_v42 = vsub.f32 %v15747_v44, %v28355_v16  ;;  %v31169_v44 = vand.u32 4294901760, %v31077_v3  ;;  %v16057_v29 = vand.u32 4294901760, %v16056_v52 }
 0x57b   : > { %20804 = vmatprep.mubr.f32.mxu1 %v31163_v33  ;;  %v16046_v37 = vsub.f32 %v28318_v50, %v31164_v43  ;;  %31166 = vst [vmem:[#allocation166_spill] sm:$0xff] %v28381_v27  ;;  %v16037_v33 = vand.u32 4294901760, %v16036_v22  ;;  %v28384_v43 = vsub.f32 %v15750_v0, %v28360_v18  ;;  %v28386_v50 = vand.u32 4294901760, %v15756_v48 }
 0x57c   : > { %22158 = vmatmul.mubr.f32.gmra.mrb[16].mxu0 %v16007_v20  ;;  %v15762_v20 = vsel %vm238_vm0, %v17942_v61, 0  ;;  %v31171_v22 = vand.u32 4294901760, %v28353_v28  ;;  %v29921_v25 = vand.u32 4294901760, %v28379_v42  ;;  %v28405_v61 = vand.u32 4294901760, %v15759_v30 }
 0x57d   : > { %22160 = vmatprep.mubr.f32.mxu0 %v16017_v40  ;;  %31167 = vst [vmem:[#allocation172_spill] sm:$0xff] %v28386_v50  ;;  %v16047_v59 = vand.u32 4294901760, %v16046_v37  ;;  %v31170_v40 = vand.u32 4294901760, %v28346_v26  ;;  %v28409_v37 = vsub.f32 %v15756_v48, %v28386_v50  ;;  %v28411_v52 = vand.u32 4294901760, %v15762_v20 }
 0x57e   : > { %20805 = vmatmul.mubr.f32.gmra.mrb[14].mxu1 %v31168_v5  ;;  %v16076_v35 = vsub.f32 %v28353_v28, %v31171_v22  ;;  %v28403_v5 = vsub.f32 %v15753_v4, %v28381_v27  ;;  %31172 = vst [vmem:[#allocation174_spill] sm:$0xff] %v28405_v61  ;;  %v28423_v48 = vsub.f32 %v15759_v30, %v28405_v61 }
 0x57f   : > { %20807 = vmatprep.mubr.f32.mxu1 %v31169_v44  ;;  %v16066_v0 = vsub.f32 %v28346_v26, %v31170_v40  ;;  %31173 = vst [vmem:[#allocation175_spill] sm:$0xff] %v28411_v52  ;;  %v31174_v44 = vand.u32 4294901760, %v27715_v12  ;;  %v31175_v40 = vand.u32 4294901760, %v31078_v24  ;;  %v31177_v12 = vand.u32 4294901760, %v28384_v43 }
 0x580   : > { %22161 = vmatmul.mubr.f32.gmra.mrb[18].mxu0 %v16027_v2  ;;  %v15765_v2 = vsel %vm238_vm0, %v17943_v63, 0  ;;  %v29920_v22 = vand.u32 4294901760, %v28403_v5  ;;  %v16077_v63 = vand.u32 4294901760, %v16076_v35  ;;  %v29918_v35 = vand.u32 4294901760, %v28423_v48 }
 0x581   : > { %22163 = vmatprep.mubr.f32.mxu0 %v16037_v33  ;;  %v16067_v4 = vand.u32 4294901760, %v16066_v0  ;;  %v16086_v33 = vsub.f32 %v28379_v42, %v29921_v25  ;;  %v28425_v3 = vand.u32 4294901760, %v15765_v2  ;;  %v16096_v24 = vsub.f32 %v28384_v43, %v31177_v12  ;;  %v31219_v25 = vld [vmem:[#allocation142_spill] sm:$0xff] }
 0x582   : > { %20808 = vmatmul.mubr.f32.gmra.mrb[16].mxu1 %v31174_v44  ;;  %v29919_v0 = vand.u32 4294901760, %v28409_v37  ;;  %v31178_v44 = vand.u32 4294901760, %v31079_v58 }
 0x583   : > { %20810 = vmatprep.mubr.f32.mxu1 %v31175_v40  ;;  %31176 = vst [vmem:[#allocation127_spill] sm:$0xff] %v28425_v3  ;;  %v31179_v40 = vand.u32 4294901760, %v31080_v13  ;;  %v16087_v30 = vand.u32 4294901760, %v16086_v33  ;;  %v28443_v12 = vsub.f32 %v15765_v2, %v28425_v3  ;;  %v31181_v33 = vand.u32 4294901760, %v31084_v47 }
 0x584   : > { %22164 = vmatmul.mubr.f32.gmra.mrb[20].mxu0 %v16047_v59  ;;  %v28432_v59 = vsub.f32 %v15762_v20, %v28411_v52  ;;  %v16097_v20 = vand.u32 4294901760, %v16096_v24  ;;  %v16116_v58 = vsub.f32 %v28409_v37, %v29919_v0  ;;  %v16126_v2 = vsub.f32 %v28423_v48, %v29918_v35  ;;  %v31216_v35 = vld [vmem:[#allocation164_spill] sm:$0xff]  ;;  %v31217_v0 = vld [vmem:[#allocation67_spill] sm:$0xff] }
 0x585   : > { %22166 = vmatprep.mubr.f32.mxu0 %v16057_v29  ;;  %v16106_v29 = vsub.f32 %v28403_v5, %v29920_v22  ;;  %v31183_v47 = vand.u32 4294901760, %v27794_v41  ;;  %v31186_v41 = vand.u32 4294901760, %v27844_v62  ;;  %v31191_v62 = vand.u32 4294901760, %v27884_v53  ;;  %v31200_v53 = vld [vmem:[#allocation135_spill] sm:$0xff]  ;;  %v31218_v22 = vld [vmem:[#allocation102_spill] sm:$0xff] }
 0x586   : > { %20811 = vmatmul.mubr.f32.gmra.mrb[18].mxu1 %v31178_v44  ;;  %v29917_v13 = vand.u32 4294901760, %v28432_v59  ;;  %v16117_v24 = vand.u32 4294901760, %v16116_v58  ;;  %v31185_v58 = vand.u32 4294901760, %v27825_v10  ;;  %v31190_v10 = vld [vmem:[#allocation160_spill] sm:$0xff] }
 0x587   : > { %20813 = vmatprep.mubr.f32.mxu1 %v31179_v40  ;;  %v16107_v44 = vand.u32 4294901760, %v16106_v29 }
 0x588   : > { %22167 = vmatmul.mubr.f32.gmra.mrb[22].mxu0 %v16067_v4  ;;  %v31180_v4 = vand.u32 4294901760, %v31083_v38  ;;  %v16136_v40 = vsub.f32 %v28432_v59, %v29917_v13  ;;  %v31182_v38 = vand.u32 4294901760, %v27787_v39  ;;  %v31215_v13 = vld [vmem:[#allocation157_spill] sm:$0xff] }
 0x589   : > { %22169 = vmatprep.mubr.f32.mxu0 %v16077_v63  ;;  %v29916_v63 = vand.u32 4294901760, %v28443_v12 }
 0x58a   : > { %20814 = vmatmul.mubr.f32.gmra.mrb[20].mxu1 %v31180_v4  ;;  %v16137_v4 = vand.u32 4294901760, %v16136_v40  ;;  %v31196_v40 = vld [vmem:[#allocation222_spill] sm:$0xff] }
 0x58b   : > { %20816 = vmatprep.mubr.f32.mxu1 %v31181_v33  ;;  %v16146_v29 = vsub.f32 %v28443_v12, %v29916_v63  ;;  %v31187_v33 = vand.u32 4294901760, %v27850_v6  ;;  %v31192_v6 = vld [vmem:[#allocation18_spill] sm:$0xff]  ;;  %v31214_v63 = vld [vmem:[#allocation143_spill] sm:$0xff] }
 0x58c   : > { %22170 = vmatmul.mubr.f32.gmra.mrb[24].mxu0 %v16087_v30  ;;  %v16127_v30 = vand.u32 4294901760, %v16126_v2  ;;  %v31193_v2 = vld [vmem:[#allocation220_spill] sm:$0xff] }
 0x58d   : > { %22172 = vmatprep.mubr.f32.mxu0 %v16097_v20  ;;  %v31184_v20 = vand.u32 4294901760, %v27820_v14  ;;  %v16147_v39 = vand.u32 4294901760, %v16146_v29  ;;  %v31189_v14 = vand.u32 4294901760, %v27873_v51  ;;  %v31197_v51 = vld [vmem:[#allocation227_spill] sm:$0xff] }
 0x58e   : > { %20817 = vmatmul.mubr.f32.gmra.mrb[22].mxu1 %v31182_v38  ;;  %v31198_v38 = vld [vmem:[#allocation75_spill] sm:$0xff] }
 0x58f   : > { %20819 = vmatprep.mubr.f32.mxu1 %v31183_v47  ;;  %v31201_v47 = vld [vmem:[#allocation230_spill] sm:$0xff]  ;;  %v31203_v29 = vld [vmem:[#allocation203_spill] sm:$0xff] }
 0x590   : > { %22173 = vmatmul.mubr.f32.gmra.mrb[26].mxu0 %v16107_v44  ;;  %v31188_v44 = vand.u32 4294901760, %v27864_v11  ;;  %v31195_v11 = vld [vmem:[#allocation165_spill] sm:$0xff] }
 0x591   : > { %22175 = vmatprep.mubr.f32.mxu0 %v16117_v24  ;;  %v31194_v24 = vld [vmem:[#allocation52_spill] sm:$0xff] }
 0x592   : > { %20820 = vmatmul.mubr.f32.gmra.mrb[24].mxu1 %v31184_v20  ;;  %v31206_v20 = vld [vmem:[#allocation188_spill] sm:$0xff] }
 0x593   : > { %20822 = vmatprep.mubr.f32.mxu1 %v31185_v58  ;;  %v31207_v58 = vld [vmem:[#allocation214_spill] sm:$0xff] }
 0x594   : > { %22176 = vmatmul.mubr.f32.gmra.mrb[28].mxu0 %v16127_v30  ;;  %v31202_v30 = vld [vmem:[#allocation193_spill] sm:$0xff] }
 0x595   : > { %22178 = vmatprep.mubr.f32.mxu0 %v16137_v4  ;;  %v31204_v4 = vld [vmem:[#allocation210_spill] sm:$0xff] }
 0x596   : > { %20823 = vmatmul.mubr.f32.gmra.mrb[26].mxu1 %v31186_v41  ;;  %v31209_v41 = vld [vmem:[#allocation198_spill] sm:$0xff] }
 0x597   : > { %20825 = vmatprep.mubr.f32.mxu1 %v31187_v33  ;;  %v31210_v33 = vld [vmem:[#allocation224_spill] sm:$0xff] }
 0x598   : > { %22179 = vmatmul.mubr.f32.gmra.mrb[30].mxu0 %v16147_v39  ;;  %v31208_v39 = vld [vmem:[#allocation219_spill] sm:$0xff] }
 0x599   : > { %22183 = vmatprep.mubr.f32.mxu0 %v28042_v19 }
 0x59a   : > { %20826 = vmatmul.mubr.f32.gmra.mrb[28].mxu1 %v31188_v44  ;;  %v31211_v44 = vld [vmem:[#allocation130_spill] sm:$0xff] }
 0x59b   : > { %20828 = vmatprep.mubr.f32.mxu1 %v31189_v14  ;;  %v31212_v14 = vld [vmem:[#allocation134_spill] sm:$0xff] }
 0x59c   : > { %22184 = vmatmul.mubr.f32.vlgmr.msra.gmra.mrb[0].mxu0 %v28051_v55 }
 0x59d   : > { %22186 = vmatprep.mubr.f32.mxu0 %v31190_v10  ;;  %22232 = vmatpush3.msra.mxu0 %v27971_v46  ;;  %v31199_v46 = vld [vmem:[#allocation2_spill] sm:$0xff] }
 0x59e   : > { %20829 = vmatmul.mubr.f32.gmra.mrb[30].mxu1 %v31191_v62  ;;  %22281 = vmatprep.subr.mxu0 %v31192_v6  ;;  %v31213_v62 = vld [vmem:[#allocation153_spill] sm:$0xff] }
 0x59f   : > { %20833 = vmatprep.mubr.f32.mxu1 %v31193_v2 }
 0x5a0   : > { %22187 = vmatmul.mubr.f32.gmra.mrb[2].mxu0 %v31194_v24 }
 0x5a1   : > { %22189 = vmatprep.mubr.f32.mxu0 %v31195_v11 }
 0x5a2   : > { %20834 = vmatmul.mubr.f32.vlgmr.msra.gmra.mrb[0].mxu1 %v31196_v40 }
 0x5a3   : > { %20882 = vmatpush3.msra.mxu1 %v31030_v54  ;;  %20836 = vmatprep.mubr.f32.mxu1 %v31197_v51  ;;  %v31205_v54 = vld [vmem:[#allocation180_spill] sm:$0xff] }
 0x5a4   : > { %22190 = vmatmul.mubr.f32.gmra.mrb[4].mxu0 %v31198_v38  ;;  %20931 = vmatprep.subr.mxu1 %v31199_v46 }
 0x5a5   : > { %22192 = vmatprep.mubr.f32.mxu0 %v31200_v53 }
 0x5a6   : > { %20837 = vmatmul.mubr.f32.gmra.mrb[2].mxu1 %v31201_v47 }
 0x5a7   : > { %20839 = vmatprep.mubr.f32.mxu1 %v31202_v30 }
 0x5a8   : > { %22193 = vmatmul.mubr.f32.gmra.mrb[6].mxu0 %v28112_v56 }
 0x5a9   : > { %22195 = vmatprep.mubr.f32.mxu0 %v28126_v7  ;;  %v31242_v7 = vld [vmem:[#allocation34_spill] sm:$0xff] }
 0x5aa   : > { %20840 = vmatmul.mubr.f32.gmra.mrb[4].mxu1 %v31203_v29 }
 0x5ab   : > { %20842 = vmatprep.mubr.f32.mxu1 %v31204_v4 }
 0x5ac   : > { %22196 = vmatmul.mubr.f32.gmra.mrb[8].mxu0 %v31205_v54  ;;  %v31240_v54 = vld [vmem:[#allocation129_spill] sm:$0xff] }
 0x5ad   : > { %22198 = vmatprep.mubr.f32.mxu0 %v31206_v20 }
 0x5ae   : > { %20843 = vmatmul.mubr.f32.gmra.mrb[6].mxu1 %v31207_v58 }
 0x5af   : > { %20845 = vmatprep.mubr.f32.mxu1 %v31208_v39 }
 0x5b0   : > { %22199 = vmatmul.mubr.f32.gmra.mrb[10].mxu0 %v31209_v41  ;;  %v31238_v41 = vld [vmem:[#allocation21_spill] sm:$0xff] }
 0x5b1   : > { %22201 = vmatprep.mubr.f32.mxu0 %v28178_v36 }
 0x5b2   : > { %20846 = vmatmul.mubr.f32.gmra.mrb[8].mxu1 %v31210_v33 }
 0x5b3   : > { %20848 = vmatprep.mubr.f32.mxu1 %v31211_v44 }
 0x5b4   : > { %22202 = vmatmul.mubr.f32.gmra.mrb[12].mxu0 %v28188_v45  ;;  %v31235_v45 = vld [vmem:[#allocation3_spill] sm:$0xff] }
 0x5b5   : > { %22204 = vmatprep.mubr.f32.mxu0 %v28190_v32  ;;  %v31234_v32 = vld [vmem:[#allocation4_spill] sm:$0xff] }
 0x5b6   : > { %20849 = vmatmul.mubr.f32.gmra.mrb[10].mxu1 %v31212_v14  ;;  %v8392_v36 = vsub.f32 %v31235_v45, %v31234_v32  ;;  %v31241_v32 = vld [vmem:[#allocation154_spill] sm:$0xff] }
 0x5b7   : > { %20851 = vmatprep.mubr.f32.mxu1 %v31213_v62 }
 0x5b8   : > { %22205 = vmatmul.mubr.f32.gmra.mrb[14].mxu0 %v28219_v57  ;;  %v31231_v57 = vld [vmem:[#allocation146_spill] sm:$0xff]  ;;  %v28558_v20 = vand.u32 4294901760, %v8392_v36  ;;  %v31243_v36 = vld [vmem:[#allocation197_spill] sm:$0xff] }
 0x5b9   : > { %22207 = vmatprep.mubr.f32.mxu0 %v28230_v31  ;;  %v31220_v31 = vld [vmem:[#allocation150_spill] sm:$0xff] }
 0x5ba   : > { %20852 = vmatmul.mubr.f32.gmra.mrb[12].mxu1 %v31214_v63 }
 0x5bb   : > { %20854 = vmatprep.mubr.f32.mxu1 %v31215_v13 }
 0x5bc   : > { %22208 = vmatmul.mubr.f32.gmra.mrb[16].mxu0 %v28248_v60  ;;  %v31221_v60 = vld [vmem:[#allocation167_spill] sm:$0xff] }
 0x5bd   : > { %22210 = vmatprep.mubr.f32.mxu0 %v28256_v9  ;;  %v31222_v9 = vld [vmem:[#allocation176_spill] sm:$0xff] }
 0x5be   : > { %20855 = vmatmul.mubr.f32.gmra.mrb[14].mxu1 %v31216_v35 }
 0x5bf   : > { %20857 = vmatprep.mubr.f32.mxu1 %v31217_v0 }
 0x5c0   : > { %22211 = vmatmul.mubr.f32.gmra.mrb[18].mxu0 %v28276_v15  ;;  %v31223_v15 = vld [vmem:[#allocation184_spill] sm:$0xff] }
 0x5c1   : > { %22213 = vmatprep.mubr.f32.mxu0 %v28284_v49  ;;  %v31224_v49 = vld [vmem:[#allocation170_spill] sm:$0xff] }
 0x5c2   : > { %20858 = vmatmul.mubr.f32.gmra.mrb[16].mxu1 %v31218_v22 }
 0x5c3   : > { %20860 = vmatprep.mubr.f32.mxu1 %v31219_v25 }
 0x5c4   : > { %22214 = vmatmul.mubr.f32.gmra.mrb[20].mxu0 %v28292_v34  ;;  %v31225_v34 = vld [vmem:[#allocation178_spill] sm:$0xff] }
 0x5c5   : > { %22216 = vmatprep.mubr.f32.mxu0 %v28294_v21  ;;  %v31226_v21 = vld [vmem:[#allocation182_spill] sm:$0xff] }
 0x5c6   : > { %20861 = vmatmul.mubr.f32.gmra.mrb[18].mxu1 %v31220_v31 }
 0x5c7   : > { %20863 = vmatprep.mubr.f32.mxu1 %v31221_v60 }
 0x5c8   : > { %22217 = vmatmul.mubr.f32.gmra.mrb[22].mxu0 %v28323_v8  ;;  %v31227_v8 = vld [vmem:[#allocation191_spill] sm:$0xff] }
 0x5c9   : > { %22219 = vmatprep.mubr.f32.mxu0 %v28330_v23  ;;  %v31228_v23 = vld [vmem:[#allocation233_spill] sm:$0xff] }
 0x5ca   : > { %20864 = vmatmul.mubr.f32.gmra.mrb[20].mxu1 %v31222_v9 }
 0x5cb   : > { %20866 = vmatprep.mubr.f32.mxu1 %v31223_v15 }
 0x5cc   : > { %22220 = vmatmul.mubr.f32.gmra.mrb[24].mxu0 %v28355_v16  ;;  %v31229_v16 = vld [vmem:[#allocation217_spill] sm:$0xff] }
 0x5cd   : > { %22222 = vmatprep.mubr.f32.mxu0 %v28360_v18  ;;  %v31230_v18 = vld [vmem:[#allocation25_spill] sm:$0xff] }
 0x5ce   : > { %20867 = vmatmul.mubr.f32.gmra.mrb[22].mxu1 %v31224_v49 }
 0x5cf   : > { %20869 = vmatprep.mubr.f32.mxu1 %v31225_v34 }
 0x5d0   : > { %22223 = vmatmul.mubr.f32.gmra.mrb[26].mxu0 %v28381_v27  ;;  %v31232_v27 = vld [vmem:[#allocation148_spill] sm:$0xff] }
 0x5d1   : > { %22225 = vmatprep.mubr.f32.mxu0 %v28386_v50  ;;  %v31233_v50 = vld [vmem:[#allocation162_spill] sm:$0xff] }
 0x5d2   : > { %20870 = vmatmul.mubr.f32.gmra.mrb[24].mxu1 %v31226_v21 }
 0x5d3   : > { %20872 = vmatprep.mubr.f32.mxu1 %v31227_v8 }
 0x5d4   : > { %22226 = vmatmul.mubr.f32.gmra.mrb[28].mxu0 %v28405_v61  ;;  %v31236_v61 = vld [vmem:[#allocation59_spill] sm:$0xff] }
 0x5d5   : > { %22228 = vmatprep.mubr.f32.mxu0 %v28411_v52  ;;  %v31237_v52 = vld [vmem:[#allocation152_spill] sm:$0xff] }
 0x5d6   : > { %20873 = vmatmul.mubr.f32.gmra.mrb[26].mxu1 %v31228_v23 }
 0x5d7   : > { %20875 = vmatprep.mubr.f32.mxu1 %v31229_v16 }
 0x5d8   : > { %22229 = vmatmul.mubr.f32.gmra.mrb[30].mxu0 %v28425_v3  ;;  %v31239_v3 = vld [vmem:[#allocation86_spill] sm:$0xff] }
 0x5d9   : > { %22233 = vmatprep.mubr.f32.mxu0 %v31230_v18 }
 0x5da   : > { %20876 = vmatmul.mubr.f32.gmra.mrb[28].mxu1 %v31231_v57 }
 0x5db   : > { %20878 = vmatprep.mubr.f32.mxu1 %v31232_v27 }
 0x5dc   : > { %22234 = vmatmul.mubr.f32.vlgmr.msra.gmra.mrb[0].mxu0 %v31233_v50 }
 0x5dd   : > { %22236 = vmatprep.mubr.f32.mxu0 %v31236_v61  ;;  %22282 = vmatpush3.msra.mxu0 %v31192_v6 }
 0x5de   : > { %20879 = vmatmul.mubr.f32.gmra.mrb[30].mxu1 %v31237_v52  ;;  %22331 = vmatprep.subr.mxu0 %v31238_v41 }
 0x5df   : > { %20883 = vmatprep.mubr.f32.mxu1 %v31193_v2  ;;  %v31244_v2 = vld [vmem:[#allocation199_spill] sm:$0xff] }
 0x5e0   : > { %22237 = vmatmul.mubr.f32.gmra.mrb[2].mxu0 %v31239_v3 }
 0x5e1   : > { %22239 = vmatprep.mubr.f32.mxu0 %v31240_v54 }
 0x5e2   : > { %20884 = vmatmul.mubr.f32.vlgmr.msra.gmra.mrb[0].mxu1 %v31196_v40  ;;  %v31245_v40 = vld [vmem:[#allocation171_spill] sm:$0xff] }
 0x5e3   : > { %20932 = vmatpush3.msra.mxu1 %v31199_v46  ;;  %20886 = vmatprep.mubr.f32.mxu1 %v31197_v51  ;;  %v31246_v51 = vld [vmem:[#allocation186_spill] sm:$0xff]  ;;  %v31247_v46 = vld [vmem:[#allocation204_spill] sm:$0xff] }
 0x5e4   : > { %22240 = vmatmul.mubr.f32.gmra.mrb[4].mxu0 %v31241_v32  ;;  %20981 = vmatprep.subr.mxu1 %v28558_v20 }
 0x5e5   : > { %22242 = vmatprep.mubr.f32.mxu0 %v31242_v7 }
 0x5e6   : > { %20887 = vmatmul.mubr.f32.gmra.mrb[2].mxu1 %v31201_v47  ;;  %v31248_v47 = vld [vmem:[#allocation232_spill] sm:$0xff] }
 0x5e7   : > { %20889 = vmatprep.mubr.f32.mxu1 %v31202_v30  ;;  %v31249_v30 = vld [vmem:[#allocation208_spill] sm:$0xff] }
 0x5e8   : > { %22243 = vmatmul.mubr.f32.gmra.mrb[6].mxu0 %v28138_v17 }
 0x5e9   : > { %22245 = vmatprep.mubr.f32.mxu0 %v31243_v36 }
 0x5ea   : > { %20890 = vmatmul.mubr.f32.gmra.mrb[4].mxu1 %v31203_v29  ;;  %v31250_v29 = vld [vmem:[#allocation125_spill] sm:$0xff] }
 0x5eb   : > { %20892 = vmatprep.mubr.f32.mxu1 %v31204_v4  ;;  %v31251_v4 = vld [vmem:[#allocation231_spill] sm:$0xff] }
 0x5ec   : > { %22246 = vmatmul.mubr.f32.gmra.mrb[8].mxu0 %v31244_v2 }
 0x5ed   : > { %22248 = vmatprep.mubr.f32.mxu0 %v31245_v40 }
 0x5ee   : > { %20893 = vmatmul.mubr.f32.gmra.mrb[6].mxu1 %v31207_v58  ;;  %v31252_v58 = vld [vmem:[#allocation144_spill] sm:$0xff] }
 0x5ef   : > { %20895 = vmatprep.mubr.f32.mxu1 %v31208_v39  ;;  %v31253_v39 = vld [vmem:[#allocation179_spill] sm:$0xff] }
 0x5f0   : > { %22249 = vmatmul.mubr.f32.gmra.mrb[10].mxu0 %v31246_v51 }
 0x5f1   : > { %22251 = vmatprep.mubr.f32.mxu0 %v31247_v46 }
 0x5f2   : > { %20896 = vmatmul.mubr.f32.gmra.mrb[8].mxu1 %v31210_v33  ;;  %v31254_v33 = vld [vmem:[#allocation185_spill] sm:$0xff] }
 0x5f3   : > { %20898 = vmatprep.mubr.f32.mxu1 %v31211_v44  ;;  %v31255_v44 = vld [vmem:[#allocation223_spill] sm:$0xff] }
 0x5f4   : > { %22252 = vmatmul.mubr.f32.gmra.mrb[12].mxu0 %v31248_v47 }
 0x5f5   : > { %22254 = vmatprep.mubr.f32.mxu0 %v31249_v30 }
 0x5f6   : > { %20899 = vmatmul.mubr.f32.gmra.mrb[10].mxu1 %v31212_v14  ;;  %v31284_v14 = vld [vmem:[#allocation74_spill] sm:$0xff] }
 0x5f7   : > { %20901 = vmatprep.mubr.f32.mxu1 %v31213_v62  ;;  %v31285_v62 = vand.u32 4294901760, %v31250_v29 }
 0x5f8   : > { %22255 = vmatmul.mubr.f32.gmra.mrb[14].mxu0 %v31250_v29  ;;  %v31294_v29 = vand.u32 4294901760, %v31254_v33 }
 0x5f9   : > { %22257 = vmatprep.mubr.f32.mxu0 %v31251_v4 }
 0x5fa   : > { %20902 = vmatmul.mubr.f32.gmra.mrb[12].mxu1 %v31214_v63  ;;  %v31256_v63 = vld [vmem:[#allocation226_spill] sm:$0xff] }
 0x5fb   : > { %20904 = vmatprep.mubr.f32.mxu1 %v31215_v13  ;;  %v31280_v13 = vld [vmem:[#allocation66_spill] sm:$0xff] }
 0x5fc   : > { %22258 = vmatmul.mubr.f32.gmra.mrb[16].mxu0 %v28274_v1 }
 0x5fd   : > { %22260 = vmatprep.mubr.f32.mxu0 %v31252_v58 }
 0x5fe   : > { %20905 = vmatmul.mubr.f32.gmra.mrb[14].mxu1 %v31216_v35  ;;  %v31279_v35 = vld [vmem:[#allocation65_spill] sm:$0xff] }
 0x5ff   : > { %20907 = vmatprep.mubr.f32.mxu1 %v31217_v0  ;;  %v31278_v0 = vand.u32 4294901760, %v31247_v46  ;;  %v31291_v46 = vld [vmem:[#allocation89_spill] sm:$0xff] }
 0x600   : > { %22261 = vmatmul.mubr.f32.gmra.mrb[18].mxu0 %v31253_v39 }
 0x601   : > { %22263 = vmatprep.mubr.f32.mxu0 %v31254_v33  ;;  %v31302_v33 = vand.u32 4294901760, %v28353_v28 }
 0x602   : > { %20908 = vmatmul.mubr.f32.gmra.mrb[16].mxu1 %v31218_v22  ;;  %v31276_v22 = vld [vmem:[#allocation58_spill] sm:$0xff] }
 0x603   : > { %20910 = vmatprep.mubr.f32.mxu1 %v31219_v25  ;;  %v31271_v25 = vld [vmem:[#allocation48_spill] sm:$0xff] }
 0x604   : > { %22264 = vmatmul.mubr.f32.gmra.mrb[20].mxu0 %v31255_v44 }
 0x605   : > { %22266 = vmatprep.mubr.f32.mxu0 %v31256_v63 }
 0x606   : > { %20911 = vmatmul.mubr.f32.gmra.mrb[18].mxu1 %v31220_v31  ;;  %v31258_v31 = vand.u32 4294901760, %v31233_v50  ;;  %v31265_v50 = vand.u32 4294901760, %v31241_v32  ;;  %v31286_v32 = vand.u32 4294901760, %v31251_v4  ;;  %v31295_v4 = vld [vmem:[#allocation97_spill] sm:$0xff] }
 0x607   : > { %20913 = vmatprep.mubr.f32.mxu1 %v31221_v60  ;;  %v31257_v60 = vand.u32 4294901760, %v31230_v18  ;;  %v31268_v18 = vld [vmem:[#allocation42_spill] sm:$0xff] }
 0x608   : > { %22267 = vmatmul.mubr.f32.gmra.mrb[22].mxu0 %v28346_v26 }
 0x609   : > { %22269 = vmatprep.mubr.f32.mxu0 %v28353_v28  ;;  %v31310_v28 = vand.u32 4294901760, %v28409_v37 }
 0x60a   : > { %20914 = vmatmul.mubr.f32.gmra.mrb[20].mxu1 %v31222_v9  ;;  %v31259_v9 = vand.u32 4294901760, %v31236_v61  ;;  %v31272_v61 = vld [vmem:[#allocation50_spill] sm:$0xff] }
 0x60b   : > { %20916 = vmatprep.mubr.f32.mxu1 %v31223_v15  ;;  %v31260_v15 = vld [vmem:[#allocation23_spill] sm:$0xff] }
 0x60c   : > { %22270 = vmatmul.mubr.f32.gmra.mrb[24].mxu0 %v28379_v42 }
 0x60d   : > { %22272 = vmatprep.mubr.f32.mxu0 %v28384_v43 }
 0x60e   : > { %20917 = vmatmul.mubr.f32.gmra.mrb[22].mxu1 %v31224_v49  ;;  %v31261_v49 = vand.u32 4294901760, %v31239_v3  ;;  %v31273_v3 = vand.u32 4294901760, %v31244_v2  ;;  %v31288_v2 = vld [vmem:[#allocation82_spill] sm:$0xff] }
 0x60f   : > { %20919 = vmatprep.mubr.f32.mxu1 %v31225_v34  ;;  %v31263_v34 = vld [vmem:[#allocation22_spill] sm:$0xff] }
 0x610   : > { %22273 = vmatmul.mubr.f32.gmra.mrb[26].mxu0 %v28403_v5 }
 0x611   : > { %22275 = vmatprep.mubr.f32.mxu0 %v28409_v37 }
 0x612   : > { %20920 = vmatmul.mubr.f32.gmra.mrb[24].mxu1 %v31226_v21  ;;  %v31264_v21 = vld [vmem:[#allocation27_spill] sm:$0xff] }
 0x613   : > { %20922 = vmatprep.mubr.f32.mxu1 %v31227_v8  ;;  %v31266_v8 = vand.u32 4294901760, %v31242_v7  ;;  %v31274_v7 = vand.u32 4294901760, %v31245_v40  ;;  %v31289_v40 = vand.u32 4294901760, %v28274_v1  ;;  %v31297_v1 = vand.u32 4294901760, %v31255_v44 }
 0x614   : > { %22276 = vmatmul.mubr.f32.gmra.mrb[28].mxu0 %v28423_v48  ;;  %v31305_v44 = vand.u32 4294901760, %v28379_v42 }
 0x615   : > { %22278 = vmatprep.mubr.f32.mxu0 %v28432_v59 }
 0x616   : > { %20923 = vmatmul.mubr.f32.gmra.mrb[26].mxu1 %v31228_v23  ;;  %v31267_v23 = vld [vmem:[#allocation40_spill] sm:$0xff] }
 0x617   : > { %20925 = vmatprep.mubr.f32.mxu1 %v31229_v16  ;;  %v31269_v16 = vand.u32 4294901760, %v28138_v17  ;;  %v31277_v17 = vand.u32 4294901760, %v31246_v51  ;;  %v31290_v51 = vand.u32 4294901760, %v31252_v58  ;;  %v31298_v58 = vand.u32 4294901760, %v31256_v63 }
 0x618   : > { %22279 = vmatmul.mubr.f32.gmra.mrb[30].mxu0 %v28443_v12  ;;  %v31306_v63 = vand.u32 4294901760, %v28384_v43  ;;  %v31315_v43 = vand.u32 4294901760, %v28423_v48 }
 0x619   : > { %22283 = vmatprep.mubr.f32.mxu0 %v31257_v60  ;;  %v31296_v60 = vld [vmem:[#allocation98_spill] sm:$0xff] }
 0x61a   : > { %20926 = vmatmul.mubr.f32.gmra.mrb[28].mxu1 %v31231_v57  ;;  %v31262_v57 = vand.u32 4294901760, %v31240_v54  ;;  %v31281_v54 = vand.u32 4294901760, %v31248_v47  ;;  %v31292_v47 = vld [vmem:[#allocation90_spill] sm:$0xff] }
 0x61b   : > { %20928 = vmatprep.mubr.f32.mxu1 %v31232_v27  ;;  %v31270_v27 = vand.u32 4294901760, %v31243_v36  ;;  %v31287_v36 = vld [vmem:[#allocation81_spill] sm:$0xff] }
 0x61c   : > { %22284 = vmatmul.mubr.f32.vlgmr.msra.gmra.mrb[0].mxu0 %v31258_v31  ;;  %v31299_v31 = vld [vmem:[#allocation105_spill] sm:$0xff] }
 0x61d   : > { %22286 = vmatprep.mubr.f32.mxu0 %v31259_v9  ;;  %22332 = vmatpush3.msra.mxu0 %v31238_v41  ;;  %v31283_v41 = vld [vmem:[#allocation73_spill] sm:$0xff]  ;;  %v31300_v9 = vld [vmem:[#allocation106_spill] sm:$0xff] }
 0x61e   : > { %20929 = vmatmul.mubr.f32.gmra.mrb[30].mxu1 %v31237_v52  ;;  %22381 = vmatprep.subr.mxu0 %v31192_v6  ;;  %v31275_v52 = vld [vmem:[#allocation57_spill] sm:$0xff] }
 0x61f   : > { %20933 = vmatprep.mubr.f32.mxu1 %v31260_v15  ;;  %v31303_v15 = vld [vmem:[#allocation112_spill] sm:$0xff] }
 0x620   : > { %22287 = vmatmul.mubr.f32.gmra.mrb[2].mxu0 %v31261_v49  ;;  %v31304_v49 = vld [vmem:[#allocation113_spill] sm:$0xff] }
 0x621   : > { %22289 = vmatprep.mubr.f32.mxu0 %v31262_v57  ;;  %v31307_v57 = vld [vmem:[#allocation117_spill] sm:$0xff] }
 0x622   : > { %20934 = vmatmul.mubr.f32.vlgmr.msra.gmra.mrb[0].mxu1 %v31263_v34  ;;  %v31308_v34 = vld [vmem:[#allocation118_spill] sm:$0xff] }
 0x623   : > { %20982 = vmatpush3.msra.mxu1 %v28558_v20  ;;  %20936 = vmatprep.mubr.f32.mxu1 %v31264_v21  ;;  %v31282_v20 = vand.u32 4294901760, %v31249_v30  ;;  %v31293_v30 = vand.u32 4294901760, %v31253_v39  ;;  %v31301_v39 = vand.u32 4294901760, %v28346_v26  ;;  %v31309_v26 = vand.u32 4294901760, %v28403_v5  ;;  %v31311_v21 = vld [vmem:[#allocation120_spill] sm:$0xff]  ;;  %v31318_v5 = vld [vmem:[#allocation119_spill] sm:$0xff] }
 0x624   : > { %22290 = vmatmul.mubr.f32.gmra.mrb[4].mxu0 %v31265_v50  ;;  %21031 = vmatprep.subr.mxu1 %v31235_v45  ;;  %v31312_v50 = vld [vmem:[#allocation121_spill] sm:$0xff] }
 0x625   : > { %22292 = vmatprep.mubr.f32.mxu0 %v31266_v8  ;;  %v31313_v8 = vld [vmem:[#allocation116_spill] sm:$0xff] }
 0x626   : > { %20937 = vmatmul.mubr.f32.gmra.mrb[2].mxu1 %v31267_v23  ;;  %v31314_v42 = vand.u32 4294901760, %v31313_v8 }
 0x627   : > { %20939 = vmatprep.mubr.f32.mxu1 %v31268_v18  ;;  %v31316_v18 = vand.u32 4294901760, %v28432_v59  ;;  %v31323_v59 = vld [vmem:[#allocation5_spill] sm:$0xff] }
 0x628   : > { %22293 = vmatmul.mubr.f32.gmra.mrb[6].mxu0 %v31269_v16  ;;  %v8371_v23 = vsub.f32 %v31313_v8, %v31314_v42  ;;  %v31317_v16 = vld [vmem:[#allocation122_spill] sm:$0xff]  ;;  %v31365_v42 = vld [vmem:[#allocation85_spill] sm:$0xff] }
 0x629   : > { %22295 = vmatprep.mubr.f32.mxu0 %v31270_v27  ;;  %v31319_v27 = vand.u32 4294901760, %v31318_v5 }
 0x62a   : > { %20940 = vmatmul.mubr.f32.gmra.mrb[4].mxu1 %v31271_v25  ;;  %v31320_v25 = vld [vmem:[#allocation123_spill] sm:$0xff] }
 0x62b   : > { %20942 = vmatprep.mubr.f32.mxu1 %v31272_v61  ;;  %v8381_v37 = vsub.f32 %v31318_v5, %v31319_v27  ;;  %v8372_v61 = vand.u32 4294901760, %v8371_v23  ;;  %v31366_v23 = vld [vmem:[#allocation88_spill] sm:$0xff] }
 0x62c   : > { %22296 = vmatmul.mubr.f32.gmra.mrb[8].mxu0 %v31273_v3  ;;  %v31321_v3 = vand.u32 4294901760, %v28443_v12  ;;  %v31324_v12 = vld [vmem:[#allocation6_spill] sm:$0xff]  ;;  %v31370_v27 = vld [vmem:[#allocation96_spill] sm:$0xff] }
 0x62d   : > { %22298 = vmatprep.mubr.f32.mxu0 %v31274_v7  ;;  %v31322_v7 = vld [vmem:[#allocation124_spill] sm:$0xff]  ;;  %v8382_v48 = vand.u32 4294901760, %v8381_v37  ;;  %v31371_v37 = vld [vmem:[#allocation174_spill] sm:$0xff] }
 0x62e   : > { %20943 = vmatmul.mubr.f32.gmra.mrb[6].mxu1 %v31275_v52  ;;  %v31325_v52 = vld [vmem:[#allocation9_spill] sm:$0xff] }
 0x62f   : > { %20945 = vmatprep.mubr.f32.mxu1 %v31276_v22  ;;  %v31326_v22 = vld [vmem:[#allocation10_spill] sm:$0xff] }
 0x630   : > { %22299 = vmatmul.mubr.f32.gmra.mrb[10].mxu0 %v31277_v17  ;;  %v31328_v17 = vld [vmem:[#allocation168_spill] sm:$0xff] }
 0x631   : > { %22301 = vmatprep.mubr.f32.mxu0 %v31278_v0  ;;  %v31329_v0 = vld [vmem:[#allocation17_spill] sm:$0xff] }
 0x632   : > { %20946 = vmatmul.mubr.f32.gmra.mrb[8].mxu1 %v31279_v35  ;;  %v31330_v35 = vld [vmem:[#allocation24_spill] sm:$0xff] }
 0x633   : > { %20948 = vmatprep.mubr.f32.mxu1 %v31280_v13  ;;  %v31331_v13 = vld [vmem:[#allocation180_spill] sm:$0xff] }
 0x634   : > { %22302 = vmatmul.mubr.f32.gmra.mrb[12].mxu0 %v31281_v54  ;;  %v31333_v54 = vld [vmem:[#allocation26_spill] sm:$0xff] }
 0x635   : > { %22304 = vmatprep.mubr.f32.mxu0 %v31282_v20  ;;  %v31334_v20 = vld [vmem:[#allocation29_spill] sm:$0xff] }
 0x636   : > { %20949 = vmatmul.mubr.f32.gmra.mrb[10].mxu1 %v31283_v41  ;;  %v31335_v41 = vld [vmem:[#allocation198_spill] sm:$0xff] }
 0x637   : > { %20951 = vmatprep.mubr.f32.mxu1 %v31284_v14  ;;  %v31336_v14 = vld [vmem:[#allocation177_spill] sm:$0xff] }
 0x638   : > { %22305 = vmatmul.mubr.f32.gmra.mrb[14].mxu0 %v31285_v62  ;;  %v31337_v62 = vld [vmem:[#allocation33_spill] sm:$0xff] }
 0x639   : > { %22307 = vmatprep.mubr.f32.mxu0 %v31286_v32  ;;  %v31338_v32 = vld [vmem:[#allocation35_spill] sm:$0xff] }
 0x63a   : > { %20952 = vmatmul.mubr.f32.gmra.mrb[12].mxu1 %v31287_v36  ;;  %v31339_v36 = vld [vmem:[#allocation190_spill] sm:$0xff] }
 0x63b   : > { %20954 = vmatprep.mubr.f32.mxu1 %v31288_v2  ;;  %v31340_v2 = vld [vmem:[#allocation201_spill] sm:$0xff] }
 0x63c   : > { %22308 = vmatmul.mubr.f32.gmra.mrb[16].mxu0 %v31289_v40  ;;  %v31341_v40 = vld [vmem:[#allocation36_spill] sm:$0xff] }
 0x63d   : > { %22310 = vmatprep.mubr.f32.mxu0 %v31290_v51  ;;  %v31342_v51 = vld [vmem:[#allocation39_spill] sm:$0xff] }
 0x63e   : > { %20955 = vmatmul.mubr.f32.gmra.mrb[14].mxu1 %v31291_v46  ;;  %v31343_v46 = vld [vmem:[#allocation212_spill] sm:$0xff] }
 0x63f   : > { %20957 = vmatprep.mubr.f32.mxu1 %v31292_v47  ;;  %v31344_v47 = vld [vmem:[#allocation109_spill] sm:$0xff] }
 0x640   : > { %22311 = vmatmul.mubr.f32.gmra.mrb[18].mxu0 %v31293_v30  ;;  %v31345_v30 = vld [vmem:[#allocation46_spill] sm:$0xff] }
 0x641   : > { %22313 = vmatprep.mubr.f32.mxu0 %v31294_v29  ;;  %v31346_v29 = vld [vmem:[#allocation49_spill] sm:$0xff] }
 0x642   : > { %20958 = vmatmul.mubr.f32.gmra.mrb[16].mxu1 %v31295_v4  ;;  %v31347_v4 = vld [vmem:[#allocation215_spill] sm:$0xff] }
 0x643   : > { %20960 = vmatprep.mubr.f32.mxu1 %v31296_v60  ;;  %v31348_v60 = vld [vmem:[#allocation131_spill] sm:$0xff] }
 0x644   : > { %22314 = vmatmul.mubr.f32.gmra.mrb[20].mxu0 %v31297_v1  ;;  %v31349_v1 = vld [vmem:[#allocation55_spill] sm:$0xff] }
 0x645   : > { %22316 = vmatprep.mubr.f32.mxu0 %v31298_v58  ;;  %v31350_v58 = vld [vmem:[#allocation56_spill] sm:$0xff] }
 0x646   : > { %20961 = vmatmul.mubr.f32.gmra.mrb[18].mxu1 %v31299_v31  ;;  %v31351_v31 = vld [vmem:[#allocation83_spill] sm:$0xff] }
 0x647   : > { %20963 = vmatprep.mubr.f32.mxu1 %v31300_v9  ;;  %v31352_v9 = vld [vmem:[#allocation99_spill] sm:$0xff] }
 0x648   : > { %22317 = vmatmul.mubr.f32.gmra.mrb[22].mxu0 %v31301_v39  ;;  %v31353_v39 = vld [vmem:[#allocation61_spill] sm:$0xff] }
 0x649   : > { %22319 = vmatprep.mubr.f32.mxu0 %v31302_v33  ;;  %v31354_v33 = vld [vmem:[#allocation64_spill] sm:$0xff] }
 0x64a   : > { %20964 = vmatmul.mubr.f32.gmra.mrb[20].mxu1 %v31303_v15  ;;  %v31355_v15 = vld [vmem:[#allocation43_spill] sm:$0xff] }
 0x64b   : > { %20966 = vmatprep.mubr.f32.mxu1 %v31304_v49  ;;  %v31356_v49 = vld [vmem:[#allocation173_spill] sm:$0xff] }
 0x64c   : > { %22320 = vmatmul.mubr.f32.gmra.mrb[24].mxu0 %v31305_v44  ;;  %v31357_v44 = vld [vmem:[#allocation69_spill] sm:$0xff] }
 0x64d   : > { %22322 = vmatprep.mubr.f32.mxu0 %v31306_v63  ;;  %v31358_v63 = vld [vmem:[#allocation72_spill] sm:$0xff] }
 0x64e   : > { %20967 = vmatmul.mubr.f32.gmra.mrb[22].mxu1 %v31307_v57  ;;  %v31359_v57 = vld [vmem:[#allocation228_spill] sm:$0xff] }
 0x64f   : > { %20969 = vmatprep.mubr.f32.mxu1 %v31308_v34  ;;  %v31360_v34 = vld [vmem:[#allocation140_spill] sm:$0xff] }
 0x650   : > { %22323 = vmatmul.mubr.f32.gmra.mrb[26].mxu0 %v31309_v26  ;;  %v31361_v26 = vld [vmem:[#allocation77_spill] sm:$0xff] }
 0x651   : > { %22325 = vmatprep.mubr.f32.mxu0 %v31310_v28  ;;  %v31362_v28 = vld [vmem:[#allocation80_spill] sm:$0xff] }
 0x652   : > { %20970 = vmatmul.mubr.f32.gmra.mrb[24].mxu1 %v31311_v21  ;;  %v31363_v21 = vld [vmem:[#allocation133_spill] sm:$0xff] }
 0x653   : > { %20972 = vmatprep.mubr.f32.mxu1 %v31312_v50  ;;  %v31364_v50 = vld [vmem:[#allocation12_spill] sm:$0xff] }
 0x654   : > { %22326 = vmatmul.mubr.f32.gmra.mrb[28].mxu0 %v31315_v43  ;;  %v31367_v43 = vld [vmem:[#allocation166_spill] sm:$0xff] }
 0x655   : > { %22328 = vmatprep.mubr.f32.mxu0 %v31316_v18  ;;  %v31368_v18 = vld [vmem:[#allocation172_spill] sm:$0xff] }
 0x656   : > { %20973 = vmatmul.mubr.f32.gmra.mrb[26].mxu1 %v31317_v16  ;;  %v31369_v16 = vld [vmem:[#allocation93_spill] sm:$0xff] }
 0x657   : > { %20975 = vmatprep.mubr.f32.mxu1 %v31320_v25  ;;  %v31372_v25 = vld [vmem:[#allocation175_spill] sm:$0xff] }
 0x658   : > { %22329 = vmatmul.mubr.f32.gmra.mrb[30].mxu0 %v31321_v3  ;;  %v31374_v3 = vld [vmem:[#allocation104_spill] sm:$0xff] }
 0x659   : > { %22333 = vmatprep.mubr.f32.mxu0 %v28042_v19 }
 0x65a   : > { %20976 = vmatmul.mubr.f32.gmra.mrb[28].mxu1 %v31322_v7  ;;  %v31375_v7 = vld [vmem:[#allocation127_spill] sm:$0xff] }
 0x65b   : > { %20978 = vmatprep.mubr.f32.mxu1 %v8372_v61  ;;  %v31373_v61 = vld [vmem:[#allocation101_spill] sm:$0xff] }
 0x65c   : > { %22334 = vmatmul.mubr.f32.vlgmr.msra.gmra.mrb[0].mxu0 %v28051_v55 }
 0x65d   : > { %22336 = vmatprep.mubr.f32.mxu0 %v31190_v10  ;;  %22382 = vmatpush3.msra.mxu0 %v31192_v6  ;;  %v31327_v6 = vld [vmem:[#allocation11_spill] sm:$0xff] }
 0x65e   : > { %20979 = vmatmul.mubr.f32.gmra.mrb[30].mxu1 %v8382_v48  ;;  %v31376_v48 = vld [vmem:[#allocation108_spill] sm:$0xff] }
 0x65f   : > { %20983 = vmatprep.mubr.f32.mxu1 %v31323_v59  ;;  %v31377_v59 = vld [vmem:[#allocation111_spill] sm:$0xff] }
 0x660   : > { %22337 = vmatmul.mubr.f32.gmra.mrb[2].mxu0 %v31194_v24 }
 0x661   : > { %22339 = vmatprep.mubr.f32.mxu0 %v31195_v11 }
 0x662   : > { %20984 = vmatmul.mubr.f32.vlgmr.msra.gmra.mrb[0].mxu1 %v31324_v12  ;;  %v31378_v12 = vld [vmem:[#allocation115_spill] sm:$0xff] }
 0x663   : > { %21032 = vmatpush3.msra.mxu1 %v31235_v45  ;;  %20986 = vmatprep.mubr.f32.mxu1 %v31325_v52  ;;  %v31332_v45 = vld [vmem:[#allocation188_spill] sm:$0xff]  ;;  %v31379_v52 = vld [vmem:[#allocation7_spill] sm:$0xff] }
 0x664   : > { %22340 = vmatmul.mubr.f32.gmra.mrb[4].mxu0 %v31198_v38 }
 0x665   : > { %22342 = vmatprep.mubr.f32.mxu0 %v31200_v53 }
 0x666   : > { %20987 = vmatmul.mubr.f32.gmra.mrb[2].mxu1 %v31326_v22  ;;  %v31380_v22 = vld [vmem:[#allocation8_spill] sm:$0xff] }
 0x667   : > { %20989 = vmatprep.mubr.f32.mxu1 %v31327_v6  ;;  %v31381_v6 = vld [vmem:[#allocation14_spill] sm:$0xff] }
 0x668   : > { %22343 = vmatmul.mubr.f32.gmra.mrb[6].mxu0 %v28112_v56 }
 0x669   : > { %22345 = vmatprep.mubr.f32.mxu0 %v31328_v17 }
 0x66a   : > { %20990 = vmatmul.mubr.f32.gmra.mrb[4].mxu1 %v31329_v0  ;;  %v31391_v0 = vld [vmem:[#allocation45_spill] sm:$0xff] }
 0x66b   : > { %20992 = vmatprep.mubr.f32.mxu1 %v31330_v35  ;;  %v31392_v35 = vld [vmem:[#allocation53_spill] sm:$0xff] }
 0x66c   : > { %22346 = vmatmul.mubr.f32.gmra.mrb[8].mxu0 %v31331_v13 }
 0x66d   : > { %22348 = vmatprep.mubr.f32.mxu0 %v31332_v45 }
 0x66e   : > { %20993 = vmatmul.mubr.f32.gmra.mrb[6].mxu1 %v31333_v54  ;;  %v31395_v54 = vld [vmem:[#allocation63_spill] sm:$0xff] }
 0x66f   : > { %20995 = vmatprep.mubr.f32.mxu1 %v31334_v20  ;;  %v31396_v20 = vld [vmem:[#allocation68_spill] sm:$0xff] }
 0x670   : > { %22349 = vmatmul.mubr.f32.gmra.mrb[10].mxu0 %v31335_v41 }
 0x671   : > { %22351 = vmatprep.mubr.f32.mxu0 %v31336_v14 }
 0x672   : > { %20996 = vmatmul.mubr.f32.gmra.mrb[8].mxu1 %v31337_v62  ;;  %v31399_v62 = vld [vmem:[#allocation79_spill] sm:$0xff] }
 0x673   : > { %20998 = vmatprep.mubr.f32.mxu1 %v31338_v32  ;;  %v31400_v32 = vld [vmem:[#allocation84_spill] sm:$0xff] }
 0x674   : > { %22352 = vmatmul.mubr.f32.gmra.mrb[12].mxu0 %v31339_v36 }
 0x675   : > { %22354 = vmatprep.mubr.f32.mxu0 %v31340_v2 }
 0x676   : > { %20999 = vmatmul.mubr.f32.gmra.mrb[10].mxu1 %v31341_v40  ;;  %v31403_v40 = vld [vmem:[#allocation95_spill] sm:$0xff] }
 0x677   : > { %21001 = vmatprep.mubr.f32.mxu1 %v31342_v51  ;;  %v31404_v51 = vld [vmem:[#allocation100_spill] sm:$0xff] }
 0x678   : > { %22355 = vmatmul.mubr.f32.gmra.mrb[14].mxu0 %v31343_v46 }
 0x679   : > { %22357 = vmatprep.mubr.f32.mxu0 %v31344_v47 }
 0x67a   : > { %21002 = vmatmul.mubr.f32.gmra.mrb[12].mxu1 %v31345_v30  ;;  %v31407_v30 = vld [vmem:[#allocation110_spill] sm:$0xff] }
 0x67b   : > { %21004 = vmatprep.mubr.f32.mxu1 %v31346_v29  ;;  %v31408_v29 = vld [vmem:[#allocation114_spill] sm:$0xff] }
 0x67c   : > { %22358 = vmatmul.mubr.f32.gmra.mrb[16].mxu0 %v31347_v4 }
 0x67d   : > { %22360 = vmatprep.mubr.f32.mxu0 %v31348_v60 }
 0x67e   : > { %21005 = vmatmul.mubr.f32.gmra.mrb[14].mxu1 %v31349_v1 }
 0x67f   : > { %21007 = vmatprep.mubr.f32.mxu1 %v31350_v58 }
 0x680   : > { %22361 = vmatmul.mubr.f32.gmra.mrb[18].mxu0 %v31351_v31 }
 0x681   : > { %22363 = vmatprep.mubr.f32.mxu0 %v31352_v9 }
 0x682   : > { %21008 = vmatmul.mubr.f32.gmra.mrb[16].mxu1 %v31353_v39 }
 0x683   : > { %21010 = vmatprep.mubr.f32.mxu1 %v31354_v33 }
 0x684   : > { %22364 = vmatmul.mubr.f32.gmra.mrb[20].mxu0 %v31355_v15 }
 0x685   : > { %22366 = vmatprep.mubr.f32.mxu0 %v31356_v49 }
 0x686   : > { %21011 = vmatmul.mubr.f32.gmra.mrb[18].mxu1 %v31357_v44 }
 0x687   : > { %21013 = vmatprep.mubr.f32.mxu1 %v31358_v63 }
 0x688   : > { %22367 = vmatmul.mubr.f32.gmra.mrb[22].mxu0 %v31359_v57 }
 0x689   : > { %22369 = vmatprep.mubr.f32.mxu0 %v31360_v34 }
 0x68a   : > { %21014 = vmatmul.mubr.f32.gmra.mrb[20].mxu1 %v31361_v26 }
 0x68b   : > { %21016 = vmatprep.mubr.f32.mxu1 %v31362_v28 }
 0x68c   : > { %22370 = vmatmul.mubr.f32.gmra.mrb[24].mxu0 %v31363_v21 }
 0x68d   : > { %22372 = vmatprep.mubr.f32.mxu0 %v31364_v50 }
 0x68e   : > { %21017 = vmatmul.mubr.f32.gmra.mrb[22].mxu1 %v31365_v42 }
 0x68f   : > { %21019 = vmatprep.mubr.f32.mxu1 %v31366_v23 }
 0x690   : > { %22373 = vmatmul.mubr.f32.gmra.mrb[26].mxu0 %v31367_v43 }
 0x691   : > { %22375 = vmatprep.mubr.f32.mxu0 %v31368_v18 }
 0x692   : > { %21020 = vmatmul.mubr.f32.gmra.mrb[24].mxu1 %v31369_v16 }
 0x693   : > { %21022 = vmatprep.mubr.f32.mxu1 %v31370_v27 }
 0x694   : > { %22376 = vmatmul.mubr.f32.gmra.mrb[28].mxu0 %v31371_v37 }
 0x695   : > { %22378 = vmatprep.mubr.f32.mxu0 %v31372_v25 }
 0x696   : > { %21023 = vmatmul.mubr.f32.gmra.mrb[26].mxu1 %v31373_v61 }
 0x697   : > { %21025 = vmatprep.mubr.f32.mxu1 %v31374_v3 }
 0x698   : > { %22379 = vmatmul.mubr.f32.gmra.mrb[30].mxu0 %v31375_v7 }
 0x699   : > { %22383 = vmatprep.mubr.f32.mxu0 %v28042_v19  ;;  %v31382_v19 = vld [vmem:[#allocation15_spill] sm:$0xff] }
 0x69a   : > { %21026 = vmatmul.mubr.f32.gmra.mrb[28].mxu1 %v31376_v48 }
 0x69b   : > { %21028 = vmatprep.mubr.f32.mxu1 %v31377_v59 }
 0x69c   : > { %22384 = vmatmul.mubr.f32.vlgmr.msra.gmra.mrb[0].mxu0 %v28051_v55  ;;  %v31383_v55 = vld [vmem:[#allocation16_spill] sm:$0xff] }
 0x69d   : > { %22386 = vmatprep.mubr.f32.mxu0 %v31190_v10  ;;  %v31384_v10 = vld [vmem:[#allocation20_spill] sm:$0xff] }
 0x69e   : > { %21029 = vmatmul.mubr.f32.gmra.mrb[30].mxu1 %v31378_v12 }
 0x69f   : > { %21033 = vmatprep.mubr.f32.mxu1 %v31379_v52 }
 0x6a0   : > { %22387 = vmatmul.mubr.f32.gmra.mrb[2].mxu0 %v31194_v24  ;;  %v31385_v24 = vld [vmem:[#allocation28_spill] sm:$0xff] }
 0x6a1   : > { %22389 = vmatprep.mubr.f32.mxu0 %v31195_v11  ;;  %v31386_v11 = vld [vmem:[#allocation30_spill] sm:$0xff] }
 0x6a2   : > { %21034 = vmatmul.mubr.f32.vlgmr.msra.gmra.mrb[0].mxu1 %v31380_v22 }
 0x6a3   : > { %21036 = vmatprep.mubr.f32.mxu1 %v31381_v6 }
 0x6a4   : > { %22390 = vmatmul.mubr.f32.gmra.mrb[4].mxu0 %v31198_v38  ;;  %v31387_v38 = vld [vmem:[#allocation32_spill] sm:$0xff] }
 0x6a5   : > { %22392 = vmatprep.mubr.f32.mxu0 %v31200_v53  ;;  %v31388_v53 = vld [vmem:[#allocation38_spill] sm:$0xff] }
 0x6a6   : > { %21037 = vmatmul.mubr.f32.gmra.mrb[2].mxu1 %v31382_v19 }
 0x6a7   : > { %21039 = vmatprep.mubr.f32.mxu1 %v31383_v55 }
 0x6a8   : > { %22393 = vmatmul.mubr.f32.gmra.mrb[6].mxu0 %v28112_v56  ;;  %v31389_v56 = vld [vmem:[#allocation41_spill] sm:$0xff] }
 0x6a9   : > { %22395 = vmatprep.mubr.f32.mxu0 %v31328_v17  ;;  %v31390_v17 = vld [vmem:[#allocation44_spill] sm:$0xff] }
 0x6aa   : > { %21040 = vmatmul.mubr.f32.gmra.mrb[4].mxu1 %v31384_v10 }
 0x6ab   : > { %21042 = vmatprep.mubr.f32.mxu1 %v31385_v24 }
 0x6ac   : > { %22396 = vmatmul.mubr.f32.gmra.mrb[8].mxu0 %v31331_v13  ;;  %v31393_v13 = vld [vmem:[#allocation54_spill] sm:$0xff] }
 0x6ad   : > { %22398 = vmatprep.mubr.f32.mxu0 %v31332_v45  ;;  %v31394_v45 = vld [vmem:[#allocation60_spill] sm:$0xff] }
 0x6ae   : > { %21043 = vmatmul.mubr.f32.gmra.mrb[6].mxu1 %v31386_v11 }
 0x6af   : > { %21045 = vmatprep.mubr.f32.mxu1 %v31387_v38 }
 0x6b0   : > { %22399 = vmatmul.mubr.f32.gmra.mrb[10].mxu0 %v31335_v41  ;;  %v31397_v41 = vld [vmem:[#allocation71_spill] sm:$0xff] }
 0x6b1   : > { %22401 = vmatprep.mubr.f32.mxu0 %v31336_v14  ;;  %v31398_v14 = vld [vmem:[#allocation76_spill] sm:$0xff] }
 0x6b2   : > { %21046 = vmatmul.mubr.f32.gmra.mrb[8].mxu1 %v31388_v53 }
 0x6b3   : > { %21048 = vmatprep.mubr.f32.mxu1 %v31389_v56 }
 0x6b4   : > { %22402 = vmatmul.mubr.f32.gmra.mrb[12].mxu0 %v31339_v36  ;;  %v31401_v36 = vld [vmem:[#allocation87_spill] sm:$0xff] }
 0x6b5   : > { %22404 = vmatprep.mubr.f32.mxu0 %v31340_v2  ;;  %v31402_v2 = vld [vmem:[#allocation92_spill] sm:$0xff] }
 0x6b6   : > { %21049 = vmatmul.mubr.f32.gmra.mrb[10].mxu1 %v31390_v17 }
 0x6b7   : > { %21051 = vmatprep.mubr.f32.mxu1 %v31391_v0 }
 0x6b8   : > { %22405 = vmatmul.mubr.f32.gmra.mrb[14].mxu0 %v31343_v46  ;;  %v31405_v46 = vld [vmem:[#allocation103_spill] sm:$0xff] }
 0x6b9   : > { %22407 = vmatprep.mubr.f32.mxu0 %v31344_v47  ;;  %v31406_v47 = vld [vmem:[#allocation107_spill] sm:$0xff] }
 0x6ba   : > { %21052 = vmatmul.mubr.f32.gmra.mrb[12].mxu1 %v31392_v35 }
 0x6bb   : > { %21054 = vmatprep.mubr.f32.mxu1 %v31393_v13 }
 0x6bc   : > { %22408 = vmatmul.mubr.f32.gmra.mrb[16].mxu0 %v31347_v4 }
 0x6bd   : > { %22410 = vmatprep.mubr.f32.mxu0 %v31348_v60 }
 0x6be   : > { %21055 = vmatmul.mubr.f32.gmra.mrb[14].mxu1 %v31394_v45 }
 0x6bf   : > { %21057 = vmatprep.mubr.f32.mxu1 %v31395_v54 }
 0x6c0   : > { %22411 = vmatmul.mubr.f32.gmra.mrb[18].mxu0 %v31351_v31 }
 0x6c1   : > { %22413 = vmatprep.mubr.f32.mxu0 %v31352_v9  ;;  %v28858_v9 = vld [vmem:[%s28967_s2] ss:$0 sm:$0xff] }
 0x6c2   : > { %21058 = vmatmul.mubr.f32.gmra.mrb[16].mxu1 %v31396_v20 }
 0x6c3   : > { %21060 = vmatprep.mubr.f32.mxu1 %v31397_v41 }
 0x6c4   : > { %22414 = vmatmul.mubr.f32.gmra.mrb[20].mxu0 %v31355_v15 }
 0x6c5   : > { %22416 = vmatprep.mubr.f32.mxu0 %v31356_v49 }
 0x6c6   : > { %21061 = vmatmul.mubr.f32.gmra.mrb[18].mxu1 %v31398_v14 }
 0x6c7   : > { %21063 = vmatprep.mubr.f32.mxu1 %v31399_v62 }
 0x6c8   : > { %22417 = vmatmul.mubr.f32.gmra.mrb[22].mxu0 %v31359_v57 }
 0x6c9   : > { %22419 = vmatprep.mubr.f32.mxu0 %v31360_v34 }
 0x6ca   : > { %21064 = vmatmul.mubr.f32.gmra.mrb[20].mxu1 %v31400_v32 }
 0x6cb   : > { %21066 = vmatprep.mubr.f32.mxu1 %v31401_v36 }
 0x6cc   : > { %22420 = vmatmul.mubr.f32.gmra.mrb[24].mxu0 %v31363_v21 }
 0x6cd   : > { %22422 = vmatprep.mubr.f32.mxu0 %v31364_v50 }
 0x6ce   : > { %21067 = vmatmul.mubr.f32.gmra.mrb[22].mxu1 %v31402_v2 }
 0x6cf   : > { %21069 = vmatprep.mubr.f32.mxu1 %v31403_v40 }
 0x6d0   : > { %22423 = vmatmul.mubr.f32.gmra.mrb[26].mxu0 %v31367_v43 }
 0x6d1   : > { %22425 = vmatprep.mubr.f32.mxu0 %v31368_v18 }
 0x6d2   : > { %21070 = vmatmul.mubr.f32.gmra.mrb[24].mxu1 %v31404_v51 }
 0x6d3   : > { %21072 = vmatprep.mubr.f32.mxu1 %v31405_v46 }
 0x6d4   : > { %22426 = vmatmul.mubr.f32.gmra.mrb[28].mxu0 %v31371_v37 }
 0x6d5   : > { %22428 = vmatprep.mubr.f32.mxu0 %v31372_v25 }
 0x6d6   : > { %21073 = vmatmul.mubr.f32.gmra.mrb[26].mxu1 %v31406_v47 }
 0x6d7   : > { %21075 = vmatprep.mubr.f32.mxu1 %v31407_v30 }
 0x6d8   : > { %22429 = vmatmul.mubr.f32.gmra.mrb[30].mxu0 %v31375_v7 }
 0x6da   : > { %21076 = vmatmul.mubr.f32.gmra.mrb[28].mxu1 %v31408_v29 }
 0x6db   : > { %21078 = vmatprep.mubr.f32.mxu1 %v31313_v8 }
 0x6de   : > { %21079 = vmatmul.mubr.f32.gmra.mrb[30].mxu1 %v31318_v5 }
 0x76f   : > { %v22385_v4 = vpop.f32.mrb[0].mxu0 }
 0x770   : > { %v17356_v60 = vpop.f32.mrb[1].mxu0 }
 0x773   : > { %v22388_v1 = vpop.f32.mrb[2].mxu0 }
 0x774   : > { %v17368_v58 = vpop.f32.mrb[3].mxu0 }
 0x775   : > { %v21035_v31 = vpop.f32.mrb[0].mxu1 }
 0x776   : > { %v22431_v39 = vadd.f32 %v22385_v4, %v21035_v31  ;;  %v8720_v33 = vpop.f32.mrb[1].mxu1 }
 0x777   : > { %v22432_v15 = vadd.f32 %v17356_v60, %v8720_v33  ;;  %v22391_v49 = vpop.f32.mrb[4].mxu0 }
 0x778   : > { %v17586_v44 = vadd.f32 %v22431_v39, %v28858_v9  ;;  %v17380_v8 = vpop.f32.mrb[5].mxu0 }
 0x779   : > { %v17585_v5 = vadd.f32 %v22432_v15, %v28858_v9  ;;  %v21038_v63 = vpop.f32.mrb[2].mxu1 }
 0x77a   : > { %v17618_v57 = vmax.f32 %v17586_v44, 0.0  ;;  %v22433_v34 = vadd.f32 %v22388_v1, %v21038_v63  ;;  %v8734_v26 = vpop.f32.mrb[3].mxu1 }
 0x77b   : > { %v17617_v28 = vmax.f32 %v17585_v5, 0.0  ;;  %v22434_v21 = vadd.f32 %v17368_v58, %v8734_v26  ;;  %v22394_v50 = vpop.f32.mrb[6].mxu0 }
 0x77c   : > { %17651 = vst.msk [vmem:[%s28865_s16 + $0x8] sm:$0xff] %vm17649_vm1, %v17618_v57  ;;  %v17588_v42 = vadd.f32 %v22433_v34, %v28858_v9  ;;  %v17392_v23 = vpop.f32.mrb[7].mxu0 }
 0x77d   : > { %17650 = vst.msk [vmem:[%s28865_s16] sm:$0xff] %vm17649_vm1, %v17617_v28  ;;  %v17587_v43 = vadd.f32 %v22434_v21, %v28858_v9  ;;  %v21041_v18 = vpop.f32.mrb[4].mxu1 }
 0x77e   : > { %v17620_v16 = vmax.f32 %v17588_v42, 0.0  ;;  %v22435_v27 = vadd.f32 %v22391_v49, %v21041_v18  ;;  %v8748_v37 = vpop.f32.mrb[5].mxu1 }
 0x77f   : > { %v17619_v25 = vmax.f32 %v17587_v43, 0.0  ;;  %v22436_v61 = vadd.f32 %v17380_v8, %v8748_v37  ;;  %v22397_v3 = vpop.f32.mrb[8].mxu0 }
 0x780   : > { %17653 = vst.msk [vmem:[%s28865_s16 + $0x18] sm:$0xff] %vm17649_vm1, %v17620_v16  ;;  %v17590_v7 = vadd.f32 %v22435_v27, %v28858_v9  ;;  %v17404_v48 = vpop.f32.mrb[9].mxu0 }
 0x781   : > { %17652 = vst.msk [vmem:[%s28865_s16 + $0x10] sm:$0xff] %vm17649_vm1, %v17619_v25  ;;  %v17589_v59 = vadd.f32 %v22436_v61, %v28858_v9  ;;  %v21044_v12 = vpop.f32.mrb[6].mxu1 }
 0x782   : > { %v17622_v52 = vmax.f32 %v17590_v7, 0.0  ;;  %v22437_v22 = vadd.f32 %v22394_v50, %v21044_v12  ;;  %v8762_v6 = vpop.f32.mrb[7].mxu1 }
 0x783   : > { %v17621_v19 = vmax.f32 %v17589_v59, 0.0  ;;  %v22438_v55 = vadd.f32 %v17392_v23, %v8762_v6  ;;  %v22400_v10 = vpop.f32.mrb[10].mxu0 }
 0x784   : > { %17655 = vst.msk [vmem:[%s28865_s16 + $0x28] sm:$0xff] %vm17649_vm1, %v17622_v52  ;;  %v17592_v24 = vadd.f32 %v22437_v22, %v28858_v9  ;;  %v17416_v11 = vpop.f32.mrb[11].mxu0 }
 0x785   : > { %17654 = vst.msk [vmem:[%s28865_s16 + $0x20] sm:$0xff] %vm17649_vm1, %v17621_v19  ;;  %v17591_v38 = vadd.f32 %v22438_v55, %v28858_v9  ;;  %v21047_v53 = vpop.f32.mrb[8].mxu1 }
 0x786   : > { %v17624_v56 = vmax.f32 %v17592_v24, 0.0  ;;  %v22439_v17 = vadd.f32 %v22397_v3, %v21047_v53  ;;  %v8776_v0 = vpop.f32.mrb[9].mxu1 }
 0x787   : > { %v17623_v35 = vmax.f32 %v17591_v38, 0.0  ;;  %v22440_v13 = vadd.f32 %v17404_v48, %v8776_v0  ;;  %v22403_v45 = vpop.f32.mrb[12].mxu0 }
 0x788   : > { %17657 = vst.msk [vmem:[%s28865_s16 + $0x38] sm:$0xff] %vm17649_vm1, %v17624_v56  ;;  %v17594_v54 = vadd.f32 %v22439_v17, %v28858_v9  ;;  %v17428_v20 = vpop.f32.mrb[13].mxu0 }
 0x789   : > { %17656 = vst.msk [vmem:[%s28865_s16 + $0x30] sm:$0xff] %vm17649_vm1, %v17623_v35  ;;  %v17593_v41 = vadd.f32 %v22440_v13, %v28858_v9  ;;  %v21050_v14 = vpop.f32.mrb[10].mxu1 }
 0x78a   : > { %v17626_v62 = vmax.f32 %v17594_v54, 0.0  ;;  %v22441_v32 = vadd.f32 %v22400_v10, %v21050_v14  ;;  %v8790_v36 = vpop.f32.mrb[11].mxu1 }
 0x78b   : > { %v17625_v2 = vmax.f32 %v17593_v41, 0.0  ;;  %v22442_v40 = vadd.f32 %v17416_v11, %v8790_v36  ;;  %v22406_v51 = vpop.f32.mrb[14].mxu0 }
 0x78c   : > { %17659 = vst.msk [vmem:[%s28865_s16 + $0x48] sm:$0xff] %vm17649_vm1, %v17626_v62  ;;  %v17596_v46 = vadd.f32 %v22441_v32, %v28858_v9  ;;  %v17440_v47 = vpop.f32.mrb[15].mxu0 }
 0x78d   : > { %17658 = vst.msk [vmem:[%s28865_s16 + $0x40] sm:$0xff] %vm17649_vm1, %v17625_v2  ;;  %v17595_v30 = vadd.f32 %v22442_v40, %v28858_v9  ;;  %v21053_v29 = vpop.f32.mrb[12].mxu1 }
 0x78e   : > { %v17628_v4 = vmax.f32 %v17596_v46, 0.0  ;;  %v22443_v60 = vadd.f32 %v22403_v45, %v21053_v29  ;;  %v8804_v1 = vpop.f32.mrb[13].mxu1 }
 0x78f   : > { %v17627_v58 = vmax.f32 %v17595_v30, 0.0  ;;  %v22444_v31 = vadd.f32 %v17428_v20, %v8804_v1  ;;  %v22409_v39 = vpop.f32.mrb[16].mxu0 }
 0x790   : > { %17661 = vst.msk [vmem:[%s28865_s16 + $0x58] sm:$0xff] %vm17649_vm1, %v17628_v4  ;;  %v17598_v33 = vadd.f32 %v22443_v60, %v28858_v9  ;;  %v17452_v15 = vpop.f32.mrb[17].mxu0 }
 0x791   : > { %17660 = vst.msk [vmem:[%s28865_s16 + $0x50] sm:$0xff] %vm17649_vm1, %v17627_v58  ;;  %v17597_v49 = vadd.f32 %v22444_v31, %v28858_v9  ;;  %v21056_v44 = vpop.f32.mrb[14].mxu1 }
 0x792   : > { %v17630_v8 = vmax.f32 %v17598_v33, 0.0  ;;  %v22445_v5 = vadd.f32 %v22406_v51, %v21056_v44  ;;  %v8818_v63 = vpop.f32.mrb[15].mxu1 }
 0x793   : > { %v17629_v57 = vmax.f32 %v17597_v49, 0.0  ;;  %v22446_v34 = vadd.f32 %v17440_v47, %v8818_v63  ;;  %v22412_v26 = vpop.f32.mrb[18].mxu0 }
 0x794   : > { %17663 = vst.msk [vmem:[%s28865_s16 + $0x68] sm:$0xff] %vm17649_vm1, %v17630_v8  ;;  %v17600_v28 = vadd.f32 %v22445_v5, %v28858_v9  ;;  %v17464_v21 = vpop.f32.mrb[19].mxu0 }
 0x795   : > { %17662 = vst.msk [vmem:[%s28865_s16 + $0x60] sm:$0xff] %vm17649_vm1, %v17629_v57  ;;  %v17599_v50 = vadd.f32 %v22446_v34, %v28858_v9  ;;  %v21059_v42 = vpop.f32.mrb[16].mxu1 }
 0x796   : > { %v17632_v23 = vmax.f32 %v17600_v28, 0.0  ;;  %v22447_v43 = vadd.f32 %v22409_v39, %v21059_v42  ;;  %v8832_v18 = vpop.f32.mrb[17].mxu1 }
 0x797   : > { %v17631_v16 = vmax.f32 %v17599_v50, 0.0  ;;  %v22448_v27 = vadd.f32 %v17452_v15, %v8832_v18  ;;  %v22415_v37 = vpop.f32.mrb[20].mxu0 }
 0x798   : > { %17665 = vst.msk [vmem:[%s28865_s16 + $0x78] sm:$0xff] %vm17649_vm1, %v17632_v23  ;;  %v17602_v25 = vadd.f32 %v22447_v43, %v28858_v9  ;;  %v17476_v61 = vpop.f32.mrb[21].mxu0 }
 0x799   : > { %17664 = vst.msk [vmem:[%s28865_s16 + $0x70] sm:$0xff] %vm17649_vm1, %v17631_v16  ;;  %v17601_v3 = vadd.f32 %v22448_v27, %v28858_v9  ;;  %v21062_v7 = vpop.f32.mrb[18].mxu1 }
 0x79a   : > { %v17634_v48 = vmax.f32 %v17602_v25, 0.0  ;;  %v22449_v59 = vadd.f32 %v22412_v26, %v21062_v7  ;;  %v8846_v12 = vpop.f32.mrb[19].mxu1 }
 0x79b   : > { %v17633_v52 = vmax.f32 %v17601_v3, 0.0  ;;  %v22450_v22 = vadd.f32 %v17464_v21, %v8846_v12  ;;  %v22418_v6 = vpop.f32.mrb[22].mxu0 }
 0x79c   : > { %17667 = vst.msk [vmem:[%s28865_s16 + $0x88] sm:$0xff] %vm17649_vm1, %v17634_v48  ;;  %v17604_v19 = vadd.f32 %v22449_v59, %v28858_v9  ;;  %v17488_v55 = vpop.f32.mrb[23].mxu0 }
 0x79d   : > { %17666 = vst.msk [vmem:[%s28865_s16 + $0x80] sm:$0xff] %vm17649_vm1, %v17633_v52  ;;  %v17603_v10 = vadd.f32 %v22450_v22, %v28858_v9  ;;  %v21065_v24 = vpop.f32.mrb[20].mxu1 }
 0x79e   : > { %v17636_v11 = vmax.f32 %v17604_v19, 0.0  ;;  %v22451_v38 = vadd.f32 %v22415_v37, %v21065_v24  ;;  %v8860_v53 = vpop.f32.mrb[21].mxu1 }
 0x79f   : > { %v17635_v56 = vmax.f32 %v17603_v10, 0.0  ;;  %v22452_v17 = vadd.f32 %v17476_v61, %v8860_v53  ;;  %v22421_v0 = vpop.f32.mrb[24].mxu0 }
 0x7a0   : > { %17669 = vst.msk [vmem:[%s28865_s16 + $0x98] sm:$0xff] %vm17649_vm1, %v17636_v11  ;;  %v17606_v35 = vadd.f32 %v22451_v38, %v28858_v9  ;;  %v17500_v13 = vpop.f32.mrb[25].mxu0 }
 0x7a1   : > { %17668 = vst.msk [vmem:[%s28865_s16 + $0x90] sm:$0xff] %vm17649_vm1, %v17635_v56  ;;  %v17605_v45 = vadd.f32 %v22452_v17, %v28858_v9  ;;  %v21068_v54 = vpop.f32.mrb[22].mxu1 }
 0x7a2   : > { %v17638_v20 = vmax.f32 %v17606_v35, 0.0  ;;  %v22453_v41 = vadd.f32 %v22418_v6, %v21068_v54  ;;  %v8874_v14 = vpop.f32.mrb[23].mxu1 }
 0x7a3   : > { %v17637_v62 = vmax.f32 %v17605_v45, 0.0  ;;  %v22454_v32 = vadd.f32 %v17488_v55, %v8874_v14  ;;  %v22424_v36 = vpop.f32.mrb[26].mxu0 }
 0x7a4   : > { %17671 = vst.msk [vmem:[%s28865_s16 + $0xa8] sm:$0xff] %vm17649_vm1, %v17638_v20  ;;  %v17608_v2 = vadd.f32 %v22453_v41, %v28858_v9  ;;  %v17512_v40 = vpop.f32.mrb[27].mxu0 }
 0x7a5   : > { %17670 = vst.msk [vmem:[%s28865_s16 + $0xa0] sm:$0xff] %vm17649_vm1, %v17637_v62  ;;  %v17607_v51 = vadd.f32 %v22454_v32, %v28858_v9  ;;  %v21071_v46 = vpop.f32.mrb[24].mxu1 }
 0x7a6   : > { %v17640_v47 = vmax.f32 %v17608_v2, 0.0  ;;  %v22455_v30 = vadd.f32 %v22421_v0, %v21071_v46  ;;  %v8888_v29 = vpop.f32.mrb[25].mxu1 }
 0x7a7   : > { %v17639_v4 = vmax.f32 %v17607_v51, 0.0  ;;  %v22456_v60 = vadd.f32 %v17500_v13, %v8888_v29  ;;  %v22427_v1 = vpop.f32.mrb[28].mxu0 }
 0x7a8   : > { %17673 = vst.msk [vmem:[%s28865_s16 + $0xb8] sm:$0xff] %vm17649_vm1, %v17640_v47  ;;  %v17610_v58 = vadd.f32 %v22455_v30, %v28858_v9  ;;  %v17524_v31 = vpop.f32.mrb[29].mxu0 }
 0x7a9   : > { %17672 = vst.msk [vmem:[%s28865_s16 + $0xb0] sm:$0xff] %vm17649_vm1, %v17639_v4  ;;  %v17609_v39 = vadd.f32 %v22456_v60, %v28858_v9  ;;  %v21074_v33 = vpop.f32.mrb[26].mxu1 }
 0x7aa   : > { %v17642_v15 = vmax.f32 %v17610_v58, 0.0  ;;  %v22457_v49 = vadd.f32 %v22424_v36, %v21074_v33  ;;  %v8902_v44 = vpop.f32.mrb[27].mxu1 }
 0x7ab   : > { %v17641_v8 = vmax.f32 %v17609_v39, 0.0  ;;  %v22458_v5 = vadd.f32 %v17512_v40, %v8902_v44  ;;  %v22430_v63 = vpop.f32.mrb[30].mxu0 }
 0x7ac   : > { %17675 = vst.msk [vmem:[%s28865_s16 + $0xc8] sm:$0xff] %vm17649_vm1, %v17642_v15  ;;  %v17612_v57 = vadd.f32 %v22457_v49, %v28858_v9  ;;  %v17536_v34 = vpop.f32.mrb[31].mxu0 }
 0x7ad   : > { %17674 = vst.msk [vmem:[%s28865_s16 + $0xc0] sm:$0xff] %vm17649_vm1, %v17641_v8  ;;  %v17611_v26 = vadd.f32 %v22458_v5, %v28858_v9  ;;  %v21077_v28 = vpop.f32.mrb[28].mxu1 }
 0x7ae   : > { %v17644_v21 = vmax.f32 %v17612_v57, 0.0  ;;  %v22459_v50 = vadd.f32 %v22427_v1, %v21077_v28  ;;  %v8916_v42 = vpop.f32.mrb[29].mxu1 }
 0x7af   : > { %v17643_v23 = vmax.f32 %v17611_v26, 0.0  ;;  %v22460_v43 = vadd.f32 %v17524_v31, %v8916_v42 }
 0x7b0   : > { %17677 = vst.msk [vmem:[%s28865_s16 + $0xd8] sm:$0xff] %vm17649_vm1, %v17644_v21  ;;  %v17614_v18 = vadd.f32 %v22459_v50, %v28858_v9 }
 0x7b1   : > { %17676 = vst.msk [vmem:[%s28865_s16 + $0xd0] sm:$0xff] %vm17649_vm1, %v17643_v23  ;;  %v17613_v16 = vadd.f32 %v22460_v43, %v28858_v9  ;;  %v21080_v27 = vpop.f32.mrb[30].mxu1 }
 0x7b2   : > { %v17646_v37 = vmax.f32 %v17614_v18, 0.0  ;;  %v22461_v25 = vadd.f32 %v22430_v63, %v21080_v27  ;;  %v8930_v61 = vpop.f32.mrb[31].mxu1 }
 0x7b3   : > { %v17645_v3 = vmax.f32 %v17613_v16, 0.0  ;;  %v22462_v7 = vadd.f32 %v17536_v34, %v8930_v61 }
 0x7b4   : > { %17679 = vst.msk [vmem:[%s28865_s16 + $0xe8] sm:$0xff] %vm17649_vm1, %v17646_v37  ;;  %v17616_v48 = vadd.f32 %v22461_v25, %v28858_v9 }
 0x7b5   : > { %17678 = vst.msk [vmem:[%s28865_s16 + $0xe0] sm:$0xff] %vm17649_vm1, %v17645_v3  ;;  %v17615_v59 = vadd.f32 %v22462_v7, %v28858_v9 }
 0x7b6   : > { %v17648_v12 = vmax.f32 %v17616_v48, 0.0 }
 0x7b7   : > { %v17647_v52 = vmax.f32 %v17615_v59, 0.0 }
 0x7b8   : > { %17681 = vst.msk [vmem:[%s28865_s16 + $0xf8] sm:$0xff] %vm17649_vm1, %v17648_v12 }
 0x7b9   : > { %17680 = vst.msk [vmem:[%s28865_s16 + $0xf0] sm:$0xff] %vm17649_vm1, %v17647_v52 }
 0x7ba PF: > { %s13_s12 = sadd.s32 1, %s24142_s12  }
 0x7bb   : > { %p10_p4 = scmp.ge.s32.totalorder %s13_s12, 4  }
 0x7bd   :  { %12 = sbr.rel (!%p10_p4) target bundleno = 1 (0x1), region = 72 }

</bundles_post_ra>
